<compile_context>
chip_gen: v5e
topology: v5e:2x2
jax: 0.10.0
libtpu: 0.0.40
codegen_flags: <defaults>
</compile_context>

<pallas_src>
import jax
import jax.numpy as jnp
from jax.experimental import pallas as pl
from jax.experimental.pallas import tpu as pltpu

# ---------------- model config (small shapes consistent with SES.__init__) ---------------
N_TOKENS    = 100
N_TAGS      = 8
TOKEN_DIM   = 32
N_LEXICONS  = 50
LEXICON_DIM = 16
N_SETS      = 4          # BMES segment labels
N_LAYERS    = 2
HIDDEN_DIM  = 32         # bidirectional -> per-direction hidden = 16
PAD_ID      = 0
BATCH       = 2
SEQ_LEN     = 8
MAX_N_LEX   = 5

_H = HIDDEN_DIM // 2     # per-direction hidden size


# ---------------- Pallas kernel: fused BiLSTM stack + hidden2tag --------------------------
def _make_encoder_kernel(n_layers, S, B, H, n_tags):
    """Fully unrolled, grid-less fused encoder.

    Ref layout (inputs, then output, then scratch):
      x                                        (S*B, D_in)  bf16, time-major flattened
      per layer, per direction (fwd then bwd):
        layer 0:  w_ih (D_in,4H) bf16, b (1,4H) f32, w_hh_i/f/g/o (H,H) bf16        [6 refs]
        layer>=1: w_ih_fwdhalf (H,4H) bf16, w_ih_bwdhalf (H,4H) bf16, b (1,4H) f32,
                  w_hh_i/f/g/o (H,H) bf16                                           [7 refs]
      hidden2tag: w_fwdhalf (H,T) bf16, w_bwdhalf (H,T) bf16, b (1,T) f32
      out                                      (S*B, n_tags) f32
      scratch: per layer, per direction        (S*B, H) f32
    """
    n_l0, n_lk = 6, 7
    f32, bf16 = jnp.float32, jnp.bfloat16

    def kernel(*refs):
        idx = 0
        x_ref = refs[idx]; idx += 1
        layer_refs = []
        for l in range(n_layers):
            n = n_l0 if l == 0 else n_lk
            layer_refs.append(refs[idx: idx + 2 * n]); idx += 2 * n
        wt_f_ref, wt_b_ref, bt_ref = refs[idx], refs[idx + 1], refs[idx + 2]; idx += 3
        out_ref = refs[idx]; idx += 1
        scr = refs[idx: idx + 2 * n_layers]

        def split_gates(z):
            # Hoisted once per layer/direction: lane slices at 16/32/48 are OFF the
            # recurrent critical path (done on the time-batched projection).
            return [z[:, k * H:(k + 1) * H] for k in range(4)]

        def xg_layer0(dref):
            z = jnp.dot(x_ref[...], dref[0][...], preferred_element_type=f32) + dref[1][...]
            return split_gates(z)

        def xg_layerk(dref, hf_all, hb_all):
            # No lane-concat of fwd/bwd hiddens: two row-split half-dots instead.
            z = (jnp.dot(hf_all, dref[0][...], preferred_element_type=f32)
                 + jnp.dot(hb_all, dref[1][...], preferred_element_type=f32)
                 + dref[2][...])
            return split_gates(z)

        def whh_of(dref, l):
            off = 2 if l == 0 else 3
            return [dref[off + k][...] for k in range(4)]

        def cell(h, c, xg_t, whh):
            hb = h.astype(bf16)
            # 4 per-gate lane-offset-0 dots (bf16 in / f32 acc) — no lane slicing per step.
            zi = xg_t[0] + jnp.dot(hb, whh[0], preferred_element_type=f32)
            zf = xg_t[1] + jnp.dot(hb, whh[1], preferred_element_type=f32)
            zg = xg_t[2] + jnp.dot(hb, whh[2], preferred_element_type=f32)
            zo = xg_t[3] + jnp.dot(hb, whh[3], preferred_element_type=f32)
            i = jax.nn.sigmoid(zi)                 # PyTorch gate order: i, f, g, o
            f = jax.nn.sigmoid(zf)
            g = jnp.tanh(zg)
            o = jax.nn.sigmoid(zo)
            c_new = f * c + i * g
            h_new = o * jnp.tanh(c_new)
            return h_new, c_new

        hf_all = None
        hb_all = None
        for l in range(n_layers):
            n = n_l0 if l == 0 else n_lk
            fwd_ref = layer_refs[l][:n]
            bwd_ref = layer_refs[l][n:]
            if l == 0:
                xg_f = xg_layer0(fwd_ref)
                xg_b = xg_layer0(bwd_ref)
            else:
                xg_f = xg_layerk(fwd_ref, hf_all, hb_all)
                xg_b = xg_layerk(bwd_ref, hf_all, hb_all)
            whh_f = whh_of(fwd_ref, l)
            whh_b = whh_of(bwd_ref, l)
            scr_f, scr_b = scr[2 * l], scr[2 * l + 1]

            hf = jnp.zeros((B, H), f32); cf = jnp.zeros((B, H), f32)
            hb = jnp.zeros((B, H), f32); cb = jnp.zeros((B, H), f32)
            # Interleaved fwd/bwd chains, fully unrolled (static python loop).
            for s in range(S):
                tf = s
                tb = S - 1 - s
                xgf_t = [xg_f[k][tf * B:(tf + 1) * B, :] for k in range(4)]
                xgb_t = [xg_b[k][tb * B:(tb + 1) * B, :] for k in range(4)]
                hf, cf = cell(hf, cf, xgf_t, whh_f)
                hb, cb = cell(hb, cb, xgb_t, whh_b)
                scr_f[tf * B:(tf + 1) * B, :] = hf
                scr_b[tb * B:(tb + 1) * B, :] = hb
            hf_all = scr_f[...].astype(bf16)
            hb_all = scr_b[...].astype(bf16)

        # hidden2tag epilogue: two half-dots over all S*B rows + one store.
        logits = (jnp.dot(hf_all, wt_f_ref[...], preferred_element_type=f32)
                  + jnp.dot(hb_all, wt_b_ref[...], preferred_element_type=f32)
                  + bt_ref[...])
        out_ref[...] = logits

    return kernel


def _prep_encoder_args(lstm_layers, h2t_w, h2t_b):
    """Wrapper-side weight layout prep (row/column splits + bf16 casts) — pure XLA, jitted."""
    H = _H
    flat = []
    for l, layer in enumerate(lstm_layers):
        for d in ('fwd', 'bwd'):
            p = layer[d]
            wih = p['w_ih']
            if l == 0:
                flat.append(wih.astype(jnp.bfloat16))                 # (D_in, 4H)
            else:
                flat.append(wih[:H].astype(jnp.bfloat16))             # multiplies fwd hidden
                flat.append(wih[H:].astype(jnp.bfloat16))             # multiplies bwd hidden
            flat.append(p['b'])                                       # (1, 4H) f32
            whh = p['w_hh']
            for k in range(4):                                        # per-gate (H,H) bf16
                flat.append(whh[:, k * H:(k + 1) * H].astype(jnp.bfloat16))
    flat.append(h2t_w[:H].astype(jnp.bfloat16))                       # (H, n_tags)
    flat.append(h2t_w[H:].astype(jnp.bfloat16))                       # (H, n_tags)
    flat.append(h2t_b)                                                # (1, n_tags) f32
    return flat


def encoder_emissions(x_flat_bf16, S, B, lstm_layers, h2t_w, h2t_b):
    """x_flat_bf16: (S*B, D_in) bf16 time-major -> emissions (S*B, n_tags) f32.
    One grid-less pallas_call; whole working set (<200 KiB) is VMEM-resident."""
    n_layers = len(lstm_layers)
    args = _prep_encoder_args(lstm_layers, h2t_w, h2t_b)
    return pl.pallas_call(
        _make_encoder_kernel(n_layers, S, B, _H, N_TAGS),
        out_shape=jax.ShapeDtypeStruct((S * B, N_TAGS), jnp.float32),
        scratch_shapes=[pltpu.VMEM((S * B, _H), jnp.float32) for _ in range(2 * n_layers)],
    )(x_flat_bf16, *args)


# ---------------- CRF Viterbi decode (plain JAX, time-major, fully unrolled) ---------------
def crf_viterbi_decode(emissions_sbt, mask_sb, start_trans, end_trans, trans):
    # emissions_sbt: (S, B, T) f32; mask_sb: (S, B) float 0/1
    S, B, T = emissions_sbt.shape
    mask_b = mask_sb.astype(bool)
    # TODO(synk): like torchcrf, assumes mask[0] == 1 for every sequence.
    score = start_trans[None, :] + emissions_sbt[0]                     # (B, T)
    history = []
    for t in range(1, S):                                               # unrolled forward pass
        cand = score[:, :, None] + trans[None, :, :] + emissions_sbt[t][:, None, :]
        history.append(jnp.argmax(cand, axis=1))                        # (B, T) backpointers
        next_score = jnp.max(cand, axis=1)
        score = jnp.where(mask_b[t][:, None], next_score, score)
    score = score + end_trans[None, :]
    tag = jnp.argmax(score, axis=-1)                                    # (B,)
    tags = [tag]
    for t in range(S - 1, 0, -1):                                       # unrolled backtrack
        prev = jnp.take_along_axis(history[t - 1], tag[:, None], axis=1)[:, 0]
        tag = jnp.where(mask_b[t], prev, tag)
        tags.append(tag)
    tags_sb = jnp.stack(tags[::-1], axis=0)                             # (S, B)
    # TODO(synk): PyTorch CRF returns variable-length lists; padded positions here repeat the
    #             tag of the last valid position in a dense (B, S) array.
    return jnp.transpose(tags_sb).astype(jnp.int32)                     # (B, S)


# ---------------- parameters --------------------------------------------------------------
def init_params(key):
    ks = jax.random.split(key, 16)
    p = {}
    tok_emb = jax.random.normal(ks[0], (N_TOKENS, TOKEN_DIM), jnp.float32) * 0.1
    p['token_emb'] = tok_emb.at[PAD_ID].set(0.0)
    lex_emb = jax.random.normal(ks[1], (N_LEXICONS, LEXICON_DIM), jnp.float32) * 0.1
    p['lexicon_emb'] = lex_emb.at[0].set(0.0)                 # lexicon id 0 = padding

    H = _H
    layers = []
    kidx = 2
    d_in = TOKEN_DIM + N_SETS * LEXICON_DIM
    for _ in range(N_LAYERS):
        dirs = {}
        for d in ('fwd', 'bwd'):
            k1, k2, k3 = jax.random.split(ks[kidx], 3)
            kidx += 1
            dirs[d] = dict(
                w_ih=jax.random.normal(k1, (d_in, 4 * H), jnp.float32) * 0.1,
                w_hh=jax.random.normal(k2, (H, 4 * H), jnp.float32) * 0.1,
                b=jax.random.normal(k3, (1, 4 * H), jnp.float32) * 0.05,  # b_ih + b_hh fused
            )
        layers.append(dirs)
        d_in = HIDDEN_DIM
    p['lstm'] = layers

    p['h2t_w'] = jax.random.normal(ks[kidx], (HIDDEN_DIM, N_TAGS), jnp.float32) * 0.1; kidx += 1
    p['h2t_b'] = jnp.zeros((1, N_TAGS), jnp.float32)
    p['crf_start'] = jax.random.normal(ks[kidx], (N_TAGS,), jnp.float32) * 0.1; kidx += 1
    p['crf_end'] = jax.random.normal(ks[kidx], (N_TAGS,), jnp.float32) * 0.1; kidx += 1
    p['crf_trans'] = jax.random.normal(ks[kidx], (N_TAGS, N_TAGS), jnp.float32) * 0.1
    return p


# ---------------- full SES forward (tags=None -> CRF decode path), fully jitted ------------
@jax.jit
def ses_forward(params, inputs, lexicons, weights, mask):
    B, S = inputs.shape

    # SoftwordEmbedding: table gathers + per-BMES-set weighted pooling, fused by XLA.
    # TODO(synk): demo weights are normalized over all MAX_N_LEX slots incl. padding id 0,
    #             unlike the PyTorch SoftLexicon normalization over valid entries only.
    tok = jnp.take(params['token_emb'], inputs, axis=0)                   # (B, S, token_dim)
    lex = jnp.take(params['lexicon_emb'], lexicons, axis=0)               # (B, S, n_sets, K, lex_dim)
    pooled = jnp.einsum('bsnk,bsnkd->bsnd', weights.astype(jnp.float32), lex)
    embeds = jnp.concatenate([tok, pooled.reshape(B, S, N_SETS * LEXICON_DIM)], axis=-1)

    # Fused encoder: 2-layer BiLSTM + hidden2tag in ONE Pallas kernel, time-major flattened.
    x_flat = jnp.transpose(embeds, (1, 0, 2)).reshape(S * B, -1).astype(jnp.bfloat16)
    emissions_flat = encoder_emissions(x_flat, S, B, params['lstm'],
                                       params['h2t_w'], params['h2t_b'])  # (S*B, n_tags)
    emissions_sbt = emissions_flat.reshape(S, B, N_TAGS)                  # time-major, no transpose

    preds = crf_viterbi_decode(emissions_sbt, jnp.transpose(mask),
                               params['crf_start'], params['crf_end'], params['crf_trans'])
    return preds


# ---------------- main ----------------------------------------------------------------------
if __name__ == "__main__":
    key = jax.random.PRNGKey(0)
    kp, ki, kl, kw = jax.random.split(key, 4)
    params = init_params(kp)

    inputs = jax.random.randint(ki, (BATCH, SEQ_LEN), 1, N_TOKENS)                     # (B, S)
    lexicons = jax.random.randint(kl, (BATCH, SEQ_LEN, N_SETS, MAX_N_LEX), 0, N_LEXICONS)
    raw_w = jax.random.uniform(kw, (BATCH, SEQ_LEN, N_SETS, MAX_N_LEX), jnp.float32)
    weights = raw_w / jnp.sum(raw_w, axis=-1, keepdims=True)
    lengths = jnp.array([SEQ_LEN, 5], dtype=jnp.int32)
    mask = (jnp.arange(SEQ_LEN)[None, :] < lengths[:, None]).astype(jnp.float32)       # (B, S)

    preds = ses_forward(params, inputs, lexicons, weights, mask)
    preds = jax.block_until_ready(preds)
    assert preds.shape == (BATCH, SEQ_LEN)
    assert preds.dtype == jnp.int32
    print("KERNEL_OK")
</pallas_src>

<mosaic_0001>
module attributes {stable_mosaic.version = 11 : i64} {
  func.func @kernel(%arg0: memref<16x96xbf16, #tpu.memory_space<vmem>>, %arg1: memref<96x64xbf16, #tpu.memory_space<vmem>>, %arg2: memref<1x64xf32, #tpu.memory_space<vmem>>, %arg3: memref<16x16xbf16, #tpu.memory_space<vmem>>, %arg4: memref<16x16xbf16, #tpu.memory_space<vmem>>, %arg5: memref<16x16xbf16, #tpu.memory_space<vmem>>, %arg6: memref<16x16xbf16, #tpu.memory_space<vmem>>, %arg7: memref<96x64xbf16, #tpu.memory_space<vmem>>, %arg8: memref<1x64xf32, #tpu.memory_space<vmem>>, %arg9: memref<16x16xbf16, #tpu.memory_space<vmem>>, %arg10: memref<16x16xbf16, #tpu.memory_space<vmem>>, %arg11: memref<16x16xbf16, #tpu.memory_space<vmem>>, %arg12: memref<16x16xbf16, #tpu.memory_space<vmem>>, %arg13: memref<16x64xbf16, #tpu.memory_space<vmem>>, %arg14: memref<16x64xbf16, #tpu.memory_space<vmem>>, %arg15: memref<1x64xf32, #tpu.memory_space<vmem>>, %arg16: memref<16x16xbf16, #tpu.memory_space<vmem>>, %arg17: memref<16x16xbf16, #tpu.memory_space<vmem>>, %arg18: memref<16x16xbf16, #tpu.memory_space<vmem>>, %arg19: memref<16x16xbf16, #tpu.memory_space<vmem>>, %arg20: memref<16x64xbf16, #tpu.memory_space<vmem>>, %arg21: memref<16x64xbf16, #tpu.memory_space<vmem>>, %arg22: memref<1x64xf32, #tpu.memory_space<vmem>>, %arg23: memref<16x16xbf16, #tpu.memory_space<vmem>>, %arg24: memref<16x16xbf16, #tpu.memory_space<vmem>>, %arg25: memref<16x16xbf16, #tpu.memory_space<vmem>>, %arg26: memref<16x16xbf16, #tpu.memory_space<vmem>>, %arg27: memref<16x8xbf16, #tpu.memory_space<vmem>>, %arg28: memref<16x8xbf16, #tpu.memory_space<vmem>>, %arg29: memref<1x8xf32, #tpu.memory_space<vmem>>, %arg30: memref<16x8xf32, #tpu.memory_space<vmem>>, %arg31: memref<16x16xf32, #tpu.memory_space<vmem>>, %arg32: memref<16x16xf32, #tpu.memory_space<vmem>>, %arg33: memref<16x16xf32, #tpu.memory_space<vmem>>, %arg34: memref<16x16xf32, #tpu.memory_space<vmem>>) attributes {dimension_semantics = [], scalar_prefetch = 0 : i64, scratch_operands = 4 : i64, tpu.core_type = #tpu.core_type<tc>} {
    %c0 = arith.constant 0 : index
    %c0_0 = arith.constant 0 : index
    %0 = vector.load %arg0[%c0, %c0_0] : memref<16x96xbf16, #tpu.memory_space<vmem>>, vector<16x96xbf16>
    %c0_1 = arith.constant 0 : index
    %c0_2 = arith.constant 0 : index
    %1 = vector.load %arg1[%c0_1, %c0_2] : memref<96x64xbf16, #tpu.memory_space<vmem>>, vector<96x64xbf16>
    %cst = arith.constant dense<0.000000e+00> : vector<16x64xf32>
    %2 = tpu.matmul %0, %1, %cst {dimension_numbers = #tpu.dot_dimension_numbers<[1], [0], [0], [1], [0, 0, 1, 1], [], []>} : vector<16x96xbf16>, vector<96x64xbf16>, vector<16x64xf32> -> vector<16x64xf32>
    %c0_3 = arith.constant 0 : index
    %c0_4 = arith.constant 0 : index
    %3 = vector.load %arg2[%c0_3, %c0_4] : memref<1x64xf32, #tpu.memory_space<vmem>>, vector<1x64xf32>
    %4 = vector.broadcast %3 : vector<1x64xf32> to vector<16x64xf32>
    %5 = arith.addf %2, %4 : vector<16x64xf32>
    %6 = vector.extract_strided_slice %5 {offsets = [0, 0], sizes = [16, 16], strides = [1, 1]} : vector<16x64xf32> to vector<16x16xf32>
    %7 = vector.extract_strided_slice %5 {offsets = [0, 16], sizes = [16, 16], strides = [1, 1]} : vector<16x64xf32> to vector<16x16xf32>
    %8 = vector.extract_strided_slice %5 {offsets = [0, 32], sizes = [16, 16], strides = [1, 1]} : vector<16x64xf32> to vector<16x16xf32>
    %9 = vector.extract_strided_slice %5 {offsets = [0, 48], sizes = [16, 16], strides = [1, 1]} : vector<16x64xf32> to vector<16x16xf32>
    %c0_5 = arith.constant 0 : index
    %c0_6 = arith.constant 0 : index
    %10 = vector.load %arg0[%c0_5, %c0_6] : memref<16x96xbf16, #tpu.memory_space<vmem>>, vector<16x96xbf16>
    %c0_7 = arith.constant 0 : index
    %c0_8 = arith.constant 0 : index
    %11 = vector.load %arg7[%c0_7, %c0_8] : memref<96x64xbf16, #tpu.memory_space<vmem>>, vector<96x64xbf16>
    %cst_9 = arith.constant dense<0.000000e+00> : vector<16x64xf32>
    %12 = tpu.matmul %10, %11, %cst_9 {dimension_numbers = #tpu.dot_dimension_numbers<[1], [0], [0], [1], [0, 0, 1, 1], [], []>} : vector<16x96xbf16>, vector<96x64xbf16>, vector<16x64xf32> -> vector<16x64xf32>
    %c0_10 = arith.constant 0 : index
    %c0_11 = arith.constant 0 : index
    %13 = vector.load %arg8[%c0_10, %c0_11] : memref<1x64xf32, #tpu.memory_space<vmem>>, vector<1x64xf32>
    %14 = vector.broadcast %13 : vector<1x64xf32> to vector<16x64xf32>
    %15 = arith.addf %12, %14 : vector<16x64xf32>
    %16 = vector.extract_strided_slice %15 {offsets = [0, 0], sizes = [16, 16], strides = [1, 1]} : vector<16x64xf32> to vector<16x16xf32>
    %17 = vector.extract_strided_slice %15 {offsets = [0, 16], sizes = [16, 16], strides = [1, 1]} : vector<16x64xf32> to vector<16x16xf32>
    %18 = vector.extract_strided_slice %15 {offsets = [0, 32], sizes = [16, 16], strides = [1, 1]} : vector<16x64xf32> to vector<16x16xf32>
    %19 = vector.extract_strided_slice %15 {offsets = [0, 48], sizes = [16, 16], strides = [1, 1]} : vector<16x64xf32> to vector<16x16xf32>
    %c0_12 = arith.constant 0 : index
    %c0_13 = arith.constant 0 : index
    %20 = vector.load %arg3[%c0_12, %c0_13] : memref<16x16xbf16, #tpu.memory_space<vmem>>, vector<16x16xbf16>
    %c0_14 = arith.constant 0 : index
    %c0_15 = arith.constant 0 : index
    %21 = vector.load %arg4[%c0_14, %c0_15] : memref<16x16xbf16, #tpu.memory_space<vmem>>, vector<16x16xbf16>
    %c0_16 = arith.constant 0 : index
    %c0_17 = arith.constant 0 : index
    %22 = vector.load %arg5[%c0_16, %c0_17] : memref<16x16xbf16, #tpu.memory_space<vmem>>, vector<16x16xbf16>
    %c0_18 = arith.constant 0 : index
    %c0_19 = arith.constant 0 : index
    %23 = vector.load %arg6[%c0_18, %c0_19] : memref<16x16xbf16, #tpu.memory_space<vmem>>, vector<16x16xbf16>
    %c0_20 = arith.constant 0 : index
    %c0_21 = arith.constant 0 : index
    %24 = vector.load %arg9[%c0_20, %c0_21] : memref<16x16xbf16, #tpu.memory_space<vmem>>, vector<16x16xbf16>
    %c0_22 = arith.constant 0 : index
    %c0_23 = arith.constant 0 : index
    %25 = vector.load %arg10[%c0_22, %c0_23] : memref<16x16xbf16, #tpu.memory_space<vmem>>, vector<16x16xbf16>
    %c0_24 = arith.constant 0 : index
    %c0_25 = arith.constant 0 : index
    %26 = vector.load %arg11[%c0_24, %c0_25] : memref<16x16xbf16, #tpu.memory_space<vmem>>, vector<16x16xbf16>
    %c0_26 = arith.constant 0 : index
    %c0_27 = arith.constant 0 : index
    %27 = vector.load %arg12[%c0_26, %c0_27] : memref<16x16xbf16, #tpu.memory_space<vmem>>, vector<16x16xbf16>
    %cst_28 = arith.constant 0.000000e+00 : f32
    %28 = vector.broadcast %cst_28 : f32 to vector<2x16xf32>
    %cst_29 = arith.constant 0.000000e+00 : f32
    %29 = vector.broadcast %cst_29 : f32 to vector<2x16xf32>
    %cst_30 = arith.constant 0.000000e+00 : f32
    %30 = vector.broadcast %cst_30 : f32 to vector<2x16xf32>
    %cst_31 = arith.constant 0.000000e+00 : f32
    %31 = vector.broadcast %cst_31 : f32 to vector<2x16xf32>
    %32 = vector.extract_strided_slice %6 {offsets = [0, 0], sizes = [2, 16], strides = [1, 1]} : vector<16x16xf32> to vector<2x16xf32>
    %33 = vector.extract_strided_slice %7 {offsets = [0, 0], sizes = [2, 16], strides = [1, 1]} : vector<16x16xf32> to vector<2x16xf32>
    %34 = vector.extract_strided_slice %8 {offsets = [0, 0], sizes = [2, 16], strides = [1, 1]} : vector<16x16xf32> to vector<2x16xf32>
    %35 = vector.extract_strided_slice %9 {offsets = [0, 0], sizes = [2, 16], strides = [1, 1]} : vector<16x16xf32> to vector<2x16xf32>
    %36 = vector.extract_strided_slice %16 {offsets = [14, 0], sizes = [2, 16], strides = [1, 1]} : vector<16x16xf32> to vector<2x16xf32>
    %37 = vector.extract_strided_slice %17 {offsets = [14, 0], sizes = [2, 16], strides = [1, 1]} : vector<16x16xf32> to vector<2x16xf32>
    %38 = vector.extract_strided_slice %18 {offsets = [14, 0], sizes = [2, 16], strides = [1, 1]} : vector<16x16xf32> to vector<2x16xf32>
    %39 = vector.extract_strided_slice %19 {offsets = [14, 0], sizes = [2, 16], strides = [1, 1]} : vector<16x16xf32> to vector<2x16xf32>
    %40 = arith.truncf %28 : vector<2x16xf32> to vector<2x16xbf16>
    %cst_32 = arith.constant dense<0.000000e+00> : vector<2x16xf32>
    %41 = tpu.matmul %40, %20, %cst_32 {dimension_numbers = #tpu.dot_dimension_numbers<[1], [0], [0], [1], [0, 0, 1, 1], [], []>} : vector<2x16xbf16>, vector<16x16xbf16>, vector<2x16xf32> -> vector<2x16xf32>
    %42 = arith.addf %32, %41 : vector<2x16xf32>
    %cst_33 = arith.constant dense<0.000000e+00> : vector<2x16xf32>
    %43 = tpu.matmul %40, %21, %cst_33 {dimension_numbers = #tpu.dot_dimension_numbers<[1], [0], [0], [1], [0, 0, 1, 1], [], []>} : vector<2x16xbf16>, vector<16x16xbf16>, vector<2x16xf32> -> vector<2x16xf32>
    %44 = arith.addf %33, %43 : vector<2x16xf32>
    %cst_34 = arith.constant dense<0.000000e+00> : vector<2x16xf32>
    %45 = tpu.matmul %40, %22, %cst_34 {dimension_numbers = #tpu.dot_dimension_numbers<[1], [0], [0], [1], [0, 0, 1, 1], [], []>} : vector<2x16xbf16>, vector<16x16xbf16>, vector<2x16xf32> -> vector<2x16xf32>
    %46 = arith.addf %34, %45 : vector<2x16xf32>
    %cst_35 = arith.constant dense<0.000000e+00> : vector<2x16xf32>
    %47 = tpu.matmul %40, %23, %cst_35 {dimension_numbers = #tpu.dot_dimension_numbers<[1], [0], [0], [1], [0, 0, 1, 1], [], []>} : vector<2x16xbf16>, vector<16x16xbf16>, vector<2x16xf32> -> vector<2x16xf32>
    %48 = arith.addf %35, %47 : vector<2x16xf32>
    %49 = arith.negf %42 : vector<2x16xf32>
    %50 = math.exp %49 : vector<2x16xf32>
    %cst_36 = arith.constant 1.000000e+00 : f32
    %51 = vector.broadcast %cst_36 : f32 to vector<2x16xf32>
    %52 = arith.addf %51, %50 : vector<2x16xf32>
    %53 = arith.divf %51, %52 : vector<2x16xf32>
    %54 = arith.negf %44 : vector<2x16xf32>
    %55 = math.exp %54 : vector<2x16xf32>
    %cst_37 = arith.constant 1.000000e+00 : f32
    %56 = vector.broadcast %cst_37 : f32 to vector<2x16xf32>
    %57 = arith.addf %56, %55 : vector<2x16xf32>
    %58 = arith.divf %56, %57 : vector<2x16xf32>
    %59 = math.tanh %46 : vector<2x16xf32>
    %60 = arith.negf %48 : vector<2x16xf32>
    %61 = math.exp %60 : vector<2x16xf32>
    %cst_38 = arith.constant 1.000000e+00 : f32
    %62 = vector.broadcast %cst_38 : f32 to vector<2x16xf32>
    %63 = arith.addf %62, %61 : vector<2x16xf32>
    %64 = arith.divf %62, %63 : vector<2x16xf32>
    %65 = arith.mulf %58, %29 : vector<2x16xf32>
    %66 = arith.mulf %53, %59 : vector<2x16xf32>
    %67 = arith.addf %65, %66 : vector<2x16xf32>
    %68 = math.tanh %67 : vector<2x16xf32>
    %69 = arith.mulf %64, %68 : vector<2x16xf32>
    %70 = arith.truncf %30 : vector<2x16xf32> to vector<2x16xbf16>
    %cst_39 = arith.constant dense<0.000000e+00> : vector<2x16xf32>
    %71 = tpu.matmul %70, %24, %cst_39 {dimension_numbers = #tpu.dot_dimension_numbers<[1], [0], [0], [1], [0, 0, 1, 1], [], []>} : vector<2x16xbf16>, vector<16x16xbf16>, vector<2x16xf32> -> vector<2x16xf32>
    %72 = arith.addf %36, %71 : vector<2x16xf32>
    %cst_40 = arith.constant dense<0.000000e+00> : vector<2x16xf32>
    %73 = tpu.matmul %70, %25, %cst_40 {dimension_numbers = #tpu.dot_dimension_numbers<[1], [0], [0], [1], [0, 0, 1, 1], [], []>} : vector<2x16xbf16>, vector<16x16xbf16>, vector<2x16xf32> -> vector<2x16xf32>
    %74 = arith.addf %37, %73 : vector<2x16xf32>
    %cst_41 = arith.constant dense<0.000000e+00> : vector<2x16xf32>
    %75 = tpu.matmul %70, %26, %cst_41 {dimension_numbers = #tpu.dot_dimension_numbers<[1], [0], [0], [1], [0, 0, 1, 1], [], []>} : vector<2x16xbf16>, vector<16x16xbf16>, vector<2x16xf32> -> vector<2x16xf32>
    %76 = arith.addf %38, %75 : vector<2x16xf32>
    %cst_42 = arith.constant dense<0.000000e+00> : vector<2x16xf32>
    %77 = tpu.matmul %70, %27, %cst_42 {dimension_numbers = #tpu.dot_dimension_numbers<[1], [0], [0], [1], [0, 0, 1, 1], [], []>} : vector<2x16xbf16>, vector<16x16xbf16>, vector<2x16xf32> -> vector<2x16xf32>
    %78 = arith.addf %39, %77 : vector<2x16xf32>
    %79 = arith.negf %72 : vector<2x16xf32>
    %80 = math.exp %79 : vector<2x16xf32>
    %cst_43 = arith.constant 1.000000e+00 : f32
    %81 = vector.broadcast %cst_43 : f32 to vector<2x16xf32>
    %82 = arith.addf %81, %80 : vector<2x16xf32>
    %83 = arith.divf %81, %82 : vector<2x16xf32>
    %84 = arith.negf %74 : vector<2x16xf32>
    %85 = math.exp %84 : vector<2x16xf32>
    %cst_44 = arith.constant 1.000000e+00 : f32
    %86 = vector.broadcast %cst_44 : f32 to vector<2x16xf32>
    %87 = arith.addf %86, %85 : vector<2x16xf32>
    %88 = arith.divf %86, %87 : vector<2x16xf32>
    %89 = math.tanh %76 : vector<2x16xf32>
    %90 = arith.negf %78 : vector<2x16xf32>
    %91 = math.exp %90 : vector<2x16xf32>
    %cst_45 = arith.constant 1.000000e+00 : f32
    %92 = vector.broadcast %cst_45 : f32 to vector<2x16xf32>
    %93 = arith.addf %92, %91 : vector<2x16xf32>
    %94 = arith.divf %92, %93 : vector<2x16xf32>
    %95 = arith.mulf %88, %31 : vector<2x16xf32>
    %96 = arith.mulf %83, %89 : vector<2x16xf32>
    %97 = arith.addf %95, %96 : vector<2x16xf32>
    %98 = math.tanh %97 : vector<2x16xf32>
    %99 = arith.mulf %94, %98 : vector<2x16xf32>
    %c0_46 = arith.constant 0 : index
    %c0_47 = arith.constant 0 : index
    %100 = vector.load %arg31[%c0_46, %c0_47] : memref<16x16xf32, #tpu.memory_space<vmem>>, vector<2x16xf32>
    tpu.vector_store %arg31[%c0_46, %c0_47], %69 {strides = array<i32>} : memref<16x16xf32, #tpu.memory_space<vmem>>, vector<2x16xf32>,
    %c14 = arith.constant 14 : index
    %c0_48 = arith.constant 0 : index
    %101 = vector.load %arg32[%c14, %c0_48] : memref<16x16xf32, #tpu.memory_space<vmem>>, vector<2x16xf32>
    tpu.vector_store %arg32[%c14, %c0_48], %99 {strides = array<i32>} : memref<16x16xf32, #tpu.memory_space<vmem>>, vector<2x16xf32>,
    %102 = vector.extract_strided_slice %6 {offsets = [2, 0], sizes = [2, 16], strides = [1, 1]} : vector<16x16xf32> to vector<2x16xf32>
    %103 = vector.extract_strided_slice %7 {offsets = [2, 0], sizes = [2, 16], strides = [1, 1]} : vector<16x16xf32> to vector<2x16xf32>
    %104 = vector.extract_strided_slice %8 {offsets = [2, 0], sizes = [2, 16], strides = [1, 1]} : vector<16x16xf32> to vector<2x16xf32>
    %105 = vector.extract_strided_slice %9 {offsets = [2, 0], sizes = [2, 16], strides = [1, 1]} : vector<16x16xf32> to vector<2x16xf32>
    %106 = vector.extract_strided_slice %16 {offsets = [12, 0], sizes = [2, 16], strides = [1, 1]} : vector<16x16xf32> to vector<2x16xf32>
    %107 = vector.extract_strided_slice %17 {offsets = [12, 0], sizes = [2, 16], strides = [1, 1]} : vector<16x16xf32> to vector<2x16xf32>
    %108 = vector.extract_strided_slice %18 {offsets = [12, 0], sizes = [2, 16], strides = [1, 1]} : vector<16x16xf32> to vector<2x16xf32>
    %109 = vector.extract_strided_slice %19 {offsets = [12, 0], sizes = [2, 16], strides = [1, 1]} : vector<16x16xf32> to vector<2x16xf32>
    %110 = arith.truncf %69 : vector<2x16xf32> to vector<2x16xbf16>
    %cst_49 = arith.constant dense<0.000000e+00> : vector<2x16xf32>
    %111 = tpu.matmul %110, %20, %cst_49 {dimension_numbers = #tpu.dot_dimension_numbers<[1], [0], [0], [1], [0, 0, 1, 1], [], []>} : vector<2x16xbf16>, vector<16x16xbf16>, vector<2x16xf32> -> vector<2x16xf32>
    %112 = arith.addf %102, %111 : vector<2x16xf32>
    %cst_50 = arith.constant dense<0.000000e+00> : vector<2x16xf32>
    %113 = tpu.matmul %110, %21, %cst_50 {dimension_numbers = #tpu.dot_dimension_numbers<[1], [0], [0], [1], [0, 0, 1, 1], [], []>} : vector<2x16xbf16>, vector<16x16xbf16>, vector<2x16xf32> -> vector<2x16xf32>
    %114 = arith.addf %103, %113 : vector<2x16xf32>
    %cst_51 = arith.constant dense<0.000000e+00> : vector<2x16xf32>
    %115 = tpu.matmul %110, %22, %cst_51 {dimension_numbers = #tpu.dot_dimension_numbers<[1], [0], [0], [1], [0, 0, 1, 1], [], []>} : vector<2x16xbf16>, vector<16x16xbf16>, vector<2x16xf32> -> vector<2x16xf32>
    %116 = arith.addf %104, %115 : vector<2x16xf32>
    %cst_52 = arith.constant dense<0.000000e+00> : vector<2x16xf32>
    %117 = tpu.matmul %110, %23, %cst_52 {dimension_numbers = #tpu.dot_dimension_numbers<[1], [0], [0], [1], [0, 0, 1, 1], [], []>} : vector<2x16xbf16>, vector<16x16xbf16>, vector<2x16xf32> -> vector<2x16xf32>
    %118 = arith.addf %105, %117 : vector<2x16xf32>
    %119 = arith.negf %112 : vector<2x16xf32>
    %120 = math.exp %119 : vector<2x16xf32>
    %cst_53 = arith.constant 1.000000e+00 : f32
    %121 = vector.broadcast %cst_53 : f32 to vector<2x16xf32>
    %122 = arith.addf %121, %120 : vector<2x16xf32>
    %123 = arith.divf %121, %122 : vector<2x16xf32>
    %124 = arith.negf %114 : vector<2x16xf32>
    %125 = math.exp %124 : vector<2x16xf32>
    %cst_54 = arith.constant 1.000000e+00 : f32
    %126 = vector.broadcast %cst_54 : f32 to vector<2x16xf32>
    %127 = arith.addf %126, %125 : vector<2x16xf32>
    %128 = arith.divf %126, %127 : vector<2x16xf32>
    %129 = math.tanh %116 : vector<2x16xf32>
    %130 = arith.negf %118 : vector<2x16xf32>
    %131 = math.exp %130 : vector<2x16xf32>
    %cst_55 = arith.constant 1.000000e+00 : f32
    %132 = vector.broadcast %cst_55 : f32 to vector<2x16xf32>
    %133 = arith.addf %132, %131 : vector<2x16xf32>
    %134 = arith.divf %132, %133 : vector<2x16xf32>
    %135 = arith.mulf %128, %67 : vector<2x16xf32>
    %136 = arith.mulf %123, %129 : vector<2x16xf32>
    %137 = arith.addf %135, %136 : vector<2x16xf32>
    %138 = math.tanh %137 : vector<2x16xf32>
    %139 = arith.mulf %134, %138 : vector<2x16xf32>
    %140 = arith.truncf %99 : vector<2x16xf32> to vector<2x16xbf16>
    %cst_56 = arith.constant dense<0.000000e+00> : vector<2x16xf32>
    %141 = tpu.matmul %140, %24, %cst_56 {dimension_numbers = #tpu.dot_dimension_numbers<[1], [0], [0], [1], [0, 0, 1, 1], [], []>} : vector<2x16xbf16>, vector<16x16xbf16>, vector<2x16xf32> -> vector<2x16xf32>
    %142 = arith.addf %106, %141 : vector<2x16xf32>
    %cst_57 = arith.constant dense<0.000000e+00> : vector<2x16xf32>
    %143 = tpu.matmul %140, %25, %cst_57 {dimension_numbers = #tpu.dot_dimension_numbers<[1], [0], [0], [1], [0, 0, 1, 1], [], []>} : vector<2x16xbf16>, vector<16x16xbf16>, vector<2x16xf32> -> vector<2x16xf32>
    %144 = arith.addf %107, %143 : vector<2x16xf32>
    %cst_58 = arith.constant dense<0.000000e+00> : vector<2x16xf32>
    %145 = tpu.matmul %140, %26, %cst_58 {dimension_numbers = #tpu.dot_dimension_numbers<[1], [0], [0], [1], [0, 0, 1, 1], [], []>} : vector<2x16xbf16>, vector<16x16xbf16>, vector<2x16xf32> -> vector<2x16xf32>
    %146 = arith.addf %108, %145 : vector<2x16xf32>
    %cst_59 = arith.constant dense<0.000000e+00> : vector<2x16xf32>
    %147 = tpu.matmul %140, %27, %cst_59 {dimension_numbers = #tpu.dot_dimension_numbers<[1], [0], [0], [1], [0, 0, 1, 1], [], []>} : vector<2x16xbf16>, vector<16x16xbf16>, vector<2x16xf32> -> vector<2x16xf32>
    %148 = arith.addf %109, %147 : vector<2x16xf32>
    %149 = arith.negf %142 : vector<2x16xf32>
    %150 = math.exp %149 : vector<2x16xf32>
    %cst_60 = arith.constant 1.000000e+00 : f32
    %151 = vector.broadcast %cst_60 : f32 to vector<2x16xf32>
    %152 = arith.addf %151, %150 : vector<2x16xf32>
    %153 = arith.divf %151, %152 : vector<2x16xf32>
    %154 = arith.negf %144 : vector<2x16xf32>
    %155 = math.exp %154 : vector<2x16xf32>
    %cst_61 = arith.constant 1.000000e+00 : f32
    %156 = vector.broadcast %cst_61 : f32 to vector<2x16xf32>
    %157 = arith.addf %156, %155 : vector<2x16xf32>
    %158 = arith.divf %156, %157 : vector<2x16xf32>
    %159 = math.tanh %146 : vector<2x16xf32>
    %160 = arith.negf %148 : vector<2x16xf32>
    %161 = math.exp %160 : vector<2x16xf32>
    %cst_62 = arith.constant 1.000000e+00 : f32
    %162 = vector.broadcast %cst_62 : f32 to vector<2x16xf32>
    %163 = arith.addf %162, %161 : vector<2x16xf32>
    %164 = arith.divf %162, %163 : vector<2x16xf32>
    %165 = arith.mulf %158, %97 : vector<2x16xf32>
    %166 = arith.mulf %153, %159 : vector<2x16xf32>
    %167 = arith.addf %165, %166 : vector<2x16xf32>
    %168 = math.tanh %167 : vector<2x16xf32>
    %169 = arith.mulf %164, %168 : vector<2x16xf32>
    %c2 = arith.constant 2 : index
    %c0_63 = arith.constant 0 : index
    %170 = vector.load %arg31[%c2, %c0_63] : memref<16x16xf32, #tpu.memory_space<vmem>>, vector<2x16xf32>
    tpu.vector_store %arg31[%c2, %c0_63], %139 {strides = array<i32>} : memref<16x16xf32, #tpu.memory_space<vmem>>, vector<2x16xf32>,
    %c12 = arith.constant 12 : index
    %c0_64 = arith.constant 0 : index
    %171 = vector.load %arg32[%c12, %c0_64] : memref<16x16xf32, #tpu.memory_space<vmem>>, vector<2x16xf32>
    tpu.vector_store %arg32[%c12, %c0_64], %169 {strides = array<i32>} : memref<16x16xf32, #tpu.memory_space<vmem>>, vector<2x16xf32>,
    %172 = vector.extract_strided_slice %6 {offsets = [4, 0], sizes = [2, 16], strides = [1, 1]} : vector<16x16xf32> to vector<2x16xf32>
    %173 = vector.extract_strided_slice %7 {offsets = [4, 0], sizes = [2, 16], strides = [1, 1]} : vector<16x16xf32> to vector<2x16xf32>
    %174 = vector.extract_strided_slice %8 {offsets = [4, 0], sizes = [2, 16], strides = [1, 1]} : vector<16x16xf32> to vector<2x16xf32>
    %175 = vector.extract_strided_slice %9 {offsets = [4, 0], sizes = [2, 16], strides = [1, 1]} : vector<16x16xf32> to vector<2x16xf32>
    %176 = vector.extract_strided_slice %16 {offsets = [10, 0], sizes = [2, 16], strides = [1, 1]} : vector<16x16xf32> to vector<2x16xf32>
    %177 = vector.extract_strided_slice %17 {offsets = [10, 0], sizes = [2, 16], strides = [1, 1]} : vector<16x16xf32> to vector<2x16xf32>
    %178 = vector.extract_strided_slice %18 {offsets = [10, 0], sizes = [2, 16], strides = [1, 1]} : vector<16x16xf32> to vector<2x16xf32>
    %179 = vector.extract_strided_slice %19 {offsets = [10, 0], sizes = [2, 16], strides = [1, 1]} : vector<16x16xf32> to vector<2x16xf32>
    %180 = arith.truncf %139 : vector<2x16xf32> to vector<2x16xbf16>
    %cst_65 = arith.constant dense<0.000000e+00> : vector<2x16xf32>
    %181 = tpu.matmul %180, %20, %cst_65 {dimension_numbers = #tpu.dot_dimension_numbers<[1], [0], [0], [1], [0, 0, 1, 1], [], []>} : vector<2x16xbf16>, vector<16x16xbf16>, vector<2x16xf32> -> vector<2x16xf32>
    %182 = arith.addf %172, %181 : vector<2x16xf32>
    %cst_66 = arith.constant dense<0.000000e+00> : vector<2x16xf32>
    %183 = tpu.matmul %180, %21, %cst_66 {dimension_numbers = #tpu.dot_dimension_numbers<[1], [0], [0], [1], [0, 0, 1, 1], [], []>} : vector<2x16xbf16>, vector<16x16xbf16>, vector<2x16xf32> -> vector<2x16xf32>
    %184 = arith.addf %173, %183 : vector<2x16xf32>
    %cst_67 = arith.constant dense<0.000000e+00> : vector<2x16xf32>
    %185 = tpu.matmul %180, %22, %cst_67 {dimension_numbers = #tpu.dot_dimension_numbers<[1], [0], [0], [1], [0, 0, 1, 1], [], []>} : vector<2x16xbf16>, vector<16x16xbf16>, vector<2x16xf32> -> vector<2x16xf32>
    %186 = arith.addf %174, %185 : vector<2x16xf32>
    %cst_68 = arith.constant dense<0.000000e+00> : vector<2x16xf32>
    %187 = tpu.matmul %180, %23, %cst_68 {dimension_numbers = #tpu.dot_dimension_numbers<[1], [0], [0], [1], [0, 0, 1, 1], [], []>} : vector<2x16xbf16>, vector<16x16xbf16>, vector<2x16xf32> -> vector<2x16xf32>
    %188 = arith.addf %175, %187 : vector<2x16xf32>
    %189 = arith.negf %182 : vector<2x16xf32>
    %190 = math.exp %189 : vector<2x16xf32>
    %cst_69 = arith.constant 1.000000e+00 : f32
    %191 = vector.broadcast %cst_69 : f32 to vector<2x16xf32>
    %192 = arith.addf %191, %190 : vector<2x16xf32>
    %193 = arith.divf %191, %192 : vector<2x16xf32>
    %194 = arith.negf %184 : vector<2x16xf32>
    %195 = math.exp %194 : vector<2x16xf32>
    %cst_70 = arith.constant 1.000000e+00 : f32
    %196 = vector.broadcast %cst_70 : f32 to vector<2x16xf32>
    %197 = arith.addf %196, %195 : vector<2x16xf32>
    %198 = arith.divf %196, %197 : vector<2x16xf32>
    %199 = math.tanh %186 : vector<2x16xf32>
    %200 = arith.negf %188 : vector<2x16xf32>
    %201 = math.exp %200 : vector<2x16xf32>
    %cst_71 = arith.constant 1.000000e+00 : f32
    %202 = vector.broadcast %cst_71 : f32 to vector<2x16xf32>
    %203 = arith.addf %202, %201 : vector<2x16xf32>
    %204 = arith.divf %202, %203 : vector<2x16xf32>
    %205 = arith.mulf %198, %137 : vector<2x16xf32>
    %206 = arith.mulf %193, %199 : vector<2x16xf32>
    %207 = arith.addf %205, %206 : vector<2x16xf32>
    %208 = math.tanh %207 : vector<2x16xf32>
    %209 = arith.mulf %204, %208 : vector<2x16xf32>
    %210 = arith.truncf %169 : vector<2x16xf32> to vector<2x16xbf16>
    %cst_72 = arith.constant dense<0.000000e+00> : vector<2x16xf32>
    %211 = tpu.matmul %210, %24, %cst_72 {dimension_numbers = #tpu.dot_dimension_numbers<[1], [0], [0], [1], [0, 0, 1, 1], [], []>} : vector<2x16xbf16>, vector<16x16xbf16>, vector<2x16xf32> -> vector<2x16xf32>
    %212 = arith.addf %176, %211 : vector<2x16xf32>
    %cst_73 = arith.constant dense<0.000000e+00> : vector<2x16xf32>
    %213 = tpu.matmul %210, %25, %cst_73 {dimension_numbers = #tpu.dot_dimension_numbers<[1], [0], [0], [1], [0, 0, 1, 1], [], []>} : vector<2x16xbf16>, vector<16x16xbf16>, vector<2x16xf32> -> vector<2x16xf32>
    %214 = arith.addf %177, %213 : vector<2x16xf32>
    %cst_74 = arith.constant dense<0.000000e+00> : vector<2x16xf32>
    %215 = tpu.matmul %210, %26, %cst_74 {dimension_numbers = #tpu.dot_dimension_numbers<[1], [0], [0], [1], [0, 0, 1, 1], [], []>} : vector<2x16xbf16>, vector<16x16xbf16>, vector<2x16xf32> -> vector<2x16xf32>
    %216 = arith.addf %178, %215 : vector<2x16xf32>
    %cst_75 = arith.constant dense<0.000000e+00> : vector<2x16xf32>
    %217 = tpu.matmul %210, %27, %cst_75 {dimension_numbers = #tpu.dot_dimension_numbers<[1], [0], [0], [1], [0, 0, 1, 1], [], []>} : vector<2x16xbf16>, vector<16x16xbf16>, vector<2x16xf32> -> vector<2x16xf32>
    %218 = arith.addf %179, %217 : vector<2x16xf32>
    %219 = arith.negf %212 : vector<2x16xf32>
    %220 = math.exp %219 : vector<2x16xf32>
    %cst_76 = arith.constant 1.000000e+00 : f32
    %221 = vector.broadcast %cst_76 : f32 to vector<2x16xf32>
    %222 = arith.addf %221, %220 : vector<2x16xf32>
    %223 = arith.divf %221, %222 : vector<2x16xf32>
    %224 = arith.negf %214 : vector<2x16xf32>
    %225 = math.exp %224 : vector<2x16xf32>
    %cst_77 = arith.constant 1.000000e+00 : f32
    %226 = vector.broadcast %cst_77 : f32 to vector<2x16xf32>
    %227 = arith.addf %226, %225 : vector<2x16xf32>
    %228 = arith.divf %226, %227 : vector<2x16xf32>
    %229 = math.tanh %216 : vector<2x16xf32>
    %230 = arith.negf %218 : vector<2x16xf32>
    %231 = math.exp %230 : vector<2x16xf32>
    %cst_78 = arith.constant 1.000000e+00 : f32
    %232 = vector.broadcast %cst_78 : f32 to vector<2x16xf32>
    %233 = arith.addf %232, %231 : vector<2x16xf32>
    %234 = arith.divf %232, %233 : vector<2x16xf32>
    %235 = arith.mulf %228, %167 : vector<2x16xf32>
    %236 = arith.mulf %223, %229 : vector<2x16xf32>
    %237 = arith.addf %235, %236 : vector<2x16xf32>
    %238 = math.tanh %237 : vector<2x16xf32>
    %239 = arith.mulf %234, %238 : vector<2x16xf32>
    %c4 = arith.constant 4 : index
    %c0_79 = arith.constant 0 : index
    %240 = vector.load %arg31[%c4, %c0_79] : memref<16x16xf32, #tpu.memory_space<vmem>>, vector<2x16xf32>
    tpu.vector_store %arg31[%c4, %c0_79], %209 {strides = array<i32>} : memref<16x16xf32, #tpu.memory_space<vmem>>, vector<2x16xf32>,
    %c10 = arith.constant 10 : index
    %c0_80 = arith.constant 0 : index
    %241 = vector.load %arg32[%c10, %c0_80] : memref<16x16xf32, #tpu.memory_space<vmem>>, vector<2x16xf32>
    tpu.vector_store %arg32[%c10, %c0_80], %239 {strides = array<i32>} : memref<16x16xf32, #tpu.memory_space<vmem>>, vector<2x16xf32>,
    %242 = vector.extract_strided_slice %6 {offsets = [6, 0], sizes = [2, 16], strides = [1, 1]} : vector<16x16xf32> to vector<2x16xf32>
    %243 = vector.extract_strided_slice %7 {offsets = [6, 0], sizes = [2, 16], strides = [1, 1]} : vector<16x16xf32> to vector<2x16xf32>
    %244 = vector.extract_strided_slice %8 {offsets = [6, 0], sizes = [2, 16], strides = [1, 1]} : vector<16x16xf32> to vector<2x16xf32>
    %245 = vector.extract_strided_slice %9 {offsets = [6, 0], sizes = [2, 16], strides = [1, 1]} : vector<16x16xf32> to vector<2x16xf32>
    %246 = vector.extract_strided_slice %16 {offsets = [8, 0], sizes = [2, 16], strides = [1, 1]} : vector<16x16xf32> to vector<2x16xf32>
    %247 = vector.extract_strided_slice %17 {offsets = [8, 0], sizes = [2, 16], strides = [1, 1]} : vector<16x16xf32> to vector<2x16xf32>
    %248 = vector.extract_strided_slice %18 {offsets = [8, 0], sizes = [2, 16], strides = [1, 1]} : vector<16x16xf32> to vector<2x16xf32>
    %249 = vector.extract_strided_slice %19 {offsets = [8, 0], sizes = [2, 16], strides = [1, 1]} : vector<16x16xf32> to vector<2x16xf32>
    %250 = arith.truncf %209 : vector<2x16xf32> to vector<2x16xbf16>
    %cst_81 = arith.constant dense<0.000000e+00> : vector<2x16xf32>
    %251 = tpu.matmul %250, %20, %cst_81 {dimension_numbers = #tpu.dot_dimension_numbers<[1], [0], [0], [1], [0, 0, 1, 1], [], []>} : vector<2x16xbf16>, vector<16x16xbf16>, vector<2x16xf32> -> vector<2x16xf32>
    %252 = arith.addf %242, %251 : vector<2x16xf32>
    %cst_82 = arith.constant dense<0.000000e+00> : vector<2x16xf32>
    %253 = tpu.matmul %250, %21, %cst_82 {dimension_numbers = #tpu.dot_dimension_numbers<[1], [0], [0], [1], [0, 0, 1, 1], [], []>} : vector<2x16xbf16>, vector<16x16xbf16>, vector<2x16xf32> -> vector<2x16xf32>
    %254 = arith.addf %243, %253 : vector<2x16xf32>
    %cst_83 = arith.constant dense<0.000000e+00> : vector<2x16xf32>
    %255 = tpu.matmul %250, %22, %cst_83 {dimension_numbers = #tpu.dot_dimension_numbers<[1], [0], [0], [1], [0, 0, 1, 1], [], []>} : vector<2x16xbf16>, vector<16x16xbf16>, vector<2x16xf32> -> vector<2x16xf32>
    %256 = arith.addf %244, %255 : vector<2x16xf32>
    %cst_84 = arith.constant dense<0.000000e+00> : vector<2x16xf32>
    %257 = tpu.matmul %250, %23, %cst_84 {dimension_numbers = #tpu.dot_dimension_numbers<[1], [0], [0], [1], [0, 0, 1, 1], [], []>} : vector<2x16xbf16>, vector<16x16xbf16>, vector<2x16xf32> -> vector<2x16xf32>
    %258 = arith.addf %245, %257 : vector<2x16xf32>
    %259 = arith.negf %252 : vector<2x16xf32>
    %260 = math.exp %259 : vector<2x16xf32>
    %cst_85 = arith.constant 1.000000e+00 : f32
    %261 = vector.broadcast %cst_85 : f32 to vector<2x16xf32>
    %262 = arith.addf %261, %260 : vector<2x16xf32>
    %263 = arith.divf %261, %262 : vector<2x16xf32>
    %264 = arith.negf %254 : vector<2x16xf32>
    %265 = math.exp %264 : vector<2x16xf32>
    %cst_86 = arith.constant 1.000000e+00 : f32
    %266 = vector.broadcast %cst_86 : f32 to vector<2x16xf32>
    %267 = arith.addf %266, %265 : vector<2x16xf32>
    %268 = arith.divf %266, %267 : vector<2x16xf32>
    %269 = math.tanh %256 : vector<2x16xf32>
    %270 = arith.negf %258 : vector<2x16xf32>
    %271 = math.exp %270 : vector<2x16xf32>
    %cst_87 = arith.constant 1.000000e+00 : f32
    %272 = vector.broadcast %cst_87 : f32 to vector<2x16xf32>
    %273 = arith.addf %272, %271 : vector<2x16xf32>
    %274 = arith.divf %272, %273 : vector<2x16xf32>
    %275 = arith.mulf %268, %207 : vector<2x16xf32>
    %276 = arith.mulf %263, %269 : vector<2x16xf32>
    %277 = arith.addf %275, %276 : vector<2x16xf32>
    %278 = math.tanh %277 : vector<2x16xf32>
    %279 = arith.mulf %274, %278 : vector<2x16xf32>
    %280 = arith.truncf %239 : vector<2x16xf32> to vector<2x16xbf16>
    %cst_88 = arith.constant dense<0.000000e+00> : vector<2x16xf32>
    %281 = tpu.matmul %280, %24, %cst_88 {dimension_numbers = #tpu.dot_dimension_numbers<[1], [0], [0], [1], [0, 0, 1, 1], [], []>} : vector<2x16xbf16>, vector<16x16xbf16>, vector<2x16xf32> -> vector<2x16xf32>
    %282 = arith.addf %246, %281 : vector<2x16xf32>
    %cst_89 = arith.constant dense<0.000000e+00> : vector<2x16xf32>
    %283 = tpu.matmul %280, %25, %cst_89 {dimension_numbers = #tpu.dot_dimension_numbers<[1], [0], [0], [1], [0, 0, 1, 1], [], []>} : vector<2x16xbf16>, vector<16x16xbf16>, vector<2x16xf32> -> vector<2x16xf32>
    %284 = arith.addf %247, %283 : vector<2x16xf32>
    %cst_90 = arith.constant dense<0.000000e+00> : vector<2x16xf32>
    %285 = tpu.matmul %280, %26, %cst_90 {dimension_numbers = #tpu.dot_dimension_numbers<[1], [0], [0], [1], [0, 0, 1, 1], [], []>} : vector<2x16xbf16>, vector<16x16xbf16>, vector<2x16xf32> -> vector<2x16xf32>
    %286 = arith.addf %248, %285 : vector<2x16xf32>
    %cst_91 = arith.constant dense<0.000000e+00> : vector<2x16xf32>
    %287 = tpu.matmul %280, %27, %cst_91 {dimension_numbers = #tpu.dot_dimension_numbers<[1], [0], [0], [1], [0, 0, 1, 1], [], []>} : vector<2x16xbf16>, vector<16x16xbf16>, vector<2x16xf32> -> vector<2x16xf32>
    %288 = arith.addf %249, %287 : vector<2x16xf32>
    %289 = arith.negf %282 : vector<2x16xf32>
    %290 = math.exp %289 : vector<2x16xf32>
    %cst_92 = arith.constant 1.000000e+00 : f32
    %291 = vector.broadcast %cst_92 : f32 to vector<2x16xf32>
    %292 = arith.addf %291, %290 : vector<2x16xf32>
    %293 = arith.divf %291, %292 : vector<2x16xf32>
    %294 = arith.negf %284 : vector<2x16xf32>
    %295 = math.exp %294 : vector<2x16xf32>
    %cst_93 = arith.constant 1.000000e+00 : f32
    %296 = vector.broadcast %cst_93 : f32 to vector<2x16xf32>
    %297 = arith.addf %296, %295 : vector<2x16xf32>
    %298 = arith.divf %296, %297 : vector<2x16xf32>
    %299 = math.tanh %286 : vector<2x16xf32>
    %300 = arith.negf %288 : vector<2x16xf32>
    %301 = math.exp %300 : vector<2x16xf32>
    %cst_94 = arith.constant 1.000000e+00 : f32
    %302 = vector.broadcast %cst_94 : f32 to vector<2x16xf32>
    %303 = arith.addf %302, %301 : vector<2x16xf32>
    %304 = arith.divf %302, %303 : vector<2x16xf32>
    %305 = arith.mulf %298, %237 : vector<2x16xf32>
    %306 = arith.mulf %293, %299 : vector<2x16xf32>
    %307 = arith.addf %305, %306 : vector<2x16xf32>
    %308 = math.tanh %307 : vector<2x16xf32>
    %309 = arith.mulf %304, %308 : vector<2x16xf32>
    %c6 = arith.constant 6 : index
    %c0_95 = arith.constant 0 : index
    %310 = vector.load %arg31[%c6, %c0_95] : memref<16x16xf32, #tpu.memory_space<vmem>>, vector<2x16xf32>
    tpu.vector_store %arg31[%c6, %c0_95], %279 {strides = array<i32>} : memref<16x16xf32, #tpu.memory_space<vmem>>, vector<2x16xf32>,
    %c8 = arith.constant 8 : index
    %c0_96 = arith.constant 0 : index
    %311 = vector.load %arg32[%c8, %c0_96] : memref<16x16xf32, #tpu.memory_space<vmem>>, vector<2x16xf32>
    tpu.vector_store %arg32[%c8, %c0_96], %309 {strides = array<i32>} : memref<16x16xf32, #tpu.memory_space<vmem>>, vector<2x16xf32>,
    %312 = vector.extract_strided_slice %6 {offsets = [8, 0], sizes = [2, 16], strides = [1, 1]} : vector<16x16xf32> to vector<2x16xf32>
    %313 = vector.extract_strided_slice %7 {offsets = [8, 0], sizes = [2, 16], strides = [1, 1]} : vector<16x16xf32> to vector<2x16xf32>
    %314 = vector.extract_strided_slice %8 {offsets = [8, 0], sizes = [2, 16], strides = [1, 1]} : vector<16x16xf32> to vector<2x16xf32>
    %315 = vector.extract_strided_slice %9 {offsets = [8, 0], sizes = [2, 16], strides = [1, 1]} : vector<16x16xf32> to vector<2x16xf32>
    %316 = vector.extract_strided_slice %16 {offsets = [6, 0], sizes = [2, 16], strides = [1, 1]} : vector<16x16xf32> to vector<2x16xf32>
    %317 = vector.extract_strided_slice %17 {offsets = [6, 0], sizes = [2, 16], strides = [1, 1]} : vector<16x16xf32> to vector<2x16xf32>
    %318 = vector.extract_strided_slice %18 {offsets = [6, 0], sizes = [2, 16], strides = [1, 1]} : vector<16x16xf32> to vector<2x16xf32>
    %319 = vector.extract_strided_slice %19 {offsets = [6, 0], sizes = [2, 16], strides = [1, 1]} : vector<16x16xf32> to vector<2x16xf32>
    %320 = arith.truncf %279 : vector<2x16xf32> to vector<2x16xbf16>
    %cst_97 = arith.constant dense<0.000000e+00> : vector<2x16xf32>
    %321 = tpu.matmul %320, %20, %cst_97 {dimension_numbers = #tpu.dot_dimension_numbers<[1], [0], [0], [1], [0, 0, 1, 1], [], []>} : vector<2x16xbf16>, vector<16x16xbf16>, vector<2x16xf32> -> vector<2x16xf32>
    %322 = arith.addf %312, %321 : vector<2x16xf32>
    %cst_98 = arith.constant dense<0.000000e+00> : vector<2x16xf32>
    %323 = tpu.matmul %320, %21, %cst_98 {dimension_numbers = #tpu.dot_dimension_numbers<[1], [0], [0], [1], [0, 0, 1, 1], [], []>} : vector<2x16xbf16>, vector<16x16xbf16>, vector<2x16xf32> -> vector<2x16xf32>
    %324 = arith.addf %313, %323 : vector<2x16xf32>
    %cst_99 = arith.constant dense<0.000000e+00> : vector<2x16xf32>
    %325 = tpu.matmul %320, %22, %cst_99 {dimension_numbers = #tpu.dot_dimension_numbers<[1], [0], [0], [1], [0, 0, 1, 1], [], []>} : vector<2x16xbf16>, vector<16x16xbf16>, vector<2x16xf32> -> vector<2x16xf32>
    %326 = arith.addf %314, %325 : vector<2x16xf32>
    %cst_100 = arith.constant dense<0.000000e+00> : vector<2x16xf32>
    %327 = tpu.matmul %320, %23, %cst_100 {dimension_numbers = #tpu.dot_dimension_numbers<[1], [0], [0], [1], [0, 0, 1, 1], [], []>} : vector<2x16xbf16>, vector<16x16xbf16>, vector<2x16xf32> -> vector<2x16xf32>
    %328 = arith.addf %315, %327 : vector<2x16xf32>
    %329 = arith.negf %322 : vector<2x16xf32>
    %330 = math.exp %329 : vector<2x16xf32>
    %cst_101 = arith.constant 1.000000e+00 : f32
    %331 = vector.broadcast %cst_101 : f32 to vector<2x16xf32>
    %332 = arith.addf %331, %330 : vector<2x16xf32>
    %333 = arith.divf %331, %332 : vector<2x16xf32>
    %334 = arith.negf %324 : vector<2x16xf32>
    %335 = math.exp %334 : vector<2x16xf32>
    %cst_102 = arith.constant 1.000000e+00 : f32
    %336 = vector.broadcast %cst_102 : f32 to vector<2x16xf32>
    %337 = arith.addf %336, %335 : vector<2x16xf32>
    %338 = arith.divf %336, %337 : vector<2x16xf32>
    %339 = math.tanh %326 : vector<2x16xf32>
    %340 = arith.negf %328 : vector<2x16xf32>
    %341 = math.exp %340 : vector<2x16xf32>
    %cst_103 = arith.constant 1.000000e+00 : f32
    %342 = vector.broadcast %cst_103 : f32 to vector<2x16xf32>
    %343 = arith.addf %342, %341 : vector<2x16xf32>
    %344 = arith.divf %342, %343 : vector<2x16xf32>
    %345 = arith.mulf %338, %277 : vector<2x16xf32>
    %346 = arith.mulf %333, %339 : vector<2x16xf32>
    %347 = arith.addf %345, %346 : vector<2x16xf32>
    %348 = math.tanh %347 : vector<2x16xf32>
    %349 = arith.mulf %344, %348 : vector<2x16xf32>
    %350 = arith.truncf %309 : vector<2x16xf32> to vector<2x16xbf16>
    %cst_104 = arith.constant dense<0.000000e+00> : vector<2x16xf32>
    %351 = tpu.matmul %350, %24, %cst_104 {dimension_numbers = #tpu.dot_dimension_numbers<[1], [0], [0], [1], [0, 0, 1, 1], [], []>} : vector<2x16xbf16>, vector<16x16xbf16>, vector<2x16xf32> -> vector<2x16xf32>
    %352 = arith.addf %316, %351 : vector<2x16xf32>
    %cst_105 = arith.constant dense<0.000000e+00> : vector<2x16xf32>
    %353 = tpu.matmul %350, %25, %cst_105 {dimension_numbers = #tpu.dot_dimension_numbers<[1], [0], [0], [1], [0, 0, 1, 1], [], []>} : vector<2x16xbf16>, vector<16x16xbf16>, vector<2x16xf32> -> vector<2x16xf32>
    %354 = arith.addf %317, %353 : vector<2x16xf32>
    %cst_106 = arith.constant dense<0.000000e+00> : vector<2x16xf32>
    %355 = tpu.matmul %350, %26, %cst_106 {dimension_numbers = #tpu.dot_dimension_numbers<[1], [0], [0], [1], [0, 0, 1, 1], [], []>} : vector<2x16xbf16>, vector<16x16xbf16>, vector<2x16xf32> -> vector<2x16xf32>
    %356 = arith.addf %318, %355 : vector<2x16xf32>
    %cst_107 = arith.constant dense<0.000000e+00> : vector<2x16xf32>
    %357 = tpu.matmul %350, %27, %cst_107 {dimension_numbers = #tpu.dot_dimension_numbers<[1], [0], [0], [1], [0, 0, 1, 1], [], []>} : vector<2x16xbf16>, vector<16x16xbf16>, vector<2x16xf32> -> vector<2x16xf32>
    %358 = arith.addf %319, %357 : vector<2x16xf32>
    %359 = arith.negf %352 : vector<2x16xf32>
    %360 = math.exp %359 : vector<2x16xf32>
    %cst_108 = arith.constant 1.000000e+00 : f32
    %361 = vector.broadcast %cst_108 : f32 to vector<2x16xf32>
    %362 = arith.addf %361, %360 : vector<2x16xf32>
    %363 = arith.divf %361, %362 : vector<2x16xf32>
    %364 = arith.negf %354 : vector<2x16xf32>
    %365 = math.exp %364 : vector<2x16xf32>
    %cst_109 = arith.constant 1.000000e+00 : f32
    %366 = vector.broadcast %cst_109 : f32 to vector<2x16xf32>
    %367 = arith.addf %366, %365 : vector<2x16xf32>
    %368 = arith.divf %366, %367 : vector<2x16xf32>
    %369 = math.tanh %356 : vector<2x16xf32>
    %370 = arith.negf %358 : vector<2x16xf32>
    %371 = math.exp %370 : vector<2x16xf32>
    %cst_110 = arith.constant 1.000000e+00 : f32
    %372 = vector.broadcast %cst_110 : f32 to vector<2x16xf32>
    %373 = arith.addf %372, %371 : vector<2x16xf32>
    %374 = arith.divf %372, %373 : vector<2x16xf32>
    %375 = arith.mulf %368, %307 : vector<2x16xf32>
    %376 = arith.mulf %363, %369 : vector<2x16xf32>
    %377 = arith.addf %375, %376 : vector<2x16xf32>
    %378 = math.tanh %377 : vector<2x16xf32>
    %379 = arith.mulf %374, %378 : vector<2x16xf32>
    %c8_111 = arith.constant 8 : index
    %c0_112 = arith.constant 0 : index
    %380 = vector.load %arg31[%c8_111, %c0_112] : memref<16x16xf32, #tpu.memory_space<vmem>>, vector<2x16xf32>
    tpu.vector_store %arg31[%c8_111, %c0_112], %349 {strides = array<i32>} : memref<16x16xf32, #tpu.memory_space<vmem>>, vector<2x16xf32>,
    %c6_113 = arith.constant 6 : index
    %c0_114 = arith.constant 0 : index
    %381 = vector.load %arg32[%c6_113, %c0_114] : memref<16x16xf32, #tpu.memory_space<vmem>>, vector<2x16xf32>
    tpu.vector_store %arg32[%c6_113, %c0_114], %379 {strides = array<i32>} : memref<16x16xf32, #tpu.memory_space<vmem>>, vector<2x16xf32>,
    %382 = vector.extract_strided_slice %6 {offsets = [10, 0], sizes = [2, 16], strides = [1, 1]} : vector<16x16xf32> to vector<2x16xf32>
    %383 = vector.extract_strided_slice %7 {offsets = [10, 0], sizes = [2, 16], strides = [1, 1]} : vector<16x16xf32> to vector<2x16xf32>
    %384 = vector.extract_strided_slice %8 {offsets = [10, 0], sizes = [2, 16], strides = [1, 1]} : vector<16x16xf32> to vector<2x16xf32>
    %385 = vector.extract_strided_slice %9 {offsets = [10, 0], sizes = [2, 16], strides = [1, 1]} : vector<16x16xf32> to vector<2x16xf32>
    %386 = vector.extract_strided_slice %16 {offsets = [4, 0], sizes = [2, 16], strides = [1, 1]} : vector<16x16xf32> to vector<2x16xf32>
    %387 = vector.extract_strided_slice %17 {offsets = [4, 0], sizes = [2, 16], strides = [1, 1]} : vector<16x16xf32> to vector<2x16xf32>
    %388 = vector.extract_strided_slice %18 {offsets = [4, 0], sizes = [2, 16], strides = [1, 1]} : vector<16x16xf32> to vector<2x16xf32>
    %389 = vector.extract_strided_slice %19 {offsets = [4, 0], sizes = [2, 16], strides = [1, 1]} : vector<16x16xf32> to vector<2x16xf32>
    %390 = arith.truncf %349 : vector<2x16xf32> to vector<2x16xbf16>
    %cst_115 = arith.constant dense<0.000000e+00> : vector<2x16xf32>
    %391 = tpu.matmul %390, %20, %cst_115 {dimension_numbers = #tpu.dot_dimension_numbers<[1], [0], [0], [1], [0, 0, 1, 1], [], []>} : vector<2x16xbf16>, vector<16x16xbf16>, vector<2x16xf32> -> vector<2x16xf32>
    %392 = arith.addf %382, %391 : vector<2x16xf32>
    %cst_116 = arith.constant dense<0.000000e+00> : vector<2x16xf32>
    %393 = tpu.matmul %390, %21, %cst_116 {dimension_numbers = #tpu.dot_dimension_numbers<[1], [0], [0], [1], [0, 0, 1, 1], [], []>} : vector<2x16xbf16>, vector<16x16xbf16>, vector<2x16xf32> -> vector<2x16xf32>
    %394 = arith.addf %383, %393 : vector<2x16xf32>
    %cst_117 = arith.constant dense<0.000000e+00> : vector<2x16xf32>
    %395 = tpu.matmul %390, %22, %cst_117 {dimension_numbers = #tpu.dot_dimension_numbers<[1], [0], [0], [1], [0, 0, 1, 1], [], []>} : vector<2x16xbf16>, vector<16x16xbf16>, vector<2x16xf32> -> vector<2x16xf32>
    %396 = arith.addf %384, %395 : vector<2x16xf32>
    %cst_118 = arith.constant dense<0.000000e+00> : vector<2x16xf32>
    %397 = tpu.matmul %390, %23, %cst_118 {dimension_numbers = #tpu.dot_dimension_numbers<[1], [0], [0], [1], [0, 0, 1, 1], [], []>} : vector<2x16xbf16>, vector<16x16xbf16>, vector<2x16xf32> -> vector<2x16xf32>
    %398 = arith.addf %385, %397 : vector<2x16xf32>
    %399 = arith.negf %392 : vector<2x16xf32>
    %400 = math.exp %399 : vector<2x16xf32>
    %cst_119 = arith.constant 1.000000e+00 : f32
    %401 = vector.broadcast %cst_119 : f32 to vector<2x16xf32>
    %402 = arith.addf %401, %400 : vector<2x16xf32>
    %403 = arith.divf %401, %402 : vector<2x16xf32>
    %404 = arith.negf %394 : vector<2x16xf32>
    %405 = math.exp %404 : vector<2x16xf32>
    %cst_120 = arith.constant 1.000000e+00 : f32
    %406 = vector.broadcast %cst_120 : f32 to vector<2x16xf32>
    %407 = arith.addf %406, %405 : vector<2x16xf32>
    %408 = arith.divf %406, %407 : vector<2x16xf32>
    %409 = math.tanh %396 : vector<2x16xf32>
    %410 = arith.negf %398 : vector<2x16xf32>
    %411 = math.exp %410 : vector<2x16xf32>
    %cst_121 = arith.constant 1.000000e+00 : f32
    %412 = vector.broadcast %cst_121 : f32 to vector<2x16xf32>
    %413 = arith.addf %412, %411 : vector<2x16xf32>
    %414 = arith.divf %412, %413 : vector<2x16xf32>
    %415 = arith.mulf %408, %347 : vector<2x16xf32>
    %416 = arith.mulf %403, %409 : vector<2x16xf32>
    %417 = arith.addf %415, %416 : vector<2x16xf32>
    %418 = math.tanh %417 : vector<2x16xf32>
    %419 = arith.mulf %414, %418 : vector<2x16xf32>
    %420 = arith.truncf %379 : vector<2x16xf32> to vector<2x16xbf16>
    %cst_122 = arith.constant dense<0.000000e+00> : vector<2x16xf32>
    %421 = tpu.matmul %420, %24, %cst_122 {dimension_numbers = #tpu.dot_dimension_numbers<[1], [0], [0], [1], [0, 0, 1, 1], [], []>} : vector<2x16xbf16>, vector<16x16xbf16>, vector<2x16xf32> -> vector<2x16xf32>
    %422 = arith.addf %386, %421 : vector<2x16xf32>
    %cst_123 = arith.constant dense<0.000000e+00> : vector<2x16xf32>
    %423 = tpu.matmul %420, %25, %cst_123 {dimension_numbers = #tpu.dot_dimension_numbers<[1], [0], [0], [1], [0, 0, 1, 1], [], []>} : vector<2x16xbf16>, vector<16x16xbf16>, vector<2x16xf32> -> vector<2x16xf32>
    %424 = arith.addf %387, %423 : vector<2x16xf32>
    %cst_124 = arith.constant dense<0.000000e+00> : vector<2x16xf32>
    %425 = tpu.matmul %420, %26, %cst_124 {dimension_numbers = #tpu.dot_dimension_numbers<[1], [0], [0], [1], [0, 0, 1, 1], [], []>} : vector<2x16xbf16>, vector<16x16xbf16>, vector<2x16xf32> -> vector<2x16xf32>
    %426 = arith.addf %388, %425 : vector<2x16xf32>
    %cst_125 = arith.constant dense<0.000000e+00> : vector<2x16xf32>
    %427 = tpu.matmul %420, %27, %cst_125 {dimension_numbers = #tpu.dot_dimension_numbers<[1], [0], [0], [1], [0, 0, 1, 1], [], []>} : vector<2x16xbf16>, vector<16x16xbf16>, vector<2x16xf32> -> vector<2x16xf32>
    %428 = arith.addf %389, %427 : vector<2x16xf32>
    %429 = arith.negf %422 : vector<2x16xf32>
    %430 = math.exp %429 : vector<2x16xf32>
    %cst_126 = arith.constant 1.000000e+00 : f32
    %431 = vector.broadcast %cst_126 : f32 to vector<2x16xf32>
    %432 = arith.addf %431, %430 : vector<2x16xf32>
    %433 = arith.divf %431, %432 : vector<2x16xf32>
    %434 = arith.negf %424 : vector<2x16xf32>
    %435 = math.exp %434 : vector<2x16xf32>
    %cst_127 = arith.constant 1.000000e+00 : f32
    %436 = vector.broadcast %cst_127 : f32 to vector<2x16xf32>
    %437 = arith.addf %436, %435 : vector<2x16xf32>
    %438 = arith.divf %436, %437 : vector<2x16xf32>
    %439 = math.tanh %426 : vector<2x16xf32>
    %440 = arith.negf %428 : vector<2x16xf32>
    %441 = math.exp %440 : vector<2x16xf32>
    %cst_128 = arith.constant 1.000000e+00 : f32
    %442 = vector.broadcast %cst_128 : f32 to vector<2x16xf32>
    %443 = arith.addf %442, %441 : vector<2x16xf32>
    %444 = arith.divf %442, %443 : vector<2x16xf32>
    %445 = arith.mulf %438, %377 : vector<2x16xf32>
    %446 = arith.mulf %433, %439 : vector<2x16xf32>
    %447 = arith.addf %445, %446 : vector<2x16xf32>
    %448 = math.tanh %447 : vector<2x16xf32>
    %449 = arith.mulf %444, %448 : vector<2x16xf32>
    %c10_129 = arith.constant 10 : index
    %c0_130 = arith.constant 0 : index
    %450 = vector.load %arg31[%c10_129, %c0_130] : memref<16x16xf32, #tpu.memory_space<vmem>>, vector<2x16xf32>
    tpu.vector_store %arg31[%c10_129, %c0_130], %419 {strides = array<i32>} : memref<16x16xf32, #tpu.memory_space<vmem>>, vector<2x16xf32>,
    %c4_131 = arith.constant 4 : index
    %c0_132 = arith.constant 0 : index
    %451 = vector.load %arg32[%c4_131, %c0_132] : memref<16x16xf32, #tpu.memory_space<vmem>>, vector<2x16xf32>
    tpu.vector_store %arg32[%c4_131, %c0_132], %449 {strides = array<i32>} : memref<16x16xf32, #tpu.memory_space<vmem>>, vector<2x16xf32>,
    %452 = vector.extract_strided_slice %6 {offsets = [12, 0], sizes = [2, 16], strides = [1, 1]} : vector<16x16xf32> to vector<2x16xf32>
    %453 = vector.extract_strided_slice %7 {offsets = [12, 0], sizes = [2, 16], strides = [1, 1]} : vector<16x16xf32> to vector<2x16xf32>
    %454 = vector.extract_strided_slice %8 {offsets = [12, 0], sizes = [2, 16], strides = [1, 1]} : vector<16x16xf32> to vector<2x16xf32>
    %455 = vector.extract_strided_slice %9 {offsets = [12, 0], sizes = [2, 16], strides = [1, 1]} : vector<16x16xf32> to vector<2x16xf32>
    %456 = vector.extract_strided_slice %16 {offsets = [2, 0], sizes = [2, 16], strides = [1, 1]} : vector<16x16xf32> to vector<2x16xf32>
    %457 = vector.extract_strided_slice %17 {offsets = [2, 0], sizes = [2, 16], strides = [1, 1]} : vector<16x16xf32> to vector<2x16xf32>
    %458 = vector.extract_strided_slice %18 {offsets = [2, 0], sizes = [2, 16], strides = [1, 1]} : vector<16x16xf32> to vector<2x16xf32>
    %459 = vector.extract_strided_slice %19 {offsets = [2, 0], sizes = [2, 16], strides = [1, 1]} : vector<16x16xf32> to vector<2x16xf32>
    %460 = arith.truncf %419 : vector<2x16xf32> to vector<2x16xbf16>
    %cst_133 = arith.constant dense<0.000000e+00> : vector<2x16xf32>
    %461 = tpu.matmul %460, %20, %cst_133 {dimension_numbers = #tpu.dot_dimension_numbers<[1], [0], [0], [1], [0, 0, 1, 1], [], []>} : vector<2x16xbf16>, vector<16x16xbf16>, vector<2x16xf32> -> vector<2x16xf32>
    %462 = arith.addf %452, %461 : vector<2x16xf32>
    %cst_134 = arith.constant dense<0.000000e+00> : vector<2x16xf32>
    %463 = tpu.matmul %460, %21, %cst_134 {dimension_numbers = #tpu.dot_dimension_numbers<[1], [0], [0], [1], [0, 0, 1, 1], [], []>} : vector<2x16xbf16>, vector<16x16xbf16>, vector<2x16xf32> -> vector<2x16xf32>
    %464 = arith.addf %453, %463 : vector<2x16xf32>
    %cst_135 = arith.constant dense<0.000000e+00> : vector<2x16xf32>
    %465 = tpu.matmul %460, %22, %cst_135 {dimension_numbers = #tpu.dot_dimension_numbers<[1], [0], [0], [1], [0, 0, 1, 1], [], []>} : vector<2x16xbf16>, vector<16x16xbf16>, vector<2x16xf32> -> vector<2x16xf32>
    %466 = arith.addf %454, %465 : vector<2x16xf32>
    %cst_136 = arith.constant dense<0.000000e+00> : vector<2x16xf32>
    %467 = tpu.matmul %460, %23, %cst_136 {dimension_numbers = #tpu.dot_dimension_numbers<[1], [0], [0], [1], [0, 0, 1, 1], [], []>} : vector<2x16xbf16>, vector<16x16xbf16>, vector<2x16xf32> -> vector<2x16xf32>
    %468 = arith.addf %455, %467 : vector<2x16xf32>
    %469 = arith.negf %462 : vector<2x16xf32>
    %470 = math.exp %469 : vector<2x16xf32>
    %cst_137 = arith.constant 1.000000e+00 : f32
    %471 = vector.broadcast %cst_137 : f32 to vector<2x16xf32>
    %472 = arith.addf %471, %470 : vector<2x16xf32>
    %473 = arith.divf %471, %472 : vector<2x16xf32>
    %474 = arith.negf %464 : vector<2x16xf32>
    %475 = math.exp %474 : vector<2x16xf32>
    %cst_138 = arith.constant 1.000000e+00 : f32
    %476 = vector.broadcast %cst_138 : f32 to vector<2x16xf32>
    %477 = arith.addf %476, %475 : vector<2x16xf32>
    %478 = arith.divf %476, %477 : vector<2x16xf32>
    %479 = math.tanh %466 : vector<2x16xf32>
    %480 = arith.negf %468 : vector<2x16xf32>
    %481 = math.exp %480 : vector<2x16xf32>
    %cst_139 = arith.constant 1.000000e+00 : f32
    %482 = vector.broadcast %cst_139 : f32 to vector<2x16xf32>
    %483 = arith.addf %482, %481 : vector<2x16xf32>
    %484 = arith.divf %482, %483 : vector<2x16xf32>
    %485 = arith.mulf %478, %417 : vector<2x16xf32>
    %486 = arith.mulf %473, %479 : vector<2x16xf32>
    %487 = arith.addf %485, %486 : vector<2x16xf32>
    %488 = math.tanh %487 : vector<2x16xf32>
    %489 = arith.mulf %484, %488 : vector<2x16xf32>
    %490 = arith.truncf %449 : vector<2x16xf32> to vector<2x16xbf16>
    %cst_140 = arith.constant dense<0.000000e+00> : vector<2x16xf32>
    %491 = tpu.matmul %490, %24, %cst_140 {dimension_numbers = #tpu.dot_dimension_numbers<[1], [0], [0], [1], [0, 0, 1, 1], [], []>} : vector<2x16xbf16>, vector<16x16xbf16>, vector<2x16xf32> -> vector<2x16xf32>
    %492 = arith.addf %456, %491 : vector<2x16xf32>
    %cst_141 = arith.constant dense<0.000000e+00> : vector<2x16xf32>
    %493 = tpu.matmul %490, %25, %cst_141 {dimension_numbers = #tpu.dot_dimension_numbers<[1], [0], [0], [1], [0, 0, 1, 1], [], []>} : vector<2x16xbf16>, vector<16x16xbf16>, vector<2x16xf32> -> vector<2x16xf32>
    %494 = arith.addf %457, %493 : vector<2x16xf32>
    %cst_142 = arith.constant dense<0.000000e+00> : vector<2x16xf32>
    %495 = tpu.matmul %490, %26, %cst_142 {dimension_numbers = #tpu.dot_dimension_numbers<[1], [0], [0], [1], [0, 0, 1, 1], [], []>} : vector<2x16xbf16>, vector<16x16xbf16>, vector<2x16xf32> -> vector<2x16xf32>
    %496 = arith.addf %458, %495 : vector<2x16xf32>
    %cst_143 = arith.constant dense<0.000000e+00> : vector<2x16xf32>
    %497 = tpu.matmul %490, %27, %cst_143 {dimension_numbers = #tpu.dot_dimension_numbers<[1], [0], [0], [1], [0, 0, 1, 1], [], []>} : vector<2x16xbf16>, vector<16x16xbf16>, vector<2x16xf32> -> vector<2x16xf32>
    %498 = arith.addf %459, %497 : vector<2x16xf32>
    %499 = arith.negf %492 : vector<2x16xf32>
    %500 = math.exp %499 : vector<2x16xf32>
    %cst_144 = arith.constant 1.000000e+00 : f32
    %501 = vector.broadcast %cst_144 : f32 to vector<2x16xf32>
    %502 = arith.addf %501, %500 : vector<2x16xf32>
    %503 = arith.divf %501, %502 : vector<2x16xf32>
    %504 = arith.negf %494 : vector<2x16xf32>
    %505 = math.exp %504 : vector<2x16xf32>
    %cst_145 = arith.constant 1.000000e+00 : f32
    %506 = vector.broadcast %cst_145 : f32 to vector<2x16xf32>
    %507 = arith.addf %506, %505 : vector<2x16xf32>
    %508 = arith.divf %506, %507 : vector<2x16xf32>
    %509 = math.tanh %496 : vector<2x16xf32>
    %510 = arith.negf %498 : vector<2x16xf32>
    %511 = math.exp %510 : vector<2x16xf32>
    %cst_146 = arith.constant 1.000000e+00 : f32
    %512 = vector.broadcast %cst_146 : f32 to vector<2x16xf32>
    %513 = arith.addf %512, %511 : vector<2x16xf32>
    %514 = arith.divf %512, %513 : vector<2x16xf32>
    %515 = arith.mulf %508, %447 : vector<2x16xf32>
    %516 = arith.mulf %503, %509 : vector<2x16xf32>
    %517 = arith.addf %515, %516 : vector<2x16xf32>
    %518 = math.tanh %517 : vector<2x16xf32>
    %519 = arith.mulf %514, %518 : vector<2x16xf32>
    %c12_147 = arith.constant 12 : index
    %c0_148 = arith.constant 0 : index
    %520 = vector.load %arg31[%c12_147, %c0_148] : memref<16x16xf32, #tpu.memory_space<vmem>>, vector<2x16xf32>
    tpu.vector_store %arg31[%c12_147, %c0_148], %489 {strides = array<i32>} : memref<16x16xf32, #tpu.memory_space<vmem>>, vector<2x16xf32>,
    %c2_149 = arith.constant 2 : index
    %c0_150 = arith.constant 0 : index
    %521 = vector.load %arg32[%c2_149, %c0_150] : memref<16x16xf32, #tpu.memory_space<vmem>>, vector<2x16xf32>
    tpu.vector_store %arg32[%c2_149, %c0_150], %519 {strides = array<i32>} : memref<16x16xf32, #tpu.memory_space<vmem>>, vector<2x16xf32>,
    %522 = vector.extract_strided_slice %6 {offsets = [14, 0], sizes = [2, 16], strides = [1, 1]} : vector<16x16xf32> to vector<2x16xf32>
    %523 = vector.extract_strided_slice %7 {offsets = [14, 0], sizes = [2, 16], strides = [1, 1]} : vector<16x16xf32> to vector<2x16xf32>
    %524 = vector.extract_strided_slice %8 {offsets = [14, 0], sizes = [2, 16], strides = [1, 1]} : vector<16x16xf32> to vector<2x16xf32>
    %525 = vector.extract_strided_slice %9 {offsets = [14, 0], sizes = [2, 16], strides = [1, 1]} : vector<16x16xf32> to vector<2x16xf32>
    %526 = vector.extract_strided_slice %16 {offsets = [0, 0], sizes = [2, 16], strides = [1, 1]} : vector<16x16xf32> to vector<2x16xf32>
    %527 = vector.extract_strided_slice %17 {offsets = [0, 0], sizes = [2, 16], strides = [1, 1]} : vector<16x16xf32> to vector<2x16xf32>
    %528 = vector.extract_strided_slice %18 {offsets = [0, 0], sizes = [2, 16], strides = [1, 1]} : vector<16x16xf32> to vector<2x16xf32>
    %529 = vector.extract_strided_slice %19 {offsets = [0, 0], sizes = [2, 16], strides = [1, 1]} : vector<16x16xf32> to vector<2x16xf32>
    %530 = arith.truncf %489 : vector<2x16xf32> to vector<2x16xbf16>
    %cst_151 = arith.constant dense<0.000000e+00> : vector<2x16xf32>
    %531 = tpu.matmul %530, %20, %cst_151 {dimension_numbers = #tpu.dot_dimension_numbers<[1], [0], [0], [1], [0, 0, 1, 1], [], []>} : vector<2x16xbf16>, vector<16x16xbf16>, vector<2x16xf32> -> vector<2x16xf32>
    %532 = arith.addf %522, %531 : vector<2x16xf32>
    %cst_152 = arith.constant dense<0.000000e+00> : vector<2x16xf32>
    %533 = tpu.matmul %530, %21, %cst_152 {dimension_numbers = #tpu.dot_dimension_numbers<[1], [0], [0], [1], [0, 0, 1, 1], [], []>} : vector<2x16xbf16>, vector<16x16xbf16>, vector<2x16xf32> -> vector<2x16xf32>
    %534 = arith.addf %523, %533 : vector<2x16xf32>
    %cst_153 = arith.constant dense<0.000000e+00> : vector<2x16xf32>
    %535 = tpu.matmul %530, %22, %cst_153 {dimension_numbers = #tpu.dot_dimension_numbers<[1], [0], [0], [1], [0, 0, 1, 1], [], []>} : vector<2x16xbf16>, vector<16x16xbf16>, vector<2x16xf32> -> vector<2x16xf32>
    %536 = arith.addf %524, %535 : vector<2x16xf32>
    %cst_154 = arith.constant dense<0.000000e+00> : vector<2x16xf32>
    %537 = tpu.matmul %530, %23, %cst_154 {dimension_numbers = #tpu.dot_dimension_numbers<[1], [0], [0], [1], [0, 0, 1, 1], [], []>} : vector<2x16xbf16>, vector<16x16xbf16>, vector<2x16xf32> -> vector<2x16xf32>
    %538 = arith.addf %525, %537 : vector<2x16xf32>
    %539 = arith.negf %532 : vector<2x16xf32>
    %540 = math.exp %539 : vector<2x16xf32>
    %cst_155 = arith.constant 1.000000e+00 : f32
    %541 = vector.broadcast %cst_155 : f32 to vector<2x16xf32>
    %542 = arith.addf %541, %540 : vector<2x16xf32>
    %543 = arith.divf %541, %542 : vector<2x16xf32>
    %544 = arith.negf %534 : vector<2x16xf32>
    %545 = math.exp %544 : vector<2x16xf32>
    %cst_156 = arith.constant 1.000000e+00 : f32
    %546 = vector.broadcast %cst_156 : f32 to vector<2x16xf32>
    %547 = arith.addf %546, %545 : vector<2x16xf32>
    %548 = arith.divf %546, %547 : vector<2x16xf32>
    %549 = math.tanh %536 : vector<2x16xf32>
    %550 = arith.negf %538 : vector<2x16xf32>
    %551 = math.exp %550 : vector<2x16xf32>
    %cst_157 = arith.constant 1.000000e+00 : f32
    %552 = vector.broadcast %cst_157 : f32 to vector<2x16xf32>
    %553 = arith.addf %552, %551 : vector<2x16xf32>
    %554 = arith.divf %552, %553 : vector<2x16xf32>
    %555 = arith.mulf %548, %487 : vector<2x16xf32>
    %556 = arith.mulf %543, %549 : vector<2x16xf32>
    %557 = arith.addf %555, %556 : vector<2x16xf32>
    %558 = math.tanh %557 : vector<2x16xf32>
    %559 = arith.mulf %554, %558 : vector<2x16xf32>
    %560 = arith.truncf %519 : vector<2x16xf32> to vector<2x16xbf16>
    %cst_158 = arith.constant dense<0.000000e+00> : vector<2x16xf32>
    %561 = tpu.matmul %560, %24, %cst_158 {dimension_numbers = #tpu.dot_dimension_numbers<[1], [0], [0], [1], [0, 0, 1, 1], [], []>} : vector<2x16xbf16>, vector<16x16xbf16>, vector<2x16xf32> -> vector<2x16xf32>
    %562 = arith.addf %526, %561 : vector<2x16xf32>
    %cst_159 = arith.constant dense<0.000000e+00> : vector<2x16xf32>
    %563 = tpu.matmul %560, %25, %cst_159 {dimension_numbers = #tpu.dot_dimension_numbers<[1], [0], [0], [1], [0, 0, 1, 1], [], []>} : vector<2x16xbf16>, vector<16x16xbf16>, vector<2x16xf32> -> vector<2x16xf32>
    %564 = arith.addf %527, %563 : vector<2x16xf32>
    %cst_160 = arith.constant dense<0.000000e+00> : vector<2x16xf32>
    %565 = tpu.matmul %560, %26, %cst_160 {dimension_numbers = #tpu.dot_dimension_numbers<[1], [0], [0], [1], [0, 0, 1, 1], [], []>} : vector<2x16xbf16>, vector<16x16xbf16>, vector<2x16xf32> -> vector<2x16xf32>
    %566 = arith.addf %528, %565 : vector<2x16xf32>
    %cst_161 = arith.constant dense<0.000000e+00> : vector<2x16xf32>
    %567 = tpu.matmul %560, %27, %cst_161 {dimension_numbers = #tpu.dot_dimension_numbers<[1], [0], [0], [1], [0, 0, 1, 1], [], []>} : vector<2x16xbf16>, vector<16x16xbf16>, vector<2x16xf32> -> vector<2x16xf32>
    %568 = arith.addf %529, %567 : vector<2x16xf32>
    %569 = arith.negf %562 : vector<2x16xf32>
    %570 = math.exp %569 : vector<2x16xf32>
    %cst_162 = arith.constant 1.000000e+00 : f32
    %571 = vector.broadcast %cst_162 : f32 to vector<2x16xf32>
    %572 = arith.addf %571, %570 : vector<2x16xf32>
    %573 = arith.divf %571, %572 : vector<2x16xf32>
    %574 = arith.negf %564 : vector<2x16xf32>
    %575 = math.exp %574 : vector<2x16xf32>
    %cst_163 = arith.constant 1.000000e+00 : f32
    %576 = vector.broadcast %cst_163 : f32 to vector<2x16xf32>
    %577 = arith.addf %576, %575 : vector<2x16xf32>
    %578 = arith.divf %576, %577 : vector<2x16xf32>
    %579 = math.tanh %566 : vector<2x16xf32>
    %580 = arith.negf %568 : vector<2x16xf32>
    %581 = math.exp %580 : vector<2x16xf32>
    %cst_164 = arith.constant 1.000000e+00 : f32
    %582 = vector.broadcast %cst_164 : f32 to vector<2x16xf32>
    %583 = arith.addf %582, %581 : vector<2x16xf32>
    %584 = arith.divf %582, %583 : vector<2x16xf32>
    %585 = arith.mulf %578, %517 : vector<2x16xf32>
    %586 = arith.mulf %573, %579 : vector<2x16xf32>
    %587 = arith.addf %585, %586 : vector<2x16xf32>
    %588 = math.tanh %587 : vector<2x16xf32>
    %589 = arith.mulf %584, %588 : vector<2x16xf32>
    %c14_165 = arith.constant 14 : index
    %c0_166 = arith.constant 0 : index
    %590 = vector.load %arg31[%c14_165, %c0_166] : memref<16x16xf32, #tpu.memory_space<vmem>>, vector<2x16xf32>
    tpu.vector_store %arg31[%c14_165, %c0_166], %559 {strides = array<i32>} : memref<16x16xf32, #tpu.memory_space<vmem>>, vector<2x16xf32>,
    %c0_167 = arith.constant 0 : index
    %c0_168 = arith.constant 0 : index
    %591 = vector.load %arg32[%c0_167, %c0_168] : memref<16x16xf32, #tpu.memory_space<vmem>>, vector<2x16xf32>
    tpu.vector_store %arg32[%c0_167, %c0_168], %589 {strides = array<i32>} : memref<16x16xf32, #tpu.memory_space<vmem>>, vector<2x16xf32>,
    %c0_169 = arith.constant 0 : index
    %c0_170 = arith.constant 0 : index
    %592 = vector.load %arg31[%c0_169, %c0_170] : memref<16x16xf32, #tpu.memory_space<vmem>>, vector<16x16xf32>
    %593 = arith.truncf %592 : vector<16x16xf32> to vector<16x16xbf16>
    %c0_171 = arith.constant 0 : index
    %c0_172 = arith.constant 0 : index
    %594 = vector.load %arg32[%c0_171, %c0_172] : memref<16x16xf32, #tpu.memory_space<vmem>>, vector<16x16xf32>
    %595 = arith.truncf %594 : vector<16x16xf32> to vector<16x16xbf16>
    %c0_173 = arith.constant 0 : index
    %c0_174 = arith.constant 0 : index
    %596 = vector.load %arg13[%c0_173, %c0_174] : memref<16x64xbf16, #tpu.memory_space<vmem>>, vector<16x64xbf16>
    %cst_175 = arith.constant dense<0.000000e+00> : vector<16x64xf32>
    %597 = tpu.matmul %593, %596, %cst_175 {dimension_numbers = #tpu.dot_dimension_numbers<[1], [0], [0], [1], [0, 0, 1, 1], [], []>} : vector<16x16xbf16>, vector<16x64xbf16>, vector<16x64xf32> -> vector<16x64xf32>
    %c0_176 = arith.constant 0 : index
    %c0_177 = arith.constant 0 : index
    %598 = vector.load %arg14[%c0_176, %c0_177] : memref<16x64xbf16, #tpu.memory_space<vmem>>, vector<16x64xbf16>
    %cst_178 = arith.constant dense<0.000000e+00> : vector<16x64xf32>
    %599 = tpu.matmul %595, %598, %cst_178 {dimension_numbers = #tpu.dot_dimension_numbers<[1], [0], [0], [1], [0, 0, 1, 1], [], []>} : vector<16x16xbf16>, vector<16x64xbf16>, vector<16x64xf32> -> vector<16x64xf32>
    %600 = arith.addf %597, %599 : vector<16x64xf32>
    %c0_179 = arith.constant 0 : index
    %c0_180 = arith.constant 0 : index
    %601 = vector.load %arg15[%c0_179, %c0_180] : memref<1x64xf32, #tpu.memory_space<vmem>>, vector<1x64xf32>
    %602 = vector.broadcast %601 : vector<1x64xf32> to vector<16x64xf32>
    %603 = arith.addf %600, %602 : vector<16x64xf32>
    %604 = vector.extract_strided_slice %603 {offsets = [0, 0], sizes = [16, 16], strides = [1, 1]} : vector<16x64xf32> to vector<16x16xf32>
    %605 = vector.extract_strided_slice %603 {offsets = [0, 16], sizes = [16, 16], strides = [1, 1]} : vector<16x64xf32> to vector<16x16xf32>
    %606 = vector.extract_strided_slice %603 {offsets = [0, 32], sizes = [16, 16], strides = [1, 1]} : vector<16x64xf32> to vector<16x16xf32>
    %607 = vector.extract_strided_slice %603 {offsets = [0, 48], sizes = [16, 16], strides = [1, 1]} : vector<16x64xf32> to vector<16x16xf32>
    %c0_181 = arith.constant 0 : index
    %c0_182 = arith.constant 0 : index
    %608 = vector.load %arg20[%c0_181, %c0_182] : memref<16x64xbf16, #tpu.memory_space<vmem>>, vector<16x64xbf16>
    %cst_183 = arith.constant dense<0.000000e+00> : vector<16x64xf32>
    %609 = tpu.matmul %593, %608, %cst_183 {dimension_numbers = #tpu.dot_dimension_numbers<[1], [0], [0], [1], [0, 0, 1, 1], [], []>} : vector<16x16xbf16>, vector<16x64xbf16>, vector<16x64xf32> -> vector<16x64xf32>
    %c0_184 = arith.constant 0 : index
    %c0_185 = arith.constant 0 : index
    %610 = vector.load %arg21[%c0_184, %c0_185] : memref<16x64xbf16, #tpu.memory_space<vmem>>, vector<16x64xbf16>
    %cst_186 = arith.constant dense<0.000000e+00> : vector<16x64xf32>
    %611 = tpu.matmul %595, %610, %cst_186 {dimension_numbers = #tpu.dot_dimension_numbers<[1], [0], [0], [1], [0, 0, 1, 1], [], []>} : vector<16x16xbf16>, vector<16x64xbf16>, vector<16x64xf32> -> vector<16x64xf32>
    %612 = arith.addf %609, %611 : vector<16x64xf32>
    %c0_187 = arith.constant 0 : index
    %c0_188 = arith.constant 0 : index
    %613 = vector.load %arg22[%c0_187, %c0_188] : memref<1x64xf32, #tpu.memory_space<vmem>>, vector<1x64xf32>
    %614 = vector.broadcast %613 : vector<1x64xf32> to vector<16x64xf32>
    %615 = arith.addf %612, %614 : vector<16x64xf32>
    %616 = vector.extract_strided_slice %615 {offsets = [0, 0], sizes = [16, 16], strides = [1, 1]} : vector<16x64xf32> to vector<16x16xf32>
    %617 = vector.extract_strided_slice %615 {offsets = [0, 16], sizes = [16, 16], strides = [1, 1]} : vector<16x64xf32> to vector<16x16xf32>
    %618 = vector.extract_strided_slice %615 {offsets = [0, 32], sizes = [16, 16], strides = [1, 1]} : vector<16x64xf32> to vector<16x16xf32>
    %619 = vector.extract_strided_slice %615 {offsets = [0, 48], sizes = [16, 16], strides = [1, 1]} : vector<16x64xf32> to vector<16x16xf32>
    %c0_189 = arith.constant 0 : index
    %c0_190 = arith.constant 0 : index
    %620 = vector.load %arg16[%c0_189, %c0_190] : memref<16x16xbf16, #tpu.memory_space<vmem>>, vector<16x16xbf16>
    %c0_191 = arith.constant 0 : index
    %c0_192 = arith.constant 0 : index
    %621 = vector.load %arg17[%c0_191, %c0_192] : memref<16x16xbf16, #tpu.memory_space<vmem>>, vector<16x16xbf16>
    %c0_193 = arith.constant 0 : index
    %c0_194 = arith.constant 0 : index
    %622 = vector.load %arg18[%c0_193, %c0_194] : memref<16x16xbf16, #tpu.memory_space<vmem>>, vector<16x16xbf16>
    %c0_195 = arith.constant 0 : index
    %c0_196 = arith.constant 0 : index
    %623 = vector.load %arg19[%c0_195, %c0_196] : memref<16x16xbf16, #tpu.memory_space<vmem>>, vector<16x16xbf16>
    %c0_197 = arith.constant 0 : index
    %c0_198 = arith.constant 0 : index
    %624 = vector.load %arg23[%c0_197, %c0_198] : memref<16x16xbf16, #tpu.memory_space<vmem>>, vector<16x16xbf16>
    %c0_199 = arith.constant 0 : index
    %c0_200 = arith.constant 0 : index
    %625 = vector.load %arg24[%c0_199, %c0_200] : memref<16x16xbf16, #tpu.memory_space<vmem>>, vector<16x16xbf16>
    %c0_201 = arith.constant 0 : index
    %c0_202 = arith.constant 0 : index
    %626 = vector.load %arg25[%c0_201, %c0_202] : memref<16x16xbf16, #tpu.memory_space<vmem>>, vector<16x16xbf16>
    %c0_203 = arith.constant 0 : index
    %c0_204 = arith.constant 0 : index
    %627 = vector.load %arg26[%c0_203, %c0_204] : memref<16x16xbf16, #tpu.memory_space<vmem>>, vector<16x16xbf16>
    %cst_205 = arith.constant 0.000000e+00 : f32
    %628 = vector.broadcast %cst_205 : f32 to vector<2x16xf32>
    %cst_206 = arith.constant 0.000000e+00 : f32
    %629 = vector.broadcast %cst_206 : f32 to vector<2x16xf32>
    %cst_207 = arith.constant 0.000000e+00 : f32
    %630 = vector.broadcast %cst_207 : f32 to vector<2x16xf32>
    %cst_208 = arith.constant 0.000000e+00 : f32
    %631 = vector.broadcast %cst_208 : f32 to vector<2x16xf32>
    %632 = vector.extract_strided_slice %604 {offsets = [0, 0], sizes = [2, 16], strides = [1, 1]} : vector<16x16xf32> to vector<2x16xf32>
    %633 = vector.extract_strided_slice %605 {offsets = [0, 0], sizes = [2, 16], strides = [1, 1]} : vector<16x16xf32> to vector<2x16xf32>
    %634 = vector.extract_strided_slice %606 {offsets = [0, 0], sizes = [2, 16], strides = [1, 1]} : vector<16x16xf32> to vector<2x16xf32>
    %635 = vector.extract_strided_slice %607 {offsets = [0, 0], sizes = [2, 16], strides = [1, 1]} : vector<16x16xf32> to vector<2x16xf32>
    %636 = vector.extract_strided_slice %616 {offsets = [14, 0], sizes = [2, 16], strides = [1, 1]} : vector<16x16xf32> to vector<2x16xf32>
    %637 = vector.extract_strided_slice %617 {offsets = [14, 0], sizes = [2, 16], strides = [1, 1]} : vector<16x16xf32> to vector<2x16xf32>
    %638 = vector.extract_strided_slice %618 {offsets = [14, 0], sizes = [2, 16], strides = [1, 1]} : vector<16x16xf32> to vector<2x16xf32>
    %639 = vector.extract_strided_slice %619 {offsets = [14, 0], sizes = [2, 16], strides = [1, 1]} : vector<16x16xf32> to vector<2x16xf32>
    %640 = arith.truncf %628 : vector<2x16xf32> to vector<2x16xbf16>
    %cst_209 = arith.constant dense<0.000000e+00> : vector<2x16xf32>
    %641 = tpu.matmul %640, %620, %cst_209 {dimension_numbers = #tpu.dot_dimension_numbers<[1], [0], [0], [1], [0, 0, 1, 1], [], []>} : vector<2x16xbf16>, vector<16x16xbf16>, vector<2x16xf32> -> vector<2x16xf32>
    %642 = arith.addf %632, %641 : vector<2x16xf32>
    %cst_210 = arith.constant dense<0.000000e+00> : vector<2x16xf32>
    %643 = tpu.matmul %640, %621, %cst_210 {dimension_numbers = #tpu.dot_dimension_numbers<[1], [0], [0], [1], [0, 0, 1, 1], [], []>} : vector<2x16xbf16>, vector<16x16xbf16>, vector<2x16xf32> -> vector<2x16xf32>
    %644 = arith.addf %633, %643 : vector<2x16xf32>
    %cst_211 = arith.constant dense<0.000000e+00> : vector<2x16xf32>
    %645 = tpu.matmul %640, %622, %cst_211 {dimension_numbers = #tpu.dot_dimension_numbers<[1], [0], [0], [1], [0, 0, 1, 1], [], []>} : vector<2x16xbf16>, vector<16x16xbf16>, vector<2x16xf32> -> vector<2x16xf32>
    %646 = arith.addf %634, %645 : vector<2x16xf32>
    %cst_212 = arith.constant dense<0.000000e+00> : vector<2x16xf32>
    %647 = tpu.matmul %640, %623, %cst_212 {dimension_numbers = #tpu.dot_dimension_numbers<[1], [0], [0], [1], [0, 0, 1, 1], [], []>} : vector<2x16xbf16>, vector<16x16xbf16>, vector<2x16xf32> -> vector<2x16xf32>
    %648 = arith.addf %635, %647 : vector<2x16xf32>
    %649 = arith.negf %642 : vector<2x16xf32>
    %650 = math.exp %649 : vector<2x16xf32>
    %cst_213 = arith.constant 1.000000e+00 : f32
    %651 = vector.broadcast %cst_213 : f32 to vector<2x16xf32>
    %652 = arith.addf %651, %650 : vector<2x16xf32>
    %653 = arith.divf %651, %652 : vector<2x16xf32>
    %654 = arith.negf %644 : vector<2x16xf32>
    %655 = math.exp %654 : vector<2x16xf32>
    %cst_214 = arith.constant 1.000000e+00 : f32
    %656 = vector.broadcast %cst_214 : f32 to vector<2x16xf32>
    %657 = arith.addf %656, %655 : vector<2x16xf32>
    %658 = arith.divf %656, %657 : vector<2x16xf32>
    %659 = math.tanh %646 : vector<2x16xf32>
    %660 = arith.negf %648 : vector<2x16xf32>
    %661 = math.exp %660 : vector<2x16xf32>
    %cst_215 = arith.constant 1.000000e+00 : f32
    %662 = vector.broadcast %cst_215 : f32 to vector<2x16xf32>
    %663 = arith.addf %662, %661 : vector<2x16xf32>
    %664 = arith.divf %662, %663 : vector<2x16xf32>
    %665 = arith.mulf %658, %629 : vector<2x16xf32>
    %666 = arith.mulf %653, %659 : vector<2x16xf32>
    %667 = arith.addf %665, %666 : vector<2x16xf32>
    %668 = math.tanh %667 : vector<2x16xf32>
    %669 = arith.mulf %664, %668 : vector<2x16xf32>
    %670 = arith.truncf %630 : vector<2x16xf32> to vector<2x16xbf16>
    %cst_216 = arith.constant dense<0.000000e+00> : vector<2x16xf32>
    %671 = tpu.matmul %670, %624, %cst_216 {dimension_numbers = #tpu.dot_dimension_numbers<[1], [0], [0], [1], [0, 0, 1, 1], [], []>} : vector<2x16xbf16>, vector<16x16xbf16>, vector<2x16xf32> -> vector<2x16xf32>
    %672 = arith.addf %636, %671 : vector<2x16xf32>
    %cst_217 = arith.constant dense<0.000000e+00> : vector<2x16xf32>
    %673 = tpu.matmul %670, %625, %cst_217 {dimension_numbers = #tpu.dot_dimension_numbers<[1], [0], [0], [1], [0, 0, 1, 1], [], []>} : vector<2x16xbf16>, vector<16x16xbf16>, vector<2x16xf32> -> vector<2x16xf32>
    %674 = arith.addf %637, %673 : vector<2x16xf32>
    %cst_218 = arith.constant dense<0.000000e+00> : vector<2x16xf32>
    %675 = tpu.matmul %670, %626, %cst_218 {dimension_numbers = #tpu.dot_dimension_numbers<[1], [0], [0], [1], [0, 0, 1, 1], [], []>} : vector<2x16xbf16>, vector<16x16xbf16>, vector<2x16xf32> -> vector<2x16xf32>
    %676 = arith.addf %638, %675 : vector<2x16xf32>
    %cst_219 = arith.constant dense<0.000000e+00> : vector<2x16xf32>
    %677 = tpu.matmul %670, %627, %cst_219 {dimension_numbers = #tpu.dot_dimension_numbers<[1], [0], [0], [1], [0, 0, 1, 1], [], []>} : vector<2x16xbf16>, vector<16x16xbf16>, vector<2x16xf32> -> vector<2x16xf32>
    %678 = arith.addf %639, %677 : vector<2x16xf32>
    %679 = arith.negf %672 : vector<2x16xf32>
    %680 = math.exp %679 : vector<2x16xf32>
    %cst_220 = arith.constant 1.000000e+00 : f32
    %681 = vector.broadcast %cst_220 : f32 to vector<2x16xf32>
    %682 = arith.addf %681, %680 : vector<2x16xf32>
    %683 = arith.divf %681, %682 : vector<2x16xf32>
    %684 = arith.negf %674 : vector<2x16xf32>
    %685 = math.exp %684 : vector<2x16xf32>
    %cst_221 = arith.constant 1.000000e+00 : f32
    %686 = vector.broadcast %cst_221 : f32 to vector<2x16xf32>
    %687 = arith.addf %686, %685 : vector<2x16xf32>
    %688 = arith.divf %686, %687 : vector<2x16xf32>
    %689 = math.tanh %676 : vector<2x16xf32>
    %690 = arith.negf %678 : vector<2x16xf32>
    %691 = math.exp %690 : vector<2x16xf32>
    %cst_222 = arith.constant 1.000000e+00 : f32
    %692 = vector.broadcast %cst_222 : f32 to vector<2x16xf32>
    %693 = arith.addf %692, %691 : vector<2x16xf32>
    %694 = arith.divf %692, %693 : vector<2x16xf32>
    %695 = arith.mulf %688, %631 : vector<2x16xf32>
    %696 = arith.mulf %683, %689 : vector<2x16xf32>
    %697 = arith.addf %695, %696 : vector<2x16xf32>
    %698 = math.tanh %697 : vector<2x16xf32>
    %699 = arith.mulf %694, %698 : vector<2x16xf32>
    %c0_223 = arith.constant 0 : index
    %c0_224 = arith.constant 0 : index
    %700 = vector.load %arg33[%c0_223, %c0_224] : memref<16x16xf32, #tpu.memory_space<vmem>>, vector<2x16xf32>
    tpu.vector_store %arg33[%c0_223, %c0_224], %669 {strides = array<i32>} : memref<16x16xf32, #tpu.memory_space<vmem>>, vector<2x16xf32>,
    %c14_225 = arith.constant 14 : index
    %c0_226 = arith.constant 0 : index
    %701 = vector.load %arg34[%c14_225, %c0_226] : memref<16x16xf32, #tpu.memory_space<vmem>>, vector<2x16xf32>
    tpu.vector_store %arg34[%c14_225, %c0_226], %699 {strides = array<i32>} : memref<16x16xf32, #tpu.memory_space<vmem>>, vector<2x16xf32>,
    %702 = vector.extract_strided_slice %604 {offsets = [2, 0], sizes = [2, 16], strides = [1, 1]} : vector<16x16xf32> to vector<2x16xf32>
    %703 = vector.extract_strided_slice %605 {offsets = [2, 0], sizes = [2, 16], strides = [1, 1]} : vector<16x16xf32> to vector<2x16xf32>
    %704 = vector.extract_strided_slice %606 {offsets = [2, 0], sizes = [2, 16], strides = [1, 1]} : vector<16x16xf32> to vector<2x16xf32>
    %705 = vector.extract_strided_slice %607 {offsets = [2, 0], sizes = [2, 16], strides = [1, 1]} : vector<16x16xf32> to vector<2x16xf32>
    %706 = vector.extract_strided_slice %616 {offsets = [12, 0], sizes = [2, 16], strides = [1, 1]} : vector<16x16xf32> to vector<2x16xf32>
    %707 = vector.extract_strided_slice %617 {offsets = [12, 0], sizes = [2, 16], strides = [1, 1]} : vector<16x16xf32> to vector<2x16xf32>
    %708 = vector.extract_strided_slice %618 {offsets = [12, 0], sizes = [2, 16], strides = [1, 1]} : vector<16x16xf32> to vector<2x16xf32>
    %709 = vector.extract_strided_slice %619 {offsets = [12, 0], sizes = [2, 16], strides = [1, 1]} : vector<16x16xf32> to vector<2x16xf32>
    %710 = arith.truncf %669 : vector<2x16xf32> to vector<2x16xbf16>
    %cst_227 = arith.constant dense<0.000000e+00> : vector<2x16xf32>
    %711 = tpu.matmul %710, %620, %cst_227 {dimension_numbers = #tpu.dot_dimension_numbers<[1], [0], [0], [1], [0, 0, 1, 1], [], []>} : vector<2x16xbf16>, vector<16x16xbf16>, vector<2x16xf32> -> vector<2x16xf32>
    %712 = arith.addf %702, %711 : vector<2x16xf32>
    %cst_228 = arith.constant dense<0.000000e+00> : vector<2x16xf32>
    %713 = tpu.matmul %710, %621, %cst_228 {dimension_numbers = #tpu.dot_dimension_numbers<[1], [0], [0], [1], [0, 0, 1, 1], [], []>} : vector<2x16xbf16>, vector<16x16xbf16>, vector<2x16xf32> -> vector<2x16xf32>
    %714 = arith.addf %703, %713 : vector<2x16xf32>
    %cst_229 = arith.constant dense<0.000000e+00> : vector<2x16xf32>
    %715 = tpu.matmul %710, %622, %cst_229 {dimension_numbers = #tpu.dot_dimension_numbers<[1], [0], [0], [1], [0, 0, 1, 1], [], []>} : vector<2x16xbf16>, vector<16x16xbf16>, vector<2x16xf32> -> vector<2x16xf32>
    %716 = arith.addf %704, %715 : vector<2x16xf32>
    %cst_230 = arith.constant dense<0.000000e+00> : vector<2x16xf32>
    %717 = tpu.matmul %710, %623, %cst_230 {dimension_numbers = #tpu.dot_dimension_numbers<[1], [0], [0], [1], [0, 0, 1, 1], [], []>} : vector<2x16xbf16>, vector<16x16xbf16>, vector<2x16xf32> -> vector<2x16xf32>
    %718 = arith.addf %705, %717 : vector<2x16xf32>
    %719 = arith.negf %712 : vector<2x16xf32>
    %720 = math.exp %719 : vector<2x16xf32>
    %cst_231 = arith.constant 1.000000e+00 : f32
    %721 = vector.broadcast %cst_231 : f32 to vector<2x16xf32>
    %722 = arith.addf %721, %720 : vector<2x16xf32>
    %723 = arith.divf %721, %722 : vector<2x16xf32>
    %724 = arith.negf %714 : vector<2x16xf32>
    %725 = math.exp %724 : vector<2x16xf32>
    %cst_232 = arith.constant 1.000000e+00 : f32
    %726 = vector.broadcast %cst_232 : f32 to vector<2x16xf32>
    %727 = arith.addf %726, %725 : vector<2x16xf32>
    %728 = arith.divf %726, %727 : vector<2x16xf32>
    %729 = math.tanh %716 : vector<2x16xf32>
    %730 = arith.negf %718 : vector<2x16xf32>
    %731 = math.exp %730 : vector<2x16xf32>
    %cst_233 = arith.constant 1.000000e+00 : f32
    %732 = vector.broadcast %cst_233 : f32 to vector<2x16xf32>
    %733 = arith.addf %732, %731 : vector<2x16xf32>
    %734 = arith.divf %732, %733 : vector<2x16xf32>
    %735 = arith.mulf %728, %667 : vector<2x16xf32>
    %736 = arith.mulf %723, %729 : vector<2x16xf32>
    %737 = arith.addf %735, %736 : vector<2x16xf32>
    %738 = math.tanh %737 : vector<2x16xf32>
    %739 = arith.mulf %734, %738 : vector<2x16xf32>
    %740 = arith.truncf %699 : vector<2x16xf32> to vector<2x16xbf16>
    %cst_234 = arith.constant dense<0.000000e+00> : vector<2x16xf32>
    %741 = tpu.matmul %740, %624, %cst_234 {dimension_numbers = #tpu.dot_dimension_numbers<[1], [0], [0], [1], [0, 0, 1, 1], [], []>} : vector<2x16xbf16>, vector<16x16xbf16>, vector<2x16xf32> -> vector<2x16xf32>
    %742 = arith.addf %706, %741 : vector<2x16xf32>
    %cst_235 = arith.constant dense<0.000000e+00> : vector<2x16xf32>
    %743 = tpu.matmul %740, %625, %cst_235 {dimension_numbers = #tpu.dot_dimension_numbers<[1], [0], [0], [1], [0, 0, 1, 1], [], []>} : vector<2x16xbf16>, vector<16x16xbf16>, vector<2x16xf32> -> vector<2x16xf32>
    %744 = arith.addf %707, %743 : vector<2x16xf32>
    %cst_236 = arith.constant dense<0.000000e+00> : vector<2x16xf32>
    %745 = tpu.matmul %740, %626, %cst_236 {dimension_numbers = #tpu.dot_dimension_numbers<[1], [0], [0], [1], [0, 0, 1, 1], [], []>} : vector<2x16xbf16>, vector<16x16xbf16>, vector<2x16xf32> -> vector<2x16xf32>
    %746 = arith.addf %708, %745 : vector<2x16xf32>
    %cst_237 = arith.constant dense<0.000000e+00> : vector<2x16xf32>
    %747 = tpu.matmul %740, %627, %cst_237 {dimension_numbers = #tpu.dot_dimension_numbers<[1], [0], [0], [1], [0, 0, 1, 1], [], []>} : vector<2x16xbf16>, vector<16x16xbf16>, vector<2x16xf32> -> vector<2x16xf32>
    %748 = arith.addf %709, %747 : vector<2x16xf32>
    %749 = arith.negf %742 : vector<2x16xf32>
    %750 = math.exp %749 : vector<2x16xf32>
    %cst_238 = arith.constant 1.000000e+00 : f32
    %751 = vector.broadcast %cst_238 : f32 to vector<2x16xf32>
    %752 = arith.addf %751, %750 : vector<2x16xf32>
    %753 = arith.divf %751, %752 : vector<2x16xf32>
    %754 = arith.negf %744 : vector<2x16xf32>
    %755 = math.exp %754 : vector<2x16xf32>
    %cst_239 = arith.constant 1.000000e+00 : f32
    %756 = vector.broadcast %cst_239 : f32 to vector<2x16xf32>
    %757 = arith.addf %756, %755 : vector<2x16xf32>
    %758 = arith.divf %756, %757 : vector<2x16xf32>
    %759 = math.tanh %746 : vector<2x16xf32>
    %760 = arith.negf %748 : vector<2x16xf32>
    %761 = math.exp %760 : vector<2x16xf32>
    %cst_240 = arith.constant 1.000000e+00 : f32
    %762 = vector.broadcast %cst_240 : f32 to vector<2x16xf32>
    %763 = arith.addf %762, %761 : vector<2x16xf32>
    %764 = arith.divf %762, %763 : vector<2x16xf32>
    %765 = arith.mulf %758, %697 : vector<2x16xf32>
    %766 = arith.mulf %753, %759 : vector<2x16xf32>
    %767 = arith.addf %765, %766 : vector<2x16xf32>
    %768 = math.tanh %767 : vector<2x16xf32>
    %769 = arith.mulf %764, %768 : vector<2x16xf32>
    %c2_241 = arith.constant 2 : index
    %c0_242 = arith.constant 0 : index
    %770 = vector.load %arg33[%c2_241, %c0_242] : memref<16x16xf32, #tpu.memory_space<vmem>>, vector<2x16xf32>
    tpu.vector_store %arg33[%c2_241, %c0_242], %739 {strides = array<i32>} : memref<16x16xf32, #tpu.memory_space<vmem>>, vector<2x16xf32>,
    %c12_243 = arith.constant 12 : index
    %c0_244 = arith.constant 0 : index
    %771 = vector.load %arg34[%c12_243, %c0_244] : memref<16x16xf32, #tpu.memory_space<vmem>>, vector<2x16xf32>
    tpu.vector_store %arg34[%c12_243, %c0_244], %769 {strides = array<i32>} : memref<16x16xf32, #tpu.memory_space<vmem>>, vector<2x16xf32>,
    %772 = vector.extract_strided_slice %604 {offsets = [4, 0], sizes = [2, 16], strides = [1, 1]} : vector<16x16xf32> to vector<2x16xf32>
    %773 = vector.extract_strided_slice %605 {offsets = [4, 0], sizes = [2, 16], strides = [1, 1]} : vector<16x16xf32> to vector<2x16xf32>
    %774 = vector.extract_strided_slice %606 {offsets = [4, 0], sizes = [2, 16], strides = [1, 1]} : vector<16x16xf32> to vector<2x16xf32>
    %775 = vector.extract_strided_slice %607 {offsets = [4, 0], sizes = [2, 16], strides = [1, 1]} : vector<16x16xf32> to vector<2x16xf32>
    %776 = vector.extract_strided_slice %616 {offsets = [10, 0], sizes = [2, 16], strides = [1, 1]} : vector<16x16xf32> to vector<2x16xf32>
    %777 = vector.extract_strided_slice %617 {offsets = [10, 0], sizes = [2, 16], strides = [1, 1]} : vector<16x16xf32> to vector<2x16xf32>
    %778 = vector.extract_strided_slice %618 {offsets = [10, 0], sizes = [2, 16], strides = [1, 1]} : vector<16x16xf32> to vector<2x16xf32>
    %779 = vector.extract_strided_slice %619 {offsets = [10, 0], sizes = [2, 16], strides = [1, 1]} : vector<16x16xf32> to vector<2x16xf32>
    %780 = arith.truncf %739 : vector<2x16xf32> to vector<2x16xbf16>
    %cst_245 = arith.constant dense<0.000000e+00> : vector<2x16xf32>
    %781 = tpu.matmul %780, %620, %cst_245 {dimension_numbers = #tpu.dot_dimension_numbers<[1], [0], [0], [1], [0, 0, 1, 1], [], []>} : vector<2x16xbf16>, vector<16x16xbf16>, vector<2x16xf32> -> vector<2x16xf32>
    %782 = arith.addf %772, %781 : vector<2x16xf32>
    %cst_246 = arith.constant dense<0.000000e+00> : vector<2x16xf32>
    %783 = tpu.matmul %780, %621, %cst_246 {dimension_numbers = #tpu.dot_dimension_numbers<[1], [0], [0], [1], [0, 0, 1, 1], [], []>} : vector<2x16xbf16>, vector<16x16xbf16>, vector<2x16xf32> -> vector<2x16xf32>
    %784 = arith.addf %773, %783 : vector<2x16xf32>
    %cst_247 = arith.constant dense<0.000000e+00> : vector<2x16xf32>
    %785 = tpu.matmul %780, %622, %cst_247 {dimension_numbers = #tpu.dot_dimension_numbers<[1], [0], [0], [1], [0, 0, 1, 1], [], []>} : vector<2x16xbf16>, vector<16x16xbf16>, vector<2x16xf32> -> vector<2x16xf32>
    %786 = arith.addf %774, %785 : vector<2x16xf32>
    %cst_248 = arith.constant dense<0.000000e+00> : vector<2x16xf32>
    %787 = tpu.matmul %780, %623, %cst_248 {dimension_numbers = #tpu.dot_dimension_numbers<[1], [0], [0], [1], [0, 0, 1, 1], [], []>} : vector<2x16xbf16>, vector<16x16xbf16>, vector<2x16xf32> -> vector<2x16xf32>
    %788 = arith.addf %775, %787 : vector<2x16xf32>
    %789 = arith.negf %782 : vector<2x16xf32>
    %790 = math.exp %789 : vector<2x16xf32>
    %cst_249 = arith.constant 1.000000e+00 : f32
    %791 = vector.broadcast %cst_249 : f32 to vector<2x16xf32>
    %792 = arith.addf %791, %790 : vector<2x16xf32>
    %793 = arith.divf %791, %792 : vector<2x16xf32>
    %794 = arith.negf %784 : vector<2x16xf32>
    %795 = math.exp %794 : vector<2x16xf32>
    %cst_250 = arith.constant 1.000000e+00 : f32
    %796 = vector.broadcast %cst_250 : f32 to vector<2x16xf32>
    %797 = arith.addf %796, %795 : vector<2x16xf32>
    %798 = arith.divf %796, %797 : vector<2x16xf32>
    %799 = math.tanh %786 : vector<2x16xf32>
    %800 = arith.negf %788 : vector<2x16xf32>
    %801 = math.exp %800 : vector<2x16xf32>
    %cst_251 = arith.constant 1.000000e+00 : f32
    %802 = vector.broadcast %cst_251 : f32 to vector<2x16xf32>
    %803 = arith.addf %802, %801 : vector<2x16xf32>
    %804 = arith.divf %802, %803 : vector<2x16xf32>
    %805 = arith.mulf %798, %737 : vector<2x16xf32>
    %806 = arith.mulf %793, %799 : vector<2x16xf32>
    %807 = arith.addf %805, %806 : vector<2x16xf32>
    %808 = math.tanh %807 : vector<2x16xf32>
    %809 = arith.mulf %804, %808 : vector<2x16xf32>
    %810 = arith.truncf %769 : vector<2x16xf32> to vector<2x16xbf16>
    %cst_252 = arith.constant dense<0.000000e+00> : vector<2x16xf32>
    %811 = tpu.matmul %810, %624, %cst_252 {dimension_numbers = #tpu.dot_dimension_numbers<[1], [0], [0], [1], [0, 0, 1, 1], [], []>} : vector<2x16xbf16>, vector<16x16xbf16>, vector<2x16xf32> -> vector<2x16xf32>
    %812 = arith.addf %776, %811 : vector<2x16xf32>
    %cst_253 = arith.constant dense<0.000000e+00> : vector<2x16xf32>
    %813 = tpu.matmul %810, %625, %cst_253 {dimension_numbers = #tpu.dot_dimension_numbers<[1], [0], [0], [1], [0, 0, 1, 1], [], []>} : vector<2x16xbf16>, vector<16x16xbf16>, vector<2x16xf32> -> vector<2x16xf32>
    %814 = arith.addf %777, %813 : vector<2x16xf32>
    %cst_254 = arith.constant dense<0.000000e+00> : vector<2x16xf32>
    %815 = tpu.matmul %810, %626, %cst_254 {dimension_numbers = #tpu.dot_dimension_numbers<[1], [0], [0], [1], [0, 0, 1, 1], [], []>} : vector<2x16xbf16>, vector<16x16xbf16>, vector<2x16xf32> -> vector<2x16xf32>
    %816 = arith.addf %778, %815 : vector<2x16xf32>
    %cst_255 = arith.constant dense<0.000000e+00> : vector<2x16xf32>
    %817 = tpu.matmul %810, %627, %cst_255 {dimension_numbers = #tpu.dot_dimension_numbers<[1], [0], [0], [1], [0, 0, 1, 1], [], []>} : vector<2x16xbf16>, vector<16x16xbf16>, vector<2x16xf32> -> vector<2x16xf32>
    %818 = arith.addf %779, %817 : vector<2x16xf32>
    %819 = arith.negf %812 : vector<2x16xf32>
    %820 = math.exp %819 : vector<2x16xf32>
    %cst_256 = arith.constant 1.000000e+00 : f32
    %821 = vector.broadcast %cst_256 : f32 to vector<2x16xf32>
    %822 = arith.addf %821, %820 : vector<2x16xf32>
    %823 = arith.divf %821, %822 : vector<2x16xf32>
    %824 = arith.negf %814 : vector<2x16xf32>
    %825 = math.exp %824 : vector<2x16xf32>
    %cst_257 = arith.constant 1.000000e+00 : f32
    %826 = vector.broadcast %cst_257 : f32 to vector<2x16xf32>
    %827 = arith.addf %826, %825 : vector<2x16xf32>
    %828 = arith.divf %826, %827 : vector<2x16xf32>
    %829 = math.tanh %816 : vector<2x16xf32>
    %830 = arith.negf %818 : vector<2x16xf32>
    %831 = math.exp %830 : vector<2x16xf32>
    %cst_258 = arith.constant 1.000000e+00 : f32
    %832 = vector.broadcast %cst_258 : f32 to vector<2x16xf32>
    %833 = arith.addf %832, %831 : vector<2x16xf32>
    %834 = arith.divf %832, %833 : vector<2x16xf32>
    %835 = arith.mulf %828, %767 : vector<2x16xf32>
    %836 = arith.mulf %823, %829 : vector<2x16xf32>
    %837 = arith.addf %835, %836 : vector<2x16xf32>
    %838 = math.tanh %837 : vector<2x16xf32>
    %839 = arith.mulf %834, %838 : vector<2x16xf32>
    %c4_259 = arith.constant 4 : index
    %c0_260 = arith.constant 0 : index
    %840 = vector.load %arg33[%c4_259, %c0_260] : memref<16x16xf32, #tpu.memory_space<vmem>>, vector<2x16xf32>
    tpu.vector_store %arg33[%c4_259, %c0_260], %809 {strides = array<i32>} : memref<16x16xf32, #tpu.memory_space<vmem>>, vector<2x16xf32>,
    %c10_261 = arith.constant 10 : index
    %c0_262 = arith.constant 0 : index
    %841 = vector.load %arg34[%c10_261, %c0_262] : memref<16x16xf32, #tpu.memory_space<vmem>>, vector<2x16xf32>
    tpu.vector_store %arg34[%c10_261, %c0_262], %839 {strides = array<i32>} : memref<16x16xf32, #tpu.memory_space<vmem>>, vector<2x16xf32>,
    %842 = vector.extract_strided_slice %604 {offsets = [6, 0], sizes = [2, 16], strides = [1, 1]} : vector<16x16xf32> to vector<2x16xf32>
    %843 = vector.extract_strided_slice %605 {offsets = [6, 0], sizes = [2, 16], strides = [1, 1]} : vector<16x16xf32> to vector<2x16xf32>
    %844 = vector.extract_strided_slice %606 {offsets = [6, 0], sizes = [2, 16], strides = [1, 1]} : vector<16x16xf32> to vector<2x16xf32>
    %845 = vector.extract_strided_slice %607 {offsets = [6, 0], sizes = [2, 16], strides = [1, 1]} : vector<16x16xf32> to vector<2x16xf32>
    %846 = vector.extract_strided_slice %616 {offsets = [8, 0], sizes = [2, 16], strides = [1, 1]} : vector<16x16xf32> to vector<2x16xf32>
    %847 = vector.extract_strided_slice %617 {offsets = [8, 0], sizes = [2, 16], strides = [1, 1]} : vector<16x16xf32> to vector<2x16xf32>
    %848 = vector.extract_strided_slice %618 {offsets = [8, 0], sizes = [2, 16], strides = [1, 1]} : vector<16x16xf32> to vector<2x16xf32>
    %849 = vector.extract_strided_slice %619 {offsets = [8, 0], sizes = [2, 16], strides = [1, 1]} : vector<16x16xf32> to vector<2x16xf32>
    %850 = arith.truncf %809 : vector<2x16xf32> to vector<2x16xbf16>
    %cst_263 = arith.constant dense<0.000000e+00> : vector<2x16xf32>
    %851 = tpu.matmul %850, %620, %cst_263 {dimension_numbers = #tpu.dot_dimension_numbers<[1], [0], [0], [1], [0, 0, 1, 1], [], []>} : vector<2x16xbf16>, vector<16x16xbf16>, vector<2x16xf32> -> vector<2x16xf32>
    %852 = arith.addf %842, %851 : vector<2x16xf32>
    %cst_264 = arith.constant dense<0.000000e+00> : vector<2x16xf32>
    %853 = tpu.matmul %850, %621, %cst_264 {dimension_numbers = #tpu.dot_dimension_numbers<[1], [0], [0], [1], [0, 0, 1, 1], [], []>} : vector<2x16xbf16>, vector<16x16xbf16>, vector<2x16xf32> -> vector<2x16xf32>
    %854 = arith.addf %843, %853 : vector<2x16xf32>
    %cst_265 = arith.constant dense<0.000000e+00> : vector<2x16xf32>
    %855 = tpu.matmul %850, %622, %cst_265 {dimension_numbers = #tpu.dot_dimension_numbers<[1], [0], [0], [1], [0, 0, 1, 1], [], []>} : vector<2x16xbf16>, vector<16x16xbf16>, vector<2x16xf32> -> vector<2x16xf32>
    %856 = arith.addf %844, %855 : vector<2x16xf32>
    %cst_266 = arith.constant dense<0.000000e+00> : vector<2x16xf32>
    %857 = tpu.matmul %850, %623, %cst_266 {dimension_numbers = #tpu.dot_dimension_numbers<[1], [0], [0], [1], [0, 0, 1, 1], [], []>} : vector<2x16xbf16>, vector<16x16xbf16>, vector<2x16xf32> -> vector<2x16xf32>
    %858 = arith.addf %845, %857 : vector<2x16xf32>
    %859 = arith.negf %852 : vector<2x16xf32>
    %860 = math.exp %859 : vector<2x16xf32>
    %cst_267 = arith.constant 1.000000e+00 : f32
    %861 = vector.broadcast %cst_267 : f32 to vector<2x16xf32>
    %862 = arith.addf %861, %860 : vector<2x16xf32>
    %863 = arith.divf %861, %862 : vector<2x16xf32>
    %864 = arith.negf %854 : vector<2x16xf32>
    %865 = math.exp %864 : vector<2x16xf32>
    %cst_268 = arith.constant 1.000000e+00 : f32
    %866 = vector.broadcast %cst_268 : f32 to vector<2x16xf32>
    %867 = arith.addf %866, %865 : vector<2x16xf32>
    %868 = arith.divf %866, %867 : vector<2x16xf32>
    %869 = math.tanh %856 : vector<2x16xf32>
    %870 = arith.negf %858 : vector<2x16xf32>
    %871 = math.exp %870 : vector<2x16xf32>
    %cst_269 = arith.constant 1.000000e+00 : f32
    %872 = vector.broadcast %cst_269 : f32 to vector<2x16xf32>
    %873 = arith.addf %872, %871 : vector<2x16xf32>
    %874 = arith.divf %872, %873 : vector<2x16xf32>
    %875 = arith.mulf %868, %807 : vector<2x16xf32>
    %876 = arith.mulf %863, %869 : vector<2x16xf32>
    %877 = arith.addf %875, %876 : vector<2x16xf32>
    %878 = math.tanh %877 : vector<2x16xf32>
    %879 = arith.mulf %874, %878 : vector<2x16xf32>
    %880 = arith.truncf %839 : vector<2x16xf32> to vector<2x16xbf16>
    %cst_270 = arith.constant dense<0.000000e+00> : vector<2x16xf32>
    %881 = tpu.matmul %880, %624, %cst_270 {dimension_numbers = #tpu.dot_dimension_numbers<[1], [0], [0], [1], [0, 0, 1, 1], [], []>} : vector<2x16xbf16>, vector<16x16xbf16>, vector<2x16xf32> -> vector<2x16xf32>
    %882 = arith.addf %846, %881 : vector<2x16xf32>
    %cst_271 = arith.constant dense<0.000000e+00> : vector<2x16xf32>
    %883 = tpu.matmul %880, %625, %cst_271 {dimension_numbers = #tpu.dot_dimension_numbers<[1], [0], [0], [1], [0, 0, 1, 1], [], []>} : vector<2x16xbf16>, vector<16x16xbf16>, vector<2x16xf32> -> vector<2x16xf32>
    %884 = arith.addf %847, %883 : vector<2x16xf32>
    %cst_272 = arith.constant dense<0.000000e+00> : vector<2x16xf32>
    %885 = tpu.matmul %880, %626, %cst_272 {dimension_numbers = #tpu.dot_dimension_numbers<[1], [0], [0], [1], [0, 0, 1, 1], [], []>} : vector<2x16xbf16>, vector<16x16xbf16>, vector<2x16xf32> -> vector<2x16xf32>
    %886 = arith.addf %848, %885 : vector<2x16xf32>
    %cst_273 = arith.constant dense<0.000000e+00> : vector<2x16xf32>
    %887 = tpu.matmul %880, %627, %cst_273 {dimension_numbers = #tpu.dot_dimension_numbers<[1], [0], [0], [1], [0, 0, 1, 1], [], []>} : vector<2x16xbf16>, vector<16x16xbf16>, vector<2x16xf32> -> vector<2x16xf32>
    %888 = arith.addf %849, %887 : vector<2x16xf32>
    %889 = arith.negf %882 : vector<2x16xf32>
    %890 = math.exp %889 : vector<2x16xf32>
    %cst_274 = arith.constant 1.000000e+00 : f32
    %891 = vector.broadcast %cst_274 : f32 to vector<2x16xf32>
    %892 = arith.addf %891, %890 : vector<2x16xf32>
    %893 = arith.divf %891, %892 : vector<2x16xf32>
    %894 = arith.negf %884 : vector<2x16xf32>
    %895 = math.exp %894 : vector<2x16xf32>
    %cst_275 = arith.constant 1.000000e+00 : f32
    %896 = vector.broadcast %cst_275 : f32 to vector<2x16xf32>
    %897 = arith.addf %896, %895 : vector<2x16xf32>
    %898 = arith.divf %896, %897 : vector<2x16xf32>
    %899 = math.tanh %886 : vector<2x16xf32>
    %900 = arith.negf %888 : vector<2x16xf32>
    %901 = math.exp %900 : vector<2x16xf32>
    %cst_276 = arith.constant 1.000000e+00 : f32
    %902 = vector.broadcast %cst_276 : f32 to vector<2x16xf32>
    %903 = arith.addf %902, %901 : vector<2x16xf32>
    %904 = arith.divf %902, %903 : vector<2x16xf32>
    %905 = arith.mulf %898, %837 : vector<2x16xf32>
    %906 = arith.mulf %893, %899 : vector<2x16xf32>
    %907 = arith.addf %905, %906 : vector<2x16xf32>
    %908 = math.tanh %907 : vector<2x16xf32>
    %909 = arith.mulf %904, %908 : vector<2x16xf32>
    %c6_277 = arith.constant 6 : index
    %c0_278 = arith.constant 0 : index
    %910 = vector.load %arg33[%c6_277, %c0_278] : memref<16x16xf32, #tpu.memory_space<vmem>>, vector<2x16xf32>
    tpu.vector_store %arg33[%c6_277, %c0_278], %879 {strides = array<i32>} : memref<16x16xf32, #tpu.memory_space<vmem>>, vector<2x16xf32>,
    %c8_279 = arith.constant 8 : index
    %c0_280 = arith.constant 0 : index
    %911 = vector.load %arg34[%c8_279, %c0_280] : memref<16x16xf32, #tpu.memory_space<vmem>>, vector<2x16xf32>
    tpu.vector_store %arg34[%c8_279, %c0_280], %909 {strides = array<i32>} : memref<16x16xf32, #tpu.memory_space<vmem>>, vector<2x16xf32>,
    %912 = vector.extract_strided_slice %604 {offsets = [8, 0], sizes = [2, 16], strides = [1, 1]} : vector<16x16xf32> to vector<2x16xf32>
    %913 = vector.extract_strided_slice %605 {offsets = [8, 0], sizes = [2, 16], strides = [1, 1]} : vector<16x16xf32> to vector<2x16xf32>
    %914 = vector.extract_strided_slice %606 {offsets = [8, 0], sizes = [2, 16], strides = [1, 1]} : vector<16x16xf32> to vector<2x16xf32>
    %915 = vector.extract_strided_slice %607 {offsets = [8, 0], sizes = [2, 16], strides = [1, 1]} : vector<16x16xf32> to vector<2x16xf32>
    %916 = vector.extract_strided_slice %616 {offsets = [6, 0], sizes = [2, 16], strides = [1, 1]} : vector<16x16xf32> to vector<2x16xf32>
    %917 = vector.extract_strided_slice %617 {offsets = [6, 0], sizes = [2, 16], strides = [1, 1]} : vector<16x16xf32> to vector<2x16xf32>
    %918 = vector.extract_strided_slice %618 {offsets = [6, 0], sizes = [2, 16], strides = [1, 1]} : vector<16x16xf32> to vector<2x16xf32>
    %919 = vector.extract_strided_slice %619 {offsets = [6, 0], sizes = [2, 16], strides = [1, 1]} : vector<16x16xf32> to vector<2x16xf32>
    %920 = arith.truncf %879 : vector<2x16xf32> to vector<2x16xbf16>
    %cst_281 = arith.constant dense<0.000000e+00> : vector<2x16xf32>
    %921 = tpu.matmul %920, %620, %cst_281 {dimension_numbers = #tpu.dot_dimension_numbers<[1], [0], [0], [1], [0, 0, 1, 1], [], []>} : vector<2x16xbf16>, vector<16x16xbf16>, vector<2x16xf32> -> vector<2x16xf32>
    %922 = arith.addf %912, %921 : vector<2x16xf32>
    %cst_282 = arith.constant dense<0.000000e+00> : vector<2x16xf32>
    %923 = tpu.matmul %920, %621, %cst_282 {dimension_numbers = #tpu.dot_dimension_numbers<[1], [0], [0], [1], [0, 0, 1, 1], [], []>} : vector<2x16xbf16>, vector<16x16xbf16>, vector<2x16xf32> -> vector<2x16xf32>
    %924 = arith.addf %913, %923 : vector<2x16xf32>
    %cst_283 = arith.constant dense<0.000000e+00> : vector<2x16xf32>
    %925 = tpu.matmul %920, %622, %cst_283 {dimension_numbers = #tpu.dot_dimension_numbers<[1], [0], [0], [1], [0, 0, 1, 1], [], []>} : vector<2x16xbf16>, vector<16x16xbf16>, vector<2x16xf32> -> vector<2x16xf32>
    %926 = arith.addf %914, %925 : vector<2x16xf32>
    %cst_284 = arith.constant dense<0.000000e+00> : vector<2x16xf32>
    %927 = tpu.matmul %920, %623, %cst_284 {dimension_numbers = #tpu.dot_dimension_numbers<[1], [0], [0], [1], [0, 0, 1, 1], [], []>} : vector<2x16xbf16>, vector<16x16xbf16>, vector<2x16xf32> -> vector<2x16xf32>
    %928 = arith.addf %915, %927 : vector<2x16xf32>
    %929 = arith.negf %922 : vector<2x16xf32>
    %930 = math.exp %929 : vector<2x16xf32>
    %cst_285 = arith.constant 1.000000e+00 : f32
    %931 = vector.broadcast %cst_285 : f32 to vector<2x16xf32>
    %932 = arith.addf %931, %930 : vector<2x16xf32>
    %933 = arith.divf %931, %932 : vector<2x16xf32>
    %934 = arith.negf %924 : vector<2x16xf32>
    %935 = math.exp %934 : vector<2x16xf32>
    %cst_286 = arith.constant 1.000000e+00 : f32
    %936 = vector.broadcast %cst_286 : f32 to vector<2x16xf32>
    %937 = arith.addf %936, %935 : vector<2x16xf32>
    %938 = arith.divf %936, %937 : vector<2x16xf32>
    %939 = math.tanh %926 : vector<2x16xf32>
    %940 = arith.negf %928 : vector<2x16xf32>
    %941 = math.exp %940 : vector<2x16xf32>
    %cst_287 = arith.constant 1.000000e+00 : f32
    %942 = vector.broadcast %cst_287 : f32 to vector<2x16xf32>
    %943 = arith.addf %942, %941 : vector<2x16xf32>
    %944 = arith.divf %942, %943 : vector<2x16xf32>
    %945 = arith.mulf %938, %877 : vector<2x16xf32>
    %946 = arith.mulf %933, %939 : vector<2x16xf32>
    %947 = arith.addf %945, %946 : vector<2x16xf32>
    %948 = math.tanh %947 : vector<2x16xf32>
    %949 = arith.mulf %944, %948 : vector<2x16xf32>
    %950 = arith.truncf %909 : vector<2x16xf32> to vector<2x16xbf16>
    %cst_288 = arith.constant dense<0.000000e+00> : vector<2x16xf32>
    %951 = tpu.matmul %950, %624, %cst_288 {dimension_numbers = #tpu.dot_dimension_numbers<[1], [0], [0], [1], [0, 0, 1, 1], [], []>} : vector<2x16xbf16>, vector<16x16xbf16>, vector<2x16xf32> -> vector<2x16xf32>
    %952 = arith.addf %916, %951 : vector<2x16xf32>
    %cst_289 = arith.constant dense<0.000000e+00> : vector<2x16xf32>
    %953 = tpu.matmul %950, %625, %cst_289 {dimension_numbers = #tpu.dot_dimension_numbers<[1], [0], [0], [1], [0, 0, 1, 1], [], []>} : vector<2x16xbf16>, vector<16x16xbf16>, vector<2x16xf32> -> vector<2x16xf32>
    %954 = arith.addf %917, %953 : vector<2x16xf32>
    %cst_290 = arith.constant dense<0.000000e+00> : vector<2x16xf32>
    %955 = tpu.matmul %950, %626, %cst_290 {dimension_numbers = #tpu.dot_dimension_numbers<[1], [0], [0], [1], [0, 0, 1, 1], [], []>} : vector<2x16xbf16>, vector<16x16xbf16>, vector<2x16xf32> -> vector<2x16xf32>
    %956 = arith.addf %918, %955 : vector<2x16xf32>
    %cst_291 = arith.constant dense<0.000000e+00> : vector<2x16xf32>
    %957 = tpu.matmul %950, %627, %cst_291 {dimension_numbers = #tpu.dot_dimension_numbers<[1], [0], [0], [1], [0, 0, 1, 1], [], []>} : vector<2x16xbf16>, vector<16x16xbf16>, vector<2x16xf32> -> vector<2x16xf32>
    %958 = arith.addf %919, %957 : vector<2x16xf32>
    %959 = arith.negf %952 : vector<2x16xf32>
    %960 = math.exp %959 : vector<2x16xf32>
    %cst_292 = arith.constant 1.000000e+00 : f32
    %961 = vector.broadcast %cst_292 : f32 to vector<2x16xf32>
    %962 = arith.addf %961, %960 : vector<2x16xf32>
    %963 = arith.divf %961, %962 : vector<2x16xf32>
    %964 = arith.negf %954 : vector<2x16xf32>
    %965 = math.exp %964 : vector<2x16xf32>
    %cst_293 = arith.constant 1.000000e+00 : f32
    %966 = vector.broadcast %cst_293 : f32 to vector<2x16xf32>
    %967 = arith.addf %966, %965 : vector<2x16xf32>
    %968 = arith.divf %966, %967 : vector<2x16xf32>
    %969 = math.tanh %956 : vector<2x16xf32>
    %970 = arith.negf %958 : vector<2x16xf32>
    %971 = math.exp %970 : vector<2x16xf32>
    %cst_294 = arith.constant 1.000000e+00 : f32
    %972 = vector.broadcast %cst_294 : f32 to vector<2x16xf32>
    %973 = arith.addf %972, %971 : vector<2x16xf32>
    %974 = arith.divf %972, %973 : vector<2x16xf32>
    %975 = arith.mulf %968, %907 : vector<2x16xf32>
    %976 = arith.mulf %963, %969 : vector<2x16xf32>
    %977 = arith.addf %975, %976 : vector<2x16xf32>
    %978 = math.tanh %977 : vector<2x16xf32>
    %979 = arith.mulf %974, %978 : vector<2x16xf32>
    %c8_295 = arith.constant 8 : index
    %c0_296 = arith.constant 0 : index
    %980 = vector.load %arg33[%c8_295, %c0_296] : memref<16x16xf32, #tpu.memory_space<vmem>>, vector<2x16xf32>
    tpu.vector_store %arg33[%c8_295, %c0_296], %949 {strides = array<i32>} : memref<16x16xf32, #tpu.memory_space<vmem>>, vector<2x16xf32>,
    %c6_297 = arith.constant 6 : index
    %c0_298 = arith.constant 0 : index
    %981 = vector.load %arg34[%c6_297, %c0_298] : memref<16x16xf32, #tpu.memory_space<vmem>>, vector<2x16xf32>
    tpu.vector_store %arg34[%c6_297, %c0_298], %979 {strides = array<i32>} : memref<16x16xf32, #tpu.memory_space<vmem>>, vector<2x16xf32>,
    %982 = vector.extract_strided_slice %604 {offsets = [10, 0], sizes = [2, 16], strides = [1, 1]} : vector<16x16xf32> to vector<2x16xf32>
    %983 = vector.extract_strided_slice %605 {offsets = [10, 0], sizes = [2, 16], strides = [1, 1]} : vector<16x16xf32> to vector<2x16xf32>
    %984 = vector.extract_strided_slice %606 {offsets = [10, 0], sizes = [2, 16], strides = [1, 1]} : vector<16x16xf32> to vector<2x16xf32>
    %985 = vector.extract_strided_slice %607 {offsets = [10, 0], sizes = [2, 16], strides = [1, 1]} : vector<16x16xf32> to vector<2x16xf32>
    %986 = vector.extract_strided_slice %616 {offsets = [4, 0], sizes = [2, 16], strides = [1, 1]} : vector<16x16xf32> to vector<2x16xf32>
    %987 = vector.extract_strided_slice %617 {offsets = [4, 0], sizes = [2, 16], strides = [1, 1]} : vector<16x16xf32> to vector<2x16xf32>
    %988 = vector.extract_strided_slice %618 {offsets = [4, 0], sizes = [2, 16], strides = [1, 1]} : vector<16x16xf32> to vector<2x16xf32>
    %989 = vector.extract_strided_slice %619 {offsets = [4, 0], sizes = [2, 16], strides = [1, 1]} : vector<16x16xf32> to vector<2x16xf32>
    %990 = arith.truncf %949 : vector<2x16xf32> to vector<2x16xbf16>
    %cst_299 = arith.constant dense<0.000000e+00> : vector<2x16xf32>
    %991 = tpu.matmul %990, %620, %cst_299 {dimension_numbers = #tpu.dot_dimension_numbers<[1], [0], [0], [1], [0, 0, 1, 1], [], []>} : vector<2x16xbf16>, vector<16x16xbf16>, vector<2x16xf32> -> vector<2x16xf32>
    %992 = arith.addf %982, %991 : vector<2x16xf32>
    %cst_300 = arith.constant dense<0.000000e+00> : vector<2x16xf32>
    %993 = tpu.matmul %990, %621, %cst_300 {dimension_numbers = #tpu.dot_dimension_numbers<[1], [0], [0], [1], [0, 0, 1, 1], [], []>} : vector<2x16xbf16>, vector<16x16xbf16>, vector<2x16xf32> -> vector<2x16xf32>
    %994 = arith.addf %983, %993 : vector<2x16xf32>
    %cst_301 = arith.constant dense<0.000000e+00> : vector<2x16xf32>
    %995 = tpu.matmul %990, %622, %cst_301 {dimension_numbers = #tpu.dot_dimension_numbers<[1], [0], [0], [1], [0, 0, 1, 1], [], []>} : vector<2x16xbf16>, vector<16x16xbf16>, vector<2x16xf32> -> vector<2x16xf32>
    %996 = arith.addf %984, %995 : vector<2x16xf32>
    %cst_302 = arith.constant dense<0.000000e+00> : vector<2x16xf32>
    %997 = tpu.matmul %990, %623, %cst_302 {dimension_numbers = #tpu.dot_dimension_numbers<[1], [0], [0], [1], [0, 0, 1, 1], [], []>} : vector<2x16xbf16>, vector<16x16xbf16>, vector<2x16xf32> -> vector<2x16xf32>
    %998 = arith.addf %985, %997 : vector<2x16xf32>
    %999 = arith.negf %992 : vector<2x16xf32>
    %1000 = math.exp %999 : vector<2x16xf32>
    %cst_303 = arith.constant 1.000000e+00 : f32
    %1001 = vector.broadcast %cst_303 : f32 to vector<2x16xf32>
    %1002 = arith.addf %1001, %1000 : vector<2x16xf32>
    %1003 = arith.divf %1001, %1002 : vector<2x16xf32>
    %1004 = arith.negf %994 : vector<2x16xf32>
    %1005 = math.exp %1004 : vector<2x16xf32>
    %cst_304 = arith.constant 1.000000e+00 : f32
    %1006 = vector.broadcast %cst_304 : f32 to vector<2x16xf32>
    %1007 = arith.addf %1006, %1005 : vector<2x16xf32>
    %1008 = arith.divf %1006, %1007 : vector<2x16xf32>
    %1009 = math.tanh %996 : vector<2x16xf32>
    %1010 = arith.negf %998 : vector<2x16xf32>
    %1011 = math.exp %1010 : vector<2x16xf32>
    %cst_305 = arith.constant 1.000000e+00 : f32
    %1012 = vector.broadcast %cst_305 : f32 to vector<2x16xf32>
    %1013 = arith.addf %1012, %1011 : vector<2x16xf32>
    %1014 = arith.divf %1012, %1013 : vector<2x16xf32>
    %1015 = arith.mulf %1008, %947 : vector<2x16xf32>
    %1016 = arith.mulf %1003, %1009 : vector<2x16xf32>
    %1017 = arith.addf %1015, %1016 : vector<2x16xf32>
    %1018 = math.tanh %1017 : vector<2x16xf32>
    %1019 = arith.mulf %1014, %1018 : vector<2x16xf32>
    %1020 = arith.truncf %979 : vector<2x16xf32> to vector<2x16xbf16>
    %cst_306 = arith.constant dense<0.000000e+00> : vector<2x16xf32>
    %1021 = tpu.matmul %1020, %624, %cst_306 {dimension_numbers = #tpu.dot_dimension_numbers<[1], [0], [0], [1], [0, 0, 1, 1], [], []>} : vector<2x16xbf16>, vector<16x16xbf16>, vector<2x16xf32> -> vector<2x16xf32>
    %1022 = arith.addf %986, %1021 : vector<2x16xf32>
    %cst_307 = arith.constant dense<0.000000e+00> : vector<2x16xf32>
    %1023 = tpu.matmul %1020, %625, %cst_307 {dimension_numbers = #tpu.dot_dimension_numbers<[1], [0], [0], [1], [0, 0, 1, 1], [], []>} : vector<2x16xbf16>, vector<16x16xbf16>, vector<2x16xf32> -> vector<2x16xf32>
    %1024 = arith.addf %987, %1023 : vector<2x16xf32>
    %cst_308 = arith.constant dense<0.000000e+00> : vector<2x16xf32>
    %1025 = tpu.matmul %1020, %626, %cst_308 {dimension_numbers = #tpu.dot_dimension_numbers<[1], [0], [0], [1], [0, 0, 1, 1], [], []>} : vector<2x16xbf16>, vector<16x16xbf16>, vector<2x16xf32> -> vector<2x16xf32>
    %1026 = arith.addf %988, %1025 : vector<2x16xf32>
    %cst_309 = arith.constant dense<0.000000e+00> : vector<2x16xf32>
    %1027 = tpu.matmul %1020, %627, %cst_309 {dimension_numbers = #tpu.dot_dimension_numbers<[1], [0], [0], [1], [0, 0, 1, 1], [], []>} : vector<2x16xbf16>, vector<16x16xbf16>, vector<2x16xf32> -> vector<2x16xf32>
    %1028 = arith.addf %989, %1027 : vector<2x16xf32>
    %1029 = arith.negf %1022 : vector<2x16xf32>
    %1030 = math.exp %1029 : vector<2x16xf32>
    %cst_310 = arith.constant 1.000000e+00 : f32
    %1031 = vector.broadcast %cst_310 : f32 to vector<2x16xf32>
    %1032 = arith.addf %1031, %1030 : vector<2x16xf32>
    %1033 = arith.divf %1031, %1032 : vector<2x16xf32>
    %1034 = arith.negf %1024 : vector<2x16xf32>
    %1035 = math.exp %1034 : vector<2x16xf32>
    %cst_311 = arith.constant 1.000000e+00 : f32
    %1036 = vector.broadcast %cst_311 : f32 to vector<2x16xf32>
    %1037 = arith.addf %1036, %1035 : vector<2x16xf32>
    %1038 = arith.divf %1036, %1037 : vector<2x16xf32>
    %1039 = math.tanh %1026 : vector<2x16xf32>
    %1040 = arith.negf %1028 : vector<2x16xf32>
    %1041 = math.exp %1040 : vector<2x16xf32>
    %cst_312 = arith.constant 1.000000e+00 : f32
    %1042 = vector.broadcast %cst_312 : f32 to vector<2x16xf32>
    %1043 = arith.addf %1042, %1041 : vector<2x16xf32>
    %1044 = arith.divf %1042, %1043 : vector<2x16xf32>
    %1045 = arith.mulf %1038, %977 : vector<2x16xf32>
    %1046 = arith.mulf %1033, %1039 : vector<2x16xf32>
    %1047 = arith.addf %1045, %1046 : vector<2x16xf32>
    %1048 = math.tanh %1047 : vector<2x16xf32>
    %1049 = arith.mulf %1044, %1048 : vector<2x16xf32>
    %c10_313 = arith.constant 10 : index
    %c0_314 = arith.constant 0 : index
    %1050 = vector.load %arg33[%c10_313, %c0_314] : memref<16x16xf32, #tpu.memory_space<vmem>>, vector<2x16xf32>
    tpu.vector_store %arg33[%c10_313, %c0_314], %1019 {strides = array<i32>} : memref<16x16xf32, #tpu.memory_space<vmem>>, vector<2x16xf32>,
    %c4_315 = arith.constant 4 : index
    %c0_316 = arith.constant 0 : index
    %1051 = vector.load %arg34[%c4_315, %c0_316] : memref<16x16xf32, #tpu.memory_space<vmem>>, vector<2x16xf32>
    tpu.vector_store %arg34[%c4_315, %c0_316], %1049 {strides = array<i32>} : memref<16x16xf32, #tpu.memory_space<vmem>>, vector<2x16xf32>,
    %1052 = vector.extract_strided_slice %604 {offsets = [12, 0], sizes = [2, 16], strides = [1, 1]} : vector<16x16xf32> to vector<2x16xf32>
    %1053 = vector.extract_strided_slice %605 {offsets = [12, 0], sizes = [2, 16], strides = [1, 1]} : vector<16x16xf32> to vector<2x16xf32>
    %1054 = vector.extract_strided_slice %606 {offsets = [12, 0], sizes = [2, 16], strides = [1, 1]} : vector<16x16xf32> to vector<2x16xf32>
    %1055 = vector.extract_strided_slice %607 {offsets = [12, 0], sizes = [2, 16], strides = [1, 1]} : vector<16x16xf32> to vector<2x16xf32>
    %1056 = vector.extract_strided_slice %616 {offsets = [2, 0], sizes = [2, 16], strides = [1, 1]} : vector<16x16xf32> to vector<2x16xf32>
    %1057 = vector.extract_strided_slice %617 {offsets = [2, 0], sizes = [2, 16], strides = [1, 1]} : vector<16x16xf32> to vector<2x16xf32>
    %1058 = vector.extract_strided_slice %618 {offsets = [2, 0], sizes = [2, 16], strides = [1, 1]} : vector<16x16xf32> to vector<2x16xf32>
    %1059 = vector.extract_strided_slice %619 {offsets = [2, 0], sizes = [2, 16], strides = [1, 1]} : vector<16x16xf32> to vector<2x16xf32>
    %1060 = arith.truncf %1019 : vector<2x16xf32> to vector<2x16xbf16>
    %cst_317 = arith.constant dense<0.000000e+00> : vector<2x16xf32>
    %1061 = tpu.matmul %1060, %620, %cst_317 {dimension_numbers = #tpu.dot_dimension_numbers<[1], [0], [0], [1], [0, 0, 1, 1], [], []>} : vector<2x16xbf16>, vector<16x16xbf16>, vector<2x16xf32> -> vector<2x16xf32>
    %1062 = arith.addf %1052, %1061 : vector<2x16xf32>
    %cst_318 = arith.constant dense<0.000000e+00> : vector<2x16xf32>
    %1063 = tpu.matmul %1060, %621, %cst_318 {dimension_numbers = #tpu.dot_dimension_numbers<[1], [0], [0], [1], [0, 0, 1, 1], [], []>} : vector<2x16xbf16>, vector<16x16xbf16>, vector<2x16xf32> -> vector<2x16xf32>
    %1064 = arith.addf %1053, %1063 : vector<2x16xf32>
    %cst_319 = arith.constant dense<0.000000e+00> : vector<2x16xf32>
    %1065 = tpu.matmul %1060, %622, %cst_319 {dimension_numbers = #tpu.dot_dimension_numbers<[1], [0], [0], [1], [0, 0, 1, 1], [], []>} : vector<2x16xbf16>, vector<16x16xbf16>, vector<2x16xf32> -> vector<2x16xf32>
    %1066 = arith.addf %1054, %1065 : vector<2x16xf32>
    %cst_320 = arith.constant dense<0.000000e+00> : vector<2x16xf32>
    %1067 = tpu.matmul %1060, %623, %cst_320 {dimension_numbers = #tpu.dot_dimension_numbers<[1], [0], [0], [1], [0, 0, 1, 1], [], []>} : vector<2x16xbf16>, vector<16x16xbf16>, vector<2x16xf32> -> vector<2x16xf32>
    %1068 = arith.addf %1055, %1067 : vector<2x16xf32>
    %1069 = arith.negf %1062 : vector<2x16xf32>
    %1070 = math.exp %1069 : vector<2x16xf32>
    %cst_321 = arith.constant 1.000000e+00 : f32
    %1071 = vector.broadcast %cst_321 : f32 to vector<2x16xf32>
    %1072 = arith.addf %1071, %1070 : vector<2x16xf32>
    %1073 = arith.divf %1071, %1072 : vector<2x16xf32>
    %1074 = arith.negf %1064 : vector<2x16xf32>
    %1075 = math.exp %1074 : vector<2x16xf32>
    %cst_322 = arith.constant 1.000000e+00 : f32
    %1076 = vector.broadcast %cst_322 : f32 to vector<2x16xf32>
    %1077 = arith.addf %1076, %1075 : vector<2x16xf32>
    %1078 = arith.divf %1076, %1077 : vector<2x16xf32>
    %1079 = math.tanh %1066 : vector<2x16xf32>
    %1080 = arith.negf %1068 : vector<2x16xf32>
    %1081 = math.exp %1080 : vector<2x16xf32>
    %cst_323 = arith.constant 1.000000e+00 : f32
    %1082 = vector.broadcast %cst_323 : f32 to vector<2x16xf32>
    %1083 = arith.addf %1082, %1081 : vector<2x16xf32>
    %1084 = arith.divf %1082, %1083 : vector<2x16xf32>
    %1085 = arith.mulf %1078, %1017 : vector<2x16xf32>
    %1086 = arith.mulf %1073, %1079 : vector<2x16xf32>
    %1087 = arith.addf %1085, %1086 : vector<2x16xf32>
    %1088 = math.tanh %1087 : vector<2x16xf32>
    %1089 = arith.mulf %1084, %1088 : vector<2x16xf32>
    %1090 = arith.truncf %1049 : vector<2x16xf32> to vector<2x16xbf16>
    %cst_324 = arith.constant dense<0.000000e+00> : vector<2x16xf32>
    %1091 = tpu.matmul %1090, %624, %cst_324 {dimension_numbers = #tpu.dot_dimension_numbers<[1], [0], [0], [1], [0, 0, 1, 1], [], []>} : vector<2x16xbf16>, vector<16x16xbf16>, vector<2x16xf32> -> vector<2x16xf32>
    %1092 = arith.addf %1056, %1091 : vector<2x16xf32>
    %cst_325 = arith.constant dense<0.000000e+00> : vector<2x16xf32>
    %1093 = tpu.matmul %1090, %625, %cst_325 {dimension_numbers = #tpu.dot_dimension_numbers<[1], [0], [0], [1], [0, 0, 1, 1], [], []>} : vector<2x16xbf16>, vector<16x16xbf16>, vector<2x16xf32> -> vector<2x16xf32>
    %1094 = arith.addf %1057, %1093 : vector<2x16xf32>
    %cst_326 = arith.constant dense<0.000000e+00> : vector<2x16xf32>
    %1095 = tpu.matmul %1090, %626, %cst_326 {dimension_numbers = #tpu.dot_dimension_numbers<[1], [0], [0], [1], [0, 0, 1, 1], [], []>} : vector<2x16xbf16>, vector<16x16xbf16>, vector<2x16xf32> -> vector<2x16xf32>
    %1096 = arith.addf %1058, %1095 : vector<2x16xf32>
    %cst_327 = arith.constant dense<0.000000e+00> : vector<2x16xf32>
    %1097 = tpu.matmul %1090, %627, %cst_327 {dimension_numbers = #tpu.dot_dimension_numbers<[1], [0], [0], [1], [0, 0, 1, 1], [], []>} : vector<2x16xbf16>, vector<16x16xbf16>, vector<2x16xf32> -> vector<2x16xf32>
    %1098 = arith.addf %1059, %1097 : vector<2x16xf32>
    %1099 = arith.negf %1092 : vector<2x16xf32>
    %1100 = math.exp %1099 : vector<2x16xf32>
    %cst_328 = arith.constant 1.000000e+00 : f32
    %1101 = vector.broadcast %cst_328 : f32 to vector<2x16xf32>
    %1102 = arith.addf %1101, %1100 : vector<2x16xf32>
    %1103 = arith.divf %1101, %1102 : vector<2x16xf32>
    %1104 = arith.negf %1094 : vector<2x16xf32>
    %1105 = math.exp %1104 : vector<2x16xf32>
    %cst_329 = arith.constant 1.000000e+00 : f32
    %1106 = vector.broadcast %cst_329 : f32 to vector<2x16xf32>
    %1107 = arith.addf %1106, %1105 : vector<2x16xf32>
    %1108 = arith.divf %1106, %1107 : vector<2x16xf32>
    %1109 = math.tanh %1096 : vector<2x16xf32>
    %1110 = arith.negf %1098 : vector<2x16xf32>
    %1111 = math.exp %1110 : vector<2x16xf32>
    %cst_330 = arith.constant 1.000000e+00 : f32
    %1112 = vector.broadcast %cst_330 : f32 to vector<2x16xf32>
    %1113 = arith.addf %1112, %1111 : vector<2x16xf32>
    %1114 = arith.divf %1112, %1113 : vector<2x16xf32>
    %1115 = arith.mulf %1108, %1047 : vector<2x16xf32>
    %1116 = arith.mulf %1103, %1109 : vector<2x16xf32>
    %1117 = arith.addf %1115, %1116 : vector<2x16xf32>
    %1118 = math.tanh %1117 : vector<2x16xf32>
    %1119 = arith.mulf %1114, %1118 : vector<2x16xf32>
    %c12_331 = arith.constant 12 : index
    %c0_332 = arith.constant 0 : index
    %1120 = vector.load %arg33[%c12_331, %c0_332] : memref<16x16xf32, #tpu.memory_space<vmem>>, vector<2x16xf32>
    tpu.vector_store %arg33[%c12_331, %c0_332], %1089 {strides = array<i32>} : memref<16x16xf32, #tpu.memory_space<vmem>>, vector<2x16xf32>,
    %c2_333 = arith.constant 2 : index
    %c0_334 = arith.constant 0 : index
    %1121 = vector.load %arg34[%c2_333, %c0_334] : memref<16x16xf32, #tpu.memory_space<vmem>>, vector<2x16xf32>
    tpu.vector_store %arg34[%c2_333, %c0_334], %1119 {strides = array<i32>} : memref<16x16xf32, #tpu.memory_space<vmem>>, vector<2x16xf32>,
    %1122 = vector.extract_strided_slice %604 {offsets = [14, 0], sizes = [2, 16], strides = [1, 1]} : vector<16x16xf32> to vector<2x16xf32>
    %1123 = vector.extract_strided_slice %605 {offsets = [14, 0], sizes = [2, 16], strides = [1, 1]} : vector<16x16xf32> to vector<2x16xf32>
    %1124 = vector.extract_strided_slice %606 {offsets = [14, 0], sizes = [2, 16], strides = [1, 1]} : vector<16x16xf32> to vector<2x16xf32>
    %1125 = vector.extract_strided_slice %607 {offsets = [14, 0], sizes = [2, 16], strides = [1, 1]} : vector<16x16xf32> to vector<2x16xf32>
    %1126 = vector.extract_strided_slice %616 {offsets = [0, 0], sizes = [2, 16], strides = [1, 1]} : vector<16x16xf32> to vector<2x16xf32>
    %1127 = vector.extract_strided_slice %617 {offsets = [0, 0], sizes = [2, 16], strides = [1, 1]} : vector<16x16xf32> to vector<2x16xf32>
    %1128 = vector.extract_strided_slice %618 {offsets = [0, 0], sizes = [2, 16], strides = [1, 1]} : vector<16x16xf32> to vector<2x16xf32>
    %1129 = vector.extract_strided_slice %619 {offsets = [0, 0], sizes = [2, 16], strides = [1, 1]} : vector<16x16xf32> to vector<2x16xf32>
    %1130 = arith.truncf %1089 : vector<2x16xf32> to vector<2x16xbf16>
    %cst_335 = arith.constant dense<0.000000e+00> : vector<2x16xf32>
    %1131 = tpu.matmul %1130, %620, %cst_335 {dimension_numbers = #tpu.dot_dimension_numbers<[1], [0], [0], [1], [0, 0, 1, 1], [], []>} : vector<2x16xbf16>, vector<16x16xbf16>, vector<2x16xf32> -> vector<2x16xf32>
    %1132 = arith.addf %1122, %1131 : vector<2x16xf32>
    %cst_336 = arith.constant dense<0.000000e+00> : vector<2x16xf32>
    %1133 = tpu.matmul %1130, %621, %cst_336 {dimension_numbers = #tpu.dot_dimension_numbers<[1], [0], [0], [1], [0, 0, 1, 1], [], []>} : vector<2x16xbf16>, vector<16x16xbf16>, vector<2x16xf32> -> vector<2x16xf32>
    %1134 = arith.addf %1123, %1133 : vector<2x16xf32>
    %cst_337 = arith.constant dense<0.000000e+00> : vector<2x16xf32>
    %1135 = tpu.matmul %1130, %622, %cst_337 {dimension_numbers = #tpu.dot_dimension_numbers<[1], [0], [0], [1], [0, 0, 1, 1], [], []>} : vector<2x16xbf16>, vector<16x16xbf16>, vector<2x16xf32> -> vector<2x16xf32>
    %1136 = arith.addf %1124, %1135 : vector<2x16xf32>
    %cst_338 = arith.constant dense<0.000000e+00> : vector<2x16xf32>
    %1137 = tpu.matmul %1130, %623, %cst_338 {dimension_numbers = #tpu.dot_dimension_numbers<[1], [0], [0], [1], [0, 0, 1, 1], [], []>} : vector<2x16xbf16>, vector<16x16xbf16>, vector<2x16xf32> -> vector<2x16xf32>
    %1138 = arith.addf %1125, %1137 : vector<2x16xf32>
    %1139 = arith.negf %1132 : vector<2x16xf32>
    %1140 = math.exp %1139 : vector<2x16xf32>
    %cst_339 = arith.constant 1.000000e+00 : f32
    %1141 = vector.broadcast %cst_339 : f32 to vector<2x16xf32>
    %1142 = arith.addf %1141, %1140 : vector<2x16xf32>
    %1143 = arith.divf %1141, %1142 : vector<2x16xf32>
    %1144 = arith.negf %1134 : vector<2x16xf32>
    %1145 = math.exp %1144 : vector<2x16xf32>
    %cst_340 = arith.constant 1.000000e+00 : f32
    %1146 = vector.broadcast %cst_340 : f32 to vector<2x16xf32>
    %1147 = arith.addf %1146, %1145 : vector<2x16xf32>
    %1148 = arith.divf %1146, %1147 : vector<2x16xf32>
    %1149 = math.tanh %1136 : vector<2x16xf32>
    %1150 = arith.negf %1138 : vector<2x16xf32>
    %1151 = math.exp %1150 : vector<2x16xf32>
    %cst_341 = arith.constant 1.000000e+00 : f32
    %1152 = vector.broadcast %cst_341 : f32 to vector<2x16xf32>
    %1153 = arith.addf %1152, %1151 : vector<2x16xf32>
    %1154 = arith.divf %1152, %1153 : vector<2x16xf32>
    %1155 = arith.mulf %1148, %1087 : vector<2x16xf32>
    %1156 = arith.mulf %1143, %1149 : vector<2x16xf32>
    %1157 = arith.addf %1155, %1156 : vector<2x16xf32>
    %1158 = math.tanh %1157 : vector<2x16xf32>
    %1159 = arith.mulf %1154, %1158 : vector<2x16xf32>
    %1160 = arith.truncf %1119 : vector<2x16xf32> to vector<2x16xbf16>
    %cst_342 = arith.constant dense<0.000000e+00> : vector<2x16xf32>
    %1161 = tpu.matmul %1160, %624, %cst_342 {dimension_numbers = #tpu.dot_dimension_numbers<[1], [0], [0], [1], [0, 0, 1, 1], [], []>} : vector<2x16xbf16>, vector<16x16xbf16>, vector<2x16xf32> -> vector<2x16xf32>
    %1162 = arith.addf %1126, %1161 : vector<2x16xf32>
    %cst_343 = arith.constant dense<0.000000e+00> : vector<2x16xf32>
    %1163 = tpu.matmul %1160, %625, %cst_343 {dimension_numbers = #tpu.dot_dimension_numbers<[1], [0], [0], [1], [0, 0, 1, 1], [], []>} : vector<2x16xbf16>, vector<16x16xbf16>, vector<2x16xf32> -> vector<2x16xf32>
    %1164 = arith.addf %1127, %1163 : vector<2x16xf32>
    %cst_344 = arith.constant dense<0.000000e+00> : vector<2x16xf32>
    %1165 = tpu.matmul %1160, %626, %cst_344 {dimension_numbers = #tpu.dot_dimension_numbers<[1], [0], [0], [1], [0, 0, 1, 1], [], []>} : vector<2x16xbf16>, vector<16x16xbf16>, vector<2x16xf32> -> vector<2x16xf32>
    %1166 = arith.addf %1128, %1165 : vector<2x16xf32>
    %cst_345 = arith.constant dense<0.000000e+00> : vector<2x16xf32>
    %1167 = tpu.matmul %1160, %627, %cst_345 {dimension_numbers = #tpu.dot_dimension_numbers<[1], [0], [0], [1], [0, 0, 1, 1], [], []>} : vector<2x16xbf16>, vector<16x16xbf16>, vector<2x16xf32> -> vector<2x16xf32>
    %1168 = arith.addf %1129, %1167 : vector<2x16xf32>
    %1169 = arith.negf %1162 : vector<2x16xf32>
    %1170 = math.exp %1169 : vector<2x16xf32>
    %cst_346 = arith.constant 1.000000e+00 : f32
    %1171 = vector.broadcast %cst_346 : f32 to vector<2x16xf32>
    %1172 = arith.addf %1171, %1170 : vector<2x16xf32>
    %1173 = arith.divf %1171, %1172 : vector<2x16xf32>
    %1174 = arith.negf %1164 : vector<2x16xf32>
    %1175 = math.exp %1174 : vector<2x16xf32>
    %cst_347 = arith.constant 1.000000e+00 : f32
    %1176 = vector.broadcast %cst_347 : f32 to vector<2x16xf32>
    %1177 = arith.addf %1176, %1175 : vector<2x16xf32>
    %1178 = arith.divf %1176, %1177 : vector<2x16xf32>
    %1179 = math.tanh %1166 : vector<2x16xf32>
    %1180 = arith.negf %1168 : vector<2x16xf32>
    %1181 = math.exp %1180 : vector<2x16xf32>
    %cst_348 = arith.constant 1.000000e+00 : f32
    %1182 = vector.broadcast %cst_348 : f32 to vector<2x16xf32>
    %1183 = arith.addf %1182, %1181 : vector<2x16xf32>
    %1184 = arith.divf %1182, %1183 : vector<2x16xf32>
    %1185 = arith.mulf %1178, %1117 : vector<2x16xf32>
    %1186 = arith.mulf %1173, %1179 : vector<2x16xf32>
    %1187 = arith.addf %1185, %1186 : vector<2x16xf32>
    %1188 = math.tanh %1187 : vector<2x16xf32>
    %1189 = arith.mulf %1184, %1188 : vector<2x16xf32>
    %c14_349 = arith.constant 14 : index
    %c0_350 = arith.constant 0 : index
    %1190 = vector.load %arg33[%c14_349, %c0_350] : memref<16x16xf32, #tpu.memory_space<vmem>>, vector<2x16xf32>
    tpu.vector_store %arg33[%c14_349, %c0_350], %1159 {strides = array<i32>} : memref<16x16xf32, #tpu.memory_space<vmem>>, vector<2x16xf32>,
    %c0_351 = arith.constant 0 : index
    %c0_352 = arith.constant 0 : index
    %1191 = vector.load %arg34[%c0_351, %c0_352] : memref<16x16xf32, #tpu.memory_space<vmem>>, vector<2x16xf32>
    tpu.vector_store %arg34[%c0_351, %c0_352], %1189 {strides = array<i32>} : memref<16x16xf32, #tpu.memory_space<vmem>>, vector<2x16xf32>,
    %c0_353 = arith.constant 0 : index
    %c0_354 = arith.constant 0 : index
    %1192 = vector.load %arg33[%c0_353, %c0_354] : memref<16x16xf32, #tpu.memory_space<vmem>>, vector<16x16xf32>
    %1193 = arith.truncf %1192 : vector<16x16xf32> to vector<16x16xbf16>
    %c0_355 = arith.constant 0 : index
    %c0_356 = arith.constant 0 : index
    %1194 = vector.load %arg34[%c0_355, %c0_356] : memref<16x16xf32, #tpu.memory_space<vmem>>, vector<16x16xf32>
    %1195 = arith.truncf %1194 : vector<16x16xf32> to vector<16x16xbf16>
    %c0_357 = arith.constant 0 : index
    %c0_358 = arith.constant 0 : index
    %1196 = vector.load %arg27[%c0_357, %c0_358] : memref<16x8xbf16, #tpu.memory_space<vmem>>, vector<16x8xbf16>
    %cst_359 = arith.constant dense<0.000000e+00> : vector<16x8xf32>
    %1197 = tpu.matmul %1193, %1196, %cst_359 {dimension_numbers = #tpu.dot_dimension_numbers<[1], [0], [0], [1], [0, 0, 1, 1], [], []>} : vector<16x16xbf16>, vector<16x8xbf16>, vector<16x8xf32> -> vector<16x8xf32>
    %c0_360 = arith.constant 0 : index
    %c0_361 = arith.constant 0 : index
    %1198 = vector.load %arg28[%c0_360, %c0_361] : memref<16x8xbf16, #tpu.memory_space<vmem>>, vector<16x8xbf16>
    %cst_362 = arith.constant dense<0.000000e+00> : vector<16x8xf32>
    %1199 = tpu.matmul %1195, %1198, %cst_362 {dimension_numbers = #tpu.dot_dimension_numbers<[1], [0], [0], [1], [0, 0, 1, 1], [], []>} : vector<16x16xbf16>, vector<16x8xbf16>, vector<16x8xf32> -> vector<16x8xf32>
    %1200 = arith.addf %1197, %1199 : vector<16x8xf32>
    %c0_363 = arith.constant 0 : index
    %c0_364 = arith.constant 0 : index
    %1201 = vector.load %arg29[%c0_363, %c0_364] : memref<1x8xf32, #tpu.memory_space<vmem>>, vector<1x8xf32>
    %1202 = vector.broadcast %1201 : vector<1x8xf32> to vector<16x8xf32>
    %1203 = arith.addf %1200, %1202 : vector<16x8xf32>
    %c0_365 = arith.constant 0 : index
    %c0_366 = arith.constant 0 : index
    %1204 = vector.load %arg30[%c0_365, %c0_366] : memref<16x8xf32, #tpu.memory_space<vmem>>, vector<16x8xf32>
    tpu.vector_store %arg30[%c0_365, %c0_366], %1203 {strides = array<i32>} : memref<16x8xf32, #tpu.memory_space<vmem>>, vector<16x8xf32>,
    return
  }
}

</mosaic_0001>

<bundles_post_ra>
// kernel: ses_forward.1
= control target key start
LH: loop header
LB: loop body
LE: loop exit
PB: predicated region body
PF: predicated region fallthrough
CT: control target
= control target key end

     0   :  { %s6776_s3 = smov 1   ;;  %s6777_s7 = smov 3   ;;  %v6781_v4 = vmov 0   ;;  %vm186_vm0 = vcmask 785408   ;;  %s8024_s0 = inlined_call_operand.smem [shape: u32[31], index: -1, kind: input, shape index: {}] }
   0x1   :  { %s6819_s6 = sld [smem:[%s8024_s0 + %s6776_s3]]   ;;  %s6778_s11 = smov 5  }
   0x2   :  { %s6824_s10 = sld [smem:[%s8024_s0 + %s6777_s7]]   ;;  %s6779_s15 = smov 7  }
   0x3   :  { %s6829_s14 = sld [smem:[%s8024_s0 + %s6778_s11]]   ;;  %s6780_s19 = smov 4  }
   0x4   :  { %s6835_s18 = sld [smem:[%s8024_s0 + %s6779_s15]]   ;;  %s6782_s23 = smov 11  }
   0x5   :  { %s6843_s22 = sld [smem:[%s8024_s0 + %s6780_s19]]   ;;  %s6783_s30 = smov 2  }
   0x6   :  { %s6861_s26 = sld [smem:[%s8024_s0 + %s6782_s23]]   ;;  %s6784_s4 = smov 6  }
   0x7   :  { %v6161_v0 = vld [vmem:[%s6819_s6 + $0x28] sm:$0xff]  ;;  %v6160_v3 = vld [vmem:[%s6819_s6 + $0x20] sm:$0xff]  ;;  %v6159_v5 = vld [vmem:[%s6819_s6 + $0x18] sm:$0xff]  ;;  %s1_s29 = sld [smem:[%s8024_s0]]   ;;  %s6785_s8 = smov 10  }
   0x8   :  { %v6838_v1 = vld [vmem:[%s6824_s10] sm:$0xff]  ;;  %192 = vmatpush.bf16.msra.mxu0 %v6161_v0  ;;  %v6158_v8 = vld [vmem:[%s6819_s6 + $0x10] sm:$0xff]  ;;  %v6157_v10 = vld [vmem:[%s6819_s6 + $0x8] sm:$0xff]  ;;  %s6874_s3 = sld [smem:[%s8024_s0 + %s6783_s30]]   ;;  %s6786_s13 = smov 9  }
   0x9   :  { %v6846_v2 = vld [vmem:[%s6829_s14] sm:$0xff]  ;;  %303 = vmatpush.bf16.msra.mxu2 %v6838_v1  ;;  %s6890_s7 = sld [smem:[%s8024_s0 + %s6784_s4]]   ;;  %s6788_s23 = smov 32  }
   0xa   :  { %v6167_v6 = vld [vmem:[%s6835_s18 + $0x28] sm:$0xff]  ;;  %v6166_v9 = vld [vmem:[%s6835_s18 + $0x20] sm:$0xff]  ;;  %v6165_v11 = vld [vmem:[%s6835_s18 + $0x18] sm:$0xff]  ;;  %s6903_s12 = sld [smem:[%s8024_s0 + %s6785_s8]]   ;;  %s6789_s24 = smov 12  }
   0xb   :  { %v6855_v7 = vld [vmem:[%s6843_s22] sm:$0xff]  ;;  %258 = vmatpush.bf16.msra.mxu1 %v6167_v6  ;;  %v6164_v15 = vld [vmem:[%s6835_s18 + $0x10] sm:$0xff]  ;;  %v6163_v16 = vld [vmem:[%s6835_s18 + $0x8] sm:$0xff]  ;;  %s6911_s17 = sld [smem:[%s8024_s0 + %s6786_s13]]   ;;  %s6791_s30 = smov 16  }
   0xc   :  { %304 = vmatmul.bf16.vlgmr.msra.gmra.mxu2 %v6781_v4  ;;  %193 = vmatpush.bf16.msra.mxu0 %v6160_v3  ;;  %v6156_v12 = vld [vmem:[%s6819_s6] sm:$0xff]  ;;  %s6934_s28 = sld [smem:[%s8024_s0 + %s6789_s24]]   ;;  %s6792_s1 = smov 48  }
   0xd   :  { %347 = vmatpush.bf16.msrb.mxu2 %v6846_v2  ;;  %323 = vmatpush.bf16.msra.mxu3 %v6855_v7  ;;  %v6878_v13 = vld [vmem:[%s6861_s26] sm:$0xff]  ;;  %s6793_s2 = smov 80   ;;  %s7433_s15 = sld [smem:[%s8024_s0 + %s6791_s30]]  }
   0xe   :  { %v6155_v14 = vld [vmem:[%s1_s29] sm:$0xff]  ;;  %s6790_s29 = smov 96   ;;  %s6797_s16 = smov 13  }
   0xf   :  { %259 = vmatpush.bf16.msra.mxu1 %v6166_v9  ;;  %v6162_v17 = vld [vmem:[%s6835_s18] sm:$0xff]  ;;  %s6787_s18 = smov 8   ;;  %s5781_s19 = sld [smem:[%s8024_s0 + %s6797_s16]]  }
  0x10   :  { %194 = vmatpush.bf16.msra.mxu0 %v6159_v5  ;;  %324 = vmatmul.bf16.vlgmr.msra.gmra.mxu3 %v6781_v4  ;;  %v6895_v18 = vld [vmem:[%s6890_s7] sm:$0xff]  ;;  %s5776_s21 = sld [smem:[%s8024_s0 + %s6787_s18]]   ;;  %s6798_s20 = smov 20  }
  0x11   :  { %371 = vmatpush.bf16.msrb.mxu3 %v6895_v18  ;;  %v6906_v19 = vld [vmem:[%s6903_s12] sm:$0xff]  ;;  %s5788_s25 = sld [smem:[%s8024_s0 + %s6798_s20]]   ;;  %s6799_s27 = smov 25  }
  0x12   :  { %v6918_v21 = vld [vmem:[%s6911_s17] sm:$0xff]  ;;  %s6801_s5 = smov 17   ;;  %s6802_s9 = smov 22  }
  0x13   :  { %260 = vmatpush.bf16.msra.mxu1 %v6165_v11  ;;  %470 = vmatpush.bf16.msra.mxu2 %v6918_v21  ;;  %v6937_v32 = vld [vmem:[%s6934_s28] sm:$0xff]  ;;  %s7459_s8 = sld [smem:[%s8024_s0 + %s6801_s5]]   ;;  %s6810_s13 = smov 30  }
  0x14   :  { %195 = vmatpush.bf16.msra.mxu0 %v6158_v8  ;;  %v6225_v38 = vld [vmem:[%s6874_s3] ss:$0 sm:$0xff]  ;;  %s7485_s16 = sld [smem:[%s8024_s0 + %s6802_s9]]  }
  0x15   :  { %493 = vmatpush.bf16.msra.mxu3 %v6906_v19  ;;  %s5798_s18 = sld [smem:[%s8024_s0 + %s6810_s13]]  }
  0x16   :  { %v6226_v33 = vld [vmem:[%s5776_s21] ss:$0 sm:$0xff]  ;;  %s6804_s21 = smov 24  }
  0x17   :  { %261 = vmatpush.bf16.msra.mxu1 %v6164_v15 }
  0x18   :  { %196 = vmatpush.bf16.msra.mxu0 %v6157_v10 }
  0x1b   :  { %262 = vmatpush.bf16.msra.mxu1 %v6163_v16 }
  0x1c   :  { %348 = vmatmul.bf16.vlgmr.msrb.gmra.mxu2 %v6781_v4  ;;  %197 = vmatpush.bf16.msra.mxu0 %v6156_v12 }
  0x1d   :  { %656 = vmatpush.bf16.msrb.mxu2 %v6838_v1 }
  0x1f   :  { %5827 = vmatmul.msk.bf16.vlgmr.msra.gmra.mxu0 %vm186_vm0, %v6155_v14  ;;  %263 = vmatpush.bf16.msra.mxu1 %v6162_v17 }
  0x20   :  { %518 = vmatpush.bf16.msrb.mxu0 %v6878_v13  ;;  %372 = vmatmul.bf16.vlgmr.msrb.gmra.mxu3 %v6781_v4 }
  0x21   :  { %673 = vmatpush.bf16.msrb.mxu3 %v6855_v7 }
  0x22   :  { %5852 = vmatmul.msk.bf16.vlgmr.msra.gmra.mxu1 %vm186_vm0, %v6155_v14 }
  0x23   :  { %543 = vmatpush.bf16.msrb.mxu1 %v6937_v32 }
  0x24   :  { %692 = vmatpush.bf16.msra.mxu0 %v6846_v2 }
  0x27   :  { %711 = vmatpush.bf16.msra.mxu1 %v6895_v18 }
  0x2c   :  { %471 = vmatmul.bf16.vlgmr.msra.gmra.mxu2 %v6781_v4 }
  0x2d   :  { %816 = vmatpush.bf16.msra.mxu2 %v6918_v21 }
  0x2f   :  { %519 = vmatmul.bf16.vlgmr.msrb.gmra.mxu0 %v6781_v4 }
  0x30   :  { %852 = vmatpush.bf16.msrb.mxu0 %v6878_v13  ;;  %494 = vmatmul.bf16.vlgmr.msra.gmra.mxu3 %v6781_v4 }
  0x31   :  { %833 = vmatpush.bf16.msra.mxu3 %v6906_v19 }
  0x32   :  { %544 = vmatmul.bf16.vlgmr.msrb.gmra.mxu1 %v6781_v4 }
  0x33   :  { %871 = vmatpush.bf16.msrb.mxu1 %v6937_v32 }
  0x8f   :  { %v305_v20 = vpop.f32.mrf.mxu2 }
  0x93   :  { %v325_v23 = vpop.f32.mrf.mxu3 }
  0x97   :  { %v307_v22 = vpop.f32.mrf.mxu2 }
  0x9b   :  { %v327_v26 = vpop.f32.mrf.mxu3 }
  0x9c   :  { %v199_v24 = vpop.f32.mrf.mxu0 }
  0x9d   :  { %v6946_v40 = vadd.f32 %v6225_v38, %v199_v24 }
  0x9f   :  { %v349_v25 = vpop.f32.mrf.mxu2  ;;  %v265_v34 = vpop.f32.mrf.mxu1  ;;  %v309_v56 = vadd.f32 %v305_v20, %v6946_v40 }
  0xa0   :  { %354 = vrot.lane.b32.xlu0 %v349_v25, %s6788_s23  ;;  %v6941_v35 = vadd.f32 %v6226_v33, %v265_v34 }
  0xa1   :  { %v5869_v57 = vmul.f32 -1.442695, %v309_v56 }
  0xa3   :  { %v373_v36 = vpop.f32.mrf.mxu3 }
  0xa4   :  { %v6928_v27 = vpop.f32.mrf.mxu0 }
  0xa7   :  { %v351_v28 = vpop.f32.mrf.mxu2  ;;  %v267_v46 = vpop.f32.mrf.mxu1 }
  0xa8   :  { %v6950_v47 = vadd.f32 %v6226_v33, %v267_v46 }
  0xab   :  { %v375_v37 = vpop.f32.mrf.mxu3 }
  0xac   :  { %v520_v29 = vpop.f32.mrf.mxu0 }
  0xad   :  { %v525_v30 = vrot.slane %v520_v29, 2 }
  0xaf   :  { %526 = vrot.lane.b32.xlu0 %v525_v30, %s6788_s23  ;;  %v472_v43 = vpop.f32.mrf.mxu2  ;;  %v545_v3 = vpop.f32.mrf.mxu1 }
  0xb0   :  { %v477_v53 = vrot.slane %v472_v43, 2  ;;  %v550_v34 = vrot.slane %v545_v3, 2 }
  0xb2   :  { %v479_v54 = vadd.f32 %v477_v53, %v6950_v47 }
  0xb3   :  { %v495_v39 = vpop.f32.mrf.mxu3 }
  0xb4   :  { %v522_v31 = vpop.f32.mrf.mxu0  ;;  %v500_v52 = vrot.slane %v495_v39, 2  ;;  %v5888_v55 = vmul.f32 -1.442695, %v479_v54 }
  0xb7   :  { %v474_v48 = vpop.f32.mrf.mxu2  ;;  %v547_v12 = vpop.f32.mrf.mxu1 }
  0xbb   :  { %v497_v44 = vpop.f32.mrf.mxu3 }
 0x112   :  { %v355_v41 = vpop.permute.xlu0 %354 }
 0x113   :  { %v357_v42 = vadd.f32 %v355_v41, %v6946_v40 }
 0x115   :  { %6230 = vtanh.f32 %v357_v42 }
 0x11b   :  { %v6231_v45 = vpop.eup %6230 }
 0x11c   :  { %442 = vrot.lane.b32.xlu1 %v6231_v45, %s6790_s29 }
 0x121   :  { %v527_v49 = vpop.permute.xlu0 %526 }
 0x122   :  { %v529_v50 = vadd.f32 %v527_v49, %v6950_v47 }
 0x124   :  { %6232 = vtanh.f32 %v529_v50  ;;  %330 = vrot.lane.b32.xlu1 %v325_v23, %s6791_s30 }
 0x125   :  { %6234 = vpow2.f32 %v5888_v55 }
 0x126   :  { %6236 = vpow2.f32 %v5869_v57 }
 0x12a   :  { %v6233_v51 = vpop.eup %6232 }
 0x12b   :  { %615 = vrot.lane.b32.xlu2 %v6233_v51, %s6790_s29  ;;  %v6235_v58 = vpop.eup %6234 }
 0x12c   :  { %378 = vrot.lane.b32.xlu1 %v373_v36, %s6792_s1  ;;  %v558_v59 = vadd.f32 1.0, %v6235_v58  ;;  %v6237_v60 = vpop.eup %6236 }
 0x12d   :  { %v385_v61 = vadd.f32 1.0, %v6237_v60 }
 0x12e   :  { %6238 = vrcp.f32 %v558_v59  ;;  %vm564_vm1 = vweird.f32 %v558_v59  ;;  %v570_v9 = vand.u32 2147483648, %v558_v59  ;;  %v568_v11 = vand.u32 2147483647, %v558_v59 }
 0x12f   :  { %6240 = vrcp.f32 %v385_v61  ;;  %v397_v25 = vand.u32 2147483648, %v385_v61  ;;  %vm391_vm6 = vweird.f32 %v385_v61  ;;  %v395_v26 = vand.u32 2147483647, %v385_v61 }
 0x130   :  { %v571_v15 = vor.u32 1.1754944e-38, %v570_v9  ;;  %vm569_vm4 = vcmp.eq.f32.partialorder %v568_v11, 8.507059e+37 }
 0x131   :  { %v398_v29 = vor.u32 1.1754944e-38, %v397_v25  ;;  %vm396_vm8 = vcmp.eq.f32.partialorder %v395_v26, 8.507059e+37 }
 0x133   :  { %501 = vrot.lane.b32.xlu2 %v500_v52, %s6791_s30 }
 0x134   :  { %v6239_v62 = vpop.eup %6238 }
 0x135   :  { %v560_v63 = vmul.f32 %v6239_v62, %v558_v59  ;;  %v6241_v5 = vpop.eup %6240  ;;  %vm565_vm2 = vweird.f32 %v6239_v62 }
 0x136   :  { %v387_v8 = vmul.f32 %v6241_v5, %v385_v61  ;;  %vm566_vm3 = vmor %vm564_vm1, %vm565_vm2  ;;  %vm392_vm5 = vweird.f32 %v6241_v5 }
 0x137   :  { %v561_v0 = vsub.f32 1.0, %v560_v63  ;;  %vm393_vm7 = vmor %vm391_vm6, %vm392_vm5 }
 0x138   :  { %v388_v14 = vsub.f32 1.0, %v387_v8 }
 0x139   :  { %v562_v6 = vmul.f32 %v6239_v62, %v561_v0 }
 0x13a   :  { %v389_v17 = vmul.f32 %v6241_v5, %v388_v14 }
 0x13b   :  { %v563_v10 = vadd.f32 %v6239_v62, %v562_v6 }
 0x13c   :  { %v390_v24 = vadd.f32 %v6241_v5, %v389_v17 }
 0x13d   :  { %v567_v16 = vsel %vm566_vm3, %v6239_v62, %v563_v10 }
 0x13e   :  { %v572_v20 = vsel %vm569_vm4, %v571_v15, %v567_v16  ;;  %v394_v28 = vsel %vm393_vm7, %v6241_v5, %v390_v24 }
 0x13f   :  { %v399_v31 = vsel %vm396_vm8, %v398_v29, %v394_v28 }
 0x185   :  { %v616_v22 = vpop.permute.xlu2 %615 }
 0x186   :  { %v618_v23 = vmul.f32 %v616_v22, %v572_v20 }
 0x188   :  { %620 = vrot.lane.b32.xlu2 %v618_v23, %s6791_s30 }
 0x18d   :  { %v502_v36 = vpop.permute.xlu2 %501 }
 0x18e   :  { %v443_v30 = vpop.permute.xlu1 %442  ;;  %v504_v37 = vadd.f32 %v502_v36, %v6950_v47 }
 0x18f   :  { %v445_v33 = vmul.f32 %v443_v30, %v399_v31 }
 0x190   :  { %v5889_v38 = vmul.f32 -1.442695, %v504_v37 }
 0x191   :  { %447 = vrot.lane.b32.xlu0 %v445_v33, %s6791_s30 }
 0x192   :  { %6242 = vpow2.f32 %v5889_v38 }
 0x196   :  { %v331_v43 = vpop.permute.xlu1 %330 }
 0x197   :  { %v333_v45 = vadd.f32 %v331_v43, %v6946_v40 }
 0x198   :  { %v6243_v39 = vpop.eup %6242 }
 0x199   :  { %551 = vrot.lane.b32.xlu0 %v550_v34, %s6792_s1  ;;  %v577_v41 = vadd.f32 1.0, %v6243_v39  ;;  %v5870_v48 = vmul.f32 -1.442695, %v333_v45 }
 0x19b   :  { %6244 = vrcp.f32 %v577_v41  ;;  %v589_v51 = vand.u32 2147483648, %v577_v41  ;;  %vm583_vm10 = vweird.f32 %v577_v41  ;;  %v587_v52 = vand.u32 2147483647, %v577_v41 }
 0x19c   :  { %6246 = vpow2.f32 %v5870_v48 }
 0x19d   :  { %v590_v55 = vor.u32 1.1754944e-38, %v589_v51  ;;  %vm588_vm12 = vcmp.eq.f32.partialorder %v587_v52, 8.507059e+37 }
 0x1a1   :  { %v6245_v42 = vpop.eup %6244 }
 0x1a2   :  { %v579_v44 = vmul.f32 %v6245_v42, %v577_v41  ;;  %vm584_vm9 = vweird.f32 %v6245_v42  ;;  %v6247_v54 = vpop.eup %6246 }
 0x1a3   :  { %vm585_vm11 = vmor %vm583_vm10, %vm584_vm9  ;;  %v404_v57 = vadd.f32 1.0, %v6247_v54  ;;  %vm292_vm9 = vcmask 130048  }
 0x1a4   :  { %v580_v46 = vsub.f32 1.0, %v579_v44 }
 0x1a5   :  { %6248 = vrcp.f32 %v404_v57  ;;  %v416_v6 = vand.u32 2147483648, %v404_v57  ;;  %vm410_vm14 = vweird.f32 %v404_v57  ;;  %v414_v8 = vand.u32 2147483647, %v404_v57 }
 0x1a6   :  { %v581_v49 = vmul.f32 %v6245_v42, %v580_v46 }
 0x1a7   :  { %v417_v10 = vor.u32 1.1754944e-38, %v416_v6  ;;  %vm415_vm0 = vcmp.eq.f32.partialorder %v414_v8, 8.507059e+37 }
 0x1a8   :  { %v582_v50 = vadd.f32 %v6245_v42, %v581_v49 }
 0x1aa   :  { %v586_v53 = vsel %vm585_vm11, %v6245_v42, %v582_v50  ;;  %v379_v42 = vpop.permute.xlu1 %378 }
 0x1ab   :  { %v591_v56 = vsel %vm588_vm12, %v590_v55, %v586_v53  ;;  %v6249_v61 = vpop.eup %6248  ;;  %v381_v44 = vadd.f32 %v379_v42, %v6946_v40 }
 0x1ac   :  { %v613_v58 = vmul.f32 0.0, %v591_v56  ;;  %v406_v63 = vmul.f32 %v6249_v61, %v404_v57  ;;  %vm411_vm13 = vweird.f32 %v6249_v61 }
 0x1ad   :  { %vm412_vm15 = vmor %vm410_vm14, %vm411_vm13  ;;  %v5871_v45 = vmul.f32 -1.442695, %v381_v44 }
 0x1ae   :  { %v407_v0 = vsub.f32 1.0, %v406_v63 }
 0x1b0   :  { %v408_v3 = vmul.f32 %v6249_v61, %v407_v0 }
 0x1b2   :  { %v409_v5 = vadd.f32 %v6249_v61, %v408_v3 }
 0x1b4   :  { %v413_v9 = vsel %vm412_vm15, %v6249_v61, %v409_v5 }
 0x1b5   :  { %v418_v11 = vsel %vm415_vm0, %v417_v10, %v413_v9 }
 0x1b6   :  { %v440_v12 = vmul.f32 0.0, %v418_v11 }
 0x1e2   :  { %v621_v59 = vpop.permute.xlu2 %620 }
 0x1e3   :  { %v6964_v60 = vadd.f32 %v621_v59, %v613_v58 }
 0x1e5   :  { %6250 = vtanh.f32 %v6964_v60 }
 0x1eb   :  { %v6251_v62 = vpop.eup %6250 }
 0x1ec   :  { %626 = vrot.lane.b32.xlu2 %v6251_v62, %s6788_s23 }
 0x203   :  { %v448_v14 = vpop.permute.xlu0 %447 }
 0x204   :  { %v6968_v15 = vadd.f32 %v448_v14, %v440_v12 }
 0x206   :  { %6252 = vtanh.f32 %v6968_v15 }
 0x20b   :  { %v552_v17 = vpop.permute.xlu0 %551 }
 0x20c   :  { %v6253_v16 = vpop.eup %6252  ;;  %v554_v20 = vadd.f32 %v552_v17, %v6950_v47 }
 0x20d   :  { %453 = vrot.lane.b32.xlu1 %v6253_v16, %s6788_s23 }
 0x20e   :  { %v5890_v22 = vmul.f32 -1.442695, %v554_v20 }
 0x210   :  { %6254 = vpow2.f32 %v5890_v22 }
 0x216   :  { %v6255_v23 = vpop.eup %6254 }
 0x217   :  { %v597_v24 = vadd.f32 1.0, %v6255_v23 }
 0x219   :  { %6256 = vrcp.f32 %v597_v24  ;;  %v609_v31 = vand.u32 2147483648, %v597_v24  ;;  %vm603_vm2 = vweird.f32 %v597_v24  ;;  %v607_v33 = vand.u32 2147483647, %v597_v24 }
 0x21a   :  { %6258 = vpow2.f32 %v5871_v45 }
 0x21b   :  { %v610_v36 = vor.u32 1.1754944e-38, %v609_v31  ;;  %vm608_vm4 = vcmp.eq.f32.partialorder %v607_v33, 8.507059e+37 }
 0x21f   :  { %v6257_v25 = vpop.eup %6256 }
 0x220   :  { %v599_v26 = vmul.f32 %v6257_v25, %v597_v24  ;;  %vm604_vm1 = vweird.f32 %v6257_v25  ;;  %v6259_v46 = vpop.eup %6258 }
 0x221   :  { %vm605_vm3 = vmor %vm603_vm2, %vm604_vm1  ;;  %v424_v48 = vadd.f32 1.0, %v6259_v46 }
 0x222   :  { %v600_v28 = vsub.f32 1.0, %v599_v26 }
 0x223   :  { %6260 = vrcp.f32 %v424_v48  ;;  %v436_v54 = vand.u32 2147483648, %v424_v48  ;;  %vm430_vm6 = vweird.f32 %v424_v48  ;;  %v434_v55 = vand.u32 2147483647, %v424_v48 }
 0x224   :  { %v601_v29 = vmul.f32 %v6257_v25, %v600_v28 }
 0x225   :  { %v437_v57 = vor.u32 1.1754944e-38, %v436_v54  ;;  %vm435_vm8 = vcmp.eq.f32.partialorder %v434_v55, 8.507059e+37 }
 0x226   :  { %v602_v30 = vadd.f32 %v6257_v25, %v601_v29 }
 0x228   :  { %v606_v34 = vsel %vm605_vm3, %v6257_v25, %v602_v30 }
 0x229   :  { %v611_v38 = vsel %vm608_vm4, %v610_v36, %v606_v34  ;;  %v6261_v49 = vpop.eup %6260 }
 0x22a   :  { %v426_v50 = vmul.f32 %v6261_v49, %v424_v48  ;;  %vm431_vm5 = vweird.f32 %v6261_v49 }
 0x22b   :  { %vm432_vm7 = vmor %vm430_vm6, %vm431_vm5 }
 0x22c   :  { %v427_v51 = vsub.f32 1.0, %v426_v50 }
 0x22e   :  { %v428_v52 = vmul.f32 %v6261_v49, %v427_v51 }
 0x230   :  { %v429_v53 = vadd.f32 %v6261_v49, %v428_v52 }
 0x232   :  { %v433_v56 = vsel %vm432_vm7, %v6261_v49, %v429_v53 }
 0x233   :  { %v438_v58 = vsel %vm435_vm8, %v437_v57, %v433_v56 }
 0x246   :  { %v627_v37 = vpop.permute.xlu2 %626 }
 0x247   :  { %v6973_v39 = vmul.f32 %v627_v37, %v611_v38 }
 0x249   :  { %v801_v41 = vpack.c.bf16 %v6973_v39, %v6973_v39 }
 0x24b   :  { %v803_v43 = vrot.slane %v801_v41, 3 }
 0x24d   :  { %804 = vrot.lane.b32.xlu1 %v803_v43, %s6793_s2 }
 0x27f   :  { %v454_v59 = vpop.permute.xlu1 %453 }
 0x280   :  { %v6979_v61 = vmul.f32 %v454_v59, %v438_v58 }
 0x282   :  { %v642_v62 = vpack.c.bf16 %v6979_v61, %v6979_v61 }
 0x284   :  { %644 = vrot.lane.b32.xlu0 %v642_v62, %s6793_s2 }
 0x2bf   :  { %v805_v0 = vpop.permute.xlu1 %804 }
 0x2f6   :  { %v645_v63 = vpop.permute.xlu0 %644 }
 0x2f7   :  { %5891 = vmatmul.msk.bf16.vlgmr.msrb.gmra.mxu2 %vm292_vm9, %v645_v63  ;;  %5892 = vmatmul.msk.bf16.vlgmr.msrb.gmra.mxu3 %vm292_vm9, %v645_v63 }
 0x2f8   :  { %5893 = vmatmul.msk.bf16.vlgmr.msra.gmra.mxu0 %vm292_vm9, %v645_v63  ;;  %5894 = vmatmul.msk.bf16.vlgmr.msra.gmra.mxu1 %vm292_vm9, %v645_v63 }
 0x2f9   :  { %1024 = vmatpush.bf16.msra.mxu0 %v6846_v2  ;;  %988 = vmatpush.bf16.msrb.mxu2 %v6838_v1 }
 0x2fa   :  { %1005 = vmatpush.bf16.msrb.mxu3 %v6855_v7  ;;  %1043 = vmatpush.bf16.msra.mxu1 %v6895_v18 }
 0x307   :  { %5898 = vmatmul.msk.bf16.vlgmr.msra.gmra.mxu2 %vm292_vm9, %v805_v0  ;;  %5899 = vmatmul.msk.bf16.vlgmr.msra.gmra.mxu3 %vm292_vm9, %v805_v0 }
 0x308   :  { %5900 = vmatmul.msk.bf16.vlgmr.msrb.gmra.mxu0 %vm292_vm9, %v805_v0  ;;  %5901 = vmatmul.msk.bf16.vlgmr.msrb.gmra.mxu1 %vm292_vm9, %v805_v0 }
 0x309   :  { %1184 = vmatpush.bf16.msrb.mxu0 %v6878_v13  ;;  %1148 = vmatpush.bf16.msra.mxu2 %v6918_v21 }
 0x30a   :  { %1165 = vmatpush.bf16.msra.mxu3 %v6906_v19  ;;  %1203 = vmatpush.bf16.msrb.mxu1 %v6937_v32 }
 0x375   :  { %v694_v3 = vpop.f32.mrf.mxu0  ;;  %v713_v5 = vpop.f32.mrf.mxu1 }
 0x376   :  { %v699_v6 = vrot.slane %v694_v3, 6  ;;  %v718_v41 = vrot.slane %v713_v5, 6 }
 0x378   :  { %700 = vrot.lane.b32.xlu2 %v699_v6, %s6788_s23 }
 0x37a   :  { %v658_v8 = vpop.f32.mrf.mxu2  ;;  %v675_v9 = vpop.f32.mrf.mxu3 }
 0x37b   :  { %v680_v12 = vrot.slane %v675_v9, 6  ;;  %v663_v42 = vrot.slane %v658_v8, 6 }
 0x37d   :  { %v696_v10 = vpop.f32.mrf.mxu0  ;;  %v715_v11 = vpop.f32.mrf.mxu1  ;;  %v665_v43 = vadd.f32 %v663_v42, %v6946_v40 }
 0x37f   :  { %v5895_v44 = vmul.f32 -1.442695, %v665_v43 }
 0x380   :  { %681 = vrot.lane.b32.xlu2 %v680_v12, %s6791_s30 }
 0x382   :  { %v660_v14 = vpop.f32.mrf.mxu2  ;;  %v677_v16 = vpop.f32.mrf.mxu3 }
 0x385   :  { %v854_v17 = vpop.f32.mrf.mxu0  ;;  %v873_v20 = vpop.f32.mrf.mxu1 }
 0x386   :  { %v859_v22 = vrot.slane %v854_v17, 4  ;;  %v878_v6 = vrot.slane %v873_v20, 4 }
 0x388   :  { %860 = vrot.lane.b32.xlu0 %v859_v22, %s6788_s23 }
 0x38a   :  { %v818_v23 = vpop.f32.mrf.mxu2  ;;  %v835_v24 = vpop.f32.mrf.mxu3 }
 0x38b   :  { %v840_v34 = vrot.slane %v835_v24, 4  ;;  %v823_v51 = vrot.slane %v818_v23, 4 }
 0x38d   :  { %v856_v25 = vpop.f32.mrf.mxu0  ;;  %v875_v26 = vpop.f32.mrf.mxu1  ;;  %v825_v53 = vadd.f32 %v823_v51, %v6950_v47 }
 0x38f   :  { %v5902_v56 = vmul.f32 -1.442695, %v825_v53 }
 0x392   :  { %v820_v28 = vpop.f32.mrf.mxu2  ;;  %v837_v29 = vpop.f32.mrf.mxu3 }
 0x3d2   :  { %v701_v30 = vpop.permute.xlu2 %700 }
 0x3d3   :  { %v703_v31 = vadd.f32 %v701_v30, %v6946_v40 }
 0x3d5   :  { %6262 = vtanh.f32 %v703_v31 }
 0x3da   :  { %v682_v17 = vpop.permute.xlu2 %681 }
 0x3db   :  { %v6263_v33 = vpop.eup %6262  ;;  %v684_v24 = vadd.f32 %v682_v17, %v6946_v40 }
 0x3dc   :  { %786 = vrot.lane.b32.xlu1 %v6263_v33, %s6790_s29 }
 0x3dd   :  { %v5896_v28 = vmul.f32 -1.442695, %v684_v24 }
 0x3e4   :  { %841 = vrot.lane.b32.xlu1 %v840_v34, %s6791_s30 }
 0x3fa   :  { %v861_v36 = vpop.permute.xlu0 %860 }
 0x3fb   :  { %v863_v37 = vadd.f32 %v861_v36, %v6950_v47 }
 0x3fd   :  { %6264 = vtanh.f32 %v863_v37 }
 0x3fe   :  { %6266 = vpow2.f32 %v5895_v44 }
 0x403   :  { %v6265_v38 = vpop.eup %6264 }
 0x404   :  { %946 = vrot.lane.b32.xlu0 %v6265_v38, %s6790_s29  ;;  %v6267_v45 = vpop.eup %6266 }
 0x405   :  { %v726_v46 = vadd.f32 1.0, %v6267_v45  ;;  %v782_v45 = vrot.slane %v6968_v15, 6 }
 0x407   :  { %6268 = vrcp.f32 %v726_v46  ;;  %v738_v55 = vand.u32 2147483648, %v726_v46  ;;  %vm732_vm11 = vweird.f32 %v726_v46  ;;  %v736_v57 = vand.u32 2147483647, %v726_v46 }
 0x408   :  { %6270 = vpow2.f32 %v5902_v56 }
 0x409   :  { %v739_v59 = vor.u32 1.1754944e-38, %v738_v55  ;;  %vm737_vm13 = vcmp.eq.f32.partialorder %v736_v57, 8.507059e+37 }
 0x40c   :  { %719 = vrot.lane.b32.xlu0 %v718_v41, %s6792_s1 }
 0x40d   :  { %v6269_v48 = vpop.eup %6268 }
 0x40e   :  { %v728_v49 = vmul.f32 %v6269_v48, %v726_v46  ;;  %vm733_vm10 = vweird.f32 %v6269_v48  ;;  %v6271_v3 = vpop.eup %6270 }
 0x40f   :  { %vm734_vm12 = vmor %vm732_vm11, %vm733_vm10  ;;  %v886_v5 = vadd.f32 1.0, %v6271_v3 }
 0x410   :  { %v729_v50 = vsub.f32 1.0, %v728_v49 }
 0x411   :  { %6272 = vrcp.f32 %v886_v5  ;;  %v898_v14 = vand.u32 2147483648, %v886_v5  ;;  %vm892_vm15 = vweird.f32 %v886_v5  ;;  %v896_v16 = vand.u32 2147483647, %v886_v5 }
 0x412   :  { %v730_v52 = vmul.f32 %v6269_v48, %v729_v50  ;;  %6274 = vpow2.f32 %v5896_v28 }
 0x413   :  { %v899_v23 = vor.u32 1.1754944e-38, %v898_v14  ;;  %vm897_vm1 = vcmp.eq.f32.partialorder %v896_v16, 8.507059e+37 }
 0x414   :  { %v731_v54 = vadd.f32 %v6269_v48, %v730_v52 }
 0x416   :  { %v735_v58 = vsel %vm734_vm12, %v6269_v48, %v731_v54 }
 0x417   :  { %v740_v63 = vsel %vm737_vm13, %v739_v59, %v735_v58  ;;  %v6273_v8 = vpop.eup %6272 }
 0x418   :  { %v888_v9 = vmul.f32 %v6273_v8, %v886_v5  ;;  %vm893_vm14 = vweird.f32 %v6273_v8  ;;  %v6275_v29 = vpop.eup %6274 }
 0x419   :  { %vm894_vm0 = vmor %vm892_vm15, %vm893_vm14  ;;  %v745_v30 = vadd.f32 1.0, %v6275_v29 }
 0x41a   :  { %v889_v10 = vsub.f32 1.0, %v888_v9 }
 0x41b   :  { %6276 = vrcp.f32 %v745_v30  ;;  %v757_v38 = vand.u32 2147483648, %v745_v30  ;;  %vm751_vm3 = vweird.f32 %v745_v30  ;;  %v755_v41 = vand.u32 2147483647, %v745_v30 }
 0x41c   :  { %v890_v11 = vmul.f32 %v6273_v8, %v889_v10 }
 0x41d   :  { %v758_v43 = vor.u32 1.1754944e-38, %v757_v38  ;;  %vm756_vm5 = vcmp.eq.f32.partialorder %v755_v41, 8.507059e+37 }
 0x41e   :  { %v891_v12 = vadd.f32 %v6273_v8, %v890_v11 }
 0x420   :  { %v895_v22 = vsel %vm894_vm0, %v6273_v8, %v891_v12 }
 0x421   :  { %v900_v25 = vsel %vm897_vm1, %v899_v23, %v895_v22  ;;  %v6277_v31 = vpop.eup %6276 }
 0x422   :  { %v747_v33 = vmul.f32 %v6277_v31, %v745_v30  ;;  %vm752_vm2 = vweird.f32 %v6277_v31 }
 0x423   :  { %vm753_vm4 = vmor %vm751_vm3, %vm752_vm2 }
 0x424   :  { %v748_v34 = vsub.f32 1.0, %v747_v33 }
 0x426   :  { %v749_v36 = vmul.f32 %v6277_v31, %v748_v34 }
 0x428   :  { %v750_v37 = vadd.f32 %v6277_v31, %v749_v36 }
 0x42a   :  { %v754_v42 = vsel %vm753_vm4, %v6277_v31, %v750_v37 }
 0x42b   :  { %v759_v44 = vsel %vm756_vm5, %v758_v43, %v754_v42 }
 0x42c   :  { %v784_v46 = vmul.f32 %v782_v45, %v759_v44 }
 0x44e   :  { %v787_v62 = vpop.permute.xlu1 %786 }
 0x44f   :  { %v789_v0 = vmul.f32 %v787_v62, %v740_v63 }
 0x451   :  { %791 = vrot.lane.b32.xlu2 %v789_v0, %s6791_s30 }
 0x456   :  { %v842_v50 = vpop.permute.xlu1 %841 }
 0x457   :  { %v844_v52 = vadd.f32 %v842_v50, %v6950_v47 }
 0x459   :  { %879 = vrot.lane.b32.xlu2 %v878_v6, %s6792_s1  ;;  %v5903_v53 = vmul.f32 -1.442695, %v844_v52  ;;  %v942_v6 = vrot.slane %v6964_v60, 2 }
 0x476   :  { %v947_v20 = vpop.permute.xlu0 %946 }
 0x477   :  { %v949_v26 = vmul.f32 %v947_v20, %v900_v25 }
 0x479   :  { %951 = vrot.lane.b32.xlu1 %v949_v26, %s6791_s30 }
 0x47e   :  { %v720_v11 = vpop.permute.xlu0 %719 }
 0x47f   :  { %v722_v14 = vadd.f32 %v720_v11, %v6946_v40 }
 0x481   :  { %v5897_v16 = vmul.f32 -1.442695, %v722_v14 }
 0x4ab   :  { %v792_v48 = vpop.permute.xlu2 %791 }
 0x4ac   :  { %v7016_v49 = vadd.f32 %v792_v48, %v784_v46 }
 0x4ae   :  { %6278 = vtanh.f32 %v7016_v49 }
 0x4af   :  { %6280 = vpow2.f32 %v5903_v53 }
 0x4b3   :  { %v880_v38 = vpop.permute.xlu2 %879 }
 0x4b4   :  { %v6279_v51 = vpop.eup %6278  ;;  %v882_v41 = vadd.f32 %v880_v38, %v6950_v47 }
 0x4b5   :  { %797 = vrot.lane.b32.xlu0 %v6279_v51, %s6788_s23  ;;  %v6281_v54 = vpop.eup %6280 }
 0x4b6   :  { %v905_v55 = vadd.f32 1.0, %v6281_v54  ;;  %v5904_v42 = vmul.f32 -1.442695, %v882_v41 }
 0x4b8   :  { %6282 = vrcp.f32 %v905_v55  ;;  %v917_v62 = vand.u32 2147483648, %v905_v55  ;;  %vm911_vm7 = vweird.f32 %v905_v55  ;;  %v915_v63 = vand.u32 2147483647, %v905_v55 }
 0x4ba   :  { %v918_v3 = vor.u32 1.1754944e-38, %v917_v62  ;;  %vm916_vm10 = vcmp.eq.f32.partialorder %v915_v63, 8.507059e+37 }
 0x4be   :  { %v6283_v56 = vpop.eup %6282 }
 0x4bf   :  { %v907_v57 = vmul.f32 %v6283_v56, %v905_v55  ;;  %vm912_vm6 = vweird.f32 %v6283_v56 }
 0x4c0   :  { %vm913_vm8 = vmor %vm911_vm7, %vm912_vm6 }
 0x4c1   :  { %v908_v15 = vsub.f32 1.0, %v907_v57 }
 0x4c3   :  { %v909_v58 = vmul.f32 %v6283_v56, %v908_v15 }
 0x4c5   :  { %v910_v59 = vadd.f32 %v6283_v56, %v909_v58 }
 0x4c7   :  { %v914_v0 = vsel %vm913_vm8, %v6283_v56, %v910_v59 }
 0x4c8   :  { %v919_v5 = vsel %vm916_vm10, %v918_v3, %v914_v0 }
 0x4c9   :  { %v944_v8 = vmul.f32 %v942_v6, %v919_v5 }
 0x4eb   :  { %v952_v9 = vpop.permute.xlu1 %951 }
 0x4ec   :  { %v7022_v10 = vadd.f32 %v952_v9, %v944_v8 }
 0x4ee   :  { %6284 = vtanh.f32 %v7022_v10 }
 0x4ef   :  { %6286 = vpow2.f32 %v5897_v16 }
 0x4f4   :  { %v6285_v12 = vpop.eup %6284 }
 0x4f5   :  { %957 = vrot.lane.b32.xlu1 %v6285_v12, %s6788_s23  ;;  %v6287_v17 = vpop.eup %6286 }
 0x4f6   :  { %v765_v22 = vadd.f32 1.0, %v6287_v17 }
 0x4f8   :  { %6288 = vrcp.f32 %v765_v22  ;;  %v777_v26 = vand.u32 2147483648, %v765_v22  ;;  %vm771_vm12 = vweird.f32 %v765_v22  ;;  %v775_v28 = vand.u32 2147483647, %v765_v22 }
 0x4f9   :  { %6290 = vpow2.f32 %v5904_v42 }
 0x4fa   :  { %v778_v30 = vor.u32 1.1754944e-38, %v777_v26  ;;  %vm776_vm14 = vcmp.eq.f32.partialorder %v775_v28, 8.507059e+37 }
 0x4fe   :  { %v6289_v23 = vpop.eup %6288 }
 0x4ff   :  { %v767_v24 = vmul.f32 %v6289_v23, %v765_v22  ;;  %vm772_vm11 = vweird.f32 %v6289_v23  ;;  %v6291_v43 = vpop.eup %6290 }
 0x500   :  { %vm773_vm13 = vmor %vm771_vm12, %vm772_vm11  ;;  %v925_v44 = vadd.f32 1.0, %v6291_v43 }
 0x501   :  { %v768_v60 = vsub.f32 1.0, %v767_v24 }
 0x502   :  { %6292 = vrcp.f32 %v925_v44  ;;  %v937_v52 = vand.u32 2147483648, %v925_v44  ;;  %vm931_vm0 = vweird.f32 %v925_v44  ;;  %v935_v53 = vand.u32 2147483647, %v925_v44 }
 0x503   :  { %v769_v20 = vmul.f32 %v6289_v23, %v768_v60 }
 0x504   :  { %v938_v55 = vor.u32 1.1754944e-38, %v937_v52  ;;  %vm936_vm2 = vcmp.eq.f32.partialorder %v935_v53, 8.507059e+37 }
 0x505   :  { %v770_v25 = vadd.f32 %v6289_v23, %v769_v20 }
 0x507   :  { %v774_v29 = vsel %vm773_vm13, %v6289_v23, %v770_v25 }
 0x508   :  { %v779_v31 = vsel %vm776_vm14, %v778_v30, %v774_v29  ;;  %v6293_v45 = vpop.eup %6292 }
 0x509   :  { %v927_v46 = vmul.f32 %v6293_v45, %v925_v44  ;;  %vm932_vm15 = vweird.f32 %v6293_v45 }
 0x50a   :  { %vm933_vm1 = vmor %vm931_vm0, %vm932_vm15 }
 0x50b   :  { %v928_v48 = vsub.f32 1.0, %v927_v46 }
 0x50d   :  { %v929_v50 = vmul.f32 %v6293_v45, %v928_v48 }
 0x50f   :  { %v930_v51 = vadd.f32 %v6293_v45, %v929_v50 }
 0x511   :  { %v934_v54 = vsel %vm933_vm1, %v6293_v45, %v930_v51 }
 0x512   :  { %v939_v56 = vsel %vm936_vm2, %v938_v55, %v934_v54 }
 0x527   :  { %v798_v33 = vpop.permute.xlu0 %797 }
 0x528   :  { %v7027_v34 = vmul.f32 %v798_v33, %v779_v31 }
 0x52a   :  { %v973_v36 = vpack.c.bf16 %v7027_v34, %v7027_v34 }
 0x52c   :  { %v975_v37 = vrot.slane %v973_v36, 1 }
 0x52e   :  { %976 = vrot.lane.b32.xlu2 %v975_v37, %s6793_s2 }
 0x567   :  { %v958_v57 = vpop.permute.xlu1 %957 }
 0x568   :  { %v7033_v15 = vmul.f32 %v958_v57, %v939_v56 }
 0x56a   :  { %v1133_v58 = vpack.c.bf16 %v7033_v15, %v7033_v15 }
 0x56c   :  { %v1135_v59 = vrot.slane %v1133_v58, 2 }
 0x56e   :  { %1136 = vrot.lane.b32.xlu0 %v1135_v59, %s6793_s2 }
 0x588   :  { %v977_v62 = vpop.permute.xlu2 %976 }
 0x589   :  { %5905 = vmatmul.msk.bf16.vlgmr.msrb.gmra.mxu2 %vm292_vm9, %v977_v62  ;;  %5906 = vmatmul.msk.bf16.vlgmr.msrb.gmra.mxu3 %vm292_vm9, %v977_v62 }
 0x58a   :  { %5907 = vmatmul.msk.bf16.vlgmr.msra.gmra.mxu0 %vm292_vm9, %v977_v62  ;;  %5908 = vmatmul.msk.bf16.vlgmr.msra.gmra.mxu1 %vm292_vm9, %v977_v62 }
 0x58b   :  { %1354 = vmatpush.bf16.msra.mxu0 %v6846_v2  ;;  %1318 = vmatpush.bf16.msrb.mxu2 %v6838_v1 }
 0x58c   :  { %1335 = vmatpush.bf16.msrb.mxu3 %v6855_v7  ;;  %1373 = vmatpush.bf16.msra.mxu1 %v6895_v18 }
 0x5e0   :  { %v1137_v63 = vpop.permute.xlu0 %1136 }
 0x5e1   :  { %5912 = vmatmul.msk.bf16.vlgmr.msra.gmra.mxu2 %vm292_vm9, %v1137_v63  ;;  %5913 = vmatmul.msk.bf16.vlgmr.msra.gmra.mxu3 %vm292_vm9, %v1137_v63 }
 0x5e2   :  { %5914 = vmatmul.msk.bf16.vlgmr.msrb.gmra.mxu0 %vm292_vm9, %v1137_v63  ;;  %5915 = vmatmul.msk.bf16.vlgmr.msrb.gmra.mxu1 %vm292_vm9, %v1137_v63 }
 0x5e3   :  { %1510 = vmatpush.bf16.msrb.mxu0 %v6878_v13  ;;  %1478 = vmatpush.bf16.msra.mxu2 %v6918_v21 }
 0x5e4   :  { %1492 = vmatpush.bf16.msra.mxu3 %v6906_v19  ;;  %1528 = vmatpush.bf16.msrb.mxu1 %v6937_v32 }
 0x607   :  { %v1026_v1 = vpop.f32.mrf.mxu0  ;;  %v1045_v2 = vpop.f32.mrf.mxu1 }
 0x608   :  { %v1031_v7 = vrot.slane %v1026_v1, 4  ;;  %v1050_v31 = vrot.slane %v1045_v2, 4 }
 0x60a   :  { %1032 = vrot.lane.b32.xlu1 %v1031_v7, %s6788_s23 }
 0x60c   :  { %v990_v18 = vpop.f32.mrf.mxu2  ;;  %v1007_v0 = vpop.f32.mrf.mxu3 }
 0x60d   :  { %v1012_v6 = vrot.slane %v1007_v0, 4  ;;  %v995_v26 = vrot.slane %v990_v18, 4 }
 0x60f   :  { %v1028_v3 = vpop.f32.mrf.mxu0  ;;  %v1047_v5 = vpop.f32.mrf.mxu1  ;;  %v997_v29 = vadd.f32 %v995_v26, %v6946_v40 }
 0x611   :  { %v5909_v30 = vmul.f32 -1.442695, %v997_v29  ;;  %v1114_v29 = vrot.slane %v7016_v49, 6 }
 0x612   :  { %1013 = vrot.lane.b32.xlu1 %v1012_v6, %s6791_s30 }
 0x614   :  { %v992_v8 = vpop.f32.mrf.mxu2  ;;  %v1009_v13 = vpop.f32.mrf.mxu3 }
 0x65f   :  { %v1186_v9 = vpop.f32.mrf.mxu0  ;;  %v1205_v21 = vpop.f32.mrf.mxu1 }
 0x660   :  { %v1191_v11 = vrot.slane %v1186_v9, 6  ;;  %v1210_v58 = vrot.slane %v1205_v21, 6 }
 0x662   :  { %1192 = vrot.lane.b32.xlu2 %v1191_v11, %s6788_s23 }
 0x664   :  { %v1150_v19 = vpop.f32.mrf.mxu2  ;;  %v1167_v32 = vpop.f32.mrf.mxu3 }
 0x665   :  { %v1172_v60 = vrot.slane %v1167_v32, 6  ;;  %v1155_v42 = vrot.slane %v1150_v19, 6 }
 0x667   :  { %v1188_v12 = vpop.f32.mrf.mxu0  ;;  %v1207_v14 = vpop.f32.mrf.mxu1  ;;  %v1157_v44 = vadd.f32 %v1155_v42, %v6950_v47 }
 0x669   :  { %v5916_v48 = vmul.f32 -1.442695, %v1157_v44 }
 0x66c   :  { %v1152_v16 = vpop.f32.mrf.mxu2  ;;  %v1169_v17 = vpop.f32.mrf.mxu3 }
 0x67c   :  { %v1033_v22 = vpop.permute.xlu1 %1032 }
 0x67d   :  { %v1035_v23 = vadd.f32 %v1033_v22, %v6946_v40 }
 0x67f   :  { %6294 = vtanh.f32 %v1035_v23 }
 0x684   :  { %v1014_v13 = vpop.permute.xlu1 %1013 }
 0x685   :  { %v6295_v24 = vpop.eup %6294  ;;  %v1016_v9 = vadd.f32 %v1014_v13, %v6946_v40 }
 0x686   :  { %1118 = vrot.lane.b32.xlu0 %v6295_v24, %s6790_s29 }
 0x687   :  { %v5910_v21 = vmul.f32 -1.442695, %v1016_v9 }
 0x68e   :  { %1173 = vrot.lane.b32.xlu0 %v1172_v60, %s6791_s30 }
 0x6bc   :  { %v1193_v20 = vpop.permute.xlu2 %1192 }
 0x6bd   :  { %v1195_v25 = vadd.f32 %v1193_v20, %v6950_v47 }
 0x6bf   :  { %6296 = vtanh.f32 %v1195_v25 }
 0x6c0   :  { %6298 = vpow2.f32 %v5909_v30 }
 0x6c5   :  { %v6297_v28 = vpop.eup %6296 }
 0x6c6   :  { %1278 = vrot.lane.b32.xlu2 %v6297_v28, %s6790_s29  ;;  %v6299_v33 = vpop.eup %6298 }
 0x6c7   :  { %v1058_v36 = vadd.f32 1.0, %v6299_v33 }
 0x6c9   :  { %6300 = vrcp.f32 %v1058_v36  ;;  %v1070_v46 = vand.u32 2147483648, %v1058_v36  ;;  %vm1064_vm4 = vweird.f32 %v1058_v36  ;;  %v1068_v50 = vand.u32 2147483647, %v1058_v36 }
 0x6ca   :  { %6302 = vpow2.f32 %v5916_v48 }
 0x6cb   :  { %v1071_v52 = vor.u32 1.1754944e-38, %v1070_v46  ;;  %vm1069_vm6 = vcmp.eq.f32.partialorder %v1068_v50, 8.507059e+37 }
 0x6ce   :  { %1051 = vrot.lane.b32.xlu2 %v1050_v31, %s6792_s1 }
 0x6cf   :  { %v6301_v37 = vpop.eup %6300 }
 0x6d0   :  { %v1060_v38 = vmul.f32 %v6301_v37, %v1058_v36  ;;  %vm1065_vm3 = vweird.f32 %v6301_v37  ;;  %v6303_v56 = vpop.eup %6302 }
 0x6d1   :  { %vm1066_vm5 = vmor %vm1064_vm4, %vm1065_vm3  ;;  %v1218_v57 = vadd.f32 1.0, %v6303_v56 }
 0x6d2   :  { %v1061_v41 = vsub.f32 1.0, %v1060_v38 }
 0x6d3   :  { %6304 = vrcp.f32 %v1218_v57  ;;  %v1230_v7 = vand.u32 2147483648, %v1218_v57  ;;  %vm1224_vm8 = vweird.f32 %v1218_v57  ;;  %v1228_v18 = vand.u32 2147483647, %v1218_v57 }
 0x6d4   :  { %v1062_v43 = vmul.f32 %v6301_v37, %v1061_v41  ;;  %6306 = vpow2.f32 %v5910_v21 }
 0x6d5   :  { %v1231_v3 = vor.u32 1.1754944e-38, %v1230_v7  ;;  %vm1229_vm11 = vcmp.eq.f32.partialorder %v1228_v18, 8.507059e+37 }
 0x6d6   :  { %v1063_v45 = vadd.f32 %v6301_v37, %v1062_v43 }
 0x6d8   :  { %v1067_v51 = vsel %vm1066_vm5, %v6301_v37, %v1063_v45 }
 0x6d9   :  { %v1072_v54 = vsel %vm1069_vm6, %v1071_v52, %v1067_v51  ;;  %v6305_v59 = vpop.eup %6304  ;;  %v1274_v52 = vrot.slane %v7022_v10, 2 }
 0x6da   :  { %v1220_v62 = vmul.f32 %v6305_v59, %v1218_v57  ;;  %vm1225_vm7 = vweird.f32 %v6305_v59  ;;  %v6307_v11 = vpop.eup %6306 }
 0x6db   :  { %vm1226_vm10 = vmor %vm1224_vm8, %vm1225_vm7  ;;  %v1077_v19 = vadd.f32 1.0, %v6307_v11 }
 0x6dc   :  { %v1221_v63 = vsub.f32 1.0, %v1220_v62 }
 0x6dd   :  { %6308 = vrcp.f32 %v1077_v19  ;;  %v1089_v24 = vand.u32 2147483648, %v1077_v19  ;;  %vm1083_vm13 = vweird.f32 %v1077_v19  ;;  %v1087_v20 = vand.u32 2147483647, %v1077_v19 }
 0x6de   :  { %v1222_v1 = vmul.f32 %v6305_v59, %v1221_v63 }
 0x6df   :  { %v1090_v26 = vor.u32 1.1754944e-38, %v1089_v24  ;;  %vm1088_vm15 = vcmp.eq.f32.partialorder %v1087_v20, 8.507059e+37 }
 0x6e0   :  { %v1223_v2 = vadd.f32 %v6305_v59, %v1222_v1 }
 0x6e2   :  { %v1227_v0 = vsel %vm1226_vm10, %v6305_v59, %v1223_v2 }
 0x6e3   :  { %v1232_v6 = vsel %vm1229_vm11, %v1231_v3, %v1227_v0  ;;  %v6309_v32 = vpop.eup %6308 }
 0x6e4   :  { %v1079_v12 = vmul.f32 %v6309_v32, %v1077_v19  ;;  %vm1084_vm12 = vweird.f32 %v6309_v32 }
 0x6e5   :  { %vm1085_vm14 = vmor %vm1083_vm13, %vm1084_vm12 }
 0x6e6   :  { %v1080_v14 = vsub.f32 1.0, %v1079_v12 }
 0x6e8   :  { %v1081_v17 = vmul.f32 %v6309_v32, %v1080_v14 }
 0x6ea   :  { %v1082_v23 = vadd.f32 %v6309_v32, %v1081_v17 }
 0x6ec   :  { %v1086_v25 = vsel %vm1085_vm14, %v6309_v32, %v1082_v23 }
 0x6ed   :  { %v1091_v28 = vsel %vm1088_vm15, %v1090_v26, %v1086_v25 }
 0x6ee   :  { %v1116_v30 = vmul.f32 %v1114_v29, %v1091_v28 }
 0x6f8   :  { %v1119_v53 = vpop.permute.xlu0 %1118 }
 0x6f9   :  { %v1121_v55 = vmul.f32 %v1119_v53, %v1072_v54 }
 0x6fb   :  { %1123 = vrot.lane.b32.xlu1 %v1121_v55, %s6791_s30 }
 0x700   :  { %v1174_v16 = vpop.permute.xlu0 %1173 }
 0x701   :  { %v1176_v22 = vadd.f32 %v1174_v16, %v6950_v47 }
 0x703   :  { %1211 = vrot.lane.b32.xlu1 %v1210_v58, %s6792_s1  ;;  %v5917_v60 = vmul.f32 -1.442695, %v1176_v22 }
 0x705   :  { %6310 = vpow2.f32 %v5917_v60 }
 0x70b   :  { %v6311_v33 = vpop.eup %6310 }
 0x70c   :  { %v1237_v37 = vadd.f32 1.0, %v6311_v33 }
 0x70e   :  { %v1249_v46 = vand.u32 2147483648, %v1237_v37  ;;  %vm1243_vm1 = vweird.f32 %v1237_v37  ;;  %v1247_v49 = vand.u32 2147483647, %v1237_v37 }
 0x710   :  { %v1250_v50 = vor.u32 1.1754944e-38, %v1249_v46  ;;  %vm1248_vm3 = vcmp.eq.f32.partialorder %v1247_v49, 8.507059e+37  ;;  %v7117_v46 = vld [vmem:[%s6861_s26] sm:$0xff] }
 0x711   :  { %v7121_v49 = vld [vmem:[%s6911_s17] sm:$0xff] }
 0x720   :  { %v1279_v5 = vpop.permute.xlu2 %1278 }
 0x721   :  { %v1281_v8 = vmul.f32 %v1279_v5, %v1232_v6 }
 0x723   :  { %1283 = vrot.lane.b32.xlu0 %v1281_v8, %s6791_s30 }
 0x728   :  { %v1052_v56 = vpop.permute.xlu2 %1051 }
 0x729   :  { %v1054_v58 = vadd.f32 %v1052_v56, %v6946_v40 }
 0x72b   :  { %v5911_v59 = vmul.f32 -1.442695, %v1054_v58 }
 0x76d   :  { %v1124_v31 = vpop.permute.xlu1 %1123 }
 0x76e   :  { %v7071_v36 = vadd.f32 %v1124_v31, %v1116_v30 }
 0x770   :  { %6312 = vtanh.f32 %v7071_v36 }
 0x771   :  { %6314 = vrcp.f32 %v1237_v37 }
 0x775   :  { %v1212_v19 = vpop.permute.xlu1 %1211 }
 0x776   :  { %v6313_v38 = vpop.eup %6312  ;;  %v1214_v32 = vadd.f32 %v1212_v19, %v6950_v47 }
 0x777   :  { %1129 = vrot.lane.b32.xlu2 %v6313_v38, %s6788_s23  ;;  %v6315_v41 = vpop.eup %6314 }
 0x778   :  { %v1239_v42 = vmul.f32 %v6315_v41, %v1237_v37  ;;  %vm1244_vm0 = vweird.f32 %v6315_v41  ;;  %v5918_v12 = vmul.f32 -1.442695, %v1214_v32 }
 0x779   :  { %vm1245_vm2 = vmor %vm1243_vm1, %vm1244_vm0 }
 0x77a   :  { %v1240_v43 = vsub.f32 1.0, %v1239_v42  ;;  %v7101_v42 = vld [vmem:[%s6824_s10] sm:$0xff] }
 0x77c   :  { %v1241_v44 = vmul.f32 %v6315_v41, %v1240_v43  ;;  %v7105_v43 = vld [vmem:[%s6843_s22] sm:$0xff] }
 0x77e   :  { %v1242_v45 = vadd.f32 %v6315_v41, %v1241_v44  ;;  %v7109_v44 = vld [vmem:[%s6890_s7] sm:$0xff] }
 0x780   :  { %v1246_v48 = vsel %vm1245_vm2, %v6315_v41, %v1242_v45  ;;  %v7097_v41 = vld [vmem:[%s6829_s14] sm:$0xff] }
 0x781   :  { %v1251_v51 = vsel %vm1248_vm3, %v1250_v50, %v1246_v48  ;;  %v7125_v48 = vld [vmem:[%s6903_s12] sm:$0xff] }
 0x782   :  { %v1276_v53 = vmul.f32 %v1274_v52, %v1251_v51  ;;  %v7129_v50 = vld [vmem:[%s6934_s28] sm:$0xff] }
 0x795   :  { %v1284_v54 = vpop.permute.xlu0 %1283 }
 0x796   :  { %v7076_v55 = vadd.f32 %v1284_v54, %v1276_v53 }
 0x798   :  { %6316 = vtanh.f32 %v7076_v55 }
 0x799   :  { %6318 = vpow2.f32 %v5911_v59 }
 0x79e   :  { %v6317_v57 = vpop.eup %6316 }
 0x79f   :  { %1289 = vrot.lane.b32.xlu0 %v6317_v57, %s6788_s23  ;;  %v6319_v62 = vpop.eup %6318 }
 0x7a0   :  { %v1097_v63 = vadd.f32 1.0, %v6319_v62 }
 0x7a2   :  { %6320 = vrcp.f32 %v1097_v63  ;;  %v1109_v0 = vand.u32 2147483648, %v1097_v63  ;;  %vm1103_vm5 = vweird.f32 %v1097_v63  ;;  %v1107_v3 = vand.u32 2147483647, %v1097_v63 }
 0x7a3   :  { %6322 = vpow2.f32 %v5918_v12 }
 0x7a4   :  { %v1110_v6 = vor.u32 1.1754944e-38, %v1109_v0  ;;  %vm1108_vm7 = vcmp.eq.f32.partialorder %v1107_v3, 8.507059e+37 }
 0x7a8   :  { %v6321_v1 = vpop.eup %6320 }
 0x7a9   :  { %v1099_v2 = vmul.f32 %v6321_v1, %v1097_v63  ;;  %vm1104_vm4 = vweird.f32 %v6321_v1  ;;  %v6323_v14 = vpop.eup %6322 }
 0x7aa   :  { %vm1105_vm6 = vmor %vm1103_vm5, %vm1104_vm4  ;;  %v1257_v16 = vadd.f32 1.0, %v6323_v14 }
 0x7ab   :  { %v1100_v10 = vsub.f32 1.0, %v1099_v2 }
 0x7ac   :  { %6324 = vrcp.f32 %v1257_v16  ;;  %v1269_v20 = vand.u32 2147483648, %v1257_v16  ;;  %vm1263_vm10 = vweird.f32 %v1257_v16  ;;  %v1267_v25 = vand.u32 2147483647, %v1257_v16 }
 0x7ad   :  { %v1101_v7 = vmul.f32 %v6321_v1, %v1100_v10 }
 0x7ae   :  { %v1270_v28 = vor.u32 1.1754944e-38, %v1269_v20  ;;  %vm1268_vm12 = vcmp.eq.f32.partialorder %v1267_v25, 8.507059e+37 }
 0x7af   :  { %v1102_v18 = vadd.f32 %v6321_v1, %v1101_v7 }
 0x7b1   :  { %v1106_v5 = vsel %vm1105_vm6, %v6321_v1, %v1102_v18 }
 0x7b2   :  { %v1111_v8 = vsel %vm1108_vm7, %v1110_v6, %v1106_v5  ;;  %v6325_v17 = vpop.eup %6324 }
 0x7b3   :  { %v1259_v22 = vmul.f32 %v6325_v17, %v1257_v16  ;;  %vm1264_vm8 = vweird.f32 %v6325_v17 }
 0x7b4   :  { %vm1265_vm11 = vmor %vm1263_vm10, %vm1264_vm8 }
 0x7b5   :  { %v1260_v23 = vsub.f32 1.0, %v1259_v22 }
 0x7b7   :  { %v1261_v24 = vmul.f32 %v6325_v17, %v1260_v23 }
 0x7b9   :  { %v1262_v60 = vadd.f32 %v6325_v17, %v1261_v24 }
 0x7bb   :  { %v1266_v26 = vsel %vm1265_vm11, %v6325_v17, %v1262_v60 }
 0x7bc   :  { %v1271_v29 = vsel %vm1268_vm12, %v1270_v28, %v1266_v26 }
 0x7d1   :  { %v1130_v13 = vpop.permute.xlu2 %1129 }
 0x7d2   :  { %v7081_v9 = vmul.f32 %v1130_v13, %v1111_v8 }
 0x7d4   :  { %v1303_v21 = vpack.c.bf16 %v7081_v9, %v7081_v9 }
 0x7d6   :  { %v1305_v11 = vrot.slane %v1303_v21, 2 }
 0x7d8   :  { %1306 = vrot.lane.b32.xlu1 %v1305_v11, %s6793_s2 }
 0x811   :  { %v1290_v30 = vpop.permute.xlu0 %1289 }
 0x812   :  { %v7087_v31 = vmul.f32 %v1290_v30, %v1271_v29 }
 0x814   :  { %v1463_v33 = vpack.c.bf16 %v7087_v31, %v7087_v31 }
 0x816   :  { %v1465_v37 = vrot.slane %v1463_v33, 1 }
 0x818   :  { %1466 = vrot.lane.b32.xlu2 %v1465_v37, %s6793_s2 }
 0x84a   :  { %v1307_v38 = vpop.permute.xlu1 %1306 }
 0x84b   :  { %5919 = vmatmul.msk.bf16.vlgmr.msrb.gmra.mxu2 %vm292_vm9, %v1307_v38  ;;  %5920 = vmatmul.msk.bf16.vlgmr.msrb.gmra.mxu3 %vm292_vm9, %v1307_v38 }
 0x84c   :  { %5921 = vmatmul.msk.bf16.vlgmr.msra.gmra.mxu0 %vm292_vm9, %v1307_v38  ;;  %5922 = vmatmul.msk.bf16.vlgmr.msra.gmra.mxu1 %vm292_vm9, %v1307_v38 }
 0x84d   :  { %1674 = vmatpush.bf16.msra.mxu0 %v7097_v41  ;;  %1642 = vmatpush.bf16.msrb.mxu2 %v7101_v42 }
 0x84e   :  { %1656 = vmatpush.bf16.msrb.mxu3 %v7105_v43  ;;  %1692 = vmatpush.bf16.msra.mxu1 %v7109_v44 }
 0x872   :  { %v1467_v45 = vpop.permute.xlu2 %1466 }
 0x873   :  { %5926 = vmatmul.msk.bf16.vlgmr.msra.gmra.mxu2 %vm292_vm9, %v1467_v45  ;;  %5927 = vmatmul.msk.bf16.vlgmr.msra.gmra.mxu3 %vm292_vm9, %v1467_v45 }
 0x874   :  { %5928 = vmatmul.msk.bf16.vlgmr.msrb.gmra.mxu0 %vm292_vm9, %v1467_v45  ;;  %5929 = vmatmul.msk.bf16.vlgmr.msrb.gmra.mxu1 %vm292_vm9, %v1467_v45 }
 0x875   :  { %1831 = vmatpush.bf16.msrb.mxu0 %v7117_v46  ;;  %1795 = vmatpush.bf16.msra.mxu2 %v7121_v49 }
 0x876   :  { %1812 = vmatpush.bf16.msra.mxu3 %v7125_v48  ;;  %1850 = vmatpush.bf16.msrb.mxu1 %v7129_v50 }
 0x8c9   :  { %v1356_v51 = vpop.f32.mrf.mxu0  ;;  %v1375_v52 = vpop.f32.mrf.mxu1 }
 0x8ca   :  { %v1361_v53 = vrot.slane %v1356_v51, 2  ;;  %v1380_v14 = vrot.slane %v1375_v52, 2 }
 0x8cc   :  { %1362 = vrot.lane.b32.xlu0 %v1361_v53, %s6788_s23 }
 0x8ce   :  { %v1320_v54 = vpop.f32.mrf.mxu2  ;;  %v1337_v56 = vpop.f32.mrf.mxu3 }
 0x8cf   :  { %v1342_v59 = vrot.slane %v1337_v56, 2  ;;  %v1325_v32 = vrot.slane %v1320_v54, 2 }
 0x8d1   :  { %v1358_v57 = vpop.f32.mrf.mxu0  ;;  %v1377_v58 = vpop.f32.mrf.mxu1  ;;  %v1327_v12 = vadd.f32 %v1325_v32, %v6946_v40 }
 0x8d3   :  { %v5923_v16 = vmul.f32 -1.442695, %v1327_v12 }
 0x8d4   :  { %1343 = vrot.lane.b32.xlu0 %v1342_v59, %s6791_s30 }
 0x8d6   :  { %v1322_v62 = vpop.f32.mrf.mxu2  ;;  %v1339_v63 = vpop.f32.mrf.mxu3 }
 0x8f1   :  { %v1512_v1 = vpop.f32.mrf.mxu0  ;;  %v1530_v2 = vpop.f32.mrf.mxu1 }
 0x8f2   :  { %1517 = vrot.lane.b32.xlu1 %v1512_v1, %s6788_s23 }
 0x8f6   :  { %v1480_v10 = vpop.f32.mrf.mxu2  ;;  %v1494_v7 = vpop.f32.mrf.mxu3 }
 0x8f7   :  { %v1484_v45 = vadd.f32 %v1480_v10, %v6950_v47 }
 0x8f9   :  { %v1514_v18 = vpop.f32.mrf.mxu0  ;;  %v1532_v0 = vpop.f32.mrf.mxu1  ;;  %v5930_v51 = vmul.f32 -1.442695, %v1484_v45 }
 0x8fe   :  { %v1482_v3 = vpop.f32.mrf.mxu2  ;;  %v1496_v5 = vpop.f32.mrf.mxu3 }
 0x93e   :  { %v1363_v6 = vpop.permute.xlu0 %1362 }
 0x93f   :  { %v1365_v8 = vadd.f32 %v1363_v6, %v6946_v40 }
 0x941   :  { %6326 = vtanh.f32 %v1365_v8 }
 0x947   :  { %v6327_v13 = vpop.eup %6326 }
 0x948   :  { %1448 = vrot.lane.b32.xlu2 %v6327_v13, %s6790_s29 }
 0x950   :  { %1499 = vrot.lane.b32.xlu2 %v1494_v7, %s6791_s30 }
 0x964   :  { %v1518_v21 = vpop.permute.xlu1 %1517 }
 0x965   :  { %v1520_v11 = vadd.f32 %v1518_v21, %v6950_v47 }
 0x967   :  { %6328 = vtanh.f32 %v1520_v11 }
 0x968   :  { %6330 = vpow2.f32 %v5923_v16 }
 0x96d   :  { %v6329_v19 = vpop.eup %6328 }
 0x96e   :  { %1602 = vrot.lane.b32.xlu1 %v6329_v19, %s6790_s29  ;;  %v6331_v17 = vpop.eup %6330 }
 0x96f   :  { %v1388_v22 = vadd.f32 1.0, %v6331_v17 }
 0x971   :  { %6332 = vrcp.f32 %v1388_v22  ;;  %v1400_v26 = vand.u32 2147483648, %v1388_v22  ;;  %vm1394_vm14 = vweird.f32 %v1388_v22  ;;  %v1398_v28 = vand.u32 2147483647, %v1388_v22 }
 0x972   :  { %6334 = vpow2.f32 %v5930_v51 }
 0x973   :  { %v1401_v30 = vor.u32 1.1754944e-38, %v1400_v26  ;;  %vm1399_vm0 = vcmp.eq.f32.partialorder %v1398_v28, 8.507059e+37 }
 0x976   :  { %1381 = vrot.lane.b32.xlu1 %v1380_v14, %s6792_s1 }
 0x977   :  { %v6333_v23 = vpop.eup %6332 }
 0x978   :  { %v1390_v24 = vmul.f32 %v6333_v23, %v1388_v22  ;;  %vm1395_vm13 = vweird.f32 %v6333_v23  ;;  %v6335_v52 = vpop.eup %6334 }
 0x979   :  { %vm1396_vm15 = vmor %vm1394_vm14, %vm1395_vm13  ;;  %v1542_v53 = vadd.f32 1.0, %v6335_v52 }
 0x97a   :  { %v1391_v60 = vsub.f32 1.0, %v1390_v24 }
 0x97b   :  { %6336 = vrcp.f32 %v1542_v53  ;;  %v1554_v62 = vand.u32 2147483648, %v1542_v53  ;;  %vm1548_vm2 = vweird.f32 %v1542_v53  ;;  %v1552_v63 = vand.u32 2147483647, %v1542_v53 }
 0x97c   :  { %v1392_v20 = vmul.f32 %v6333_v23, %v1391_v60 }
 0x97d   :  { %v1555_v7 = vor.u32 1.1754944e-38, %v1554_v62  ;;  %vm1553_vm4 = vcmp.eq.f32.partialorder %v1552_v63, 8.507059e+37 }
 0x97e   :  { %v1393_v25 = vadd.f32 %v6333_v23, %v1392_v20  ;;  %v1444_v20 = vrot.slane %v7071_v36, 6 }
 0x980   :  { %v1397_v29 = vsel %vm1396_vm15, %v6333_v23, %v1393_v25 }
 0x981   :  { %v1402_v37 = vsel %vm1399_vm0, %v1401_v30, %v1397_v29  ;;  %v6337_v54 = vpop.eup %6336 }
 0x982   :  { %v1544_v56 = vmul.f32 %v6337_v54, %v1542_v53  ;;  %vm1549_vm1 = vweird.f32 %v6337_v54 }
 0x983   :  { %vm1550_vm3 = vmor %vm1548_vm2, %vm1549_vm1 }
 0x984   :  { %v1545_v57 = vsub.f32 1.0, %v1544_v56 }
 0x986   :  { %v1546_v58 = vmul.f32 %v6337_v54, %v1545_v57 }
 0x988   :  { %v1547_v59 = vadd.f32 %v6337_v54, %v1546_v58  ;;  %v1598_v58 = vrot.slane %v7076_v55, 2 }
 0x98a   :  { %v1551_v1 = vsel %vm1550_vm3, %v6337_v54, %v1547_v59 }
 0x98b   :  { %v1556_v18 = vsel %vm1553_vm4, %v1555_v7, %v1551_v1 }
 0x9a2   :  { %v1449_v33 = vpop.permute.xlu2 %1448 }
 0x9a3   :  { %v1451_v38 = vmul.f32 %v1449_v33, %v1402_v37 }
 0x9a5   :  { %1453 = vrot.lane.b32.xlu0 %v1451_v38, %s6791_s30 }
 0x9aa   :  { %v1500_v19 = vpop.permute.xlu2 %1499 }
 0x9ab   :  { %v1502_v32 = vadd.f32 %v1500_v19, %v6950_v47 }
 0x9ad   :  { %1535 = vrot.lane.b32.xlu0 %v1530_v2, %s6792_s1  ;;  %v1344_v2 = vpop.permute.xlu0 %1343  ;;  %v5931_v14 = vmul.f32 -1.442695, %v1502_v32 }
 0x9ae   :  { %v1346_v3 = vadd.f32 %v1344_v2, %v6946_v40 }
 0x9b0   :  { %v5924_v5 = vmul.f32 -1.442695, %v1346_v3 }
 0x9b2   :  { %6338 = vpow2.f32 %v5924_v5 }
 0x9b8   :  { %v6339_v6 = vpop.eup %6338 }
 0x9b9   :  { %v1407_v8 = vadd.f32 1.0, %v6339_v6 }
 0x9bb   :  { %6340 = vrcp.f32 %v1407_v8  ;;  %v1419_v17 = vand.u32 2147483648, %v1407_v8  ;;  %vm1413_vm6 = vweird.f32 %v1407_v8  ;;  %v1417_v22 = vand.u32 2147483647, %v1407_v8 }
 0x9bc   :  { %6342 = vpow2.f32 %v5931_v14 }
 0x9bd   :  { %v1420_v24 = vor.u32 1.1754944e-38, %v1419_v17  ;;  %vm1418_vm8 = vcmp.eq.f32.partialorder %v1417_v22, 8.507059e+37 }
 0x9c1   :  { %v6341_v13 = vpop.eup %6340 }
 0x9c2   :  { %v1409_v21 = vmul.f32 %v6341_v13, %v1407_v8  ;;  %vm1414_vm5 = vweird.f32 %v6341_v13  ;;  %v6343_v25 = vpop.eup %6342 }
 0x9c3   :  { %vm1415_vm7 = vmor %vm1413_vm6, %vm1414_vm5  ;;  %v1561_v30 = vadd.f32 1.0, %v6343_v25 }
 0x9c4   :  { %v1410_v11 = vsub.f32 1.0, %v1409_v21 }
 0x9c5   :  { %v1573_v53 = vand.u32 2147483648, %v1561_v30  ;;  %vm1567_vm11 = vweird.f32 %v1561_v30  ;;  %v1571_v36 = vand.u32 2147483647, %v1561_v30 }
 0x9c6   :  { %v1411_v12 = vmul.f32 %v6341_v13, %v1410_v11 }
 0x9c7   :  { %v1574_v56 = vor.u32 1.1754944e-38, %v1573_v53  ;;  %vm1572_vm13 = vcmp.eq.f32.partialorder %v1571_v36, 8.507059e+37 }
 0x9c8   :  { %v1412_v16 = vadd.f32 %v6341_v13, %v1411_v12 }
 0x9ca   :  { %v1416_v23 = vsel %vm1415_vm7, %v6341_v13, %v1412_v16 }
 0x9cb   :  { %v1421_v60 = vsel %vm1418_vm8, %v1420_v24, %v1416_v23 }
 0x9cc   :  { %v1446_v26 = vmul.f32 %v1444_v20, %v1421_v60 }
 0x9e0   :  { %v1603_v10 = vpop.permute.xlu1 %1602 }
 0x9e1   :  { %v1605_v0 = vmul.f32 %v1603_v10, %v1556_v18 }
 0x9e3   :  { %1607 = vrot.lane.b32.xlu2 %v1605_v0, %s6791_s30 }
 0x9e8   :  { %v1382_v7 = vpop.permute.xlu1 %1381 }
 0x9e9   :  { %v1384_v2 = vadd.f32 %v1382_v7, %v6946_v40 }
 0x9eb   :  { %v5925_v10 = vmul.f32 -1.442695, %v1384_v2 }
 0xa17   :  { %v1454_v28 = vpop.permute.xlu0 %1453 }
 0xa18   :  { %v7149_v29 = vadd.f32 %v1454_v28, %v1446_v26 }
 0xa1a   :  { %6344 = vtanh.f32 %v7149_v29 }
 0xa1b   :  { %6346 = vrcp.f32 %v1561_v30 }
 0xa1f   :  { %v1536_v18 = vpop.permute.xlu0 %1535 }
 0xa20   :  { %v6345_v33 = vpop.eup %6344  ;;  %v1538_v3 = vadd.f32 %v1536_v18, %v6950_v47 }
 0xa21   :  { %1459 = vrot.lane.b32.xlu1 %v6345_v33, %s6788_s23  ;;  %v6347_v37 = vpop.eup %6346 }
 0xa22   :  { %v1563_v38 = vmul.f32 %v6347_v37, %v1561_v30  ;;  %vm1568_vm10 = vweird.f32 %v6347_v37  ;;  %v5932_v55 = vmul.f32 -1.442695, %v1538_v3 }
 0xa23   :  { %vm1569_vm12 = vmor %vm1567_vm11, %vm1568_vm10 }
 0xa24   :  { %v1564_v45 = vsub.f32 1.0, %v1563_v38 }
 0xa26   :  { %v1565_v51 = vmul.f32 %v6347_v37, %v1564_v45 }
 0xa28   :  { %v1566_v52 = vadd.f32 %v6347_v37, %v1565_v51 }
 0xa2a   :  { %v1570_v54 = vsel %vm1569_vm12, %v6347_v37, %v1566_v52 }
 0xa2b   :  { %v1575_v57 = vsel %vm1572_vm13, %v1574_v56, %v1570_v54 }
 0xa2c   :  { %v1600_v59 = vmul.f32 %v1598_v58, %v1575_v57 }
 0xa3d   :  { %v1608_v62 = vpop.permute.xlu2 %1607 }
 0xa3e   :  { %v7154_v63 = vadd.f32 %v1608_v62, %v1600_v59 }
 0xa40   :  { %6348 = vtanh.f32 %v7154_v63 }
 0xa41   :  { %6350 = vpow2.f32 %v5925_v10 }
 0xa46   :  { %v6349_v1 = vpop.eup %6348 }
 0xa47   :  { %1613 = vrot.lane.b32.xlu2 %v6349_v1, %s6788_s23  ;;  %v6351_v0 = vpop.eup %6350 }
 0xa48   :  { %v1427_v5 = vadd.f32 1.0, %v6351_v0 }
 0xa4a   :  { %6352 = vrcp.f32 %v1427_v5  ;;  %v1439_v40 = vand.u32 2147483648, %v1427_v5  ;;  %vm1433_vm15 = vweird.f32 %v1427_v5  ;;  %v1437_v14 = vand.u32 2147483647, %v1427_v5 }
 0xa4b   :  { %6354 = vpow2.f32 %v5932_v55 }
 0xa4c   :  { %v1440_v17 = vor.u32 1.1754944e-38, %v1439_v40  ;;  %vm1438_vm1 = vcmp.eq.f32.partialorder %v1437_v14, 8.507059e+37 }
 0xa50   :  { %v6353_v6 = vpop.eup %6352 }
 0xa51   :  { %v6355_v8 = vpop.eup %6354  ;;  %v1429_v13 = vmul.f32 %v6353_v6, %v1427_v5  ;;  %vm1434_vm14 = vweird.f32 %v6353_v6 }
 0xa52   :  { %v1581_v21 = vadd.f32 1.0, %v6355_v8  ;;  %vm1435_vm0 = vmor %vm1433_vm15, %vm1434_vm14 }
 0xa53   :  { %v1430_v11 = vsub.f32 1.0, %v1429_v13 }
 0xa54   :  { %6356 = vrcp.f32 %v1581_v21  ;;  %v1593_v30 = vand.u32 2147483648, %v1581_v21  ;;  %vm1587_vm3 = vweird.f32 %v1581_v21  ;;  %v1591_v33 = vand.u32 2147483647, %v1581_v21 }
 0xa55   :  { %v1431_v19 = vmul.f32 %v6353_v6, %v1430_v11 }
 0xa56   :  { %v1594_v38 = vor.u32 1.1754944e-38, %v1593_v30  ;;  %vm1592_vm5 = vcmp.eq.f32.partialorder %v1591_v33, 8.507059e+37 }
 0xa57   :  { %v1432_v12 = vadd.f32 %v6353_v6, %v1431_v19 }
 0xa59   :  { %v1436_v47 = vsel %vm1435_vm0, %v6353_v6, %v1432_v12 }
 0xa5a   :  { %v6357_v32 = vpop.eup %6356  ;;  %v1441_v23 = vsel %vm1438_vm1, %v1440_v17, %v1436_v47 }
 0xa5b   :  { %v1583_v16 = vmul.f32 %v6357_v32, %v1581_v21  ;;  %vm1588_vm2 = vweird.f32 %v6357_v32  ;;  %v6750_v21 = vld [vmem:[%s6874_s3] ss:$0 sm:$0xff]  ;;  %s6795_s3 = smov 14  }
 0xa5c   :  { %vm1589_vm4 = vmor %vm1587_vm3, %vm1588_vm2  ;;  %v7191_v11 = vadd.f32 %v6750_v21, %v6928_v27  ;;  %s5782_s6 = sld [smem:[%s8024_s0 + %s6795_s3]]   ;;  %s6806_s3 = smov 26  }
 0xa5d   :  { %v1584_v22 = vsub.f32 1.0, %v1583_v16 }
 0xa5f   :  { %v1585_v25 = vmul.f32 %v6357_v32, %v1584_v22 }
 0xa61   :  { %v1586_v28 = vadd.f32 %v6357_v32, %v1585_v25 }
 0xa63   :  { %v1590_v37 = vsel %vm1589_vm4, %v6357_v32, %v1586_v28 }
 0xa64   :  { %v1595_v45 = vsel %vm1592_vm5, %v1594_v38, %v1590_v37 }
 0xa93   :  { %v1460_v24 = vpop.permute.xlu1 %1459 }
 0xa94   :  { %v7160_v60 = vmul.f32 %v1460_v24, %v1441_v23 }
 0xa96   :  { %v1627_v20 = vpack.c.bf16 %v7160_v60, %v7160_v60 }
 0xa98   :  { %v1629_v26 = vrot.slane %v1627_v20, 3 }
 0xa9a   :  { %1630 = vrot.lane.b32.xlu0 %v1629_v26, %s6793_s2 }
 0xaa1   :  { %v1614_v51 = vpop.permute.xlu2 %1613 }
 0xaa2   :  { %v7165_v52 = vmul.f32 %v1614_v51, %v1595_v45 }
 0xaa4   :  { %v1781_v53 = vpack.c.bf16 %v7165_v52, %v7165_v52 }
 0xaa6   :  { %1783 = vrot.lane.b32.xlu1 %v1781_v53, %s6793_s2 }
 0xb0c   :  { %v1631_v36 = vpop.permute.xlu0 %1630 }
 0xb0d   :  { %5933 = vmatmul.msk.bf16.vlgmr.msrb.gmra.mxu2 %vm292_vm9, %v1631_v36  ;;  %5934 = vmatmul.msk.bf16.vlgmr.msrb.gmra.mxu3 %vm292_vm9, %v1631_v36 }
 0xb0e   :  { %5935 = vmatmul.msk.bf16.vlgmr.msra.gmra.mxu0 %vm292_vm9, %v1631_v36  ;;  %5936 = vmatmul.msk.bf16.vlgmr.msra.gmra.mxu1 %vm292_vm9, %v1631_v36 }
 0xb0f   :  { %2000 = vmatpush.bf16.msra.mxu0 %v7097_v41  ;;  %1964 = vmatpush.bf16.msrb.mxu2 %v7101_v42 }
 0xb10   :  { %1981 = vmatpush.bf16.msrb.mxu3 %v7105_v43  ;;  %2019 = vmatpush.bf16.msra.mxu1 %v7109_v44 }
 0xb18   :  { %v1784_v54 = vpop.permute.xlu1 %1783 }
 0xb1d   :  { %5940 = vmatmul.msk.bf16.vlgmr.msra.gmra.mxu2 %vm292_vm9, %v1784_v54  ;;  %5941 = vmatmul.msk.bf16.vlgmr.msra.gmra.mxu3 %vm292_vm9, %v1784_v54 }
 0xb1e   :  { %5942 = vmatmul.msk.bf16.vlgmr.msrb.gmra.mxu0 %vm292_vm9, %v1784_v54  ;;  %5943 = vmatmul.msk.bf16.vlgmr.msrb.gmra.mxu1 %vm292_vm9, %v1784_v54 }
 0xb1f   :  { %2160 = vmatpush.bf16.msrb.mxu0 %v7117_v46  ;;  %2124 = vmatpush.bf16.msra.mxu2 %v7121_v49 }
 0xb20   :  { %2141 = vmatpush.bf16.msra.mxu3 %v7125_v48  ;;  %2179 = vmatpush.bf16.msrb.mxu1 %v7129_v50 }
 0xb8b   :  { %v1676_v56 = vpop.f32.mrf.mxu0  ;;  %v1694_v57 = vpop.f32.mrf.mxu1 }
 0xb8c   :  { %1681 = vrot.lane.b32.xlu2 %v1676_v56, %s6788_s23 }
 0xb90   :  { %v1644_v58 = vpop.f32.mrf.mxu2  ;;  %v1658_v59 = vpop.f32.mrf.mxu3 }
 0xb91   :  { %v1648_v27 = vadd.f32 %v1644_v58, %v7191_v11 }
 0xb93   :  { %v1678_v62 = vpop.f32.mrf.mxu0  ;;  %v1696_v1 = vpop.f32.mrf.mxu1  ;;  %v5937_v17 = vmul.f32 -1.442695, %v1648_v27 }
 0xb94   :  { %1663 = vrot.lane.b32.xlu2 %v1658_v59, %s6791_s30 }
 0xb98   :  { %v1646_v7 = vpop.f32.mrf.mxu2  ;;  %v1660_v2 = vpop.f32.mrf.mxu3 }
 0xb9b   :  { %v1833_v10 = vpop.f32.mrf.mxu0  ;;  %v1852_v18 = vpop.f32.mrf.mxu1 }
 0xb9c   :  { %v1838_v0 = vrot.slane %v1833_v10, 2  ;;  %v1857_v58 = vrot.slane %v1852_v18, 2 }
 0xb9e   :  { %1839 = vrot.lane.b32.xlu0 %v1838_v0, %s6788_s23 }
 0xba0   :  { %v1797_v3 = vpop.f32.mrf.mxu2  ;;  %v1814_v5 = vpop.f32.mrf.mxu3 }
 0xba1   :  { %v1819_v40 = vrot.slane %v1814_v5, 2  ;;  %v1802_v26 = vrot.slane %v1797_v3, 2 }
 0xba3   :  { %v1835_v55 = vpop.f32.mrf.mxu0  ;;  %v1854_v6 = vpop.f32.mrf.mxu1  ;;  %v1804_v30 = vadd.f32 %v1802_v26, %v6941_v35 }
 0xba5   :  { %v5944_v45 = vmul.f32 -1.442695, %v1804_v30 }
 0xba8   :  { %v1799_v8 = vpop.f32.mrf.mxu2  ;;  %v1816_v13 = vpop.f32.mrf.mxu3 }
 0xbe6   :  { %v1682_v19 = vpop.permute.xlu2 %1681 }
 0xbe7   :  { %v1684_v32 = vadd.f32 %v1682_v19, %v7191_v11 }
 0xbe9   :  { %6358 = vtanh.f32 %v1684_v32 }
 0xbee   :  { %v1664_v3 = vpop.permute.xlu2 %1663 }
 0xbef   :  { %v6359_v12 = vpop.eup %6358  ;;  %v1666_v6 = vadd.f32 %v1664_v3, %v7191_v11 }
 0xbf0   :  { %1766 = vrot.lane.b32.xlu1 %v6359_v12, %s6790_s29 }
 0xbf1   :  { %v5938_v19 = vmul.f32 -1.442695, %v1666_v6 }
 0xbf8   :  { %1820 = vrot.lane.b32.xlu1 %v1819_v40, %s6791_s30 }
 0xc00   :  { %1699 = vrot.lane.b32.xlu1 %v1694_v57, %s6792_s1 }
 0xc10   :  { %v1840_v14 = vpop.permute.xlu0 %1839 }
 0xc11   :  { %v1842_v16 = vadd.f32 %v1840_v14, %v6941_v35 }
 0xc13   :  { %6360 = vtanh.f32 %v1842_v16 }
 0xc14   :  { %6362 = vpow2.f32 %v5937_v17 }
 0xc19   :  { %v6361_v47 = vpop.eup %6360 }
 0xc1a   :  { %1925 = vrot.lane.b32.xlu0 %v6361_v47, %s6790_s29  ;;  %v6363_v22 = vpop.eup %6362 }
 0xc1b   :  { %v1706_v23 = vadd.f32 1.0, %v6363_v22 }
 0xc1d   :  { %6364 = vrcp.f32 %v1706_v23  ;;  %v1718_v37 = vand.u32 2147483648, %v1706_v23  ;;  %vm1712_vm7 = vweird.f32 %v1706_v23  ;;  %v1716_v38 = vand.u32 2147483647, %v1706_v23 }
 0xc1e   :  { %6366 = vpow2.f32 %v5944_v45 }
 0xc1f   :  { %v1719_v53 = vor.u32 1.1754944e-38, %v1718_v37  ;;  %vm1717_vm10 = vcmp.eq.f32.partialorder %v1716_v38, 8.507059e+37 }
 0xc23   :  { %v6365_v24 = vpop.eup %6364 }
 0xc24   :  { %v1708_v20 = vmul.f32 %v6365_v24, %v1706_v23  ;;  %vm1713_vm6 = vweird.f32 %v6365_v24  ;;  %v6367_v57 = vpop.eup %6366 }
 0xc25   :  { %vm1714_vm8 = vmor %vm1712_vm7, %vm1713_vm6  ;;  %v1865_v59 = vadd.f32 1.0, %v6367_v57 }
 0xc26   :  { %v1709_v25 = vsub.f32 1.0, %v1708_v20 }
 0xc27   :  { %6368 = vrcp.f32 %v1865_v59  ;;  %v1877_v0 = vand.u32 2147483648, %v1865_v59  ;;  %vm1871_vm12 = vweird.f32 %v1865_v59  ;;  %v1875_v5 = vand.u32 2147483647, %v1865_v59 }
 0xc28   :  { %v1710_v28 = vmul.f32 %v6365_v24, %v1709_v25  ;;  %6370 = vpow2.f32 %v5938_v19  ;;  %v1762_v25 = vrot.slane %v7149_v29, 6 }
 0xc29   :  { %v1878_v8 = vor.u32 1.1754944e-38, %v1877_v0  ;;  %vm1876_vm14 = vcmp.eq.f32.partialorder %v1875_v5, 8.507059e+37 }
 0xc2a   :  { %v1711_v33 = vadd.f32 %v6365_v24, %v1710_v28 }
 0xc2c   :  { %v1715_v51 = vsel %vm1714_vm8, %v6365_v24, %v1711_v33 }
 0xc2d   :  { %v1720_v54 = vsel %vm1717_vm10, %v1719_v53, %v1715_v51  ;;  %v6369_v62 = vpop.eup %6368 }
 0xc2e   :  { %v1867_v1 = vmul.f32 %v6369_v62, %v1865_v59  ;;  %vm1872_vm11 = vweird.f32 %v6369_v62  ;;  %v6371_v32 = vpop.eup %6370 }
 0xc2f   :  { %vm1873_vm13 = vmor %vm1871_vm12, %vm1872_vm11  ;;  %v1725_v12 = vadd.f32 1.0, %v6371_v32 }
 0xc30   :  { %v1868_v7 = vsub.f32 1.0, %v1867_v1 }
 0xc31   :  { %6372 = vrcp.f32 %v1725_v12  ;;  %v1737_v17 = vand.u32 2147483648, %v1725_v12  ;;  %vm1731_vm0 = vweird.f32 %v1725_v12  ;;  %v1735_v22 = vand.u32 2147483647, %v1725_v12 }
 0xc32   :  { %v1869_v2 = vmul.f32 %v6369_v62, %v1868_v7 }
 0xc33   :  { %v1738_v24 = vor.u32 1.1754944e-38, %v1737_v17  ;;  %vm1736_vm2 = vcmp.eq.f32.partialorder %v1735_v22, 8.507059e+37 }
 0xc34   :  { %v1870_v10 = vadd.f32 %v6369_v62, %v1869_v2  ;;  %v1921_v2 = vrot.slane %v7154_v63, 2 }
 0xc36   :  { %v1874_v55 = vsel %vm1873_vm13, %v6369_v62, %v1870_v10 }
 0xc37   :  { %v1879_v13 = vsel %vm1876_vm14, %v1878_v8, %v1874_v55  ;;  %v6373_v40 = vpop.eup %6372 }
 0xc38   :  { %v1727_v14 = vmul.f32 %v6373_v40, %v1725_v12  ;;  %vm1732_vm15 = vweird.f32 %v6373_v40 }
 0xc39   :  { %vm1733_vm1 = vmor %vm1731_vm0, %vm1732_vm15 }
 0xc3a   :  { %v1728_v16 = vsub.f32 1.0, %v1727_v14 }
 0xc3c   :  { %v1729_v47 = vmul.f32 %v6373_v40, %v1728_v16 }
 0xc3e   :  { %v1730_v27 = vadd.f32 %v6373_v40, %v1729_v47 }
 0xc40   :  { %v1734_v23 = vsel %vm1733_vm1, %v6373_v40, %v1730_v27 }
 0xc41   :  { %v1739_v20 = vsel %vm1736_vm2, %v1738_v24, %v1734_v23 }
 0xc42   :  { %v1764_v26 = vmul.f32 %v1762_v25, %v1739_v20 }
 0xc62   :  { %v1767_v36 = vpop.permute.xlu1 %1766 }
 0xc63   :  { %v1769_v56 = vmul.f32 %v1767_v36, %v1720_v54 }
 0xc65   :  { %1771 = vrot.lane.b32.xlu2 %v1769_v56, %s6791_s30 }
 0xc6a   :  { %v1821_v37 = vpop.permute.xlu1 %1820 }
 0xc6b   :  { %v1823_v38 = vadd.f32 %v1821_v37, %v6941_v35 }
 0xc6d   :  { %1858 = vrot.lane.b32.xlu2 %v1857_v58, %s6792_s1  ;;  %v5945_v45 = vmul.f32 -1.442695, %v1823_v38 }
 0xc72   :  { %v1700_v5 = vpop.permute.xlu1 %1699 }
 0xc73   :  { %v1702_v6 = vadd.f32 %v1700_v5, %v7191_v11 }
 0xc75   :  { %v5939_v8 = vmul.f32 -1.442695, %v1702_v6 }
 0xc8c   :  { %v1926_v18 = vpop.permute.xlu0 %1925 }
 0xc8d   :  { %v1928_v21 = vmul.f32 %v1926_v18, %v1879_v13 }
 0xc8f   :  { %1930 = vrot.lane.b32.xlu0 %v1928_v21, %s6791_s30 }
 0xcbf   :  { %v1772_v28 = vpop.permute.xlu2 %1771 }
 0xcc0   :  { %v7206_v30 = vadd.f32 %v1772_v28, %v1764_v26 }
 0xcc2   :  { %6374 = vtanh.f32 %v7206_v30 }
 0xcc3   :  { %6376 = vpow2.f32 %v5945_v45 }
 0xcc7   :  { %v1859_v24 = vpop.permute.xlu2 %1858 }
 0xcc8   :  { %v6375_v33 = vpop.eup %6374  ;;  %v1861_v20 = vadd.f32 %v1859_v24, %v6941_v35 }
 0xcc9   :  { %1777 = vrot.lane.b32.xlu0 %v6375_v33, %s6788_s23  ;;  %v6377_v51 = vpop.eup %6376 }
 0xcca   :  { %v1884_v53 = vadd.f32 1.0, %v6377_v51  ;;  %v5946_v25 = vmul.f32 -1.442695, %v1861_v20 }
 0xccc   :  { %6378 = vrcp.f32 %v1884_v53  ;;  %v1896_v58 = vand.u32 2147483648, %v1884_v53  ;;  %vm1890_vm4 = vweird.f32 %v1884_v53  ;;  %v1894_v59 = vand.u32 2147483647, %v1884_v53 }
 0xcce   :  { %v1897_v1 = vor.u32 1.1754944e-38, %v1896_v58  ;;  %vm1895_vm6 = vcmp.eq.f32.partialorder %v1894_v59, 8.507059e+37 }
 0xcd2   :  { %v6379_v36 = vpop.eup %6378 }
 0xcd3   :  { %v1886_v54 = vmul.f32 %v6379_v36, %v1884_v53  ;;  %vm1891_vm3 = vweird.f32 %v6379_v36 }
 0xcd4   :  { %vm1892_vm5 = vmor %vm1890_vm4, %vm1891_vm3 }
 0xcd5   :  { %v1887_v29 = vsub.f32 1.0, %v1886_v54 }
 0xcd7   :  { %v1888_v56 = vmul.f32 %v6379_v36, %v1887_v29 }
 0xcd9   :  { %v1889_v57 = vadd.f32 %v6379_v36, %v1888_v56 }
 0xcdb   :  { %v1893_v62 = vsel %vm1892_vm5, %v6379_v36, %v1889_v57 }
 0xcdc   :  { %v1898_v7 = vsel %vm1895_vm6, %v1897_v1, %v1893_v62 }
 0xcdd   :  { %v1923_v10 = vmul.f32 %v1921_v2, %v1898_v7 }
 0xd01   :  { %v1931_v0 = vpop.permute.xlu0 %1930 }
 0xd02   :  { %v7212_v3 = vadd.f32 %v1931_v0, %v1923_v10 }
 0xd04   :  { %6380 = vtanh.f32 %v7212_v3 }
 0xd05   :  { %6382 = vpow2.f32 %v5939_v8 }
 0xd0a   :  { %v6381_v55 = vpop.eup %6380 }
 0xd0b   :  { %1936 = vrot.lane.b32.xlu1 %v6381_v55, %s6788_s23  ;;  %v6383_v18 = vpop.eup %6382 }
 0xd0c   :  { %v1745_v13 = vadd.f32 1.0, %v6383_v18 }
 0xd0e   :  { %6384 = vrcp.f32 %v1745_v13  ;;  %v1757_v40 = vand.u32 2147483648, %v1745_v13  ;;  %vm1751_vm8 = vweird.f32 %v1745_v13  ;;  %v1755_v14 = vand.u32 2147483647, %v1745_v13 }
 0xd0f   :  { %6386 = vpow2.f32 %v5946_v25 }
 0xd10   :  { %v1758_v47 = vor.u32 1.1754944e-38, %v1757_v40  ;;  %vm1756_vm11 = vcmp.eq.f32.partialorder %v1755_v14, 8.507059e+37 }
 0xd14   :  { %v6385_v21 = vpop.eup %6384 }
 0xd15   :  { %v1747_v19 = vmul.f32 %v6385_v21, %v1745_v13  ;;  %vm1752_vm7 = vweird.f32 %v6385_v21  ;;  %v6387_v26 = vpop.eup %6386 }
 0xd16   :  { %vm1753_vm10 = vmor %vm1751_vm8, %vm1752_vm7  ;;  %v1904_v28 = vadd.f32 1.0, %v6387_v26 }
 0xd17   :  { %v1748_v63 = vsub.f32 1.0, %v1747_v19 }
 0xd18   :  { %6388 = vrcp.f32 %v1904_v28  ;;  %v1916_v53 = vand.u32 2147483648, %v1904_v28  ;;  %vm1910_vm13 = vweird.f32 %v1904_v28  ;;  %v1914_v36 = vand.u32 2147483647, %v1904_v28 }
 0xd19   :  { %v1749_v32 = vmul.f32 %v6385_v21, %v1748_v63 }
 0xd1a   :  { %v1917_v29 = vor.u32 1.1754944e-38, %v1916_v53  ;;  %vm1915_vm15 = vcmp.eq.f32.partialorder %v1914_v36, 8.507059e+37 }
 0xd1b   :  { %v1750_v12 = vadd.f32 %v6385_v21, %v1749_v32 }
 0xd1d   :  { %v1754_v16 = vsel %vm1753_vm10, %v6385_v21, %v1750_v12 }
 0xd1e   :  { %v1759_v27 = vsel %vm1756_vm11, %v1758_v47, %v1754_v16  ;;  %v6389_v33 = vpop.eup %6388 }
 0xd1f   :  { %v1906_v37 = vmul.f32 %v6389_v33, %v1904_v28  ;;  %vm1911_vm12 = vweird.f32 %v6389_v33 }
 0xd20   :  { %vm1912_vm14 = vmor %vm1910_vm13, %vm1911_vm12 }
 0xd21   :  { %v1907_v38 = vsub.f32 1.0, %v1906_v37 }
 0xd23   :  { %v1908_v45 = vmul.f32 %v6389_v33, %v1907_v38 }
 0xd25   :  { %v1909_v51 = vadd.f32 %v6389_v33, %v1908_v45 }
 0xd27   :  { %v1913_v54 = vsel %vm1912_vm14, %v6389_v33, %v1909_v51 }
 0xd28   :  { %v1918_v56 = vsel %vm1915_vm15, %v1917_v29, %v1913_v54 }
 0xd3b   :  { %v1778_v17 = vpop.permute.xlu0 %1777 }
 0xd3c   :  { %v7217_v22 = vmul.f32 %v1778_v17, %v1759_v27 }
 0xd3e   :  { %v1950_v23 = vpack.c.bf16 %v7217_v22, %v7217_v22 }
 0xd40   :  { %1952 = vrot.lane.b32.xlu2 %v1950_v23, %s6793_s2 }
 0xd7d   :  { %v1937_v57 = vpop.permute.xlu1 %1936 }
 0xd7e   :  { %v7223_v58 = vmul.f32 %v1937_v57, %v1918_v56 }
 0xd80   :  { %v2109_v59 = vpack.c.bf16 %v7223_v58, %v7223_v58 }
 0xd82   :  { %v2111_v62 = vrot.slane %v2109_v59, 3 }
 0xd84   :  { %2112 = vrot.lane.b32.xlu0 %v2111_v62, %s6793_s2 }
 0xd9a   :  { %v1953_v1 = vpop.permute.xlu2 %1952 }
 0xd9b   :  { %5947 = vmatmul.msk.bf16.vlgmr.msrb.gmra.mxu2 %vm292_vm9, %v1953_v1  ;;  %5948 = vmatmul.msk.bf16.vlgmr.msrb.gmra.mxu3 %vm292_vm9, %v1953_v1 }
 0xd9c   :  { %5949 = vmatmul.msk.bf16.vlgmr.msra.gmra.mxu0 %vm292_vm9, %v1953_v1  ;;  %5950 = vmatmul.msk.bf16.vlgmr.msra.gmra.mxu1 %vm292_vm9, %v1953_v1 }
 0xd9d   :  { %2330 = vmatpush.bf16.msra.mxu0 %v7097_v41  ;;  %2294 = vmatpush.bf16.msrb.mxu2 %v7101_v42 }
 0xd9e   :  { %2311 = vmatpush.bf16.msrb.mxu3 %v7105_v43  ;;  %2349 = vmatpush.bf16.msra.mxu1 %v7109_v44 }
 0xdf6   :  { %v2113_v7 = vpop.permute.xlu0 %2112 }
 0xdf7   :  { %5954 = vmatmul.msk.bf16.vlgmr.msra.gmra.mxu2 %vm292_vm9, %v2113_v7  ;;  %5955 = vmatmul.msk.bf16.vlgmr.msra.gmra.mxu3 %vm292_vm9, %v2113_v7 }
 0xdf8   :  { %5956 = vmatmul.msk.bf16.vlgmr.msrb.gmra.mxu0 %vm292_vm9, %v2113_v7  ;;  %5957 = vmatmul.msk.bf16.vlgmr.msrb.gmra.mxu1 %vm292_vm9, %v2113_v7 }
 0xdf9   :  { %2490 = vmatpush.bf16.msrb.mxu0 %v7117_v46  ;;  %2454 = vmatpush.bf16.msra.mxu2 %v7121_v49 }
 0xdfa   :  { %2471 = vmatpush.bf16.msra.mxu3 %v7125_v48  ;;  %2509 = vmatpush.bf16.msrb.mxu1 %v7129_v50 }
 0xe19   :  { %v2002_v41 = vpop.f32.mrf.mxu0  ;;  %v2021_v42 = vpop.f32.mrf.mxu1 }
 0xe1a   :  { %v2007_v43 = vrot.slane %v2002_v41, 6  ;;  %v2026_v14 = vrot.slane %v2021_v42, 6 }
 0xe1c   :  { %2008 = vrot.lane.b32.xlu1 %v2007_v43, %s6788_s23 }
 0xe1e   :  { %v1966_v44 = vpop.f32.mrf.mxu2  ;;  %v1983_v2 = vpop.f32.mrf.mxu3 }
 0xe1f   :  { %v1988_v5 = vrot.slane %v1983_v2, 6  ;;  %v1971_v27 = vrot.slane %v1966_v44, 6 }
 0xe21   :  { %v2004_v10 = vpop.f32.mrf.mxu0  ;;  %v2023_v0 = vpop.f32.mrf.mxu1  ;;  %v1973_v17 = vadd.f32 %v1971_v27, %v7191_v11 }
 0xe23   :  { %v5951_v24 = vmul.f32 -1.442695, %v1973_v17 }
 0xe24   :  { %1989 = vrot.lane.b32.xlu1 %v1988_v5, %s6791_s30 }
 0xe26   :  { %v1968_v55 = vpop.f32.mrf.mxu2  ;;  %v1985_v46 = vpop.f32.mrf.mxu3 }
 0xe75   :  { %v2162_v6 = vpop.f32.mrf.mxu0  ;;  %v2181_v49 = vpop.f32.mrf.mxu1 }
 0xe76   :  { %v2167_v8 = vrot.slane %v2162_v6, 4  ;;  %v2186_v7 = vrot.slane %v2181_v49, 4 }
 0xe78   :  { %2168 = vrot.lane.b32.xlu2 %v2167_v8, %s6788_s23 }
 0xe7a   :  { %v2126_v48 = vpop.f32.mrf.mxu2  ;;  %v2143_v50 = vpop.f32.mrf.mxu3 }
 0xe7b   :  { %v2148_v40 = vrot.slane %v2143_v50, 4  ;;  %v2131_v38 = vrot.slane %v2126_v48, 4 }
 0xe7d   :  { %v2164_v18 = vpop.f32.mrf.mxu0  ;;  %v2183_v13 = vpop.f32.mrf.mxu1  ;;  %v2133_v53 = vadd.f32 %v2131_v38, %v6941_v35 }
 0xe7f   :  { %v5958_v56 = vmul.f32 -1.442695, %v2133_v53 }
 0xe82   :  { %v2128_v21 = vpop.f32.mrf.mxu2  ;;  %v2145_v19 = vpop.f32.mrf.mxu3 }
 0xe8e   :  { %v2009_v63 = vpop.permute.xlu1 %2008 }
 0xe8f   :  { %v2011_v32 = vadd.f32 %v2009_v63, %v7191_v11 }
 0xe91   :  { %6390 = vtanh.f32 %v2011_v32 }
 0xe96   :  { %v1990_v48 = vpop.permute.xlu1 %1989 }
 0xe97   :  { %v6391_v12 = vpop.eup %6390  ;;  %v1992_v50 = vadd.f32 %v1990_v48, %v7191_v11 }
 0xe98   :  { %2094 = vrot.lane.b32.xlu0 %v6391_v12, %s6790_s29 }
 0xe99   :  { %v5952_v18 = vmul.f32 -1.442695, %v1992_v50 }
 0xea0   :  { %2149 = vrot.lane.b32.xlu0 %v2148_v40, %s6791_s30 }
 0xea8   :  { %2027 = vrot.lane.b32.xlu0 %v2026_v14, %s6792_s1 }
 0xed2   :  { %v2169_v16 = vpop.permute.xlu2 %2168 }
 0xed3   :  { %v2171_v47 = vadd.f32 %v2169_v16, %v6941_v35 }
 0xed5   :  { %6392 = vtanh.f32 %v2171_v47 }
 0xed6   :  { %6394 = vpow2.f32 %v5951_v24 }
 0xedb   :  { %v6393_v23 = vpop.eup %6392 }
 0xedc   :  { %2254 = vrot.lane.b32.xlu2 %v6393_v23, %s6790_s29  ;;  %v6395_v20 = vpop.eup %6394 }
 0xedd   :  { %v2034_v25 = vadd.f32 1.0, %v6395_v20 }
 0xedf   :  { %6396 = vrcp.f32 %v2034_v25  ;;  %v2046_v51 = vand.u32 2147483648, %v2034_v25  ;;  %vm2040_vm1 = vweird.f32 %v2034_v25  ;;  %v2044_v36 = vand.u32 2147483647, %v2034_v25 }
 0xee0   :  { %6398 = vpow2.f32 %v5958_v56 }
 0xee1   :  { %v2047_v29 = vor.u32 1.1754944e-38, %v2046_v51  ;;  %vm2045_vm3 = vcmp.eq.f32.partialorder %v2044_v36, 8.507059e+37 }
 0xee5   :  { %v6397_v26 = vpop.eup %6396 }
 0xee6   :  { %v2036_v28 = vmul.f32 %v6397_v26, %v2034_v25  ;;  %vm2041_vm0 = vweird.f32 %v6397_v26  ;;  %v6399_v1 = vpop.eup %6398 }
 0xee7   :  { %vm2042_vm2 = vmor %vm2040_vm1, %vm2041_vm0  ;;  %v2194_v41 = vadd.f32 1.0, %v6399_v1  ;;  %v2250_v1 = vrot.slane %v7212_v3, 2 }
 0xee8   :  { %v2037_v33 = vsub.f32 1.0, %v2036_v28 }
 0xee9   :  { %6400 = vrcp.f32 %v2194_v41  ;;  %v2206_v0 = vand.u32 2147483648, %v2194_v41  ;;  %vm2200_vm5 = vweird.f32 %v2194_v41  ;;  %v2204_v5 = vand.u32 2147483647, %v2194_v41 }
 0xeea   :  { %v2038_v37 = vmul.f32 %v6397_v26, %v2037_v33  ;;  %6402 = vpow2.f32 %v5952_v18  ;;  %v2090_v33 = vrot.slane %v7206_v30, 6 }
 0xeeb   :  { %v2207_v46 = vor.u32 1.1754944e-38, %v2206_v0  ;;  %vm2205_vm7 = vcmp.eq.f32.partialorder %v2204_v5, 8.507059e+37 }
 0xeec   :  { %v2039_v45 = vadd.f32 %v6397_v26, %v2038_v37 }
 0xeee   :  { %v2043_v54 = vsel %vm2042_vm2, %v6397_v26, %v2039_v45 }
 0xeef   :  { %v2048_v59 = vsel %vm2045_vm3, %v2047_v29, %v2043_v54  ;;  %v6401_v42 = vpop.eup %6400 }
 0xef0   :  { %v2196_v43 = vmul.f32 %v6401_v42, %v2194_v41  ;;  %vm2201_vm4 = vweird.f32 %v6401_v42  ;;  %v6403_v13 = vpop.eup %6402 }
 0xef1   :  { %vm2202_vm6 = vmor %vm2200_vm5, %vm2201_vm4  ;;  %v2053_v21 = vadd.f32 1.0, %v6403_v13 }
 0xef2   :  { %v2197_v44 = vsub.f32 1.0, %v2196_v43 }
 0xef3   :  { %6404 = vrcp.f32 %v2053_v21  ;;  %v2065_v23 = vand.u32 2147483648, %v2053_v21  ;;  %vm2059_vm10 = vweird.f32 %v2053_v21  ;;  %v2063_v24 = vand.u32 2147483647, %v2053_v21 }
 0xef4   :  { %v2198_v2 = vmul.f32 %v6401_v42, %v2197_v44 }
 0xef5   :  { %v2066_v26 = vor.u32 1.1754944e-38, %v2065_v23  ;;  %vm2064_vm12 = vcmp.eq.f32.partialorder %v2063_v24, 8.507059e+37 }
 0xef6   :  { %v2199_v10 = vadd.f32 %v6401_v42, %v2198_v2 }
 0xef8   :  { %v2203_v55 = vsel %vm2202_vm6, %v6401_v42, %v2199_v10 }
 0xef9   :  { %v2208_v8 = vsel %vm2205_vm7, %v2207_v46, %v2203_v55  ;;  %v6405_v12 = vpop.eup %6404 }
 0xefa   :  { %v2055_v40 = vmul.f32 %v6405_v12, %v2053_v21  ;;  %vm2060_vm8 = vweird.f32 %v6405_v12 }
 0xefb   :  { %vm2061_vm11 = vmor %vm2059_vm10, %vm2060_vm8 }
 0xefc   :  { %v2056_v16 = vsub.f32 1.0, %v2055_v40 }
 0xefe   :  { %v2057_v27 = vmul.f32 %v6405_v12, %v2056_v16 }
 0xf00   :  { %v2058_v17 = vadd.f32 %v6405_v12, %v2057_v27 }
 0xf02   :  { %v2062_v20 = vsel %vm2061_vm11, %v6405_v12, %v2058_v17 }
 0xf03   :  { %v2067_v28 = vsel %vm2064_vm12, %v2066_v26, %v2062_v20 }
 0xf04   :  { %v2092_v38 = vmul.f32 %v2090_v33, %v2067_v28 }
 0xf0a   :  { %v2095_v57 = vpop.permute.xlu0 %2094 }
 0xf0b   :  { %v2097_v62 = vmul.f32 %v2095_v57, %v2048_v59 }
 0xf0d   :  { %2099 = vrot.lane.b32.xlu1 %v2097_v62, %s6791_s30 }
 0xf12   :  { %v2150_v19 = vpop.permute.xlu0 %2149 }
 0xf13   :  { %v2152_v63 = vadd.f32 %v2150_v19, %v6941_v35 }
 0xf15   :  { %2187 = vrot.lane.b32.xlu1 %v2186_v7, %s6792_s1  ;;  %v5959_v32 = vmul.f32 -1.442695, %v2152_v63 }
 0xf17   :  { %6406 = vpow2.f32 %v5959_v32 }
 0xf1a   :  { %v2028_v44 = vpop.permute.xlu0 %2027 }
 0xf1b   :  { %v2030_v2 = vadd.f32 %v2028_v44, %v7191_v11 }
 0xf1d   :  { %v6407_v14 = vpop.eup %6406  ;;  %v5953_v10 = vmul.f32 -1.442695, %v2030_v2 }
 0xf1e   :  { %v2213_v47 = vadd.f32 1.0, %v6407_v14 }
 0xf20   :  { %6408 = vrcp.f32 %v2213_v47  ;;  %v2225_v56 = vand.u32 2147483648, %v2213_v47  ;;  %vm2219_vm14 = vweird.f32 %v2213_v47  ;;  %v2223_v57 = vand.u32 2147483647, %v2213_v47 }
 0xf22   :  { %v2226_v30 = vor.u32 1.1754944e-38, %v2225_v56  ;;  %vm2224_vm0 = vcmp.eq.f32.partialorder %v2223_v57, 8.507059e+37  ;;  %v6752_v56 = vld [vmem:[%s6824_s10] sm:$0xff]  ;;  %s6794_s10 = smov 21  }
 0xf23   :  { %v6753_v57 = vld [vmem:[%s6843_s22] sm:$0xff]  ;;  %s6800_s22 = smov 23  }
 0xf24   :  { %s7454_s4 = sld [smem:[%s8024_s0 + %s6800_s22]]  }
 0xf26   :  { %v6409_v25 = vpop.eup %6408 }
 0xf27   :  { %v2215_v37 = vmul.f32 %v6409_v25, %v2213_v47  ;;  %vm2220_vm13 = vweird.f32 %v6409_v25 }
 0xf28   :  { %vm2221_vm15 = vmor %vm2219_vm14, %vm2220_vm13 }
 0xf29   :  { %v2216_v53 = vsub.f32 1.0, %v2215_v37 }
 0xf2b   :  { %v2217_v36 = vmul.f32 %v6409_v25, %v2216_v53 }
 0xf2d   :  { %v2218_v29 = vadd.f32 %v6409_v25, %v2217_v36 }
 0xf2f   :  { %v2222_v59 = vsel %vm2221_vm15, %v6409_v25, %v2218_v29  ;;  %v6751_v29 = vld [vmem:[%s6829_s14] sm:$0xff]  ;;  %s7448_s14 = sld [smem:[%s8024_s0 + %s6799_s27]]  }
 0xf30   :  { %v2227_v62 = vsel %vm2224_vm0, %v2226_v30, %v2222_v59  ;;  %v6754_v59 = vld [vmem:[%s6890_s7] sm:$0xff]  ;;  %s6796_s7 = smov 18   ;;  %s7502_s27 = sld [smem:[%s8024_s0 + %s6804_s21]]  }
 0xf31   :  { %v2252_v7 = vmul.f32 %v2250_v1, %v2227_v62  ;;  %v6755_v62 = vld [vmem:[%s6861_s26] sm:$0xff]  ;;  %s5789_s26 = sld [smem:[%s8024_s0 + %s6794_s10]]  }
 0xf32   :  { %v6756_v1 = vld [vmem:[%s6911_s17] sm:$0xff]  ;;  %s7423_s11 = sld [smem:[%s8024_s0 + %s6796_s7]]   ;;  %s6803_s17 = smov 15  }
 0xf33   :  { %s7490_s20 = sld [smem:[%s8024_s0 + %s6803_s17]]  }
 0xf34   :  { %s7527_s7 = sld [smem:[%s8024_s0 + %s6806_s3]]  }
 0xf36   :  { %v2255_v6 = vpop.permute.xlu2 %2254 }
 0xf37   :  { %v2257_v49 = vmul.f32 %v2255_v6, %v2208_v8 }
 0xf39   :  { %2259 = vrot.lane.b32.xlu2 %v2257_v49, %s6791_s30 }
 0xf7f   :  { %v2100_v45 = vpop.permute.xlu1 %2099 }
 0xf80   :  { %v7261_v51 = vadd.f32 %v2100_v45, %v2092_v38 }
 0xf82   :  { %6410 = vtanh.f32 %v7261_v51 }
 0xf87   :  { %v2188_v8 = vpop.permute.xlu1 %2187 }
 0xf88   :  { %v6411_v54 = vpop.eup %6410  ;;  %v2190_v50 = vadd.f32 %v2188_v8, %v6941_v35 }
 0xf89   :  { %2105 = vrot.lane.b32.xlu2 %v6411_v54, %s6788_s23 }
 0xf8a   :  { %v5960_v19 = vmul.f32 -1.442695, %v2190_v50 }
 0xf93   :  { %v2260_v41 = vpop.permute.xlu2 %2259 }
 0xf94   :  { %v7266_v42 = vadd.f32 %v2260_v41, %v2252_v7  ;;  %v6757_v7 = vld [vmem:[%s6903_s12] sm:$0xff] }
 0xf95   :  { %v6758_v41 = vld [vmem:[%s6934_s28] sm:$0xff]  ;;  %s6805_s28 = smov 19  }
 0xf96   :  { %6412 = vtanh.f32 %v7266_v42 }
 0xf97   :  { %6414 = vpow2.f32 %v5953_v10 }
 0xf9c   :  { %v6413_v43 = vpop.eup %6412 }
 0xf9d   :  { %2265 = vrot.lane.b32.xlu0 %v6413_v43, %s6788_s23  ;;  %v6415_v0 = vpop.eup %6414 }
 0xf9e   :  { %v2073_v5 = vadd.f32 1.0, %v6415_v0 }
 0xfa0   :  { %6416 = vrcp.f32 %v2073_v5  ;;  %v2085_v48 = vand.u32 2147483648, %v2073_v5  ;;  %vm2079_vm2 = vweird.f32 %v2073_v5  ;;  %v2083_v18 = vand.u32 2147483647, %v2073_v5 }
 0xfa1   :  { %6418 = vpow2.f32 %v5960_v19 }
 0xfa2   :  { %v2086_v21 = vor.u32 1.1754944e-38, %v2085_v48  ;;  %vm2084_vm4 = vcmp.eq.f32.partialorder %v2083_v18, 8.507059e+37 }
 0xfa6   :  { %v6417_v55 = vpop.eup %6416 }
 0xfa7   :  { %v2075_v46 = vmul.f32 %v6417_v55, %v2073_v5  ;;  %vm2080_vm1 = vweird.f32 %v6417_v55  ;;  %v6419_v16 = vpop.eup %6418 }
 0xfa8   :  { %vm2081_vm3 = vmor %vm2079_vm2, %vm2080_vm1  ;;  %v2233_v47 = vadd.f32 1.0, %v6419_v16 }
 0xfa9   :  { %v2076_v3 = vsub.f32 1.0, %v2075_v46 }
 0xfaa   :  { %6420 = vrcp.f32 %v2233_v47  ;;  %v2245_v25 = vand.u32 2147483648, %v2233_v47  ;;  %vm2239_vm6 = vweird.f32 %v2233_v47  ;;  %v2243_v26 = vand.u32 2147483647, %v2233_v47 }
 0xfab   :  { %v2077_v6 = vmul.f32 %v6417_v55, %v2076_v3 }
 0xfac   :  { %v2246_v33 = vor.u32 1.1754944e-38, %v2245_v25  ;;  %vm2244_vm8 = vcmp.eq.f32.partialorder %v2243_v26, 8.507059e+37 }
 0xfad   :  { %v2078_v49 = vadd.f32 %v6417_v55, %v2077_v6 }
 0xfaf   :  { %v2082_v13 = vsel %vm2081_vm3, %v6417_v55, %v2078_v49 }
 0xfb0   :  { %v2087_v63 = vsel %vm2084_vm4, %v2086_v21, %v2082_v13  ;;  %v6421_v27 = vpop.eup %6420 }
 0xfb1   :  { %v2235_v17 = vmul.f32 %v6421_v27, %v2233_v47  ;;  %vm2240_vm5 = vweird.f32 %v6421_v27 }
 0xfb2   :  { %vm2241_vm7 = vmor %vm2239_vm6, %vm2240_vm5 }
 0xfb3   :  { %v2236_v23 = vsub.f32 1.0, %v2235_v17 }
 0xfb5   :  { %v2237_v24 = vmul.f32 %v6421_v27, %v2236_v23 }
 0xfb7   :  { %v2238_v20 = vadd.f32 %v6421_v27, %v2237_v24 }
 0xfb9   :  { %v2242_v28 = vsel %vm2241_vm7, %v6421_v27, %v2238_v20 }
 0xfba   :  { %v2247_v37 = vsel %vm2244_vm8, %v2246_v33, %v2242_v28 }
 0xfe3   :  { %v2106_v32 = vpop.permute.xlu2 %2105 }
 0xfe4   :  { %v7272_v12 = vmul.f32 %v2106_v32, %v2087_v63 }
 0xfe6   :  { %v2279_v40 = vpack.c.bf16 %v7272_v12, %v7272_v12 }
 0xfe8   :  { %v2281_v14 = vrot.slane %v2279_v40, 1 }
 0xfea   :  { %2282 = vrot.lane.b32.xlu1 %v2281_v14, %s6793_s2 }
0x100f   :  { %v2266_v38 = vpop.permute.xlu0 %2265 }
0x1010   :  { %v7277_v45 = vmul.f32 %v2266_v38, %v2247_v37 }
0x1012   :  { %v2439_v53 = vpack.c.bf16 %v7277_v45, %v7277_v45 }
0x1014   :  { %v2441_v36 = vrot.slane %v2439_v53, 2 }
0x1016   :  { %2442 = vrot.lane.b32.xlu2 %v2441_v36, %s6793_s2 }
0x105c   :  { %v2283_v54 = vpop.permute.xlu1 %2282 }
0x105d   :  { %5961 = vmatmul.msk.bf16.vlgmr.msrb.gmra.mxu2 %vm292_vm9, %v2283_v54  ;;  %5962 = vmatmul.msk.bf16.vlgmr.msrb.gmra.mxu3 %vm292_vm9, %v2283_v54 }
0x105e   :  { %5963 = vmatmul.msk.bf16.vlgmr.msra.gmra.mxu0 %vm292_vm9, %v2283_v54  ;;  %5964 = vmatmul.msk.bf16.vlgmr.msra.gmra.mxu1 %vm292_vm9, %v2283_v54 }
0x105f   :  { %2660 = vmatpush.bf16.msra.mxu0 %v6751_v29  ;;  %2624 = vmatpush.bf16.msrb.mxu2 %v6752_v56 }
0x1060   :  { %2641 = vmatpush.bf16.msrb.mxu3 %v6753_v57  ;;  %2679 = vmatpush.bf16.msra.mxu1 %v6754_v59 }
0x1070   :  { %v2443_v30 = vpop.permute.xlu2 %2442 }
0x1071   :  { %5968 = vmatmul.msk.bf16.vlgmr.msra.gmra.mxu2 %vm292_vm9, %v2443_v30  ;;  %5969 = vmatmul.msk.bf16.vlgmr.msra.gmra.mxu3 %vm292_vm9, %v2443_v30 }
0x1072   :  { %5970 = vmatmul.msk.bf16.vlgmr.msrb.gmra.mxu0 %vm292_vm9, %v2443_v30  ;;  %5971 = vmatmul.msk.bf16.vlgmr.msrb.gmra.mxu1 %vm292_vm9, %v2443_v30 }
0x1073   :  { %2816 = vmatpush.bf16.msrb.mxu0 %v6755_v62  ;;  %2784 = vmatpush.bf16.msra.mxu2 %v6756_v1 }
0x1074   :  { %2798 = vmatpush.bf16.msra.mxu3 %v6757_v7  ;;  %2834 = vmatpush.bf16.msrb.mxu1 %v6758_v41 }
0x10db   :  { %v2332_v43 = vpop.f32.mrf.mxu0  ;;  %v2351_v44 = vpop.f32.mrf.mxu1 }
0x10dc   :  { %v2337_v2 = vrot.slane %v2332_v43, 4  ;;  %v2356_v17 = vrot.slane %v2351_v44, 4 }
0x10de   :  { %2338 = vrot.lane.b32.xlu0 %v2337_v2, %s6788_s23 }
0x10e0   :  { %v2296_v10 = vpop.f32.mrf.mxu2  ;;  %v2313_v0 = vpop.f32.mrf.mxu3 }
0x10e1   :  { %v2318_v46 = vrot.slane %v2313_v0, 4  ;;  %v2301_v24 = vrot.slane %v2296_v10, 4 }
0x10e3   :  { %v2334_v5 = vpop.f32.mrf.mxu0  ;;  %v2353_v55 = vpop.f32.mrf.mxu1  ;;  %v2303_v20 = vadd.f32 %v2301_v24, %v7191_v11 }
0x10e5   :  { %v5965_v25 = vmul.f32 -1.442695, %v2303_v20 }
0x10e6   :  { %2319 = vrot.lane.b32.xlu0 %v2318_v46, %s6791_s30 }
0x10e8   :  { %v2298_v3 = vpop.f32.mrf.mxu2  ;;  %v2315_v6 = vpop.f32.mrf.mxu3 }
0x10ef   :  { %v2492_v8 = vpop.f32.mrf.mxu0  ;;  %v2511_v49 = vpop.f32.mrf.mxu1 }
0x10f0   :  { %v2497_v48 = vrot.slane %v2492_v8, 6  ;;  %v2516_v44 = vrot.slane %v2511_v49, 6 }
0x10f2   :  { %2498 = vrot.lane.b32.xlu1 %v2497_v48, %s6788_s23 }
0x10f4   :  { %v2456_v50 = vpop.f32.mrf.mxu2  ;;  %v2473_v18 = vpop.f32.mrf.mxu3 }
0x10f5   :  { %v2478_v16 = vrot.slane %v2473_v18, 6  ;;  %v2461_v36 = vrot.slane %v2456_v50, 6 }
0x10f7   :  { %v2494_v13 = vpop.f32.mrf.mxu0  ;;  %v2513_v21 = vpop.f32.mrf.mxu1  ;;  %v2463_v56 = vadd.f32 %v2461_v36, %v6941_v35 }
0x10f9   :  { %v5972_v62 = vmul.f32 -1.442695, %v2463_v56 }
0x10fc   :  { %v2458_v19 = vpop.f32.mrf.mxu2  ;;  %v2475_v63 = vpop.f32.mrf.mxu3 }
0x1150   :  { %v2339_v32 = vpop.permute.xlu0 %2338 }
0x1151   :  { %v2341_v40 = vadd.f32 %v2339_v32, %v7191_v11 }
0x1153   :  { %6422 = vtanh.f32 %v2341_v40 }
0x1158   :  { %v2320_v13 = vpop.permute.xlu0 %2319 }
0x1159   :  { %v6423_v14 = vpop.eup %6422  ;;  %v2322_v21 = vadd.f32 %v2320_v13, %v7191_v11 }
0x115a   :  { %2424 = vrot.lane.b32.xlu2 %v6423_v14, %s6790_s29 }
0x115b   :  { %v5966_v19 = vmul.f32 -1.442695, %v2322_v21 }
0x1162   :  { %2479 = vrot.lane.b32.xlu2 %v2478_v16, %s6791_s30 }
0x1164   :  { %v2499_v47 = vpop.permute.xlu1 %2498 }
0x1165   :  { %v2501_v27 = vadd.f32 %v2499_v47, %v6941_v35 }
0x1167   :  { %6424 = vtanh.f32 %v2501_v27 }
0x1168   :  { %6426 = vpow2.f32 %v5965_v25 }
0x116a   :  { %2357 = vrot.lane.b32.xlu2 %v2356_v17, %s6792_s1 }
0x116d   :  { %v6425_v23 = vpop.eup %6424 }
0x116e   :  { %2584 = vrot.lane.b32.xlu1 %v6425_v23, %s6790_s29  ;;  %v6427_v26 = vpop.eup %6426 }
0x116f   :  { %v2364_v28 = vadd.f32 1.0, %v6427_v26 }
0x1171   :  { %6428 = vrcp.f32 %v2364_v28  ;;  %v2376_v29 = vand.u32 2147483648, %v2364_v28  ;;  %vm2370_vm11 = vweird.f32 %v2364_v28  ;;  %v2374_v57 = vand.u32 2147483647, %v2364_v28 }
0x1172   :  { %6430 = vpow2.f32 %v5972_v62 }
0x1173   :  { %v2377_v30 = vor.u32 1.1754944e-38, %v2376_v29  ;;  %vm2375_vm13 = vcmp.eq.f32.partialorder %v2374_v57, 8.507059e+37 }
0x1177   :  { %v6429_v33 = vpop.eup %6428 }
0x1178   :  { %v2366_v37 = vmul.f32 %v6429_v33, %v2364_v28  ;;  %vm2371_vm10 = vweird.f32 %v6429_v33  ;;  %v6431_v43 = vpop.eup %6430 }
0x1179   :  { %vm2372_vm12 = vmor %vm2370_vm11, %vm2371_vm10  ;;  %v2524_v2 = vadd.f32 1.0, %v6431_v43 }
0x117a   :  { %v2367_v38 = vsub.f32 1.0, %v2366_v37  ;;  %v2420_v37 = vrot.slane %v7261_v51, 6 }
0x117b   :  { %6432 = vrcp.f32 %v2524_v2  ;;  %v2536_v3 = vand.u32 2147483648, %v2524_v2  ;;  %vm2530_vm15 = vweird.f32 %v2524_v2  ;;  %v2534_v6 = vand.u32 2147483647, %v2524_v2 }
0x117c   :  { %v2368_v53 = vmul.f32 %v6429_v33, %v2367_v38  ;;  %6434 = vpow2.f32 %v5966_v19 }
0x117d   :  { %v2537_v48 = vor.u32 1.1754944e-38, %v2536_v3  ;;  %vm2535_vm1 = vcmp.eq.f32.partialorder %v2534_v6, 8.507059e+37 }
0x117e   :  { %v2369_v54 = vadd.f32 %v6429_v33, %v2368_v53 }
0x1180   :  { %v2373_v59 = vsel %vm2372_vm12, %v6429_v33, %v2369_v54 }
0x1181   :  { %v2378_v7 = vsel %vm2375_vm13, %v2377_v30, %v2373_v59  ;;  %v6433_v10 = vpop.eup %6432 }
0x1182   :  { %v2526_v0 = vmul.f32 %v6433_v10, %v2524_v2  ;;  %vm2531_vm14 = vweird.f32 %v6433_v10  ;;  %v6435_v63 = vpop.eup %6434  ;;  %v2580_v2 = vrot.slane %v7266_v42, 2 }
0x1183   :  { %vm2532_vm0 = vmor %vm2530_vm15, %vm2531_vm14  ;;  %v2383_v32 = vadd.f32 1.0, %v6435_v63 }
0x1184   :  { %v2527_v5 = vsub.f32 1.0, %v2526_v0 }
0x1185   :  { %6436 = vrcp.f32 %v2383_v32  ;;  %v2395_v23 = vand.u32 2147483648, %v2383_v32  ;;  %vm2389_vm3 = vweird.f32 %v2383_v32  ;;  %v2393_v20 = vand.u32 2147483647, %v2383_v32 }
0x1186   :  { %v2528_v55 = vmul.f32 %v6433_v10, %v2527_v5 }
0x1187   :  { %v2396_v26 = vor.u32 1.1754944e-38, %v2395_v23  ;;  %vm2394_vm5 = vcmp.eq.f32.partialorder %v2393_v20, 8.507059e+37 }
0x1188   :  { %v2529_v46 = vadd.f32 %v6433_v10, %v2528_v55 }
0x118a   :  { %v2533_v8 = vsel %vm2532_vm0, %v6433_v10, %v2529_v46 }
0x118b   :  { %v2538_v18 = vsel %vm2535_vm1, %v2537_v48, %v2533_v8  ;;  %v6437_v40 = vpop.eup %6436 }
0x118c   :  { %v2385_v14 = vmul.f32 %v6437_v40, %v2383_v32  ;;  %vm2390_vm2 = vweird.f32 %v6437_v40 }
0x118d   :  { %vm2391_vm4 = vmor %vm2389_vm3, %vm2390_vm2 }
0x118e   :  { %v2386_v16 = vsub.f32 1.0, %v2385_v14 }
0x1190   :  { %v2387_v47 = vmul.f32 %v6437_v40, %v2386_v16 }
0x1192   :  { %v2388_v17 = vadd.f32 %v6437_v40, %v2387_v47 }
0x1194   :  { %v2392_v25 = vsel %vm2391_vm4, %v6437_v40, %v2388_v17 }
0x1195   :  { %v2397_v33 = vsel %vm2394_vm5, %v2396_v26, %v2392_v25 }
0x1196   :  { %v2422_v38 = vmul.f32 %v2420_v37, %v2397_v33 }
0x11b4   :  { %v2425_v1 = vpop.permute.xlu2 %2424 }
0x11b5   :  { %v2427_v41 = vmul.f32 %v2425_v1, %v2378_v7 }
0x11b7   :  { %2429 = vrot.lane.b32.xlu0 %v2427_v41, %s6791_s30 }
0x11bc   :  { %v2480_v27 = vpop.permute.xlu2 %2479 }
0x11bd   :  { %v2482_v24 = vadd.f32 %v2480_v27, %v6941_v35 }
0x11bf   :  { %2517 = vrot.lane.b32.xlu0 %v2516_v44, %s6792_s1  ;;  %v5973_v28 = vmul.f32 -1.442695, %v2482_v24 }
0x11c1   :  { %6438 = vpow2.f32 %v5973_v28 }
0x11c4   :  { %v2358_v46 = vpop.permute.xlu2 %2357 }
0x11c5   :  { %v2360_v3 = vadd.f32 %v2358_v46, %v7191_v11 }
0x11c7   :  { %v6439_v54 = vpop.eup %6438  ;;  %v5967_v6 = vmul.f32 -1.442695, %v2360_v3 }
0x11c8   :  { %v2543_v29 = vadd.f32 1.0, %v6439_v54 }
0x11ca   :  { %v2555_v51 = vand.u32 2147483648, %v2543_v29  ;;  %vm2549_vm7 = vweird.f32 %v2543_v29  ;;  %v2553_v7 = vand.u32 2147483647, %v2543_v29 }
0x11cc   :  { %v2556_v43 = vor.u32 1.1754944e-38, %v2555_v51  ;;  %vm2554_vm10 = vcmp.eq.f32.partialorder %v2553_v7, 8.507059e+37 }
0x11e0   :  { %v2585_v50 = vpop.permute.xlu1 %2584 }
0x11e1   :  { %v2587_v49 = vmul.f32 %v2585_v50, %v2538_v18 }
0x11e3   :  { %2589 = vrot.lane.b32.xlu1 %v2587_v49, %s6791_s30 }
0x1229   :  { %v2430_v53 = vpop.permute.xlu0 %2429 }
0x122a   :  { %v7315_v36 = vadd.f32 %v2430_v53, %v2422_v38 }
0x122c   :  { %6440 = vtanh.f32 %v7315_v36 }
0x122d   :  { %6442 = vrcp.f32 %v2543_v29 }
0x1231   :  { %v2518_v50 = vpop.permute.xlu0 %2517 }
0x1232   :  { %v6441_v56 = vpop.eup %6440  ;;  %v2520_v18 = vadd.f32 %v2518_v50, %v6941_v35 }
0x1233   :  { %2435 = vrot.lane.b32.xlu1 %v6441_v56, %s6788_s23  ;;  %v6443_v57 = vpop.eup %6442 }
0x1234   :  { %v2545_v59 = vmul.f32 %v6443_v57, %v2543_v29  ;;  %vm2550_vm6 = vweird.f32 %v6443_v57  ;;  %v5974_v42 = vmul.f32 -1.442695, %v2520_v18 }
0x1235   :  { %vm2551_vm8 = vmor %vm2549_vm7, %vm2550_vm6 }
0x1236   :  { %v2546_v30 = vsub.f32 1.0, %v2545_v59 }
0x1238   :  { %v2547_v62 = vmul.f32 %v6443_v57, %v2546_v30 }
0x123a   :  { %v2548_v1 = vadd.f32 %v6443_v57, %v2547_v62 }
0x123c   :  { %v2552_v41 = vsel %vm2551_vm8, %v6443_v57, %v2548_v1 }
0x123d   :  { %v2557_v44 = vsel %vm2554_vm10, %v2556_v43, %v2552_v41 }
0x123e   :  { %v2582_v10 = vmul.f32 %v2580_v2, %v2557_v44 }
0x1255   :  { %v2590_v0 = vpop.permute.xlu1 %2589 }
0x1256   :  { %v7320_v5 = vadd.f32 %v2590_v0, %v2582_v10 }
0x1258   :  { %6444 = vtanh.f32 %v7320_v5 }
0x1259   :  { %6446 = vpow2.f32 %v5967_v6 }
0x125e   :  { %v6445_v55 = vpop.eup %6444 }
0x125f   :  { %2595 = vrot.lane.b32.xlu2 %v6445_v55, %s6788_s23  ;;  %v6447_v8 = vpop.eup %6446 }
0x1260   :  { %v2403_v48 = vadd.f32 1.0, %v6447_v8 }
0x1262   :  { %6448 = vrcp.f32 %v2403_v48  ;;  %v2415_v14 = vand.u32 2147483648, %v2403_v48  ;;  %vm2409_vm12 = vweird.f32 %v2403_v48  ;;  %v2413_v16 = vand.u32 2147483647, %v2403_v48 }
0x1263   :  { %6450 = vpow2.f32 %v5974_v42 }
0x1264   :  { %v2416_v17 = vor.u32 1.1754944e-38, %v2415_v14  ;;  %vm2414_vm14 = vcmp.eq.f32.partialorder %v2413_v16, 8.507059e+37 }
0x1268   :  { %v6449_v49 = vpop.eup %6448 }
0x1269   :  { %v2405_v13 = vmul.f32 %v6449_v49, %v2403_v48  ;;  %v6451_v21 = vpop.eup %6450  ;;  %vm2410_vm11 = vweird.f32 %v6449_v49 }
0x126a   :  { %v2563_v63 = vadd.f32 1.0, %v6451_v21  ;;  %vm2411_vm13 = vmor %vm2409_vm12, %vm2410_vm11 }
0x126b   :  { %v2406_v19 = vsub.f32 1.0, %v2405_v13 }
0x126c   :  { %6452 = vrcp.f32 %v2563_v63  ;;  %v2575_v53 = vand.u32 2147483648, %v2563_v63  ;;  %vm2569_vm0 = vweird.f32 %v2563_v63  ;;  %v2573_v54 = vand.u32 2147483647, %v2563_v63 }
0x126d   :  { %v2407_v32 = vmul.f32 %v6449_v49, %v2406_v19 }
0x126e   :  { %v2576_v56 = vor.u32 1.1754944e-38, %v2575_v53  ;;  %vm2574_vm2 = vcmp.eq.f32.partialorder %v2573_v54, 8.507059e+37 }
0x126f   :  { %v2408_v40 = vadd.f32 %v6449_v49, %v2407_v32 }
0x1271   :  { %v2412_v47 = vsel %vm2411_vm13, %v6449_v49, %v2408_v40 }
0x1272   :  { %v6453_v27 = vpop.eup %6452  ;;  %v2417_v23 = vsel %vm2414_vm14, %v2416_v17, %v2412_v47 }
0x1273   :  { %v2565_v25 = vmul.f32 %v6453_v27, %v2563_v63  ;;  %vm2570_vm15 = vweird.f32 %v6453_v27 }
0x1274   :  { %vm2571_vm1 = vmor %vm2569_vm0, %vm2570_vm15 }
0x1275   :  { %v2566_v33 = vsub.f32 1.0, %v2565_v25 }
0x1277   :  { %v2567_v37 = vmul.f32 %v6453_v27, %v2566_v33 }
0x1279   :  { %v2568_v38 = vadd.f32 %v6453_v27, %v2567_v37 }
0x127b   :  { %v2572_v29 = vsel %vm2571_vm1, %v6453_v27, %v2568_v38 }
0x127c   :  { %v2577_v57 = vsel %vm2574_vm2, %v2576_v56, %v2572_v29 }
0x12a5   :  { %v2436_v24 = vpop.permute.xlu1 %2435 }
0x12a6   :  { %v7326_v20 = vmul.f32 %v2436_v24, %v2417_v23 }
0x12a8   :  { %v2609_v26 = vpack.c.bf16 %v7326_v20, %v7326_v20 }
0x12aa   :  { %v2611_v28 = vrot.slane %v2609_v26, 2 }
0x12ac   :  { %2612 = vrot.lane.b32.xlu0 %v2611_v28, %s6793_s2 }
0x12b9   :  { %v2596_v59 = vpop.permute.xlu2 %2595 }
0x12ba   :  { %v7331_v30 = vmul.f32 %v2596_v59, %v2577_v57 }
0x12bc   :  { %v2769_v62 = vpack.c.bf16 %v7331_v30, %v7331_v30 }
0x12be   :  { %v2771_v1 = vrot.slane %v2769_v62, 1 }
0x12c0   :  { %2772 = vrot.lane.b32.xlu1 %v2771_v1, %s6793_s2 }
0x131e   :  { %v2613_v51 = vpop.permute.xlu0 %2612 }
0x131f   :  { %5975 = vmatmul.msk.bf16.vlgmr.msrb.gmra.mxu2 %vm292_vm9, %v2613_v51  ;;  %5976 = vmatmul.msk.bf16.vlgmr.msrb.gmra.mxu3 %vm292_vm9, %v2613_v51 }
0x1320   :  { %5977 = vmatmul.msk.bf16.vlgmr.msra.gmra.mxu0 %vm292_vm9, %v2613_v51  ;;  %5978 = vmatmul.msk.bf16.vlgmr.msra.gmra.mxu1 %vm292_vm9, %v2613_v51 }
0x1332   :  { %v2773_v7 = vpop.permute.xlu1 %2772 }
0x1333   :  { %5982 = vmatmul.msk.bf16.vlgmr.msra.gmra.mxu2 %vm292_vm9, %v2773_v7  ;;  %5983 = vmatmul.msk.bf16.vlgmr.msra.gmra.mxu3 %vm292_vm9, %v2773_v7 }
0x1334   :  { %5984 = vmatmul.msk.bf16.vlgmr.msrb.gmra.mxu0 %vm292_vm9, %v2773_v7  ;;  %5985 = vmatmul.msk.bf16.vlgmr.msrb.gmra.mxu1 %vm292_vm9, %v2773_v7 }
0x139d   :  { %v2662_v41 = vpop.f32.mrf.mxu0  ;;  %v7344_v43 = vpop.f32.mrf.mxu1 }
0x139e   :  { %v2667_v44 = vrot.slane %v2662_v41, 2 }
0x13a0   :  { %2668 = vrot.lane.b32.xlu0 %v2667_v44, %s6788_s23 }
0x13a2   :  { %v2626_v2 = vpop.f32.mrf.mxu2  ;;  %v2643_v10 = vpop.f32.mrf.mxu3 }
0x13a3   :  { %v2648_v21 = vrot.slane %v2643_v10, 2  ;;  %v2631_v27 = vrot.slane %v2626_v2, 2 }
0x13a5   :  { %v2664_v0 = vpop.f32.mrf.mxu0  ;;  %v2683_v55 = vpop.f32.mrf.mxu1  ;;  %v2633_v23 = vadd.f32 %v2631_v27, %v7191_v11 }
0x13a7   :  { %v5979_v24 = vmul.f32 -1.442695, %v2633_v23 }
0x13aa   :  { %v2628_v46 = vpop.f32.mrf.mxu2  ;;  %v2645_v3 = vpop.f32.mrf.mxu3 }
0x13b1   :  { %v2818_v6 = vpop.f32.mrf.mxu0  ;;  %v7347_v8 = vpop.f32.mrf.mxu1 }
0x13b2   :  { %2823 = vrot.lane.b32.xlu2 %v2818_v6, %s6788_s23 }
0x13b6   :  { %v2786_v48 = vpop.f32.mrf.mxu2  ;;  %v2800_v50 = vpop.f32.mrf.mxu3 }
0x13b7   :  { %v2790_v47 = vadd.f32 %v2786_v48, %v6941_v35 }
0x13b9   :  { %v2820_v18 = vpop.f32.mrf.mxu0  ;;  %v2838_v42 = vpop.f32.mrf.mxu1  ;;  %v5986_v17 = vmul.f32 -1.442695, %v2790_v47 }
0x13ba   :  { %2805 = vrot.lane.b32.xlu2 %v2800_v50, %s6791_s30  ;;  %v2686_v42 = vrot.slane %v7344_v43, 2 }
0x13be   :  { %v2788_v49 = vpop.f32.mrf.mxu2  ;;  %v2802_v13 = vpop.f32.mrf.mxu3 }
0x13c2   :  { %2649 = vrot.lane.b32.xlu2 %v2648_v21, %s6791_s30 }
0x140c   :  { %v2824_v19 = vpop.permute.xlu2 %2823 }
0x140d   :  { %v2826_v63 = vadd.f32 %v2824_v19, %v6941_v35 }
0x140f   :  { %6454 = vtanh.f32 %v2826_v63 }
0x1412   :  { %v2669_v32 = vpop.permute.xlu0 %2668 }
0x1413   :  { %v2671_v40 = vadd.f32 %v2669_v32, %v7191_v11 }
0x1415   :  { %v6455_v14 = vpop.eup %6454  ;;  %6456 = vtanh.f32 %v2671_v40 }
0x1416   :  { %2908 = vrot.lane.b32.xlu1 %v6455_v14, %s6790_s29  ;;  %6458 = vpow2.f32 %v5986_v17 }
0x1417   :  { %6460 = vpow2.f32 %v5979_v24 }
0x141b   :  { %v6457_v16 = vpop.eup %6456 }
0x141c   :  { %v6459_v25 = vpop.eup %6458 }
0x141d   :  { %v2848_v26 = vadd.f32 1.0, %v6459_v25  ;;  %v6461_v28 = vpop.eup %6460  ;;  %v2904_v25 = vrot.slane %v7320_v5, 2 }
0x141e   :  { %2754 = vrot.lane.b32.xlu1 %v6457_v16, %s6790_s29  ;;  %v2694_v33 = vadd.f32 1.0, %v6461_v28 }
0x141f   :  { %6462 = vrcp.f32 %v2848_v26  ;;  %v2860_v62 = vand.u32 2147483648, %v2848_v26  ;;  %vm2854_vm4 = vweird.f32 %v2848_v26  ;;  %v2858_v1 = vand.u32 2147483647, %v2848_v26 }
0x1420   :  { %6464 = vrcp.f32 %v2694_v33  ;;  %v2706_v55 = vand.u32 2147483648, %v2694_v33  ;;  %vm2700_vm8 = vweird.f32 %v2694_v33  ;;  %v2704_v46 = vand.u32 2147483647, %v2694_v33 }
0x1421   :  { %v2861_v41 = vor.u32 1.1754944e-38, %v2860_v62  ;;  %vm2859_vm6 = vcmp.eq.f32.partialorder %v2858_v1, 8.507059e+37 }
0x1422   :  { %v2707_v6 = vor.u32 1.1754944e-38, %v2706_v55  ;;  %vm2705_vm11 = vcmp.eq.f32.partialorder %v2704_v46, 8.507059e+37 }
0x1425   :  { %v6463_v37 = vpop.eup %6462 }
0x1426   :  { %v2850_v38 = vmul.f32 %v6463_v37, %v2848_v26  ;;  %v6465_v54 = vpop.eup %6464  ;;  %vm2855_vm3 = vweird.f32 %v6463_v37 }
0x1427   :  { %v2696_v56 = vmul.f32 %v6465_v54, %v2694_v33  ;;  %vm2856_vm5 = vmor %vm2854_vm4, %vm2855_vm3  ;;  %vm2701_vm7 = vweird.f32 %v6465_v54  ;;  %vm640_vm4 = vcmask 130054  }
0x1428   :  { %v2851_v53 = vsub.f32 1.0, %v2850_v38  ;;  %vm2702_vm10 = vmor %vm2700_vm8, %vm2701_vm7  ;;  %vm971_vm7 = vcmask 128004  }
0x1429   :  { %v2697_v59 = vsub.f32 1.0, %v2696_v56 }
0x142a   :  { %v2852_v29 = vmul.f32 %v6463_v37, %v2851_v53 }
0x142b   :  { %v2698_v7 = vmul.f32 %v6465_v54, %v2697_v59 }
0x142c   :  { %v2853_v57 = vadd.f32 %v6463_v37, %v2852_v29 }
0x142d   :  { %v2699_v0 = vadd.f32 %v6465_v54, %v2698_v7 }
0x142e   :  { %v2857_v51 = vsel %vm2856_vm5, %v6463_v37, %v2853_v57  ;;  %v2750_v57 = vrot.slane %v7315_v36, 6  ;;  %vm634_vm5 = vcmask 123904  }
0x142f   :  { %v2862_v2 = vsel %vm2859_vm6, %v2861_v41, %v2857_v51  ;;  %v2703_v3 = vsel %vm2702_vm10, %v6465_v54, %v2699_v0  ;;  %vm965_vm6 = vcmask 125954  }
0x1430   :  { %v2708_v50 = vsel %vm2705_vm11, %v2707_v6, %v2703_v3 }
0x1488   :  { %v2909_v44 = vpop.permute.xlu1 %2908 }
0x1489   :  { %v2911_v10 = vmul.f32 %v2909_v44, %v2862_v2 }
0x148b   :  { %2913 = vrot.lane.b32.xlu0 %v2911_v10, %s6791_s30 }
0x1490   :  { %v2755_v48 = vpop.permute.xlu1 %2754 }
0x1491   :  { %v2757_v18 = vmul.f32 %v2755_v48, %v2708_v50 }
0x1493   :  { %2759 = vrot.lane.b32.xlu1 %v2757_v18, %s6791_s30  ;;  %2841 = vrot.lane.b32.xlu0 %v7347_v8, %s6792_s1 }
0x149b   :  { %637 = vrot.lane.b32.xlu1 %v6973_v39, %s6793_s2  ;;  %2687 = vrot.lane.b32.xlu0 %v2686_v42, %s6792_s1  ;;  %v2806_v39 = vpop.permute.xlu2 %2805 }
0x14a3   :  { %1623 = vrot.lane.b32.xlu1 %v7165_v52, %s6793_s2  ;;  %1299 = vrot.lane.b32.xlu0 %v7087_v31, %s6793_s2  ;;  %v2808_v52 = vadd.f32 %v2806_v39, %v6941_v35  ;;  %v2650_v31 = vpop.permute.xlu2 %2649 }
0x14a5   :  { %v5987_v43 = vmul.f32 -1.442695, %v2808_v52 }
0x14a7   :  { %6466 = vpow2.f32 %v5987_v43 }
0x14ab   :  { %2605 = vrot.lane.b32.xlu1 %v7331_v30, %s6793_s2  ;;  %2275 = vrot.lane.b32.xlu0 %v7277_v45, %s6793_s2  ;;  %v2652_v30 = vadd.f32 %v2650_v31, %v7191_v11 }
0x14ad   :  { %v5980_v8 = vmul.f32 -1.442695, %v2652_v30  ;;  %v6467_v49 = vpop.eup %6466 }
0x14ae   :  { %v2867_v45 = vadd.f32 1.0, %v6467_v49 }
0x14af   :  { %6468 = vpow2.f32 %v5980_v8 }
0x14b0   :  { %6470 = vrcp.f32 %v2867_v45  ;;  %v2879_v16 = vand.u32 2147483648, %v2867_v45  ;;  %vm2873_vm13 = vweird.f32 %v2867_v45  ;;  %v2877_v47 = vand.u32 2147483647, %v2867_v45 }
0x14b2   :  { %v2880_v23 = vor.u32 1.1754944e-38, %v2879_v16  ;;  %vm2878_vm15 = vcmp.eq.f32.partialorder %v2877_v47, 8.507059e+37 }
0x14b3   :  { %631 = vrot.lane.b32.xlu1 %v6979_v61, %s6793_s2 }
0x14b5   :  { %v6469_v61 = vpop.eup %6468 }
0x14b6   :  { %v2713_v13 = vadd.f32 1.0, %v6469_v61  ;;  %v6471_v21 = vpop.eup %6470 }
0x14b7   :  { %vm2874_vm12 = vweird.f32 %v6471_v21 }
0x14b8   :  { %6472 = vrcp.f32 %v2713_v13  ;;  %vm2875_vm14 = vmor %vm2873_vm13, %vm2874_vm12  ;;  %v2725_v28 = vand.u32 2147483648, %v2713_v13  ;;  %vm2719_vm1 = vweird.f32 %v2713_v13  ;;  %v2723_v37 = vand.u32 2147483647, %v2713_v13 }
0x14ba   :  { %v2726_v29 = vor.u32 1.1754944e-38, %v2725_v28  ;;  %vm2724_vm3 = vcmp.eq.f32.partialorder %v2723_v37, 8.507059e+37  ;;  %v7442_v28 = vld [vmem:[%s7433_s15] sm:$0xff] }
0x14bb   :  { %1618 = vrot.lane.b32.xlu1 %v7160_v60, %s6793_s2  ;;  %v2869_v60 = vmul.f32 %v6471_v21, %v2867_v45  ;;  %v6176_v37 = vld [vmem:[%s5781_s19] sm:$0xff] }
0x14bc   :  { %2982 = vmatpush.bf16.msrb.mxu3 %v6176_v37 }
0x14bd   :  { %v2870_v19 = vsub.f32 1.0, %v2869_v60 }
0x14be   :  { %v6473_v63 = vpop.eup %6472 }
0x14bf   :  { %v2715_v32 = vmul.f32 %v6473_v63, %v2713_v13  ;;  %vm2720_vm0 = vweird.f32 %v6473_v63 }
0x14c0   :  { %vm2721_vm2 = vmor %vm2719_vm1, %vm2720_vm0 }
0x14c1   :  { %v2716_v14 = vsub.f32 1.0, %v2715_v32 }
0x14c3   :  { %2600 = vrot.lane.b32.xlu1 %v7326_v20, %s6793_s2  ;;  %v2871_v20 = vmul.f32 %v6471_v21, %v2870_v19  ;;  %v2717_v17 = vmul.f32 %v6473_v63, %v2716_v14 }
0x14c5   :  { %v2872_v40 = vadd.f32 %v6471_v21, %v2871_v20  ;;  %v2718_v26 = vadd.f32 %v6473_v63, %v2717_v17  ;;  %v6179_v20 = vld [vmem:[%s5789_s26] sm:$0xff]  ;;  %s7514_s26 = sld [smem:[%s8024_s0 + %s6805_s28]]  }
0x14c6   :  { %3012 = vmatpush.bf16.msra.mxu0 %v6179_v20 }
0x14c7   :  { %v2876_v27 = vsel %vm2875_vm14, %v6471_v21, %v2872_v40  ;;  %v2722_v54 = vsel %vm2721_vm2, %v6473_v63, %v2718_v26  ;;  %v7426_v26 = vld [vmem:[%s7423_s11] sm:$0xff] }
0x14c8   :  { %v2881_v24 = vsel %vm2878_vm15, %v2880_v23, %v2876_v27  ;;  %v2727_v56 = vsel %vm2724_vm3, %v2726_v29, %v2722_v54 }
0x14c9   :  { %v2906_v33 = vmul.f32 %v2904_v25, %v2881_v24  ;;  %v2752_v59 = vmul.f32 %v2750_v57, %v2727_v56  ;;  %v6177_v25 = vld [vmem:[%s5782_s6] sm:$0xff] }
0x14ca   :  { %2959 = vmatpush.bf16.msrb.mxu2 %v6177_v25  ;;  %3118 = vmatpush.bf16.msrb.mxu0 %v7426_v26  ;;  %v7462_v56 = vld [vmem:[%s7448_s14] sm:$0xff] }
0x14ce   :  { %3074 = vmatpush.bf16.msra.mxu2 %v7442_v28 }
0x14fd   :  { %v2914_v38 = vpop.permute.xlu0 %2913 }
0x14fe   :  { %v2916_v53 = vadd.f32 %v2914_v38, %v2906_v33  ;;  %v6178_v38 = vld [vmem:[%s5788_s25] sm:$0xff] }
0x14ff   :  { %3032 = vmatpush.bf16.msra.mxu1 %v6178_v38 }
0x1500   :  { %6474 = vtanh.f32 %v2916_v53 }
0x1505   :  { %v2760_v62 = vpop.permute.xlu1 %2759  ;;  %v2842_v1 = vpop.permute.xlu0 %2841 }
0x1506   :  { %v6475_v5 = vpop.eup %6474  ;;  %v2762_v51 = vadd.f32 %v2760_v62, %v2752_v59  ;;  %v7468_v59 = vld [vmem:[%s7454_s4] sm:$0xff] }
0x1507   :  { %2919 = vrot.lane.b32.xlu2 %v6475_v5, %s6788_s23  ;;  %v7472_v62 = vld [vmem:[%s7459_s8] sm:$0xff] }
0x1508   :  { %6476 = vtanh.f32 %v2762_v51  ;;  %3094 = vmatpush.bf16.msra.mxu3 %v7472_v62 }
0x150d   :  { %v638_v7 = vpop.permute.xlu1 %637  ;;  %v2688_v41 = vpop.permute.xlu0 %2687 }
0x150e   :  { %v6477_v44 = vpop.eup %6476  ;;  %641 = vst.msk [vmem:[#allocation3 + $0x8] sm:$0xc0] %vm640_vm4, %v638_v7 }
0x150f   :  { %2765 = vrot.lane.b32.xlu0 %v6477_v44, %s6788_s23  ;;  %968 = vrot.lane.b32.xlu2 %v7033_v15, %s6793_s2  ;;  %v7505_v44 = vld [vmem:[%s7502_s27] sm:$0xff] }
0x1515   :  { %v1624_v36 = vpop.permute.xlu1 %1623  ;;  %v1300_v2 = vpop.permute.xlu0 %1299 }
0x1516   :  { %1626 = vst.msk [vmem:[#allocation3 + $0x8] sm:$0x3] %vm634_vm5, %v1624_v36 }
0x1517   :  { %1302 = vst.msk [vmem:[#allocation3 + $0x8] sm:$0xc] %vm965_vm6, %v1300_v2  ;;  %1294 = vrot.lane.b32.xlu0 %v7081_v9, %s6793_s2  ;;  %1946 = vrot.lane.b32.xlu2 %v7223_v58, %s6793_s2  ;;  %v2844_v9 = vadd.f32 %v2842_v1, %v6941_v35  ;;  %v7517_v2 = vld [vmem:[%s7514_s26] sm:$0xff] }
0x1518   :  { %3142 = vmatpush.bf16.msrb.mxu1 %v7517_v2 }
0x1519   :  { %v5988_v46 = vmul.f32 -1.442695, %v2844_v9 }
0x151b   :  { %6478 = vpow2.f32 %v5988_v46 }
0x151d   :  { %v2606_v10 = vpop.permute.xlu1 %2605  ;;  %v2276_v0 = vpop.permute.xlu0 %2275 }
0x151e   :  { %2608 = vst.msk [vmem:[#allocation3] sm:$0xc] %vm965_vm6, %v2606_v10 }
0x151f   :  { %2278 = vst.msk [vmem:[#allocation3] sm:$0x30] %vm971_vm7, %v2276_v0  ;;  %2270 = vrot.lane.b32.xlu0 %v7272_v12, %s6793_s2  ;;  %v2690_v12 = vadd.f32 %v2688_v41, %v7191_v11 }
0x1521   :  { %v6479_v3 = vpop.eup %6478  ;;  %v5981_v42 = vmul.f32 -1.442695, %v2690_v12 }
0x1522   :  { %v2887_v6 = vadd.f32 1.0, %v6479_v3 }
0x1524   :  { %6480 = vrcp.f32 %v2887_v6  ;;  %v2899_v43 = vand.u32 2147483648, %v2887_v6  ;;  %vm2893_vm10 = vweird.f32 %v2887_v6  ;;  %v2897_v35 = vand.u32 2147483647, %v2887_v6 }
0x1525   :  { %v632_v15 = vpop.permute.xlu1 %631  ;;  %6482 = vpow2.f32 %v5981_v42 }
0x1526   :  { %635 = vst.msk [vmem:[#allocation2] sm:$0x3] %vm634_vm5, %v632_v15  ;;  %v2900_v8 = vor.u32 1.1754944e-38, %v2899_v43  ;;  %vm2898_vm12 = vcmp.eq.f32.partialorder %v2897_v35, 8.507059e+37 }
0x152a   :  { %v6481_v48 = vpop.eup %6480 }
0x152b   :  { %v2889_v50 = vmul.f32 %v6481_v48, %v2887_v6  ;;  %vm2894_vm8 = vweird.f32 %v6481_v48  ;;  %v6483_v31 = vpop.eup %6482  ;;  %v6227_v6 = vld [vmem:[%s7485_s16] ss:$0 sm:$0xff] }
0x152c   :  { %vm2895_vm11 = vmor %vm2893_vm10, %vm2894_vm8  ;;  %v2733_v49 = vadd.f32 1.0, %v6483_v31 }
0x152d   :  { %v1619_v55 = vpop.permute.xlu1 %1618  ;;  %v2890_v18 = vsub.f32 1.0, %v2889_v50 }
0x152e   :  { %1621 = vst.msk [vmem:[#allocation2] sm:$0xc0] %vm640_vm4, %v1619_v55  ;;  %6484 = vrcp.f32 %v2733_v49  ;;  %v2745_v14 = vand.u32 2147483648, %v2733_v49  ;;  %vm2739_vm14 = vweird.f32 %v2733_v49  ;;  %v2743_v16 = vand.u32 2147483647, %v2733_v49 }
0x152f   :  { %v2891_v39 = vmul.f32 %v6481_v48, %v2890_v18 }
0x1530   :  { %v2746_v27 = vor.u32 1.1754944e-38, %v2745_v14  ;;  %vm2744_vm0 = vcmp.eq.f32.partialorder %v2743_v16, 8.507059e+37 }
0x1531   :  { %v2892_v52 = vadd.f32 %v6481_v48, %v2891_v39 }
0x1533   :  { %v2896_v30 = vsel %vm2895_vm11, %v6481_v48, %v2892_v52 }
0x1534   :  { %v2901_v61 = vsel %vm2898_vm12, %v2900_v8, %v2896_v30  ;;  %v6485_v21 = vpop.eup %6484 }
0x1535   :  { %v2601_v58 = vpop.permute.xlu1 %2600  ;;  %v2735_v60 = vmul.f32 %v6485_v21, %v2733_v49  ;;  %vm2740_vm13 = vweird.f32 %v6485_v21 }
0x1536   :  { %2603 = vst.msk [vmem:[#allocation2 + $0x8] sm:$0x30] %vm971_vm7, %v2601_v58  ;;  %vm2741_vm15 = vmor %vm2739_vm14, %vm2740_vm13  ;;  %v7530_v58 = vld [vmem:[%s7527_s7] sm:$0xff] }
0x1537   :  { %v2736_v63 = vsub.f32 1.0, %v2735_v60 }
0x1539   :  { %v2737_v32 = vmul.f32 %v6485_v21, %v2736_v63 }
0x153b   :  { %v2738_v40 = vadd.f32 %v6485_v21, %v2737_v32 }
0x153d   :  { %v2742_v47 = vsel %vm2741_vm15, %v6485_v21, %v2738_v40 }
0x1561   :  { %v2920_v45 = vpop.permute.xlu2 %2919 }
0x1562   :  { %v2922_v13 = vmul.f32 %v2920_v45, %v2901_v61  ;;  %v6228_v61 = vld [vmem:[%s7490_s20] ss:$0 sm:$0xff] }
0x1564   :  { %2929 = vrot.lane.b32.xlu2 %v2922_v13, %s6793_s2 }
0x1569   :  { %v969_v11 = vpop.permute.xlu2 %968 }
0x156a   :  { %972 = vst.msk [vmem:[#allocation3 + $0x8] sm:$0x30] %vm971_vm7, %v969_v11 }
0x156c   :  { %962 = vrot.lane.b32.xlu2 %v7027_v34, %s6793_s2  ;;  %v2747_v34 = vsel %vm2744_vm0, %v2746_v27, %v2742_v47 }
0x1571   :  { %v1947_v19 = vpop.permute.xlu2 %1946  ;;  %v2937_v29 = vld [vmem:[#allocation3 + $0x8] sm:$0xff] }
0x1572   :  { %1949 = vst.msk [vmem:[#allocation3] sm:$0xc0] %vm640_vm4, %v1947_v19 }
0x1574   :  { %1941 = vrot.lane.b32.xlu2 %v7217_v22, %s6793_s2 }
0x1581   :  { %v2766_v17 = vpop.permute.xlu0 %2765 }
0x1582   :  { %v2768_v23 = vmul.f32 %v2766_v17, %v2747_v34 }
0x1584   :  { %2924 = vrot.lane.b32.xlu2 %v2768_v23, %s6793_s2 }
0x1589   :  { %v1295_v24 = vpop.permute.xlu0 %1294 }
0x158a   :  { %1297 = vst.msk [vmem:[#allocation2] sm:$0x30] %vm971_vm7, %v1295_v24 }
0x1591   :  { %v2271_v22 = vpop.permute.xlu0 %2270 }
0x1592   :  { %2273 = vst.msk [vmem:[#allocation2 + $0x8] sm:$0xc] %vm965_vm6, %v2271_v22 }
0x15be   :  { %v2930_v33 = vpop.permute.xlu2 %2929 }
0x15bf   :  { %2932 = vst.msk [vmem:[#allocation3] sm:$0x3] %vm634_vm5, %v2930_v33 }
0x15c6   :  { %v963_v53 = vpop.permute.xlu2 %962  ;;  %v2936_v54 = vld [vmem:[#allocation3] sm:$0xff] }
0x15c7   :  { %966 = vst.msk [vmem:[#allocation2] sm:$0xc] %vm965_vm6, %v963_v53  ;;  %v2938_v57 = vpack.c.bf16 %v2937_v29, %v2936_v54 }
0x15c9   :  { %5993 = vmatmul.msk.bf16.vlgmr.msrb.gmra.mxu2 %vm292_vm9, %v2938_v57  ;;  %6003 = vmatmul.msk.bf16.vlgmr.msra.gmra.mxu0 %vm292_vm9, %v2938_v57 }
0x15ca   :  { %3289 = vmatpush.bf16.msra.mxu0 %v7462_v56  ;;  %3241 = vmatpush.bf16.msrb.mxu2 %v7468_v59 }
0x15ce   :  { %v1942_v1 = vpop.permute.xlu2 %1941  ;;  %v2933_v51 = vld [vmem:[#allocation2] sm:$0xff] }
0x15cf   :  { %1944 = vst.msk [vmem:[#allocation2 + $0x8] sm:$0x3] %vm634_vm5, %v1942_v1 }
0x15d9   :  { %3119 = vmatmul.bf16.vlgmr.msrb.gmra.mxu0 %v6781_v4  ;;  %3075 = vmatmul.bf16.vlgmr.msra.gmra.mxu2 %v6781_v4 }
0x15da   :  { %3461 = vmatpush.bf16.msrb.mxu0 %v7426_v26  ;;  %3425 = vmatpush.bf16.msra.mxu2 %v7442_v28 }
0x15de   :  { %v2925_v5 = vpop.permute.xlu2 %2924 }
0x15df   :  { %2927 = vst.msk [vmem:[#allocation2 + $0x8] sm:$0xc0] %vm640_vm4, %v2925_v5 }
0x15e6   :  { %v2934_v7 = vld [vmem:[#allocation2 + $0x8] sm:$0xff] }
0x15e7   :  { %v2935_v41 = vpack.c.bf16 %v2934_v7, %v2933_v51 }
0x15e9   :  { %5998 = vmatmul.msk.bf16.vlgmr.msrb.gmra.mxu3 %vm292_vm9, %v2935_v41  ;;  %6008 = vmatmul.msk.bf16.vlgmr.msra.gmra.mxu1 %vm292_vm9, %v2935_v41 }
0x15ea   :  { %3290 = vmatmul.bf16.vlgmr.msra.gmra.mxu0 %v6781_v4  ;;  %3242 = vmatmul.bf16.vlgmr.msrb.gmra.mxu2 %v6781_v4 }
0x15eb   :  { %3621 = vmatpush.bf16.msra.mxu0 %v7462_v56  ;;  %3585 = vmatpush.bf16.msrb.mxu2 %v7468_v59 }
0x15ec   :  { %3264 = vmatpush.bf16.msrb.mxu3 %v7505_v44  ;;  %3314 = vmatpush.bf16.msra.mxu1 %v7530_v58 }
0x15f9   :  { %3095 = vmatmul.bf16.vlgmr.msra.gmra.mxu3 %v6781_v4  ;;  %3143 = vmatmul.bf16.vlgmr.msrb.gmra.mxu1 %v6781_v4 }
0x15fa   :  { %3442 = vmatpush.bf16.msra.mxu3 %v7472_v62  ;;  %3480 = vmatpush.bf16.msrb.mxu1 %v7517_v2 }
0x1609   :  { %3265 = vmatmul.bf16.vlgmr.msrb.gmra.mxu3 %v6781_v4  ;;  %3315 = vmatmul.bf16.vlgmr.msra.gmra.mxu1 %v6781_v4 }
0x160a   :  { %3602 = vmatpush.bf16.msrb.mxu3 %v7505_v44  ;;  %3640 = vmatpush.bf16.msra.mxu1 %v7530_v58 }
0x1646   :  { %v3014_v36 = vpop.f32.mrf.mxu0 }
0x164c   :  { %v2961_v10 = vpop.f32.mrf.mxu2 }
0x164e   :  { %v3016_v0 = vpop.f32.mrf.mxu0 }
0x1654   :  { %v7521_v15 = vpop.f32.mrf.mxu2 }
0x1656   :  { %v3120_v55 = vpop.f32.mrf.mxu0 }
0x1657   :  { %3125 = vrot.lane.b32.xlu0 %v3120_v55, %s6788_s23 }
0x165c   :  { %v3076_v9 = vpop.f32.mrf.mxu2 }
0x165e   :  { %v3122_v46 = vpop.f32.mrf.mxu0 }
0x1664   :  { %v3078_v3 = vpop.f32.mrf.mxu2 }
0x1666   :  { %v3034_v48 = vpop.f32.mrf.mxu1 }
0x1667   :  { %v3035_v50 = vadd.f32 %v3034_v48, %v3014_v36  ;;  %v3291_v12 = vpop.f32.mrf.mxu0 }
0x1668   :  { %v3296_v18 = vrot.slane %v3291_v12, 2 }
0x1669   :  { %v7537_v42 = vadd.f32 %v6227_v6, %v3035_v50 }
0x166a   :  { %3297 = vrot.lane.b32.xlu1 %v3296_v18, %s6788_s23 }
0x166c   :  { %v2984_v39 = vpop.f32.mrf.mxu3 }
0x166d   :  { %v2985_v52 = vadd.f32 %v2984_v39, %v2961_v10  ;;  %v3243_v43 = vpop.f32.mrf.mxu2 }
0x166e   :  { %v3036_v13 = vpop.f32.mrf.mxu1  ;;  %v3248_v54 = vrot.slane %v3243_v43, 2 }
0x166f   :  { %v3293_v35 = vpop.f32.mrf.mxu0  ;;  %v7544_v11 = vadd.f32 %v6228_v61, %v2985_v52  ;;  %v3037_v32 = vadd.f32 %v3036_v13, %v3016_v0 }
0x1671   :  { %v7548_v14 = vadd.f32 %v6227_v6, %v3037_v32  ;;  %v3080_v34 = vadd.f32 %v3076_v9, %v7544_v11 }
0x1673   :  { %v6025_v17 = vmul.f32 -1.442695, %v3080_v34  ;;  %v3250_v57 = vadd.f32 %v3248_v54, %v7548_v14 }
0x1674   :  { %v7540_v31 = vpop.f32.mrf.mxu3 }
0x1675   :  { %v3245_v30 = vpop.f32.mrf.mxu2  ;;  %v6044_v7 = vmul.f32 -1.442695, %v3250_v57 }
0x1676   :  { %v3144_v19 = vpop.f32.mrf.mxu1 }
0x167c   :  { %v3096_v8 = vpop.f32.mrf.mxu3 }
0x167d   :  { %3101 = vrot.lane.b32.xlu0 %v3096_v8, %s6791_s30 }
0x167e   :  { %v3146_v20 = vpop.f32.mrf.mxu1 }
0x1684   :  { %v3098_v4 = vpop.f32.mrf.mxu3 }
0x1686   :  { %v3316_v22 = vpop.f32.mrf.mxu1 }
0x1687   :  { %v3321_v55 = vrot.slane %v3316_v22, 2 }
0x168c   :  { %v3266_v49 = vpop.f32.mrf.mxu3 }
0x168d   :  { %v3271_v40 = vrot.slane %v3266_v49, 2 }
0x168e   :  { %v3318_v33 = vpop.f32.mrf.mxu1 }
0x1694   :  { %v3268_v45 = vpop.f32.mrf.mxu3 }
0x16c9   :  { %v3126_v21 = vpop.permute.xlu0 %3125 }
0x16ca   :  { %v3128_v60 = vadd.f32 %v3126_v21, %v7544_v11 }
0x16cc   :  { %6486 = vtanh.f32 %v3128_v60 }
0x16d2   :  { %v6487_v63 = vpop.eup %6486 }
0x16d3   :  { %3213 = vrot.lane.b32.xlu2 %v6487_v63, %s6790_s29 }
0x16db   :  { %3272 = vrot.lane.b32.xlu2 %v3271_v40, %s6791_s30 }
0x16dc   :  { %v3298_v16 = vpop.permute.xlu1 %3297 }
0x16dd   :  { %v3300_v47 = vadd.f32 %v3298_v16, %v7548_v14 }
0x16df   :  { %6488 = vtanh.f32 %v3300_v47 }
0x16e0   :  { %6490 = vpow2.f32 %v6025_v17 }
0x16e5   :  { %v6489_v27 = vpop.eup %6488 }
0x16e6   :  { %3386 = vrot.lane.b32.xlu1 %v6489_v27, %s6790_s29  ;;  %v6491_v23 = vpop.eup %6490 }
0x16e7   :  { %v3156_v24 = vadd.f32 1.0, %v6491_v23 }
0x16e9   :  { %6492 = vrcp.f32 %v3156_v24  ;;  %v3168_v1 = vand.u32 2147483648, %v3156_v24  ;;  %vm3162_vm2 = vweird.f32 %v3156_v24  ;;  %v3166_v5 = vand.u32 2147483647, %v3156_v24 }
0x16ea   :  { %6494 = vpow2.f32 %v6044_v7 }
0x16eb   :  { %v3169_v41 = vor.u32 1.1754944e-38, %v3168_v1  ;;  %vm3167_vm8 = vcmp.eq.f32.partialorder %v3166_v5, 8.507059e+37 }
0x16ee   :  { %3149 = vrot.lane.b32.xlu1 %v3144_v19, %s6792_s1 }
0x16ef   :  { %v6493_v25 = vpop.eup %6492  ;;  %v3102_v4 = vpop.permute.xlu0 %3101 }
0x16f0   :  { %v3158_v37 = vmul.f32 %v6493_v25, %v3156_v24  ;;  %vm3163_vm1 = vweird.f32 %v6493_v25  ;;  %v6495_v9 = vpop.eup %6494  ;;  %v3104_v49 = vadd.f32 %v3102_v4, %v7544_v11 }
0x16f1   :  { %vm3164_vm3 = vmor %vm3162_vm2, %vm3163_vm1  ;;  %v3329_v46 = vadd.f32 1.0, %v6495_v9 }
0x16f2   :  { %v3159_v38 = vsub.f32 1.0, %v3158_v37  ;;  %v6026_v45 = vmul.f32 -1.442695, %v3104_v49 }
0x16f3   :  { %6496 = vrcp.f32 %v3329_v46  ;;  %v3341_v18 = vand.u32 2147483648, %v3329_v46  ;;  %vm3335_vm11 = vweird.f32 %v3329_v46  ;;  %v3339_v39 = vand.u32 2147483647, %v3329_v46 }
0x16f4   :  { %v3160_v53 = vmul.f32 %v6493_v25, %v3159_v38  ;;  %6498 = vpow2.f32 %v6026_v45 }
0x16f5   :  { %v3342_v43 = vor.u32 1.1754944e-38, %v3341_v18  ;;  %vm3340_vm13 = vcmp.eq.f32.partialorder %v3339_v39, 8.507059e+37 }
0x16f6   :  { %v3161_v29 = vadd.f32 %v6493_v25, %v3160_v53 }
0x16f8   :  { %v3165_v51 = vsel %vm3164_vm3, %v6493_v25, %v3161_v29 }
0x16f9   :  { %v3170_v10 = vsel %vm3167_vm8, %v3169_v41, %v3165_v51  ;;  %v6497_v3 = vpop.eup %6496 }
0x16fa   :  { %v3331_v6 = vmul.f32 %v6497_v3, %v3329_v46  ;;  %vm3336_vm10 = vweird.f32 %v6497_v3  ;;  %v6499_v61 = vpop.eup %6498 }
0x16fb   :  { %vm3337_vm12 = vmor %vm3335_vm11, %vm3336_vm10  ;;  %v3175_v21 = vadd.f32 1.0, %v6499_v61 }
0x16fc   :  { %v3332_v48 = vsub.f32 1.0, %v3331_v6 }
0x16fd   :  { %6500 = vrcp.f32 %v3175_v21  ;;  %v3187_v34 = vand.u32 2147483648, %v3175_v21  ;;  %vm3181_vm15 = vweird.f32 %v3175_v21  ;;  %v3185_v17 = vand.u32 2147483647, %v3175_v21 }
0x16fe   :  { %v3333_v50 = vmul.f32 %v6497_v3, %v3332_v48 }
0x16ff   :  { %v3188_v22 = vor.u32 1.1754944e-38, %v3187_v34  ;;  %vm3186_vm1 = vcmp.eq.f32.partialorder %v3185_v17, 8.507059e+37 }
0x1700   :  { %v3334_v12 = vadd.f32 %v6497_v3, %v3333_v50 }
0x1702   :  { %v3338_v52 = vsel %vm3337_vm12, %v6497_v3, %v3334_v12 }
0x1703   :  { %v3343_v30 = vsel %vm3340_vm13, %v3342_v43, %v3338_v52  ;;  %v6501_v63 = vpop.eup %6500 }
0x1704   :  { %v3177_v20 = vmul.f32 %v6501_v63, %v3175_v21  ;;  %vm3182_vm14 = vweird.f32 %v6501_v63 }
0x1705   :  { %vm3183_vm0 = vmor %vm3181_vm15, %vm3182_vm14 }
0x1706   :  { %v3178_v40 = vsub.f32 1.0, %v3177_v20 }
0x1708   :  { %v3179_v47 = vmul.f32 %v6501_v63, %v3178_v40 }
0x170a   :  { %v3180_v27 = vadd.f32 %v6501_v63, %v3179_v47 }
0x170c   :  { %v3184_v24 = vsel %vm3183_vm0, %v6501_v63, %v3180_v27 }
0x170d   :  { %v3189_v25 = vsel %vm3186_vm1, %v3188_v22, %v3184_v24 }
0x170e   :  { %v3211_v37 = vmul.f32 0.0, %v3189_v25 }
0x172d   :  { %v3214_v36 = vpop.permute.xlu2 %3213 }
0x172e   :  { %v3216_v0 = vmul.f32 %v3214_v36, %v3170_v10 }
0x1730   :  { %3218 = vrot.lane.b32.xlu0 %v3216_v0, %s6791_s30 }
0x1735   :  { %v3273_v13 = vpop.permute.xlu2 %3272 }
0x1736   :  { %v3275_v60 = vadd.f32 %v3273_v13, %v7548_v14 }
0x1738   :  { %3322 = vrot.lane.b32.xlu0 %v3321_v55, %s6792_s1  ;;  %v6045_v19 = vmul.f32 -1.442695, %v3275_v60 }
0x173a   :  { %6502 = vpow2.f32 %v6045_v19 }
0x1740   :  { %v6503_v32 = vpop.eup %6502 }
0x1741   :  { %v3348_v16 = vadd.f32 1.0, %v6503_v32 }
0x1743   :  { %6504 = vrcp.f32 %v3348_v16  ;;  %v3360_v5 = vand.u32 2147483648, %v3348_v16  ;;  %vm3354_vm3 = vweird.f32 %v3348_v16  ;;  %v3358_v51 = vand.u32 2147483647, %v3348_v16 }
0x1745   :  { %v3361_v41 = vor.u32 1.1754944e-38, %v3360_v5  ;;  %vm3359_vm10 = vcmp.eq.f32.partialorder %v3358_v51, 8.507059e+37 }
0x1749   :  { %v6505_v23 = vpop.eup %6504 }
0x174a   :  { %v3350_v33 = vmul.f32 %v6505_v23, %v3348_v16  ;;  %vm3355_vm2 = vweird.f32 %v6505_v23 }
0x174b   :  { %vm3356_vm8 = vmor %vm3354_vm3, %vm3355_vm2 }
0x174c   :  { %v3351_v53 = vsub.f32 1.0, %v3350_v33 }
0x174e   :  { %v3352_v29 = vmul.f32 %v6505_v23, %v3351_v53 }
0x1750   :  { %v3353_v57 = vadd.f32 %v6505_v23, %v3352_v29 }
0x1752   :  { %v3357_v7 = vsel %vm3356_vm8, %v6505_v23, %v3353_v57 }
0x1753   :  { %v3362_v36 = vsel %vm3359_vm10, %v3361_v41, %v3357_v7 }
0x1754   :  { %v3384_v10 = vmul.f32 0.0, %v3362_v36 }
0x1758   :  { %v3387_v35 = vpop.permute.xlu1 %3386 }
0x1759   :  { %v3389_v8 = vmul.f32 %v3387_v35, %v3343_v30 }
0x175b   :  { %3391 = vrot.lane.b32.xlu2 %v3389_v8, %s6791_s30 }
0x1760   :  { %v3150_v6 = vpop.permute.xlu1 %3149 }
0x1761   :  { %v3152_v48 = vadd.f32 %v3150_v6, %v7544_v11 }
0x1763   :  { %v6027_v12 = vmul.f32 -1.442695, %v3152_v48 }
0x17a2   :  { %v3219_v38 = vpop.permute.xlu0 %3218 }
0x17a3   :  { %v7561_v54 = vadd.f32 %v3219_v38, %v3211_v37 }
0x17a5   :  { %6506 = vtanh.f32 %v7561_v54 }
0x17aa   :  { %v3323_v46 = vpop.permute.xlu0 %3322 }
0x17ab   :  { %v6507_v1 = vpop.eup %6506  ;;  %v3325_v3 = vadd.f32 %v3323_v46, %v7548_v14 }
0x17ac   :  { %3224 = vrot.lane.b32.xlu1 %v6507_v1, %s6788_s23 }
0x17ad   :  { %v6046_v50 = vmul.f32 -1.442695, %v3325_v3 }
0x17b5   :  { %v3392_v0 = vpop.permute.xlu2 %3391 }
0x17b6   :  { %v7565_v55 = vadd.f32 %v3392_v0, %v3384_v10 }
0x17b8   :  { %6508 = vtanh.f32 %v7565_v55 }
0x17b9   :  { %6510 = vpow2.f32 %v6046_v50 }
0x17ba   :  { %6512 = vpow2.f32 %v6027_v12 }
0x17be   :  { %v6509_v9 = vpop.eup %6508 }
0x17bf   :  { %3397 = vrot.lane.b32.xlu2 %v6509_v9, %s6788_s23  ;;  %v6511_v18 = vpop.eup %6510 }
0x17c0   :  { %v3368_v39 = vadd.f32 1.0, %v6511_v18  ;;  %v6513_v52 = vpop.eup %6512 }
0x17c1   :  { %v3195_v43 = vadd.f32 1.0, %v6513_v52 }
0x17c2   :  { %6514 = vrcp.f32 %v3368_v39  ;;  %v3380_v60 = vand.u32 2147483648, %v3368_v39  ;;  %vm3374_vm12 = vweird.f32 %v3368_v39  ;;  %v3378_v19 = vand.u32 2147483647, %v3368_v39 }
0x17c3   :  { %6516 = vrcp.f32 %v3195_v43  ;;  %v3207_v40 = vand.u32 2147483648, %v3195_v43  ;;  %vm3201_vm0 = vweird.f32 %v3195_v43  ;;  %v3205_v16 = vand.u32 2147483647, %v3195_v43 }
0x17c4   :  { %v3381_v32 = vor.u32 1.1754944e-38, %v3380_v60  ;;  %vm3379_vm15 = vcmp.eq.f32.partialorder %v3378_v19, 8.507059e+37 }
0x17c5   :  { %v3208_v23 = vor.u32 1.1754944e-38, %v3207_v40  ;;  %vm3206_vm2 = vcmp.eq.f32.partialorder %v3205_v16, 8.507059e+37 }
0x17c8   :  { %v6515_v35 = vpop.eup %6514 }
0x17c9   :  { %v3370_v30 = vmul.f32 %v6515_v35, %v3368_v39  ;;  %v6517_v8 = vpop.eup %6516  ;;  %vm3375_vm11 = vweird.f32 %v6515_v35 }
0x17ca   :  { %v3197_v49 = vmul.f32 %v6517_v8, %v3195_v43  ;;  %vm3376_vm13 = vmor %vm3374_vm12, %vm3375_vm11  ;;  %vm3202_vm14 = vweird.f32 %v6517_v8 }
0x17cb   :  { %v3371_v4 = vsub.f32 1.0, %v3370_v30  ;;  %vm3203_vm1 = vmor %vm3201_vm0, %vm3202_vm14 }
0x17cc   :  { %v3198_v61 = vsub.f32 1.0, %v3197_v49 }
0x17cd   :  { %v3372_v45 = vmul.f32 %v6515_v35, %v3371_v4 }
0x17ce   :  { %v3199_v21 = vmul.f32 %v6517_v8, %v3198_v61 }
0x17cf   :  { %v3373_v13 = vadd.f32 %v6515_v35, %v3372_v45 }
0x17d0   :  { %v3200_v20 = vadd.f32 %v6517_v8, %v3199_v21 }
0x17d1   :  { %v3377_v63 = vsel %vm3376_vm13, %v6515_v35, %v3373_v13 }
0x17d2   :  { %v3382_v47 = vsel %vm3379_vm15, %v3381_v32, %v3377_v63  ;;  %v3204_v17 = vsel %vm3203_vm1, %v6517_v8, %v3200_v20 }
0x17d3   :  { %v3209_v22 = vsel %vm3206_vm2, %v3208_v23, %v3204_v17 }
0x1819   :  { %v3398_v27 = vpop.permute.xlu2 %3397 }
0x181a   :  { %v7571_v34 = vmul.f32 %v3398_v27, %v3382_v47 }
0x181c   :  { %v3570_v24 = vpack.c.bf16 %v7571_v34, %v7571_v34 }
0x181e   :  { %v3225_v25 = vpop.permute.xlu1 %3224  ;;  %v3572_v33 = vrot.slane %v3570_v24, 3 }
0x181f   :  { %v7575_v37 = vmul.f32 %v3225_v25, %v3209_v22 }
0x1820   :  { %3573 = vrot.lane.b32.xlu1 %v3572_v33, %s6793_s2 }
0x1821   :  { %v3411_v38 = vpack.c.bf16 %v7575_v37, %v7575_v37 }
0x1823   :  { %3413 = vrot.lane.b32.xlu0 %v3411_v38, %s6793_s2 }
0x1892   :  { %v3574_v29 = vpop.permute.xlu1 %3573 }
0x1895   :  { %v3414_v53 = vpop.permute.xlu0 %3413 }
0x1896   :  { %6047 = vmatmul.msk.bf16.vlgmr.msra.gmra.mxu2 %vm292_vm9, %v3414_v53  ;;  %6048 = vmatmul.msk.bf16.vlgmr.msra.gmra.mxu3 %vm292_vm9, %v3414_v53 }
0x1897   :  { %6049 = vmatmul.msk.bf16.vlgmr.msrb.gmra.mxu0 %vm292_vm9, %v3414_v53  ;;  %6050 = vmatmul.msk.bf16.vlgmr.msrb.gmra.mxu1 %vm292_vm9, %v3414_v53 }
0x1898   :  { %3791 = vmatpush.bf16.msrb.mxu0 %v7426_v26  ;;  %3755 = vmatpush.bf16.msra.mxu2 %v7442_v28 }
0x1899   :  { %3772 = vmatpush.bf16.msra.mxu3 %v7472_v62  ;;  %3810 = vmatpush.bf16.msrb.mxu1 %v7517_v2 }
0x18a6   :  { %6054 = vmatmul.msk.bf16.vlgmr.msrb.gmra.mxu2 %vm292_vm9, %v3574_v29  ;;  %6055 = vmatmul.msk.bf16.vlgmr.msrb.gmra.mxu3 %vm292_vm9, %v3574_v29 }
0x18a7   :  { %6056 = vmatmul.msk.bf16.vlgmr.msra.gmra.mxu0 %vm292_vm9, %v3574_v29  ;;  %6057 = vmatmul.msk.bf16.vlgmr.msra.gmra.mxu1 %vm292_vm9, %v3574_v29 }
0x18a8   :  { %3951 = vmatpush.bf16.msra.mxu0 %v7462_v56  ;;  %3915 = vmatpush.bf16.msrb.mxu2 %v7468_v59 }
0x18a9   :  { %3932 = vmatpush.bf16.msrb.mxu3 %v7505_v44  ;;  %3970 = vmatpush.bf16.msra.mxu1 %v7530_v58 }
0x1914   :  { %v3463_v57 = vpop.f32.mrf.mxu0  ;;  %v3482_v1 = vpop.f32.mrf.mxu1 }
0x1915   :  { %v3468_v5 = vrot.slane %v3463_v57, 6  ;;  %v3487_v61 = vrot.slane %v3482_v1, 6 }
0x1917   :  { %3469 = vrot.lane.b32.xlu2 %v3468_v5, %s6788_s23 }
0x1919   :  { %v3427_v51 = vpop.f32.mrf.mxu2  ;;  %v3444_v7 = vpop.f32.mrf.mxu3 }
0x191a   :  { %v3449_v10 = vrot.slane %v3444_v7, 6  ;;  %v3432_v13 = vrot.slane %v3427_v51, 6 }
0x191c   :  { %v3465_v41 = vpop.f32.mrf.mxu0  ;;  %v3484_v36 = vpop.f32.mrf.mxu1  ;;  %v3434_v21 = vadd.f32 %v3432_v13, %v7544_v11 }
0x191e   :  { %v6051_v60 = vmul.f32 -1.442695, %v3434_v21 }
0x191f   :  { %3450 = vrot.lane.b32.xlu2 %v3449_v10, %s6791_s30 }
0x1921   :  { %v3429_v0 = vpop.f32.mrf.mxu2  ;;  %v3446_v9 = vpop.f32.mrf.mxu3 }
0x1924   :  { %v3623_v46 = vpop.f32.mrf.mxu0  ;;  %v3642_v3 = vpop.f32.mrf.mxu1 }
0x1925   :  { %v3628_v6 = vrot.slane %v3623_v46, 4  ;;  %v3647_v5 = vrot.slane %v3642_v3, 4 }
0x1927   :  { %3629 = vrot.lane.b32.xlu0 %v3628_v6, %s6788_s23 }
0x1929   :  { %v3587_v48 = vpop.f32.mrf.mxu2  ;;  %v3604_v50 = vpop.f32.mrf.mxu3 }
0x192a   :  { %v3609_v8 = vrot.slane %v3604_v50, 4  ;;  %v3592_v16 = vrot.slane %v3587_v48, 4 }
0x192c   :  { %v3625_v12 = vpop.f32.mrf.mxu0  ;;  %v3644_v18 = vpop.f32.mrf.mxu1  ;;  %v3594_v27 = vadd.f32 %v3592_v16, %v7548_v14 }
0x192e   :  { %v6058_v24 = vmul.f32 -1.442695, %v3594_v27 }
0x1931   :  { %v3589_v39 = vpop.f32.mrf.mxu2  ;;  %v3606_v52 = vpop.f32.mrf.mxu3 }
0x1971   :  { %v3470_v43 = vpop.permute.xlu2 %3469 }
0x1972   :  { %v3472_v35 = vadd.f32 %v3470_v43, %v7544_v11 }
0x1974   :  { %6518 = vtanh.f32 %v3472_v35 }
0x1979   :  { %v3451_v46 = vpop.permute.xlu2 %3450 }
0x197a   :  { %v6519_v30 = vpop.eup %6518  ;;  %v3453_v50 = vadd.f32 %v3451_v46, %v7544_v11 }
0x197b   :  { %3555 = vrot.lane.b32.xlu1 %v6519_v30, %s6790_s29 }
0x197c   :  { %v6052_v39 = vmul.f32 -1.442695, %v3453_v50 }
0x1983   :  { %3610 = vrot.lane.b32.xlu1 %v3609_v8, %s6791_s30 }
0x1999   :  { %v3630_v4 = vpop.permute.xlu0 %3629 }
0x199a   :  { %v3632_v49 = vadd.f32 %v3630_v4, %v7548_v14 }
0x199c   :  { %6520 = vtanh.f32 %v3632_v49 }
0x199d   :  { %6522 = vpow2.f32 %v6051_v60 }
0x19a2   :  { %v6521_v45 = vpop.eup %6520 }
0x19a3   :  { %3715 = vrot.lane.b32.xlu0 %v6521_v45, %s6790_s29  ;;  %v6523_v19 = vpop.eup %6522 }
0x19a4   :  { %v3495_v63 = vadd.f32 1.0, %v6523_v19  ;;  %v3551_v19 = vrot.slane %v7561_v54, 6 }
0x19a6   :  { %6524 = vrcp.f32 %v3495_v63  ;;  %v3507_v23 = vand.u32 2147483648, %v3495_v63  ;;  %vm3501_vm8 = vweird.f32 %v3495_v63  ;;  %v3505_v22 = vand.u32 2147483647, %v3495_v63 }
0x19a7   :  { %6526 = vpow2.f32 %v6058_v24 }
0x19a8   :  { %v3508_v33 = vor.u32 1.1754944e-38, %v3507_v23  ;;  %vm3506_vm11 = vcmp.eq.f32.partialorder %v3505_v22, 8.507059e+37 }
0x19ab   :  { %3488 = vrot.lane.b32.xlu0 %v3487_v61, %s6792_s1 }
0x19ac   :  { %v6525_v20 = vpop.eup %6524 }
0x19ad   :  { %v3497_v32 = vmul.f32 %v6525_v20, %v3495_v63  ;;  %vm3502_vm3 = vweird.f32 %v6525_v20  ;;  %v6527_v57 = vpop.eup %6526 }
0x19ae   :  { %vm3503_vm10 = vmor %vm3501_vm8, %vm3502_vm3  ;;  %v3655_v1 = vadd.f32 1.0, %v6527_v57 }
0x19af   :  { %v3498_v40 = vsub.f32 1.0, %v3497_v32 }
0x19b0   :  { %6528 = vrcp.f32 %v3655_v1  ;;  %v3667_v0 = vand.u32 2147483648, %v3655_v1  ;;  %vm3661_vm13 = vweird.f32 %v3655_v1  ;;  %v3665_v9 = vand.u32 2147483647, %v3655_v1 }
0x19b1   :  { %v3499_v47 = vmul.f32 %v6525_v20, %v3498_v40  ;;  %6530 = vpow2.f32 %v6052_v39 }
0x19b2   :  { %v3668_v48 = vor.u32 1.1754944e-38, %v3667_v0  ;;  %vm3666_vm15 = vcmp.eq.f32.partialorder %v3665_v9, 8.507059e+37 }
0x19b3   :  { %v3500_v17 = vadd.f32 %v6525_v20, %v3499_v47 }
0x19b5   :  { %v3504_v25 = vsel %vm3503_vm10, %v6525_v20, %v3500_v17 }
0x19b6   :  { %v3509_v53 = vsel %vm3506_vm11, %v3508_v33, %v3504_v25  ;;  %v6529_v51 = vpop.eup %6528 }
0x19b7   :  { %v3657_v7 = vmul.f32 %v6529_v51, %v3655_v1  ;;  %vm3662_vm12 = vweird.f32 %v6529_v51  ;;  %v6531_v52 = vpop.eup %6530 }
0x19b8   :  { %vm3663_vm14 = vmor %vm3661_vm13, %vm3662_vm12  ;;  %v3514_v43 = vadd.f32 1.0, %v6531_v52 }
0x19b9   :  { %v3658_v41 = vsub.f32 1.0, %v3657_v7 }
0x19ba   :  { %6532 = vrcp.f32 %v3514_v43  ;;  %v3526_v45 = vand.u32 2147483648, %v3514_v43  ;;  %vm3520_vm1 = vweird.f32 %v3514_v43  ;;  %v3524_v61 = vand.u32 2147483647, %v3514_v43 }
0x19bb   :  { %v3659_v36 = vmul.f32 %v6529_v51, %v3658_v41 }
0x19bc   :  { %v3527_v21 = vor.u32 1.1754944e-38, %v3526_v45  ;;  %vm3525_vm3 = vcmp.eq.f32.partialorder %v3524_v61, 8.507059e+37 }
0x19bd   :  { %v3660_v10 = vadd.f32 %v6529_v51, %v3659_v36 }
0x19bf   :  { %v3664_v6 = vsel %vm3663_vm14, %v6529_v51, %v3660_v10 }
0x19c0   :  { %v3669_v12 = vsel %vm3666_vm15, %v3668_v48, %v3664_v6  ;;  %v6533_v35 = vpop.eup %6532 }
0x19c1   :  { %v3516_v30 = vmul.f32 %v6533_v35, %v3514_v43  ;;  %vm3521_vm0 = vweird.f32 %v6533_v35 }
0x19c2   :  { %vm3522_vm2 = vmor %vm3520_vm1, %vm3521_vm0 }
0x19c3   :  { %v3517_v8 = vsub.f32 1.0, %v3516_v30 }
0x19c5   :  { %v3518_v4 = vmul.f32 %v6533_v35, %v3517_v8 }
0x19c7   :  { %v3519_v49 = vadd.f32 %v6533_v35, %v3518_v4 }
0x19c9   :  { %v3523_v13 = vsel %vm3522_vm2, %v6533_v35, %v3519_v49 }
0x19ca   :  { %v3528_v60 = vsel %vm3525_vm3, %v3527_v21, %v3523_v13 }
0x19cb   :  { %v3553_v63 = vmul.f32 %v3551_v19, %v3528_v60 }
0x19ed   :  { %v3556_v38 = vpop.permute.xlu1 %3555 }
0x19ee   :  { %v3558_v29 = vmul.f32 %v3556_v38, %v3509_v53 }
0x19f0   :  { %3560 = vrot.lane.b32.xlu2 %v3558_v29, %s6791_s30 }
0x19f5   :  { %v3611_v40 = vpop.permute.xlu1 %3610 }
0x19f6   :  { %v3613_v47 = vadd.f32 %v3611_v40, %v7548_v14 }
0x19f8   :  { %3648 = vrot.lane.b32.xlu2 %v3647_v5, %s6792_s1  ;;  %v6059_v27 = vmul.f32 -1.442695, %v3613_v47  ;;  %v3711_v5 = vrot.slane %v7565_v55, 2 }
0x1a15   :  { %v3716_v3 = vpop.permute.xlu0 %3715 }
0x1a16   :  { %v3718_v18 = vmul.f32 %v3716_v3, %v3669_v12 }
0x1a18   :  { %3720 = vrot.lane.b32.xlu1 %v3718_v18, %s6791_s30 }
0x1a1d   :  { %v3489_v36 = vpop.permute.xlu0 %3488 }
0x1a1e   :  { %v3491_v0 = vadd.f32 %v3489_v36, %v7544_v11 }
0x1a20   :  { %v6053_v9 = vmul.f32 -1.442695, %v3491_v0 }
0x1a4a   :  { %v3561_v20 = vpop.permute.xlu2 %3560 }
0x1a4b   :  { %v7613_v32 = vadd.f32 %v3561_v20, %v3553_v63 }
0x1a4d   :  { %6534 = vtanh.f32 %v7613_v32 }
0x1a4e   :  { %6536 = vpow2.f32 %v6059_v27 }
0x1a52   :  { %v3649_v45 = vpop.permute.xlu2 %3648 }
0x1a53   :  { %v6535_v16 = vpop.eup %6534  ;;  %v3651_v61 = vadd.f32 %v3649_v45, %v7548_v14 }
0x1a54   :  { %3566 = vrot.lane.b32.xlu0 %v6535_v16, %s6788_s23  ;;  %v6537_v17 = vpop.eup %6536 }
0x1a55   :  { %v3674_v23 = vadd.f32 1.0, %v6537_v17  ;;  %v6060_v13 = vmul.f32 -1.442695, %v3651_v61 }
0x1a57   :  { %6538 = vrcp.f32 %v3674_v23  ;;  %v3686_v38 = vand.u32 2147483648, %v3674_v23  ;;  %vm3680_vm10 = vweird.f32 %v3674_v23  ;;  %v3684_v53 = vand.u32 2147483647, %v3674_v23 }
0x1a59   :  { %v3687_v57 = vor.u32 1.1754944e-38, %v3686_v38  ;;  %vm3685_vm12 = vcmp.eq.f32.partialorder %v3684_v53, 8.507059e+37 }
0x1a5d   :  { %v6539_v24 = vpop.eup %6538 }
0x1a5e   :  { %v3676_v22 = vmul.f32 %v6539_v24, %v3674_v23  ;;  %vm3681_vm8 = vweird.f32 %v6539_v24 }
0x1a5f   :  { %vm3682_vm11 = vmor %vm3680_vm10, %vm3681_vm8 }
0x1a60   :  { %v3677_v54 = vsub.f32 1.0, %v3676_v22 }
0x1a62   :  { %v3678_v25 = vmul.f32 %v6539_v24, %v3677_v54 }
0x1a64   :  { %v3679_v33 = vadd.f32 %v6539_v24, %v3678_v25 }
0x1a66   :  { %v3683_v29 = vsel %vm3682_vm11, %v6539_v24, %v3679_v33 }
0x1a67   :  { %v3688_v1 = vsel %vm3685_vm12, %v3687_v57, %v3683_v29 }
0x1a68   :  { %v3713_v51 = vmul.f32 %v3711_v5, %v3688_v1 }
0x1a8a   :  { %v3721_v7 = vpop.permute.xlu1 %3720 }
0x1a8b   :  { %v7619_v41 = vadd.f32 %v3721_v7, %v3713_v51 }
0x1a8d   :  { %6540 = vtanh.f32 %v7619_v41 }
0x1a8e   :  { %6542 = vpow2.f32 %v6053_v9 }
0x1a93   :  { %v6541_v10 = vpop.eup %6540 }
0x1a94   :  { %3726 = vrot.lane.b32.xlu1 %v6541_v10, %s6788_s23  ;;  %v6543_v46 = vpop.eup %6542 }
0x1a95   :  { %v3534_v6 = vadd.f32 1.0, %v6543_v46 }
0x1a97   :  { %6544 = vrcp.f32 %v3534_v6  ;;  %v3546_v18 = vand.u32 2147483648, %v3534_v6  ;;  %vm3540_vm14 = vweird.f32 %v3534_v6  ;;  %v3544_v39 = vand.u32 2147483647, %v3534_v6 }
0x1a98   :  { %6546 = vpow2.f32 %v6060_v13 }
0x1a99   :  { %v3547_v43 = vor.u32 1.1754944e-38, %v3546_v18  ;;  %vm3545_vm0 = vcmp.eq.f32.partialorder %v3544_v39, 8.507059e+37 }
0x1a9d   :  { %v6545_v48 = vpop.eup %6544 }
0x1a9e   :  { %v3536_v50 = vmul.f32 %v6545_v48, %v3534_v6  ;;  %vm3541_vm13 = vweird.f32 %v6545_v48  ;;  %v6547_v21 = vpop.eup %6546 }
0x1a9f   :  { %vm3542_vm15 = vmor %vm3540_vm14, %vm3541_vm13  ;;  %v3694_v60 = vadd.f32 1.0, %v6547_v21 }
0x1aa0   :  { %v3537_v55 = vsub.f32 1.0, %v3536_v50 }
0x1aa1   :  { %6548 = vrcp.f32 %v3694_v60  ;;  %v3706_v47 = vand.u32 2147483648, %v3694_v60  ;;  %vm3700_vm2 = vweird.f32 %v3694_v60  ;;  %v3704_v27 = vand.u32 2147483647, %v3694_v60 }
0x1aa2   :  { %v3538_v3 = vmul.f32 %v6545_v48, %v3537_v55 }
0x1aa3   :  { %v3707_v23 = vor.u32 1.1754944e-38, %v3706_v47  ;;  %vm3705_vm8 = vcmp.eq.f32.partialorder %v3704_v27, 8.507059e+37 }
0x1aa4   :  { %v3539_v12 = vadd.f32 %v6545_v48, %v3538_v3 }
0x1aa6   :  { %v3543_v52 = vsel %vm3542_vm15, %v6545_v48, %v3539_v12 }
0x1aa7   :  { %v3548_v35 = vsel %vm3545_vm0, %v3547_v43, %v3543_v52  ;;  %v6549_v19 = vpop.eup %6548 }
0x1aa8   :  { %v3696_v63 = vmul.f32 %v6549_v19, %v3694_v60  ;;  %vm3701_vm1 = vweird.f32 %v6549_v19 }
0x1aa9   :  { %vm3702_vm3 = vmor %vm3700_vm2, %vm3701_vm1 }
0x1aaa   :  { %v3697_v20 = vsub.f32 1.0, %v3696_v63 }
0x1aac   :  { %v3698_v40 = vmul.f32 %v6549_v19, %v3697_v20 }
0x1aae   :  { %v3699_v16 = vadd.f32 %v6549_v19, %v3698_v40 }
0x1ab0   :  { %v3703_v17 = vsel %vm3702_vm3, %v6549_v19, %v3699_v16 }
0x1ab1   :  { %v3708_v24 = vsel %vm3705_vm8, %v3707_v23, %v3703_v17 }
0x1ac6   :  { %v3567_v30 = vpop.permute.xlu0 %3566 }
0x1ac7   :  { %v7624_v8 = vmul.f32 %v3567_v30, %v3548_v35 }
0x1ac9   :  { %v3740_v4 = vpack.c.bf16 %v7624_v8, %v7624_v8 }
0x1acb   :  { %v3742_v49 = vrot.slane %v3740_v4, 1 }
0x1acd   :  { %3743 = vrot.lane.b32.xlu2 %v3742_v49, %s6793_s2 }
0x1b06   :  { %v3727_v22 = vpop.permute.xlu1 %3726 }
0x1b07   :  { %v7630_v54 = vmul.f32 %v3727_v22, %v3708_v24 }
0x1b09   :  { %v3900_v25 = vpack.c.bf16 %v7630_v54, %v7630_v54 }
0x1b0b   :  { %v3902_v33 = vrot.slane %v3900_v25, 2 }
0x1b0d   :  { %3903 = vrot.lane.b32.xlu0 %v3902_v33, %s6793_s2 }
0x1b27   :  { %v3744_v38 = vpop.permute.xlu2 %3743 }
0x1b28   :  { %6061 = vmatmul.msk.bf16.vlgmr.msra.gmra.mxu2 %vm292_vm9, %v3744_v38  ;;  %6062 = vmatmul.msk.bf16.vlgmr.msra.gmra.mxu3 %vm292_vm9, %v3744_v38 }
0x1b29   :  { %6063 = vmatmul.msk.bf16.vlgmr.msrb.gmra.mxu0 %vm292_vm9, %v3744_v38  ;;  %6064 = vmatmul.msk.bf16.vlgmr.msrb.gmra.mxu1 %vm292_vm9, %v3744_v38 }
0x1b2a   :  { %4121 = vmatpush.bf16.msrb.mxu0 %v7426_v26  ;;  %4085 = vmatpush.bf16.msra.mxu2 %v7442_v28 }
0x1b2b   :  { %4102 = vmatpush.bf16.msra.mxu3 %v7472_v62  ;;  %4140 = vmatpush.bf16.msrb.mxu1 %v7517_v2 }
0x1b7f   :  { %v3904_v53 = vpop.permute.xlu0 %3903 }
0x1b80   :  { %6068 = vmatmul.msk.bf16.vlgmr.msrb.gmra.mxu2 %vm292_vm9, %v3904_v53  ;;  %6069 = vmatmul.msk.bf16.vlgmr.msrb.gmra.mxu3 %vm292_vm9, %v3904_v53 }
0x1b81   :  { %6070 = vmatmul.msk.bf16.vlgmr.msra.gmra.mxu0 %vm292_vm9, %v3904_v53  ;;  %6071 = vmatmul.msk.bf16.vlgmr.msra.gmra.mxu1 %vm292_vm9, %v3904_v53 }
0x1b82   :  { %4277 = vmatpush.bf16.msra.mxu0 %v7462_v56  ;;  %4245 = vmatpush.bf16.msrb.mxu2 %v7468_v59 }
0x1b83   :  { %4259 = vmatpush.bf16.msrb.mxu3 %v7505_v44  ;;  %4295 = vmatpush.bf16.msra.mxu1 %v7530_v58 }
0x1ba6   :  { %v3793_v26 = vpop.f32.mrf.mxu0  ;;  %v3812_v28 = vpop.f32.mrf.mxu1 }
0x1ba7   :  { %v3798_v62 = vrot.slane %v3793_v26, 4  ;;  %v3817_v35 = vrot.slane %v3812_v28, 4 }
0x1ba9   :  { %3799 = vrot.lane.b32.xlu1 %v3798_v62, %s6788_s23 }
0x1bab   :  { %v3757_v2 = vpop.f32.mrf.mxu2  ;;  %v3774_v29 = vpop.f32.mrf.mxu3 }
0x1bac   :  { %v3779_v5 = vrot.slane %v3774_v29, 4  ;;  %v3762_v18 = vrot.slane %v3757_v2, 4 }
0x1bae   :  { %v3795_v57 = vpop.f32.mrf.mxu0  ;;  %v3814_v1 = vpop.f32.mrf.mxu1  ;;  %v3764_v52 = vadd.f32 %v3762_v18, %v7544_v11 }
0x1bb0   :  { %v6065_v43 = vmul.f32 -1.442695, %v3764_v52  ;;  %v3881_v52 = vrot.slane %v7613_v32, 6 }
0x1bb1   :  { %3780 = vrot.lane.b32.xlu1 %v3779_v5, %s6791_s30 }
0x1bb3   :  { %v3759_v51 = vpop.f32.mrf.mxu2  ;;  %v3776_v56 = vpop.f32.mrf.mxu3 }
0x1bfe   :  { %v3953_v7 = vpop.f32.mrf.mxu0  ;;  %v3972_v59 = vpop.f32.mrf.mxu1 }
0x1bff   :  { %v3958_v36 = vrot.slane %v3953_v7, 6  ;;  %v3977_v25 = vrot.slane %v3972_v59, 6 }
0x1c01   :  { %3959 = vrot.lane.b32.xlu2 %v3958_v36, %s6788_s23 }
0x1c03   :  { %v3917_v44 = vpop.f32.mrf.mxu2  ;;  %v3934_v58 = vpop.f32.mrf.mxu3 }
0x1c04   :  { %v3939_v55 = vrot.slane %v3934_v58, 6  ;;  %v3922_v13 = vrot.slane %v3917_v44, 6 }
0x1c06   :  { %v3955_v10 = vpop.f32.mrf.mxu0  ;;  %v3974_v0 = vpop.f32.mrf.mxu1  ;;  %v3924_v60 = vadd.f32 %v3922_v13, %v7548_v14 }
0x1c08   :  { %v6072_v20 = vmul.f32 -1.442695, %v3924_v60 }
0x1c0b   :  { %v3919_v9 = vpop.f32.mrf.mxu2  ;;  %v3936_v46 = vpop.f32.mrf.mxu3 }
0x1c1b   :  { %v3800_v6 = vpop.permute.xlu1 %3799 }
0x1c1c   :  { %v3802_v48 = vadd.f32 %v3800_v6, %v7544_v11 }
0x1c1e   :  { %6550 = vtanh.f32 %v3802_v48 }
0x1c23   :  { %v3781_v56 = vpop.permute.xlu1 %3780 }
0x1c24   :  { %v6551_v50 = vpop.eup %6550  ;;  %v3783_v7 = vadd.f32 %v3781_v56, %v7544_v11 }
0x1c25   :  { %3885 = vrot.lane.b32.xlu0 %v6551_v50, %s6790_s29 }
0x1c26   :  { %v6066_v59 = vmul.f32 -1.442695, %v3783_v7 }
0x1c2d   :  { %3940 = vrot.lane.b32.xlu0 %v3939_v55, %s6791_s30 }
0x1c5b   :  { %v3960_v3 = vpop.permute.xlu2 %3959 }
0x1c5c   :  { %v3962_v12 = vadd.f32 %v3960_v3, %v7548_v14 }
0x1c5e   :  { %6552 = vtanh.f32 %v3962_v12 }
0x1c5f   :  { %6554 = vpow2.f32 %v6065_v43 }
0x1c64   :  { %v6553_v39 = vpop.eup %6552 }
0x1c65   :  { %4045 = vrot.lane.b32.xlu2 %v6553_v39, %s6790_s29  ;;  %v6555_v30 = vpop.eup %6554 }
0x1c66   :  { %v3825_v4 = vadd.f32 1.0, %v6555_v30 }
0x1c68   :  { %6556 = vrcp.f32 %v3825_v4  ;;  %v3837_v63 = vand.u32 2147483648, %v3825_v4  ;;  %vm3831_vm11 = vweird.f32 %v3825_v4  ;;  %v3835_v40 = vand.u32 2147483647, %v3825_v4 }
0x1c69   :  { %6558 = vpow2.f32 %v6072_v20 }
0x1c6a   :  { %v3838_v47 = vor.u32 1.1754944e-38, %v3837_v63  ;;  %vm3836_vm13 = vcmp.eq.f32.partialorder %v3835_v40, 8.507059e+37 }
0x1c6d   :  { %3818 = vrot.lane.b32.xlu2 %v3817_v35, %s6792_s1 }
0x1c6e   :  { %v6557_v49 = vpop.eup %6556 }
0x1c6f   :  { %v3827_v45 = vmul.f32 %v6557_v49, %v3825_v4  ;;  %vm3832_vm10 = vweird.f32 %v6557_v49  ;;  %v6559_v24 = vpop.eup %6558 }
0x1c70   :  { %vm3833_vm12 = vmor %vm3831_vm11, %vm3832_vm10  ;;  %v3985_v22 = vadd.f32 1.0, %v6559_v24 }
0x1c71   :  { %v3828_v61 = vsub.f32 1.0, %v3827_v45 }
0x1c72   :  { %6560 = vrcp.f32 %v3985_v22  ;;  %v3997_v62 = vand.u32 2147483648, %v3985_v22  ;;  %vm3991_vm15 = vweird.f32 %v3985_v22  ;;  %v3995_v2 = vand.u32 2147483647, %v3985_v22 }
0x1c73   :  { %v3829_v21 = vmul.f32 %v6557_v49, %v3828_v61  ;;  %6562 = vpow2.f32 %v6066_v59 }
0x1c74   :  { %v3998_v57 = vor.u32 1.1754944e-38, %v3997_v62  ;;  %vm3996_vm1 = vcmp.eq.f32.partialorder %v3995_v2, 8.507059e+37 }
0x1c75   :  { %v3830_v19 = vadd.f32 %v6557_v49, %v3829_v21 }
0x1c77   :  { %v3834_v16 = vsel %vm3833_vm12, %v6557_v49, %v3830_v19 }
0x1c78   :  { %v3839_v17 = vsel %vm3836_vm13, %v3838_v47, %v3834_v16  ;;  %v6561_v33 = vpop.eup %6560  ;;  %v4041_v47 = vrot.slane %v7619_v41, 2 }
0x1c79   :  { %v3987_v38 = vmul.f32 %v6561_v33, %v3985_v22  ;;  %vm3992_vm14 = vweird.f32 %v6561_v33  ;;  %v6563_v36 = vpop.eup %6562 }
0x1c7a   :  { %vm3993_vm0 = vmor %vm3991_vm15, %vm3992_vm14  ;;  %v3844_v44 = vadd.f32 1.0, %v6563_v36 }
0x1c7b   :  { %v3988_v53 = vsub.f32 1.0, %v3987_v38 }
0x1c7c   :  { %6564 = vrcp.f32 %v3844_v44  ;;  %v3856_v50 = vand.u32 2147483648, %v3844_v44  ;;  %vm3850_vm3 = vweird.f32 %v3844_v44  ;;  %v3854_v3 = vand.u32 2147483647, %v3844_v44 }
0x1c7d   :  { %v3989_v26 = vmul.f32 %v6561_v33, %v3988_v53 }
0x1c7e   :  { %v3857_v18 = vor.u32 1.1754944e-38, %v3856_v50  ;;  %vm3855_vm10 = vcmp.eq.f32.partialorder %v3854_v3, 8.507059e+37 }
0x1c7f   :  { %v3990_v28 = vadd.f32 %v6561_v33, %v3989_v26 }
0x1c81   :  { %v3994_v29 = vsel %vm3993_vm0, %v6561_v33, %v3990_v28 }
0x1c82   :  { %v3999_v5 = vsel %vm3996_vm1, %v3998_v57, %v3994_v29  ;;  %v6565_v58 = vpop.eup %6564 }
0x1c83   :  { %v3846_v10 = vmul.f32 %v6565_v58, %v3844_v44  ;;  %vm3851_vm2 = vweird.f32 %v6565_v58 }
0x1c84   :  { %vm3852_vm8 = vmor %vm3850_vm3, %vm3851_vm2 }
0x1c85   :  { %v3847_v0 = vsub.f32 1.0, %v3846_v10 }
0x1c87   :  { %v3848_v46 = vmul.f32 %v6565_v58, %v3847_v0 }
0x1c89   :  { %v3849_v48 = vadd.f32 %v6565_v58, %v3848_v46 }
0x1c8b   :  { %v3853_v12 = vsel %vm3852_vm8, %v6565_v58, %v3849_v48 }
0x1c8c   :  { %v3858_v39 = vsel %vm3855_vm10, %v3857_v18, %v3853_v12 }
0x1c8d   :  { %v3883_v43 = vmul.f32 %v3881_v52, %v3858_v39 }
0x1c97   :  { %v3886_v27 = vpop.permute.xlu0 %3885 }
0x1c98   :  { %v3888_v23 = vmul.f32 %v3886_v27, %v3839_v17 }
0x1c9a   :  { %3890 = vrot.lane.b32.xlu1 %v3888_v23, %s6791_s30 }
0x1c9f   :  { %v3941_v9 = vpop.permute.xlu0 %3940 }
0x1ca0   :  { %v3943_v6 = vadd.f32 %v3941_v9, %v7548_v14 }
0x1ca2   :  { %3978 = vrot.lane.b32.xlu1 %v3977_v25, %s6792_s1  ;;  %v6073_v55 = vmul.f32 -1.442695, %v3943_v6 }
0x1ca4   :  { %6566 = vpow2.f32 %v6073_v55 }
0x1caa   :  { %v6567_v30 = vpop.eup %6566 }
0x1cab   :  { %v4004_v49 = vadd.f32 1.0, %v6567_v30 }
0x1cad   :  { %v4016_v63 = vand.u32 2147483648, %v4004_v49  ;;  %vm4010_vm12 = vweird.f32 %v4004_v49  ;;  %v4014_v32 = vand.u32 2147483647, %v4004_v49 }
0x1caf   :  { %v4017_v40 = vor.u32 1.1754944e-38, %v4016_v63  ;;  %vm4015_vm14 = vcmp.eq.f32.partialorder %v4014_v32, 8.507059e+37  ;;  %v7714_v63 = vld [vmem:[%s7448_s14] sm:$0xff] }
0x1cb0   :  { %v7718_v32 = vld [vmem:[%s7454_s4] sm:$0xff] }
0x1cbf   :  { %v4046_v1 = vpop.permute.xlu2 %4045 }
0x1cc0   :  { %v4048_v51 = vmul.f32 %v4046_v1, %v3999_v5 }
0x1cc2   :  { %4050 = vrot.lane.b32.xlu0 %v4048_v51, %s6791_s30 }
0x1cc7   :  { %v3819_v24 = vpop.permute.xlu2 %3818 }
0x1cc8   :  { %v3821_v25 = vadd.f32 %v3819_v24, %v7544_v11 }
0x1cca   :  { %v6067_v33 = vmul.f32 -1.442695, %v3821_v25 }
0x1d0c   :  { %v3891_v35 = vpop.permute.xlu1 %3890 }
0x1d0d   :  { %v7668_v4 = vadd.f32 %v3891_v35, %v3883_v43 }
0x1d0f   :  { %6568 = vtanh.f32 %v7668_v4 }
0x1d10   :  { %6570 = vrcp.f32 %v4004_v49 }
0x1d14   :  { %v3979_v44 = vpop.permute.xlu1 %3978 }
0x1d15   :  { %v6569_v45 = vpop.eup %6568  ;;  %v3981_v58 = vadd.f32 %v3979_v44, %v7548_v14 }
0x1d16   :  { %3896 = vrot.lane.b32.xlu2 %v6569_v45, %s6788_s23  ;;  %v6571_v61 = vpop.eup %6570 }
0x1d17   :  { %v4006_v13 = vmul.f32 %v6571_v61, %v4004_v49  ;;  %vm4011_vm11 = vweird.f32 %v6571_v61  ;;  %v6074_v10 = vmul.f32 -1.442695, %v3981_v58 }
0x1d18   :  { %vm4012_vm13 = vmor %vm4010_vm12, %vm4011_vm11 }
0x1d19   :  { %v4007_v21 = vsub.f32 1.0, %v4006_v13  ;;  %v7698_v13 = vld [vmem:[%s7433_s15] sm:$0xff] }
0x1d1b   :  { %v4008_v60 = vmul.f32 %v6571_v61, %v4007_v21  ;;  %v7702_v21 = vld [vmem:[%s7459_s8] sm:$0xff] }
0x1d1d   :  { %v4009_v19 = vadd.f32 %v6571_v61, %v4008_v60  ;;  %v7706_v60 = vld [vmem:[%s7514_s26] sm:$0xff] }
0x1d1f   :  { %v4013_v20 = vsel %vm4012_vm13, %v6571_v61, %v4009_v19  ;;  %v7694_v61 = vld [vmem:[%s7423_s11] sm:$0xff] }
0x1d20   :  { %v4018_v16 = vsel %vm4015_vm14, %v4017_v40, %v4013_v20  ;;  %v7722_v20 = vld [vmem:[%s7502_s27] sm:$0xff] }
0x1d21   :  { %v4043_v27 = vmul.f32 %v4041_v47, %v4018_v16  ;;  %v7726_v40 = vld [vmem:[%s7527_s7] sm:$0xff] }
0x1d34   :  { %v4051_v17 = vpop.permute.xlu0 %4050 }
0x1d35   :  { %v7673_v23 = vadd.f32 %v4051_v17, %v4043_v27 }
0x1d37   :  { %6572 = vtanh.f32 %v7673_v23 }
0x1d38   :  { %6574 = vpow2.f32 %v6067_v33 }
0x1d3d   :  { %v6573_v22 = vpop.eup %6572 }
0x1d3e   :  { %4056 = vrot.lane.b32.xlu0 %v6573_v22, %s6788_s23  ;;  %v6575_v38 = vpop.eup %6574 }
0x1d3f   :  { %v3864_v53 = vadd.f32 1.0, %v6575_v38 }
0x1d41   :  { %6576 = vrcp.f32 %v3864_v53  ;;  %v3876_v29 = vand.u32 2147483648, %v3864_v53  ;;  %vm3870_vm0 = vweird.f32 %v3864_v53  ;;  %v3874_v57 = vand.u32 2147483647, %v3864_v53 }
0x1d42   :  { %6578 = vpow2.f32 %v6074_v10 }
0x1d43   :  { %v3877_v5 = vor.u32 1.1754944e-38, %v3876_v29  ;;  %vm3875_vm2 = vcmp.eq.f32.partialorder %v3874_v57, 8.507059e+37 }
0x1d47   :  { %v6577_v26 = vpop.eup %6576 }
0x1d48   :  { %v3866_v28 = vmul.f32 %v6577_v26, %v3864_v53  ;;  %vm3871_vm15 = vweird.f32 %v6577_v26  ;;  %v6579_v0 = vpop.eup %6578 }
0x1d49   :  { %vm3872_vm1 = vmor %vm3870_vm0, %vm3871_vm15  ;;  %v4024_v9 = vadd.f32 1.0, %v6579_v0 }
0x1d4a   :  { %v3867_v41 = vsub.f32 1.0, %v3866_v28 }
0x1d4b   :  { %6580 = vrcp.f32 %v4024_v9  ;;  %v4036_v3 = vand.u32 2147483648, %v4024_v9  ;;  %vm4030_vm8 = vweird.f32 %v4024_v9  ;;  %v4034_v12 = vand.u32 2147483647, %v4024_v9 }
0x1d4c   :  { %v3868_v62 = vmul.f32 %v6577_v26, %v3867_v41 }
0x1d4d   :  { %v4037_v39 = vor.u32 1.1754944e-38, %v4036_v3  ;;  %vm4035_vm11 = vcmp.eq.f32.partialorder %v4034_v12, 8.507059e+37 }
0x1d4e   :  { %v3869_v2 = vadd.f32 %v6577_v26, %v3868_v62 }
0x1d50   :  { %v3873_v1 = vsel %vm3872_vm1, %v6577_v26, %v3869_v2 }
0x1d51   :  { %v3878_v51 = vsel %vm3875_vm2, %v3877_v5, %v3873_v1  ;;  %v6581_v46 = vpop.eup %6580 }
0x1d52   :  { %v4026_v6 = vmul.f32 %v6581_v46, %v4024_v9  ;;  %vm4031_vm3 = vweird.f32 %v6581_v46 }
0x1d53   :  { %vm4032_vm10 = vmor %vm4030_vm8, %vm4031_vm3 }
0x1d54   :  { %v4027_v48 = vsub.f32 1.0, %v4026_v6 }
0x1d56   :  { %v4028_v50 = vmul.f32 %v6581_v46, %v4027_v48 }
0x1d58   :  { %v4029_v55 = vadd.f32 %v6581_v46, %v4028_v50 }
0x1d5a   :  { %v4033_v18 = vsel %vm4032_vm10, %v6581_v46, %v4029_v55 }
0x1d5b   :  { %v4038_v52 = vsel %vm4035_vm11, %v4037_v39, %v4033_v18 }
0x1d70   :  { %v3897_v56 = vpop.permute.xlu2 %3896 }
0x1d71   :  { %v7678_v7 = vmul.f32 %v3897_v56, %v3878_v51 }
0x1d73   :  { %v4070_v59 = vpack.c.bf16 %v7678_v7, %v7678_v7 }
0x1d75   :  { %v4072_v36 = vrot.slane %v4070_v59, 2 }
0x1d77   :  { %4073 = vrot.lane.b32.xlu1 %v4072_v36, %s6793_s2 }
0x1db0   :  { %v4057_v43 = vpop.permute.xlu0 %4056 }
0x1db1   :  { %v7684_v35 = vmul.f32 %v4057_v43, %v4038_v52 }
0x1db3   :  { %v4230_v30 = vpack.c.bf16 %v7684_v35, %v7684_v35 }
0x1db5   :  { %v4232_v49 = vrot.slane %v4230_v30, 1 }
0x1db7   :  { %4233 = vrot.lane.b32.xlu2 %v4232_v49, %s6793_s2 }
0x1de9   :  { %v4074_v45 = vpop.permute.xlu1 %4073 }
0x1dea   :  { %6075 = vmatmul.msk.bf16.vlgmr.msra.gmra.mxu2 %vm292_vm9, %v4074_v45  ;;  %6076 = vmatmul.msk.bf16.vlgmr.msra.gmra.mxu3 %vm292_vm9, %v4074_v45 }
0x1deb   :  { %6077 = vmatmul.msk.bf16.vlgmr.msrb.gmra.mxu0 %vm292_vm9, %v4074_v45  ;;  %6078 = vmatmul.msk.bf16.vlgmr.msrb.gmra.mxu1 %vm292_vm9, %v4074_v45 }
0x1dec   :  { %4441 = vmatpush.bf16.msrb.mxu0 %v7694_v61  ;;  %4409 = vmatpush.bf16.msra.mxu2 %v7698_v13 }
0x1ded   :  { %4423 = vmatpush.bf16.msra.mxu3 %v7702_v21  ;;  %4459 = vmatpush.bf16.msrb.mxu1 %v7706_v60 }
0x1e11   :  { %v4234_v19 = vpop.permute.xlu2 %4233 }
0x1e12   :  { %6082 = vmatmul.msk.bf16.vlgmr.msrb.gmra.mxu2 %vm292_vm9, %v4234_v19  ;;  %6083 = vmatmul.msk.bf16.vlgmr.msrb.gmra.mxu3 %vm292_vm9, %v4234_v19 }
0x1e13   :  { %6084 = vmatmul.msk.bf16.vlgmr.msra.gmra.mxu0 %vm292_vm9, %v4234_v19  ;;  %6085 = vmatmul.msk.bf16.vlgmr.msra.gmra.mxu1 %vm292_vm9, %v4234_v19 }
0x1e14   :  { %4598 = vmatpush.bf16.msra.mxu0 %v7714_v63  ;;  %4562 = vmatpush.bf16.msrb.mxu2 %v7718_v32 }
0x1e15   :  { %4579 = vmatpush.bf16.msrb.mxu3 %v7722_v20  ;;  %4617 = vmatpush.bf16.msra.mxu1 %v7726_v40 }
0x1e68   :  { %v4123_v16 = vpop.f32.mrf.mxu0  ;;  %v4142_v47 = vpop.f32.mrf.mxu1 }
0x1e69   :  { %v4128_v27 = vrot.slane %v4123_v16, 2  ;;  %v4147_v0 = vrot.slane %v4142_v47, 2 }
0x1e6b   :  { %4129 = vrot.lane.b32.xlu0 %v4128_v27, %s6788_s23 }
0x1e6d   :  { %v4087_v17 = vpop.f32.mrf.mxu2  ;;  %v4104_v24 = vpop.f32.mrf.mxu3 }
0x1e6e   :  { %v4109_v33 = vrot.slane %v4104_v24, 2  ;;  %v4092_v58 = vrot.slane %v4087_v17, 2 }
0x1e70   :  { %v4125_v22 = vpop.f32.mrf.mxu0  ;;  %v4144_v25 = vpop.f32.mrf.mxu1  ;;  %v4094_v10 = vadd.f32 %v4092_v58, %v7544_v11 }
0x1e72   :  { %v6079_v9 = vmul.f32 -1.442695, %v4094_v10 }
0x1e73   :  { %4110 = vrot.lane.b32.xlu0 %v4109_v33, %s6791_s30 }
0x1e75   :  { %v4089_v38 = vpop.f32.mrf.mxu2  ;;  %v4106_v53 = vpop.f32.mrf.mxu3 }
0x1e90   :  { %v4279_v26 = vpop.f32.mrf.mxu0  ;;  %v4297_v28 = vpop.f32.mrf.mxu1 }
0x1e91   :  { %4284 = vrot.lane.b32.xlu1 %v4279_v26, %s6788_s23 }
0x1e95   :  { %v4247_v41 = vpop.f32.mrf.mxu2  ;;  %v4261_v62 = vpop.f32.mrf.mxu3 }
0x1e96   :  { %v4251_v19 = vadd.f32 %v4247_v41, %v7548_v14 }
0x1e98   :  { %v4281_v2 = vpop.f32.mrf.mxu0  ;;  %v4299_v29 = vpop.f32.mrf.mxu1  ;;  %v6086_v16 = vmul.f32 -1.442695, %v4251_v19 }
0x1e9d   :  { %v4249_v57 = vpop.f32.mrf.mxu2  ;;  %v4263_v1 = vpop.f32.mrf.mxu3 }
0x1edd   :  { %v4130_v5 = vpop.permute.xlu0 %4129 }
0x1ede   :  { %v4132_v51 = vadd.f32 %v4130_v5, %v7544_v11 }
0x1ee0   :  { %6582 = vtanh.f32 %v4132_v51 }
0x1ee6   :  { %v6583_v56 = vpop.eup %6582 }
0x1ee7   :  { %4215 = vrot.lane.b32.xlu2 %v6583_v56, %s6790_s29 }
0x1eef   :  { %4266 = vrot.lane.b32.xlu2 %v4261_v62, %s6791_s30 }
0x1f03   :  { %v4285_v59 = vpop.permute.xlu1 %4284 }
0x1f04   :  { %v4287_v36 = vadd.f32 %v4285_v59, %v7548_v14 }
0x1f06   :  { %6584 = vtanh.f32 %v4287_v36 }
0x1f07   :  { %6586 = vpow2.f32 %v6079_v9 }
0x1f0c   :  { %v6585_v44 = vpop.eup %6584 }
0x1f0d   :  { %4369 = vrot.lane.b32.xlu1 %v6585_v44, %s6790_s29  ;;  %v6587_v46 = vpop.eup %6586 }
0x1f0e   :  { %v4155_v6 = vadd.f32 1.0, %v6587_v46 }
0x1f10   :  { %6588 = vrcp.f32 %v4155_v6  ;;  %v4167_v18 = vand.u32 2147483648, %v4155_v6  ;;  %vm4161_vm13 = vweird.f32 %v4155_v6  ;;  %v4165_v39 = vand.u32 2147483647, %v4155_v6 }
0x1f11   :  { %6590 = vpow2.f32 %v6086_v16 }
0x1f12   :  { %v4168_v43 = vor.u32 1.1754944e-38, %v4167_v18  ;;  %vm4166_vm15 = vcmp.eq.f32.partialorder %v4165_v39, 8.507059e+37 }
0x1f15   :  { %4148 = vrot.lane.b32.xlu1 %v4147_v0, %s6792_s1 }
0x1f16   :  { %v6589_v48 = vpop.eup %6588 }
0x1f17   :  { %v4157_v50 = vmul.f32 %v6589_v48, %v4155_v6  ;;  %vm4162_vm12 = vweird.f32 %v6589_v48  ;;  %v6591_v47 = vpop.eup %6590 }
0x1f18   :  { %vm4163_vm14 = vmor %vm4161_vm13, %vm4162_vm12  ;;  %v4309_v27 = vadd.f32 1.0, %v6591_v47 }
0x1f19   :  { %v4158_v55 = vsub.f32 1.0, %v4157_v50 }
0x1f1a   :  { %6592 = vrcp.f32 %v4309_v27  ;;  %v4321_v38 = vand.u32 2147483648, %v4309_v27  ;;  %vm4315_vm1 = vweird.f32 %v4309_v27  ;;  %v4319_v53 = vand.u32 2147483647, %v4309_v27 }
0x1f1b   :  { %v4159_v3 = vmul.f32 %v6589_v48, %v4158_v55 }
0x1f1c   :  { %v4322_v62 = vor.u32 1.1754944e-38, %v4321_v38  ;;  %vm4320_vm3 = vcmp.eq.f32.partialorder %v4319_v53, 8.507059e+37 }
0x1f1d   :  { %v4160_v12 = vadd.f32 %v6589_v48, %v4159_v3  ;;  %v4211_v3 = vrot.slane %v7668_v4, 6 }
0x1f1f   :  { %v4164_v52 = vsel %vm4163_vm14, %v6589_v48, %v4160_v12 }
0x1f20   :  { %v4169_v49 = vsel %vm4166_vm15, %v4168_v43, %v4164_v52  ;;  %v6593_v17 = vpop.eup %6592 }
0x1f21   :  { %v4311_v24 = vmul.f32 %v6593_v17, %v4309_v27  ;;  %vm4316_vm0 = vweird.f32 %v6593_v17 }
0x1f22   :  { %vm4317_vm2 = vmor %vm4315_vm1, %vm4316_vm0 }
0x1f23   :  { %v4312_v22 = vsub.f32 1.0, %v4311_v24 }
0x1f25   :  { %v4313_v25 = vmul.f32 %v6593_v17, %v4312_v22 }
0x1f27   :  { %v4314_v33 = vadd.f32 %v6593_v17, %v4313_v25  ;;  %v4365_v25 = vrot.slane %v7673_v23, 2 }
0x1f29   :  { %v4318_v26 = vsel %vm4317_vm2, %v6593_v17, %v4314_v33 }
0x1f2a   :  { %v4323_v2 = vsel %vm4320_vm3, %v4322_v62, %v4318_v26 }
0x1f41   :  { %v4216_v30 = vpop.permute.xlu2 %4215 }
0x1f42   :  { %v4218_v45 = vmul.f32 %v4216_v30, %v4169_v49 }
0x1f44   :  { %4220 = vrot.lane.b32.xlu0 %v4218_v45, %s6791_s30 }
0x1f49   :  { %v4267_v44 = vpop.permute.xlu2 %4266 }
0x1f4a   :  { %v4269_v58 = vadd.f32 %v4267_v44, %v7548_v14 }
0x1f4c   :  { %4302 = vrot.lane.b32.xlu0 %v4297_v28, %s6792_s1  ;;  %v4111_v28 = vpop.permute.xlu0 %4110  ;;  %v6087_v0 = vmul.f32 -1.442695, %v4269_v58 }
0x1f4d   :  { %v4113_v57 = vadd.f32 %v4111_v28, %v7544_v11 }
0x1f4f   :  { %v6080_v1 = vmul.f32 -1.442695, %v4113_v57 }
0x1f51   :  { %6594 = vpow2.f32 %v6080_v1 }
0x1f57   :  { %v6595_v5 = vpop.eup %6594 }
0x1f58   :  { %v4174_v51 = vadd.f32 1.0, %v6595_v5 }
0x1f5a   :  { %6596 = vrcp.f32 %v4174_v51  ;;  %v4186_v46 = vand.u32 2147483648, %v4174_v51  ;;  %vm4180_vm10 = vweird.f32 %v4174_v51  ;;  %v4184_v6 = vand.u32 2147483647, %v4174_v51 }
0x1f5b   :  { %6598 = vpow2.f32 %v6087_v0 }
0x1f5c   :  { %v4187_v50 = vor.u32 1.1754944e-38, %v4186_v46  ;;  %vm4185_vm12 = vcmp.eq.f32.partialorder %v4184_v6, 8.507059e+37 }
0x1f60   :  { %v6597_v56 = vpop.eup %6596 }
0x1f61   :  { %v4176_v59 = vmul.f32 %v6597_v56, %v4174_v51  ;;  %vm4181_vm8 = vweird.f32 %v6597_v56  ;;  %v6599_v12 = vpop.eup %6598 }
0x1f62   :  { %vm4182_vm11 = vmor %vm4180_vm10, %vm4181_vm8  ;;  %v4328_v43 = vadd.f32 1.0, %v6599_v12 }
0x1f63   :  { %v4177_v36 = vsub.f32 1.0, %v4176_v59 }
0x1f64   :  { %v4340_v27 = vand.u32 2147483648, %v4328_v43  ;;  %vm4334_vm14 = vweird.f32 %v4328_v43  ;;  %v4338_v4 = vand.u32 2147483647, %v4328_v43 }
0x1f65   :  { %v4178_v10 = vmul.f32 %v6597_v56, %v4177_v36 }
0x1f66   :  { %v4341_v24 = vor.u32 1.1754944e-38, %v4340_v27  ;;  %vm4339_vm0 = vcmp.eq.f32.partialorder %v4338_v4, 8.507059e+37 }
0x1f67   :  { %v4179_v9 = vadd.f32 %v6597_v56, %v4178_v10 }
0x1f69   :  { %v4183_v48 = vsel %vm4182_vm11, %v6597_v56, %v4179_v9 }
0x1f6a   :  { %v4188_v55 = vsel %vm4185_vm12, %v4187_v50, %v4183_v48 }
0x1f6b   :  { %v4213_v18 = vmul.f32 %v4211_v3, %v4188_v55 }
0x1f7f   :  { %v4370_v41 = vpop.permute.xlu1 %4369 }
0x1f80   :  { %v4372_v29 = vmul.f32 %v4370_v41, %v4323_v2 }
0x1f82   :  { %4374 = vrot.lane.b32.xlu2 %v4372_v29, %s6791_s30 }
0x1f87   :  { %v4149_v62 = vpop.permute.xlu1 %4148 }
0x1f88   :  { %v4151_v28 = vadd.f32 %v4149_v62, %v7544_v11 }
0x1f8a   :  { %v6081_v41 = vmul.f32 -1.442695, %v4151_v28 }
0x1fb6   :  { %v4221_v39 = vpop.permute.xlu0 %4220 }
0x1fb7   :  { %v7746_v52 = vadd.f32 %v4221_v39, %v4213_v18 }
0x1fb9   :  { %6600 = vtanh.f32 %v7746_v52 }
0x1fba   :  { %6602 = vrcp.f32 %v4328_v43 }
0x1fbe   :  { %v4303_v2 = vpop.permute.xlu0 %4302 }
0x1fbf   :  { %v6601_v30 = vpop.eup %6600  ;;  %v4305_v57 = vadd.f32 %v4303_v2, %v7548_v14 }
0x1fc0   :  { %4226 = vrot.lane.b32.xlu1 %v6601_v30, %s6788_s23  ;;  %v6603_v49 = vpop.eup %6602 }
0x1fc1   :  { %v4330_v45 = vmul.f32 %v6603_v49, %v4328_v43  ;;  %vm4335_vm13 = vweird.f32 %v6603_v49  ;;  %v6088_v23 = vmul.f32 -1.442695, %v4305_v57 }
0x1fc2   :  { %vm4336_vm15 = vmor %vm4334_vm14, %vm4335_vm13 }
0x1fc3   :  { %v4331_v19 = vsub.f32 1.0, %v4330_v45 }
0x1fc5   :  { %v4332_v16 = vmul.f32 %v6603_v49, %v4331_v19 }
0x1fc7   :  { %v4333_v47 = vadd.f32 %v6603_v49, %v4332_v16 }
0x1fc9   :  { %v4337_v17 = vsel %vm4336_vm15, %v6603_v49, %v4333_v47 }
0x1fca   :  { %v4342_v22 = vsel %vm4339_vm0, %v4341_v24, %v4337_v17 }
0x1fcb   :  { %v4367_v33 = vmul.f32 %v4365_v25, %v4342_v22 }
0x1fdc   :  { %v4375_v38 = vpop.permute.xlu2 %4374 }
0x1fdd   :  { %v7751_v53 = vadd.f32 %v4375_v38, %v4367_v33 }
0x1fdf   :  { %6604 = vtanh.f32 %v7751_v53 }
0x1fe0   :  { %6606 = vpow2.f32 %v6081_v41 }
0x1fe5   :  { %v6605_v26 = vpop.eup %6604 }
0x1fe6   :  { %4380 = vrot.lane.b32.xlu2 %v6605_v26, %s6788_s23  ;;  %v6607_v29 = vpop.eup %6606 }
0x1fe7   :  { %v4194_v1 = vadd.f32 1.0, %v6607_v29 }
0x1fe9   :  { %6608 = vrcp.f32 %v4194_v1  ;;  %v4206_v11 = vand.u32 2147483648, %v4194_v1  ;;  %vm4200_vm2 = vweird.f32 %v4194_v1  ;;  %v4204_v0 = vand.u32 2147483647, %v4194_v1 }
0x1fea   :  { %6610 = vpow2.f32 %v6088_v23 }
0x1feb   :  { %v4207_v46 = vor.u32 1.1754944e-38, %v4206_v11  ;;  %vm4205_vm8 = vcmp.eq.f32.partialorder %v4204_v0, 8.507059e+37 }
0x1fef   :  { %v6609_v5 = vpop.eup %6608 }
0x1ff0   :  { %v6611_v51 = vpop.eup %6610  ;;  %v4196_v56 = vmul.f32 %v6609_v5, %v4194_v1  ;;  %vm4201_vm1 = vweird.f32 %v6609_v5 }
0x1ff1   :  { %v4348_v59 = vadd.f32 1.0, %v6611_v51  ;;  %vm4202_vm3 = vmor %vm4200_vm2, %vm4201_vm1 }
0x1ff2   :  { %v4197_v36 = vsub.f32 1.0, %v4196_v56 }
0x1ff3   :  { %6612 = vrcp.f32 %v4348_v59  ;;  %v4360_v43 = vand.u32 2147483648, %v4348_v59  ;;  %vm4354_vm11 = vweird.f32 %v4348_v59  ;;  %v4358_v30 = vand.u32 2147483647, %v4348_v59 }
0x1ff4   :  { %v4198_v44 = vmul.f32 %v6609_v5, %v4197_v36  ;;  %v6767_v36 = vld [vmem:[%s7490_s20] ss:$0 sm:$0xff] }
0x1ff5   :  { %v4361_v45 = vor.u32 1.1754944e-38, %v4360_v43  ;;  %vm4359_vm13 = vcmp.eq.f32.partialorder %v4358_v30, 8.507059e+37 }
0x1ff6   :  { %v4199_v10 = vadd.f32 %v6609_v5, %v4198_v44 }
0x1ff8   :  { %v4203_v14 = vsel %vm4202_vm3, %v6609_v5, %v4199_v10 }
0x1ff9   :  { %v6613_v58 = vpop.eup %6612  ;;  %v4208_v48 = vsel %vm4205_vm8, %v4207_v46, %v4203_v14 }
0x1ffa   :  { %v4350_v9 = vmul.f32 %v6613_v58, %v4348_v59  ;;  %vm4355_vm10 = vweird.f32 %v6613_v58  ;;  %v2987_v59 = vadd.f32 %v7540_v31, %v7521_v15 }
0x1ffb   :  { %vm4356_vm12 = vmor %vm4354_vm11, %vm4355_vm10 }
0x1ffc   :  { %v4351_v6 = vsub.f32 1.0, %v4350_v9  ;;  %v7789_v44 = vadd.f32 %v6767_v36, %v2987_v59 }
0x1ffe   :  { %v4352_v12 = vmul.f32 %v6613_v58, %v4351_v6 }
0x2000   :  { %v4353_v39 = vadd.f32 %v6613_v58, %v4352_v12 }
0x2002   :  { %v4357_v49 = vsel %vm4356_vm12, %v6613_v58, %v4353_v39 }
0x2003   :  { %v4362_v19 = vsel %vm4359_vm13, %v4361_v45, %v4357_v49 }
0x2032   :  { %v4227_v50 = vpop.permute.xlu1 %4226 }
0x2033   :  { %v7757_v55 = vmul.f32 %v4227_v50, %v4208_v48 }
0x2035   :  { %v4394_v3 = vpack.c.bf16 %v7757_v55, %v7757_v55 }
0x2037   :  { %v4396_v18 = vrot.slane %v4394_v3, 3 }
0x2039   :  { %4397 = vrot.lane.b32.xlu0 %v4396_v18, %s6793_s2 }
0x2040   :  { %v4381_v16 = vpop.permute.xlu2 %4380 }
0x2041   :  { %v7762_v47 = vmul.f32 %v4381_v16, %v4362_v19 }
0x2043   :  { %v4548_v27 = vpack.c.bf16 %v7762_v47, %v7762_v47 }
0x2045   :  { %4550 = vrot.lane.b32.xlu1 %v4548_v27, %s6793_s2 }
0x20ab   :  { %v4398_v4 = vpop.permute.xlu0 %4397 }
0x20ac   :  { %6089 = vmatmul.msk.bf16.vlgmr.msra.gmra.mxu2 %vm292_vm9, %v4398_v4  ;;  %6090 = vmatmul.msk.bf16.vlgmr.msra.gmra.mxu3 %vm292_vm9, %v4398_v4 }
0x20ad   :  { %6091 = vmatmul.msk.bf16.vlgmr.msrb.gmra.mxu0 %vm292_vm9, %v4398_v4  ;;  %6092 = vmatmul.msk.bf16.vlgmr.msrb.gmra.mxu1 %vm292_vm9, %v4398_v4 }
0x20ae   :  { %4767 = vmatpush.bf16.msrb.mxu0 %v7694_v61  ;;  %4731 = vmatpush.bf16.msra.mxu2 %v7698_v13 }
0x20af   :  { %4748 = vmatpush.bf16.msra.mxu3 %v7702_v21  ;;  %4786 = vmatpush.bf16.msrb.mxu1 %v7706_v60 }
0x20b7   :  { %v4551_v17 = vpop.permute.xlu1 %4550 }
0x20bc   :  { %6096 = vmatmul.msk.bf16.vlgmr.msrb.gmra.mxu2 %vm292_vm9, %v4551_v17  ;;  %6097 = vmatmul.msk.bf16.vlgmr.msrb.gmra.mxu3 %vm292_vm9, %v4551_v17 }
0x20bd   :  { %6098 = vmatmul.msk.bf16.vlgmr.msra.gmra.mxu0 %vm292_vm9, %v4551_v17  ;;  %6099 = vmatmul.msk.bf16.vlgmr.msra.gmra.mxu1 %vm292_vm9, %v4551_v17 }
0x20be   :  { %4927 = vmatpush.bf16.msra.mxu0 %v7714_v63  ;;  %4891 = vmatpush.bf16.msrb.mxu2 %v7718_v32 }
0x20bf   :  { %4908 = vmatpush.bf16.msrb.mxu3 %v7722_v20  ;;  %4946 = vmatpush.bf16.msra.mxu1 %v7726_v40 }
0x212a   :  { %v4443_v24 = vpop.f32.mrf.mxu0  ;;  %v4461_v22 = vpop.f32.mrf.mxu1 }
0x212b   :  { %4448 = vrot.lane.b32.xlu2 %v4443_v24, %s6788_s23 }
0x212f   :  { %v4411_v25 = vpop.f32.mrf.mxu2  ;;  %v4425_v33 = vpop.f32.mrf.mxu3 }
0x2130   :  { %v4415_v31 = vadd.f32 %v4411_v25, %v7789_v44 }
0x2132   :  { %v4445_v38 = vpop.f32.mrf.mxu0  ;;  %v4463_v26 = vpop.f32.mrf.mxu1  ;;  %v6093_v46 = vmul.f32 -1.442695, %v4415_v31 }
0x2133   :  { %4430 = vrot.lane.b32.xlu2 %v4425_v33, %s6791_s30 }
0x2137   :  { %v4413_v62 = vpop.f32.mrf.mxu2  ;;  %v4427_v28 = vpop.f32.mrf.mxu3 }
0x213a   :  { %v4600_v41 = vpop.f32.mrf.mxu0  ;;  %v4619_v2 = vpop.f32.mrf.mxu1 }
0x213b   :  { %v4605_v29 = vrot.slane %v4600_v41, 2  ;;  %v4624_v25 = vrot.slane %v4619_v2, 2 }
0x213d   :  { %4606 = vrot.lane.b32.xlu0 %v4605_v29, %s6788_s23 }
0x213f   :  { %v4564_v57 = vpop.f32.mrf.mxu2  ;;  %v4581_v1 = vpop.f32.mrf.mxu3 }
0x2140   :  { %v4586_v0 = vrot.slane %v4581_v1, 2  ;;  %v4569_v18 = vrot.slane %v4564_v57, 2 }
0x2142   :  { %v4602_v23 = vpop.f32.mrf.mxu0  ;;  %v4621_v5 = vpop.f32.mrf.mxu1  ;;  %v4571_v43 = vadd.f32 %v4569_v18, %v7537_v42 }
0x2144   :  { %v6100_v19 = vmul.f32 -1.442695, %v4571_v43 }
0x2147   :  { %v4566_v51 = vpop.f32.mrf.mxu2  ;;  %v4583_v56 = vpop.f32.mrf.mxu3 }
0x2185   :  { %v4449_v58 = vpop.permute.xlu2 %4448 }
0x2186   :  { %v4451_v10 = vadd.f32 %v4449_v58, %v7789_v44 }
0x2188   :  { %6614 = vtanh.f32 %v4451_v10 }
0x218d   :  { %v4431_v57 = vpop.permute.xlu2 %4430 }
0x218e   :  { %v6615_v11 = vpop.eup %6614  ;;  %v4433_v5 = vadd.f32 %v4431_v57, %v7789_v44 }
0x218f   :  { %4533 = vrot.lane.b32.xlu1 %v6615_v11, %s6790_s29 }
0x2190   :  { %v6094_v36 = vmul.f32 -1.442695, %v4433_v5 }
0x2197   :  { %4587 = vrot.lane.b32.xlu1 %v4586_v0, %s6791_s30 }
0x219f   :  { %4466 = vrot.lane.b32.xlu1 %v4461_v22, %s6792_s1 }
0x21af   :  { %v4607_v9 = vpop.permute.xlu0 %4606 }
0x21b0   :  { %v4609_v14 = vadd.f32 %v4607_v9, %v7537_v42 }
0x21b2   :  { %6616 = vtanh.f32 %v4609_v14 }
0x21b3   :  { %6618 = vpow2.f32 %v6093_v46 }
0x21b8   :  { %v6617_v15 = vpop.eup %6616 }
0x21b9   :  { %4692 = vrot.lane.b32.xlu0 %v6617_v15, %s6790_s29  ;;  %v6619_v6 = vpop.eup %6618 }
0x21ba   :  { %v4473_v48 = vadd.f32 1.0, %v6619_v6 }
0x21bc   :  { %6620 = vrcp.f32 %v4473_v48  ;;  %v4485_v49 = vand.u32 2147483648, %v4473_v48  ;;  %vm4479_vm15 = vweird.f32 %v4473_v48  ;;  %v4483_v45 = vand.u32 2147483647, %v4473_v48 }
0x21bd   :  { %6622 = vpow2.f32 %v6100_v19 }
0x21be   :  { %v4486_v27 = vor.u32 1.1754944e-38, %v4485_v49  ;;  %vm4484_vm1 = vcmp.eq.f32.partialorder %v4483_v45, 8.507059e+37 }
0x21c2   :  { %v6621_v50 = vpop.eup %6620 }
0x21c3   :  { %v4475_v3 = vmul.f32 %v6621_v50, %v4473_v48  ;;  %vm4480_vm14 = vweird.f32 %v6621_v50  ;;  %v6623_v22 = vpop.eup %6622 }
0x21c4   :  { %vm4481_vm0 = vmor %vm4479_vm15, %vm4480_vm14  ;;  %v4632_v33 = vadd.f32 1.0, %v6623_v22 }
0x21c5   :  { %v4476_v12 = vsub.f32 1.0, %v4475_v3  ;;  %v4529_v3 = vrot.slane %v7746_v52, 6 }
0x21c6   :  { %6624 = vrcp.f32 %v4632_v33  ;;  %v4644_v29 = vand.u32 2147483648, %v4632_v33  ;;  %vm4638_vm3 = vweird.f32 %v4632_v33  ;;  %v4642_v1 = vand.u32 2147483647, %v4632_v33 }
0x21c7   :  { %v4477_v39 = vmul.f32 %v6621_v50, %v4476_v12  ;;  %6626 = vpow2.f32 %v6094_v36 }
0x21c8   :  { %v4645_v51 = vor.u32 1.1754944e-38, %v4644_v29  ;;  %vm4643_vm10 = vcmp.eq.f32.partialorder %v4642_v1, 8.507059e+37 }
0x21c9   :  { %v4478_v30 = vadd.f32 %v6621_v50, %v4477_v39 }
0x21cb   :  { %v4482_v16 = vsel %vm4481_vm0, %v6621_v50, %v4478_v30 }
0x21cc   :  { %v4487_v17 = vsel %vm4484_vm1, %v4486_v27, %v4482_v16  ;;  %v6625_v38 = vpop.eup %6624 }
0x21cd   :  { %v4634_v26 = vmul.f32 %v6625_v38, %v4632_v33  ;;  %vm4639_vm2 = vweird.f32 %v6625_v38  ;;  %v6627_v58 = vpop.eup %6626 }
0x21ce   :  { %vm4640_vm8 = vmor %vm4638_vm3, %vm4639_vm2  ;;  %v4492_v10 = vadd.f32 1.0, %v6627_v58 }
0x21cf   :  { %v4635_v62 = vsub.f32 1.0, %v4634_v26 }
0x21d0   :  { %6628 = vrcp.f32 %v4492_v10  ;;  %v4504_v31 = vand.u32 2147483648, %v4492_v10  ;;  %vm4498_vm12 = vweird.f32 %v4492_v10  ;;  %v4502_v46 = vand.u32 2147483647, %v4492_v10 }
0x21d1   :  { %v4636_v28 = vmul.f32 %v6625_v38, %v4635_v62  ;;  %v4688_v62 = vrot.slane %v7751_v53, 2 }
0x21d2   :  { %v4505_v48 = vor.u32 1.1754944e-38, %v4504_v31  ;;  %vm4503_vm14 = vcmp.eq.f32.partialorder %v4502_v46, 8.507059e+37 }
0x21d3   :  { %v4637_v41 = vadd.f32 %v6625_v38, %v4636_v28 }
0x21d5   :  { %v4641_v23 = vsel %vm4640_vm8, %v6625_v38, %v4637_v41 }
0x21d6   :  { %v4646_v56 = vsel %vm4643_vm10, %v4645_v51, %v4641_v23  ;;  %v6629_v11 = vpop.eup %6628 }
0x21d7   :  { %v4494_v0 = vmul.f32 %v6629_v11, %v4492_v10  ;;  %vm4499_vm11 = vweird.f32 %v6629_v11 }
0x21d8   :  { %vm4500_vm13 = vmor %vm4498_vm12, %vm4499_vm11 }
0x21d9   :  { %v4495_v9 = vsub.f32 1.0, %v4494_v0 }
0x21db   :  { %v4496_v14 = vmul.f32 %v6629_v11, %v4495_v9 }
0x21dd   :  { %v4497_v15 = vadd.f32 %v6629_v11, %v4496_v14 }
0x21df   :  { %v4501_v6 = vsel %vm4500_vm13, %v6629_v11, %v4497_v15 }
0x21e0   :  { %v4506_v50 = vsel %vm4503_vm14, %v4505_v48, %v4501_v6 }
0x21e1   :  { %v4531_v12 = vmul.f32 %v4529_v3, %v4506_v50 }
0x2201   :  { %v4534_v4 = vpop.permute.xlu1 %4533 }
0x2202   :  { %v4536_v24 = vmul.f32 %v4534_v4, %v4487_v17 }
0x2204   :  { %4538 = vrot.lane.b32.xlu2 %v4536_v24, %s6791_s30 }
0x2209   :  { %v4588_v30 = vpop.permute.xlu1 %4587 }
0x220a   :  { %v4590_v49 = vadd.f32 %v4588_v30, %v7537_v42 }
0x220c   :  { %4625 = vrot.lane.b32.xlu2 %v4624_v25, %s6792_s1  ;;  %v6101_v45 = vmul.f32 -1.442695, %v4590_v49 }
0x2211   :  { %v4467_v57 = vpop.permute.xlu1 %4466 }
0x2212   :  { %v4469_v23 = vadd.f32 %v4467_v57, %v7789_v44 }
0x2214   :  { %v6095_v5 = vmul.f32 -1.442695, %v4469_v23 }
0x222b   :  { %v4693_v2 = vpop.permute.xlu0 %4692 }
0x222c   :  { %v4695_v59 = vmul.f32 %v4693_v2, %v4646_v56 }
0x222e   :  { %4697 = vrot.lane.b32.xlu0 %v4695_v59, %s6791_s30 }
0x225e   :  { %v4539_v18 = vpop.permute.xlu2 %4538 }
0x225f   :  { %v7804_v39 = vadd.f32 %v4539_v18, %v4531_v12 }
0x2261   :  { %6630 = vtanh.f32 %v7804_v39 }
0x2262   :  { %6632 = vpow2.f32 %v6101_v45 }
0x2266   :  { %v4626_v6 = vpop.permute.xlu2 %4625 }
0x2267   :  { %v6631_v43 = vpop.eup %6630  ;;  %v4628_v48 = vadd.f32 %v4626_v6, %v7537_v42 }
0x2268   :  { %4544 = vrot.lane.b32.xlu0 %v6631_v43, %s6788_s23  ;;  %v6633_v19 = vpop.eup %6632 }
0x2269   :  { %v4651_v16 = vadd.f32 1.0, %v6633_v19  ;;  %v6102_v50 = vmul.f32 -1.442695, %v4628_v48 }
0x226b   :  { %6634 = vrcp.f32 %v4651_v16  ;;  %v4663_v22 = vand.u32 2147483648, %v4651_v16  ;;  %vm4657_vm0 = vweird.f32 %v4651_v16  ;;  %v4661_v25 = vand.u32 2147483647, %v4651_v16 }
0x226d   :  { %v4664_v38 = vor.u32 1.1754944e-38, %v4663_v22  ;;  %vm4662_vm2 = vcmp.eq.f32.partialorder %v4661_v25, 8.507059e+37 }
0x2271   :  { %v6635_v27 = vpop.eup %6634 }
0x2272   :  { %v4653_v4 = vmul.f32 %v6635_v27, %v4651_v16  ;;  %vm4658_vm15 = vweird.f32 %v6635_v27 }
0x2273   :  { %vm4659_vm1 = vmor %vm4657_vm0, %vm4658_vm15 }
0x2274   :  { %v4654_v52 = vsub.f32 1.0, %v4653_v4 }
0x2276   :  { %v4655_v17 = vmul.f32 %v6635_v27, %v4654_v52 }
0x2278   :  { %v4656_v24 = vadd.f32 %v6635_v27, %v4655_v17 }
0x227a   :  { %v4660_v33 = vsel %vm4659_vm1, %v6635_v27, %v4656_v24 }
0x227b   :  { %v4665_v26 = vsel %vm4662_vm2, %v4664_v38, %v4660_v33 }
0x227c   :  { %v4690_v28 = vmul.f32 %v4688_v62, %v4665_v26 }
0x22a0   :  { %v4698_v41 = vpop.permute.xlu0 %4697 }
0x22a1   :  { %v7810_v29 = vadd.f32 %v4698_v41, %v4690_v28 }
0x22a3   :  { %6636 = vtanh.f32 %v7810_v29 }
0x22a4   :  { %6638 = vpow2.f32 %v6095_v5 }
0x22a9   :  { %v6637_v1 = vpop.eup %6636 }
0x22aa   :  { %4703 = vrot.lane.b32.xlu1 %v6637_v1, %s6788_s23  ;;  %v6639_v51 = vpop.eup %6638 }
0x22ab   :  { %v4512_v2 = vadd.f32 1.0, %v6639_v51 }
0x22ad   :  { %6640 = vrcp.f32 %v4512_v2  ;;  %v4524_v10 = vand.u32 2147483648, %v4512_v2  ;;  %vm4518_vm8 = vweird.f32 %v4512_v2  ;;  %v4522_v11 = vand.u32 2147483647, %v4512_v2 }
0x22ae   :  { %6642 = vpow2.f32 %v6102_v50 }
0x22af   :  { %v4525_v9 = vor.u32 1.1754944e-38, %v4524_v10  ;;  %vm4523_vm11 = vcmp.eq.f32.partialorder %v4522_v11, 8.507059e+37 }
0x22b3   :  { %v6641_v56 = vpop.eup %6640 }
0x22b4   :  { %v4514_v59 = vmul.f32 %v6641_v56, %v4512_v2  ;;  %vm4519_vm3 = vweird.f32 %v6641_v56  ;;  %v6643_v3 = vpop.eup %6642 }
0x22b5   :  { %vm4520_vm10 = vmor %vm4518_vm8, %vm4519_vm3  ;;  %v4671_v12 = vadd.f32 1.0, %v6643_v3 }
0x22b6   :  { %v4515_v53 = vsub.f32 1.0, %v4514_v59 }
0x22b7   :  { %6644 = vrcp.f32 %v4671_v12  ;;  %v4683_v19 = vand.u32 2147483648, %v4671_v12  ;;  %vm4677_vm13 = vweird.f32 %v4671_v12  ;;  %v4681_v16 = vand.u32 2147483647, %v4671_v12 }
0x22b8   :  { %v4516_v36 = vmul.f32 %v6641_v56, %v4515_v53 }
0x22b9   :  { %v4684_v4 = vor.u32 1.1754944e-38, %v4683_v19  ;;  %vm4682_vm15 = vcmp.eq.f32.partialorder %v4681_v16, 8.507059e+37 }
0x22ba   :  { %v4517_v58 = vadd.f32 %v6641_v56, %v4516_v36 }
0x22bc   :  { %v4521_v0 = vsel %vm4520_vm10, %v6641_v56, %v4517_v58 }
0x22bd   :  { %v4526_v14 = vsel %vm4523_vm11, %v4525_v9, %v4521_v0  ;;  %v6645_v18 = vpop.eup %6644 }
0x22be   :  { %v4673_v43 = vmul.f32 %v6645_v18, %v4671_v12  ;;  %vm4678_vm12 = vweird.f32 %v6645_v18 }
0x22bf   :  { %vm4679_vm14 = vmor %vm4677_vm13, %vm4678_vm12 }
0x22c0   :  { %v4674_v30 = vsub.f32 1.0, %v4673_v43 }
0x22c2   :  { %v4675_v49 = vmul.f32 %v6645_v18, %v4674_v30 }
0x22c4   :  { %v4676_v45 = vadd.f32 %v6645_v18, %v4675_v49 }
0x22c6   :  { %v4680_v27 = vsel %vm4679_vm14, %v6645_v18, %v4676_v45 }
0x22c7   :  { %v4685_v17 = vsel %vm4682_vm15, %v4684_v4, %v4680_v27 }
0x22da   :  { %v4545_v15 = vpop.permute.xlu0 %4544 }
0x22db   :  { %v7815_v31 = vmul.f32 %v4545_v15, %v4526_v14 }
0x22dd   :  { %v4717_v46 = vpack.c.bf16 %v7815_v31, %v7815_v31 }
0x22df   :  { %4719 = vrot.lane.b32.xlu2 %v4717_v46, %s6793_s2 }
0x231c   :  { %v4704_v52 = vpop.permute.xlu1 %4703 }
0x231d   :  { %v7821_v24 = vmul.f32 %v4704_v52, %v4685_v17 }
0x231f   :  { %v4876_v22 = vpack.c.bf16 %v7821_v24, %v7821_v24 }
0x2321   :  { %v4878_v25 = vrot.slane %v4876_v22, 3 }
0x2323   :  { %4879 = vrot.lane.b32.xlu0 %v4878_v25, %s6793_s2 }
0x2339   :  { %v4720_v33 = vpop.permute.xlu2 %4719 }
0x233a   :  { %6103 = vmatmul.msk.bf16.vlgmr.msra.gmra.mxu2 %vm292_vm9, %v4720_v33  ;;  %6104 = vmatmul.msk.bf16.vlgmr.msra.gmra.mxu3 %vm292_vm9, %v4720_v33 }
0x233b   :  { %6105 = vmatmul.msk.bf16.vlgmr.msrb.gmra.mxu0 %vm292_vm9, %v4720_v33  ;;  %6106 = vmatmul.msk.bf16.vlgmr.msrb.gmra.mxu1 %vm292_vm9, %v4720_v33 }
0x233c   :  { %5097 = vmatpush.bf16.msrb.mxu0 %v7694_v61  ;;  %5061 = vmatpush.bf16.msra.mxu2 %v7698_v13 }
0x233d   :  { %5078 = vmatpush.bf16.msra.mxu3 %v7702_v21  ;;  %5116 = vmatpush.bf16.msrb.mxu1 %v7706_v60 }
0x2395   :  { %v4880_v38 = vpop.permute.xlu0 %4879 }
0x2396   :  { %6110 = vmatmul.msk.bf16.vlgmr.msrb.gmra.mxu2 %vm292_vm9, %v4880_v38  ;;  %6111 = vmatmul.msk.bf16.vlgmr.msrb.gmra.mxu3 %vm292_vm9, %v4880_v38 }
0x2397   :  { %6112 = vmatmul.msk.bf16.vlgmr.msra.gmra.mxu0 %vm292_vm9, %v4880_v38  ;;  %6113 = vmatmul.msk.bf16.vlgmr.msra.gmra.mxu1 %vm292_vm9, %v4880_v38 }
0x2398   :  { %5257 = vmatpush.bf16.msra.mxu0 %v7714_v63  ;;  %5221 = vmatpush.bf16.msrb.mxu2 %v7718_v32 }
0x2399   :  { %5238 = vmatpush.bf16.msrb.mxu3 %v7722_v20  ;;  %5276 = vmatpush.bf16.msra.mxu1 %v7726_v40 }
0x23b8   :  { %v4769_v61 = vpop.f32.mrf.mxu0  ;;  %v4788_v13 = vpop.f32.mrf.mxu1 }
0x23b9   :  { %v4774_v21 = vrot.slane %v4769_v61, 6  ;;  %v4793_v10 = vrot.slane %v4788_v13, 6 }
0x23bb   :  { %4775 = vrot.lane.b32.xlu1 %v4774_v21, %s6788_s23 }
0x23bd   :  { %v4733_v60 = vpop.f32.mrf.mxu2  ;;  %v4750_v26 = vpop.f32.mrf.mxu3 }
0x23be   :  { %v4755_v41 = vrot.slane %v4750_v26, 6  ;;  %v4738_v9 = vrot.slane %v4733_v60, 6 }
0x23c0   :  { %v4771_v62 = vpop.f32.mrf.mxu0  ;;  %v4790_v28 = vpop.f32.mrf.mxu1  ;;  %v4740_v14 = vadd.f32 %v4738_v9, %v7789_v44 }
0x23c2   :  { %v6107_v46 = vmul.f32 -1.442695, %v4740_v14 }
0x23c3   :  { %4756 = vrot.lane.b32.xlu1 %v4755_v41, %s6791_s30 }
0x23c5   :  { %v4735_v57 = vpop.f32.mrf.mxu2  ;;  %v4752_v63 = vpop.f32.mrf.mxu3 }
0x2414   :  { %v4929_v1 = vpop.f32.mrf.mxu0  ;;  %v4948_v32 = vpop.f32.mrf.mxu1 }
0x2415   :  { %v4934_v23 = vrot.slane %v4929_v1, 4  ;;  %v4953_v33 = vrot.slane %v4948_v32, 4 }
0x2417   :  { %4935 = vrot.lane.b32.xlu2 %v4934_v23, %s6788_s23 }
0x2419   :  { %v4893_v20 = vpop.f32.mrf.mxu2  ;;  %v4910_v40 = vpop.f32.mrf.mxu3 }
0x241a   :  { %v4915_v58 = vrot.slane %v4910_v40, 4  ;;  %v4898_v43 = vrot.slane %v4893_v20, 4 }
0x241c   :  { %v4931_v5 = vpop.f32.mrf.mxu0  ;;  %v4950_v51 = vpop.f32.mrf.mxu1  ;;  %v4900_v45 = vadd.f32 %v4898_v43, %v7537_v42 }
0x241e   :  { %v6114_v4 = vmul.f32 -1.442695, %v4900_v45 }
0x2421   :  { %v4895_v2 = vpop.f32.mrf.mxu2  ;;  %v4912_v56 = vpop.f32.mrf.mxu3 }
0x242d   :  { %v4776_v59 = vpop.permute.xlu1 %4775 }
0x242e   :  { %v4778_v53 = vadd.f32 %v4776_v59, %v7789_v44 }
0x2430   :  { %6646 = vtanh.f32 %v4778_v53 }
0x2435   :  { %v4757_v23 = vpop.permute.xlu1 %4756 }
0x2436   :  { %v6647_v36 = vpop.eup %6646  ;;  %v4759_v20 = vadd.f32 %v4757_v23, %v7789_v44 }
0x2437   :  { %4861 = vrot.lane.b32.xlu0 %v6647_v36, %s6790_s29 }
0x2438   :  { %v6108_v40 = vmul.f32 -1.442695, %v4759_v20 }
0x243f   :  { %4916 = vrot.lane.b32.xlu0 %v4915_v58, %s6791_s30 }
0x2447   :  { %4794 = vrot.lane.b32.xlu0 %v4793_v10, %s6792_s1 }
0x2471   :  { %v4936_v11 = vpop.permute.xlu2 %4935 }
0x2472   :  { %v4938_v0 = vadd.f32 %v4936_v11, %v7537_v42 }
0x2474   :  { %6648 = vtanh.f32 %v4938_v0 }
0x2475   :  { %6650 = vpow2.f32 %v6107_v46 }
0x247a   :  { %v6649_v15 = vpop.eup %6648 }
0x247b   :  { %5021 = vrot.lane.b32.xlu2 %v6649_v15, %s6790_s29  ;;  %v6651_v6 = vpop.eup %6650 }
0x247c   :  { %v4801_v48 = vadd.f32 1.0, %v6651_v6 }
0x247e   :  { %6652 = vrcp.f32 %v4801_v48  ;;  %v4813_v49 = vand.u32 2147483648, %v4801_v48  ;;  %vm4807_vm1 = vweird.f32 %v4801_v48  ;;  %v4811_v19 = vand.u32 2147483647, %v4801_v48 }
0x247f   :  { %6654 = vpow2.f32 %v6114_v4 }
0x2480   :  { %v4814_v27 = vor.u32 1.1754944e-38, %v4813_v49  ;;  %vm4812_vm3 = vcmp.eq.f32.partialorder %v4811_v19, 8.507059e+37 }
0x2484   :  { %v6653_v50 = vpop.eup %6652 }
0x2485   :  { %v4803_v3 = vmul.f32 %v6653_v50, %v4801_v48  ;;  %vm4808_vm0 = vweird.f32 %v6653_v50  ;;  %v6655_v25 = vpop.eup %6654 }
0x2486   :  { %vm4809_vm2 = vmor %vm4807_vm1, %vm4808_vm0  ;;  %v4961_v38 = vadd.f32 1.0, %v6655_v25 }
0x2487   :  { %v4804_v12 = vsub.f32 1.0, %v4803_v3  ;;  %v4857_v3 = vrot.slane %v7804_v39, 6 }
0x2488   :  { %6656 = vrcp.f32 %v4961_v38  ;;  %v4973_v62 = vand.u32 2147483648, %v4961_v38  ;;  %vm4967_vm10 = vweird.f32 %v4961_v38  ;;  %v4971_v28 = vand.u32 2147483647, %v4961_v38 }
0x2489   :  { %v4805_v18 = vmul.f32 %v6653_v50, %v4804_v12  ;;  %6658 = vpow2.f32 %v6108_v40 }
0x248a   :  { %v4974_v57 = vor.u32 1.1754944e-38, %v4973_v62  ;;  %vm4972_vm12 = vcmp.eq.f32.partialorder %v4971_v28, 8.507059e+37 }
0x248b   :  { %v4806_v30 = vadd.f32 %v6653_v50, %v4805_v18 }
0x248d   :  { %v4810_v16 = vsel %vm4809_vm2, %v6653_v50, %v4806_v30 }
0x248e   :  { %v4815_v17 = vsel %vm4812_vm3, %v4814_v27, %v4810_v16  ;;  %v6657_v61 = vpop.eup %6656 }
0x248f   :  { %v4963_v13 = vmul.f32 %v6657_v61, %v4961_v38  ;;  %vm4968_vm8 = vweird.f32 %v6657_v61  ;;  %v6659_v5 = vpop.eup %6658 }
0x2490   :  { %vm4969_vm11 = vmor %vm4967_vm10, %vm4968_vm8  ;;  %v4820_v51 = vadd.f32 1.0, %v6659_v5 }
0x2491   :  { %v4964_v21 = vsub.f32 1.0, %v4963_v13 }
0x2492   :  { %6660 = vrcp.f32 %v4820_v51  ;;  %v4832_v14 = vand.u32 2147483648, %v4820_v51  ;;  %vm4826_vm14 = vweird.f32 %v4820_v51  ;;  %v4830_v15 = vand.u32 2147483647, %v4820_v51 }
0x2493   :  { %v4965_v60 = vmul.f32 %v6657_v61, %v4964_v21 }
0x2494   :  { %v4833_v48 = vor.u32 1.1754944e-38, %v4832_v14  ;;  %vm4831_vm0 = vcmp.eq.f32.partialorder %v4830_v15, 8.507059e+37 }
0x2495   :  { %v4966_v26 = vadd.f32 %v6657_v61, %v4965_v60 }
0x2497   :  { %v4970_v41 = vsel %vm4969_vm11, %v6657_v61, %v4966_v26 }
0x2498   :  { %v4975_v1 = vsel %vm4972_vm12, %v4974_v57, %v4970_v41  ;;  %v6661_v53 = vpop.eup %6660 }
0x2499   :  { %v4822_v36 = vmul.f32 %v6661_v53, %v4820_v51  ;;  %vm4827_vm13 = vweird.f32 %v6661_v53 }
0x249a   :  { %vm4828_vm15 = vmor %vm4826_vm14, %vm4827_vm13 }
0x249b   :  { %v4823_v10 = vsub.f32 1.0, %v4822_v36 }
0x249d   :  { %v4824_v0 = vmul.f32 %v6661_v53, %v4823_v10 }
0x249f   :  { %v4825_v9 = vadd.f32 %v6661_v53, %v4824_v0 }
0x24a1   :  { %v4829_v46 = vsel %vm4828_vm15, %v6661_v53, %v4825_v9 }
0x24a2   :  { %v4834_v50 = vsel %vm4831_vm0, %v4833_v48, %v4829_v46 }
0x24a3   :  { %v4859_v18 = vmul.f32 %v4857_v3, %v4834_v50 }
0x24a9   :  { %v4862_v52 = vpop.permute.xlu0 %4861 }
0x24aa   :  { %v4864_v22 = vmul.f32 %v4862_v52, %v4815_v17 }
0x24ac   :  { %4866 = vrot.lane.b32.xlu1 %v4864_v22, %s6791_s30  ;;  %v5017_v22 = vrot.slane %v7810_v29, 2 }
0x24b1   :  { %v4917_v2 = vpop.permute.xlu0 %4916 }
0x24b2   :  { %v4919_v56 = vadd.f32 %v4917_v2, %v7537_v42 }
0x24b4   :  { %4954 = vrot.lane.b32.xlu1 %v4953_v33, %s6792_s1  ;;  %v6115_v59 = vmul.f32 -1.442695, %v4919_v56 }
0x24b6   :  { %6662 = vpow2.f32 %v6115_v59 }
0x24b9   :  { %v4795_v13 = vpop.permute.xlu0 %4794 }
0x24ba   :  { %v4797_v21 = vadd.f32 %v4795_v13, %v7789_v44 }
0x24bc   :  { %v6663_v58 = vpop.eup %6662  ;;  %v6109_v60 = vmul.f32 -1.442695, %v4797_v21 }
0x24bd   :  { %v4980_v11 = vadd.f32 1.0, %v6663_v58 }
0x24bf   :  { %6664 = vrcp.f32 %v4980_v11  ;;  %v4992_v27 = vand.u32 2147483648, %v4980_v11  ;;  %vm4986_vm2 = vweird.f32 %v4980_v11  ;;  %v4990_v4 = vand.u32 2147483647, %v4980_v11 }
0x24c1   :  { %v4993_v39 = vor.u32 1.1754944e-38, %v4992_v27  ;;  %vm4991_vm8 = vcmp.eq.f32.partialorder %v4990_v4, 8.507059e+37  ;;  %v6770_v27 = vld [vmem:[%s7459_s8] sm:$0xff] }
0x24c2   :  { %v6771_v4 = vld [vmem:[%s7514_s26] sm:$0xff] }
0x24c5   :  { %v6665_v6 = vpop.eup %6664 }
0x24c6   :  { %v4982_v12 = vmul.f32 %v6665_v6, %v4980_v11  ;;  %vm4987_vm1 = vweird.f32 %v6665_v6 }
0x24c7   :  { %vm4988_vm3 = vmor %vm4986_vm2, %vm4987_vm1 }
0x24c8   :  { %v4983_v49 = vsub.f32 1.0, %v4982_v12 }
0x24ca   :  { %v4984_v45 = vmul.f32 %v6665_v6, %v4983_v49 }
0x24cc   :  { %v4985_v16 = vadd.f32 %v6665_v6, %v4984_v45 }
0x24ce   :  { %v4989_v52 = vsel %vm4988_vm3, %v6665_v6, %v4985_v16  ;;  %v6769_v16 = vld [vmem:[%s7433_s15] sm:$0xff] }
0x24cf   :  { %v4994_v17 = vsel %vm4991_vm8, %v4993_v39, %v4989_v52  ;;  %v6772_v39 = vld [vmem:[%s7448_s14] sm:$0xff] }
0x24d0   :  { %v5019_v25 = vmul.f32 %v5017_v22, %v4994_v17  ;;  %v6773_v17 = vld [vmem:[%s7454_s4] sm:$0xff]  ;;  %s6809_s4 = smov 29  }
0x24d1   :  { %v6774_v22 = vld [vmem:[%s7502_s27] sm:$0xff]  ;;  %s5797_s12 = sld [smem:[%s8024_s0 + %s6809_s4]]  }
0x24d5   :  { %v5022_v63 = vpop.permute.xlu2 %5021 }
0x24d6   :  { %v5024_v32 = vmul.f32 %v5022_v63, %v4975_v1 }
0x24d8   :  { %5026 = vrot.lane.b32.xlu2 %v5024_v32, %s6791_s30 }
0x251e   :  { %v4867_v43 = vpop.permute.xlu1 %4866 }
0x251f   :  { %v7859_v30 = vadd.f32 %v4867_v43, %v4859_v18 }
0x2521   :  { %6666 = vtanh.f32 %v7859_v30 }
0x2526   :  { %v4955_v63 = vpop.permute.xlu1 %4954 }
0x2527   :  { %v6667_v19 = vpop.eup %6666  ;;  %v4957_v23 = vadd.f32 %v4955_v63, %v7537_v42 }
0x2528   :  { %4872 = vrot.lane.b32.xlu2 %v6667_v19, %s6788_s23  ;;  %v6768_v19 = vld [vmem:[%s7423_s11] sm:$0xff] }
0x2529   :  { %v6116_v51 = vmul.f32 -1.442695, %v4957_v23 }
0x2532   :  { %v5027_v33 = vpop.permute.xlu2 %5026 }
0x2533   :  { %v7864_v38 = vadd.f32 %v5027_v33, %v5019_v25  ;;  %v6775_v25 = vld [vmem:[%s7527_s7] sm:$0xff] }
0x2535   :  { %6668 = vtanh.f32 %v7864_v38 }
0x2536   :  { %6670 = vpow2.f32 %v6109_v60 }
0x253b   :  { %v6669_v61 = vpop.eup %6668 }
0x253c   :  { %5032 = vrot.lane.b32.xlu0 %v6669_v61, %s6788_s23  ;;  %v6671_v26 = vpop.eup %6670 }
0x253d   :  { %v4840_v62 = vadd.f32 1.0, %v6671_v26 }
0x253f   :  { %6672 = vrcp.f32 %v4840_v62  ;;  %v4852_v32 = vand.u32 2147483648, %v4840_v62  ;;  %vm4846_vm11 = vweird.f32 %v4840_v62  ;;  %v4850_v20 = vand.u32 2147483647, %v4840_v62 }
0x2540   :  { %6674 = vpow2.f32 %v6116_v51 }
0x2541   :  { %v4853_v5 = vor.u32 1.1754944e-38, %v4852_v32  ;;  %vm4851_vm13 = vcmp.eq.f32.partialorder %v4850_v20, 8.507059e+37 }
0x2545   :  { %v6673_v28 = vpop.eup %6672 }
0x2546   :  { %v4842_v41 = vmul.f32 %v6673_v28, %v4840_v62  ;;  %vm4847_vm10 = vweird.f32 %v6673_v28  ;;  %v6675_v58 = vpop.eup %6674 }
0x2547   :  { %vm4848_vm12 = vmor %vm4846_vm11, %vm4847_vm10  ;;  %v5000_v10 = vadd.f32 1.0, %v6675_v58 }
0x2548   :  { %v4843_v29 = vsub.f32 1.0, %v4842_v41 }
0x2549   :  { %6676 = vrcp.f32 %v5000_v10  ;;  %v5012_v46 = vand.u32 2147483648, %v5000_v10  ;;  %vm5006_vm15 = vweird.f32 %v5000_v10  ;;  %v5010_v6 = vand.u32 2147483647, %v5000_v10 }
0x254a   :  { %v4844_v57 = vmul.f32 %v6673_v28, %v4843_v29 }
0x254b   :  { %v5013_v50 = vor.u32 1.1754944e-38, %v5012_v46  ;;  %vm5011_vm1 = vcmp.eq.f32.partialorder %v5010_v6, 8.507059e+37 }
0x254c   :  { %v4845_v1 = vadd.f32 %v6673_v28, %v4844_v57 }
0x254e   :  { %v4849_v40 = vsel %vm4848_vm12, %v6673_v28, %v4845_v1 }
0x254f   :  { %v4854_v2 = vsel %vm4851_vm13, %v4853_v5, %v4849_v40  ;;  %v6677_v11 = vpop.eup %6676 }
0x2550   :  { %v5002_v0 = vmul.f32 %v6677_v11, %v5000_v10  ;;  %vm5007_vm14 = vweird.f32 %v6677_v11 }
0x2551   :  { %vm5008_vm0 = vmor %vm5006_vm15, %vm5007_vm14 }
0x2552   :  { %v5003_v9 = vsub.f32 1.0, %v5002_v0 }
0x2554   :  { %v5004_v14 = vmul.f32 %v6677_v11, %v5003_v9 }
0x2556   :  { %v5005_v15 = vadd.f32 %v6677_v11, %v5004_v14 }
0x2558   :  { %v5009_v48 = vsel %vm5008_vm0, %v6677_v11, %v5005_v15 }
0x2559   :  { %v5014_v3 = vsel %vm5011_vm1, %v5013_v50, %v5009_v48 }
0x2582   :  { %v4873_v56 = vpop.permute.xlu2 %4872 }
0x2583   :  { %v7870_v59 = vmul.f32 %v4873_v56, %v4854_v2 }
0x2585   :  { %v5046_v53 = vpack.c.bf16 %v7870_v59, %v7870_v59 }
0x2587   :  { %v5048_v36 = vrot.slane %v5046_v53, 1 }
0x2589   :  { %5049 = vrot.lane.b32.xlu1 %v5048_v36, %s6793_s2 }
0x25ae   :  { %v5033_v12 = vpop.permute.xlu0 %5032 }
0x25af   :  { %v7875_v18 = vmul.f32 %v5033_v12, %v5014_v3 }
0x25b1   :  { %v5206_v43 = vpack.c.bf16 %v7875_v18, %v7875_v18 }
0x25b3   :  { %v5208_v49 = vrot.slane %v5206_v43, 2 }
0x25b5   :  { %5209 = vrot.lane.b32.xlu2 %v5208_v49, %s6793_s2 }
0x25fb   :  { %v5050_v45 = vpop.permute.xlu1 %5049 }
0x25fc   :  { %6117 = vmatmul.msk.bf16.vlgmr.msra.gmra.mxu2 %vm292_vm9, %v5050_v45  ;;  %6118 = vmatmul.msk.bf16.vlgmr.msra.gmra.mxu3 %vm292_vm9, %v5050_v45 }
0x25fd   :  { %6119 = vmatmul.msk.bf16.vlgmr.msrb.gmra.mxu0 %vm292_vm9, %v5050_v45  ;;  %6120 = vmatmul.msk.bf16.vlgmr.msrb.gmra.mxu1 %vm292_vm9, %v5050_v45 }
0x25fe   :  { %5427 = vmatpush.bf16.msrb.mxu0 %v6768_v19  ;;  %5391 = vmatpush.bf16.msra.mxu2 %v6769_v16 }
0x25ff   :  { %5408 = vmatpush.bf16.msra.mxu3 %v6770_v27  ;;  %5446 = vmatpush.bf16.msrb.mxu1 %v6771_v4 }
0x260f   :  { %v5210_v52 = vpop.permute.xlu2 %5209 }
0x2610   :  { %6124 = vmatmul.msk.bf16.vlgmr.msrb.gmra.mxu2 %vm292_vm9, %v5210_v52  ;;  %6125 = vmatmul.msk.bf16.vlgmr.msrb.gmra.mxu3 %vm292_vm9, %v5210_v52 }
0x2611   :  { %6126 = vmatmul.msk.bf16.vlgmr.msra.gmra.mxu0 %vm292_vm9, %v5210_v52  ;;  %6127 = vmatmul.msk.bf16.vlgmr.msra.gmra.mxu1 %vm292_vm9, %v5210_v52 }
0x2612   :  { %5583 = vmatpush.bf16.msra.mxu0 %v6772_v39  ;;  %5551 = vmatpush.bf16.msrb.mxu2 %v6773_v17 }
0x2613   :  { %5565 = vmatpush.bf16.msrb.mxu3 %v6774_v22  ;;  %5601 = vmatpush.bf16.msra.mxu1 %v6775_v25 }
0x267a   :  { %v5099_v33 = vpop.f32.mrf.mxu0  ;;  %v5118_v61 = vpop.f32.mrf.mxu1 }
0x267b   :  { %v5104_v13 = vrot.slane %v5099_v33, 4  ;;  %v5123_v11 = vrot.slane %v5118_v61, 4 }
0x267d   :  { %5105 = vrot.lane.b32.xlu0 %v5104_v13, %s6788_s23 }
0x267f   :  { %v5063_v21 = vpop.f32.mrf.mxu2  ;;  %v5080_v60 = vpop.f32.mrf.mxu3 }
0x2680   :  { %v5085_v28 = vrot.slane %v5080_v60, 4  ;;  %v5068_v9 = vrot.slane %v5063_v21, 4 }
0x2682   :  { %v5101_v26 = vpop.f32.mrf.mxu0  ;;  %v5120_v62 = vpop.f32.mrf.mxu1  ;;  %v5070_v14 = vadd.f32 %v5068_v9, %v7789_v44 }
0x2684   :  { %v6121_v15 = vmul.f32 -1.442695, %v5070_v14 }
0x2685   :  { %5086 = vrot.lane.b32.xlu0 %v5085_v28, %s6791_s30 }
0x2687   :  { %v5065_v41 = vpop.f32.mrf.mxu2  ;;  %v5082_v29 = vpop.f32.mrf.mxu3 }
0x268e   :  { %v5259_v57 = vpop.f32.mrf.mxu0  ;;  %v5278_v63 = vpop.f32.mrf.mxu1 }
0x268f   :  { %v5264_v1 = vrot.slane %v5259_v57, 6  ;;  %v5283_v33 = vrot.slane %v5278_v63, 6 }
0x2691   :  { %5265 = vrot.lane.b32.xlu1 %v5264_v1, %s6788_s23 }
0x2693   :  { %v5223_v32 = vpop.f32.mrf.mxu2  ;;  %v5240_v23 = vpop.f32.mrf.mxu3 }
0x2694   :  { %v5245_v36 = vrot.slane %v5240_v23, 6  ;;  %v5228_v43 = vrot.slane %v5223_v32, 6 }
0x2696   :  { %v5261_v20 = vpop.f32.mrf.mxu0  ;;  %v5280_v40 = vpop.f32.mrf.mxu1  ;;  %v5230_v19 = vadd.f32 %v5228_v43, %v7537_v42 }
0x2698   :  { %v6128_v52 = vmul.f32 -1.442695, %v5230_v19 }
0x269b   :  { %v5225_v5 = vpop.f32.mrf.mxu2  ;;  %v5242_v51 = vpop.f32.mrf.mxu3 }
0x26ef   :  { %v5106_v2 = vpop.permute.xlu0 %5105 }
0x26f0   :  { %v5108_v56 = vadd.f32 %v5106_v2, %v7789_v44 }
0x26f2   :  { %6678 = vtanh.f32 %v5108_v56 }
0x26f7   :  { %v5087_v23 = vpop.permute.xlu0 %5086 }
0x26f8   :  { %v6679_v53 = vpop.eup %6678  ;;  %v5089_v20 = vadd.f32 %v5087_v23, %v7789_v44 }
0x26f9   :  { %5191 = vrot.lane.b32.xlu2 %v6679_v53, %s6790_s29 }
0x26fa   :  { %v6122_v40 = vmul.f32 -1.442695, %v5089_v20 }
0x2701   :  { %5246 = vrot.lane.b32.xlu2 %v5245_v36, %s6791_s30 }
0x2703   :  { %v5266_v58 = vpop.permute.xlu1 %5265 }
0x2704   :  { %v5268_v10 = vadd.f32 %v5266_v58, %v7537_v42 }
0x2706   :  { %6680 = vtanh.f32 %v5268_v10 }
0x2707   :  { %6682 = vpow2.f32 %v6121_v15 }
0x2709   :  { %5124 = vrot.lane.b32.xlu2 %v5123_v11, %s6792_s1 }
0x270c   :  { %v6681_v0 = vpop.eup %6680 }
0x270d   :  { %5351 = vrot.lane.b32.xlu1 %v6681_v0, %s6790_s29  ;;  %v6683_v46 = vpop.eup %6682 }
0x270e   :  { %v5131_v6 = vadd.f32 1.0, %v6683_v46 }
0x2710   :  { %6684 = vrcp.f32 %v5131_v6  ;;  %v5143_v45 = vand.u32 2147483648, %v5131_v6  ;;  %vm5137_vm3 = vweird.f32 %v5131_v6  ;;  %v5141_v16 = vand.u32 2147483647, %v5131_v6 }
0x2711   :  { %6686 = vpow2.f32 %v6128_v52 }
0x2712   :  { %v5144_v4 = vor.u32 1.1754944e-38, %v5143_v45  ;;  %vm5142_vm10 = vcmp.eq.f32.partialorder %v5141_v16, 8.507059e+37 }
0x2716   :  { %v6685_v48 = vpop.eup %6684 }
0x2717   :  { %v5133_v50 = vmul.f32 %v6685_v48, %v5131_v6  ;;  %vm5138_vm2 = vweird.f32 %v6685_v48  ;;  %v6687_v25 = vpop.eup %6686 }
0x2718   :  { %vm5139_vm8 = vmor %vm5137_vm3, %vm5138_vm2  ;;  %v5291_v61 = vadd.f32 1.0, %v6687_v25 }
0x2719   :  { %v5134_v3 = vsub.f32 1.0, %v5133_v50 }
0x271a   :  { %6688 = vrcp.f32 %v5291_v61  ;;  %v5303_v28 = vand.u32 2147483648, %v5291_v61  ;;  %vm5297_vm12 = vweird.f32 %v5291_v61  ;;  %v5301_v41 = vand.u32 2147483647, %v5291_v61 }
0x271b   :  { %v5135_v12 = vmul.f32 %v6685_v48, %v5134_v3  ;;  %6690 = vpow2.f32 %v6122_v40 }
0x271c   :  { %v5304_v57 = vor.u32 1.1754944e-38, %v5303_v28  ;;  %vm5302_vm14 = vcmp.eq.f32.partialorder %v5301_v41, 8.507059e+37 }
0x271d   :  { %v5136_v49 = vadd.f32 %v6685_v48, %v5135_v12 }
0x271f   :  { %v5140_v27 = vsel %vm5139_vm8, %v6685_v48, %v5136_v49  ;;  %v5187_v48 = vrot.slane %v7859_v30, 6 }
0x2720   :  { %v5145_v17 = vsel %vm5142_vm10, %v5144_v4, %v5140_v27  ;;  %v6689_v13 = vpop.eup %6688 }
0x2721   :  { %v5293_v21 = vmul.f32 %v6689_v13, %v5291_v61  ;;  %vm5298_vm11 = vweird.f32 %v6689_v13  ;;  %v6691_v5 = vpop.eup %6690 }
0x2722   :  { %vm5299_vm13 = vmor %vm5297_vm12, %vm5298_vm11  ;;  %v5150_v51 = vadd.f32 1.0, %v6691_v5 }
0x2723   :  { %v5294_v60 = vsub.f32 1.0, %v5293_v21 }
0x2724   :  { %6692 = vrcp.f32 %v5150_v51  ;;  %v5162_v11 = vand.u32 2147483648, %v5150_v51  ;;  %vm5156_vm0 = vweird.f32 %v5150_v51  ;;  %v5160_v9 = vand.u32 2147483647, %v5150_v51 }
0x2725   :  { %v5295_v26 = vmul.f32 %v6689_v13, %v5294_v60 }
0x2726   :  { %v5163_v15 = vor.u32 1.1754944e-38, %v5162_v11  ;;  %vm5161_vm2 = vcmp.eq.f32.partialorder %v5160_v9, 8.507059e+37 }
0x2727   :  { %v5296_v62 = vadd.f32 %v6689_v13, %v5295_v26 }
0x2729   :  { %v5300_v29 = vsel %vm5299_vm13, %v6689_v13, %v5296_v62 }
0x272a   :  { %v5305_v32 = vsel %vm5302_vm14, %v5304_v57, %v5300_v29  ;;  %v6693_v2 = vpop.eup %6692 }
0x272b   :  { %v5152_v56 = vmul.f32 %v6693_v2, %v5150_v51  ;;  %vm5157_vm15 = vweird.f32 %v6693_v2 }
0x272c   :  { %vm5158_vm1 = vmor %vm5156_vm0, %vm5157_vm15 }
0x272d   :  { %v5153_v53 = vsub.f32 1.0, %v5152_v56 }
0x272f   :  { %v5154_v36 = vmul.f32 %v6693_v2, %v5153_v53 }
0x2731   :  { %v5155_v10 = vadd.f32 %v6693_v2, %v5154_v36 }
0x2733   :  { %v5159_v14 = vsel %vm5158_vm1, %v6693_v2, %v5155_v10 }
0x2734   :  { %v5164_v6 = vsel %vm5161_vm2, %v5163_v15, %v5159_v14 }
0x2735   :  { %v5189_v50 = vmul.f32 %v5187_v48, %v5164_v6 }
0x2753   :  { %v5192_v39 = vpop.permute.xlu2 %5191 }
0x2754   :  { %v5194_v22 = vmul.f32 %v5192_v39, %v5145_v17 }
0x2756   :  { %5196 = vrot.lane.b32.xlu0 %v5194_v22, %s6791_s30 }
0x275b   :  { %v5247_v58 = vpop.permute.xlu2 %5246 }
0x275c   :  { %v5249_v0 = vadd.f32 %v5247_v58, %v7537_v42 }
0x275e   :  { %5284 = vrot.lane.b32.xlu0 %v5283_v33, %s6792_s1  ;;  %v6129_v46 = vmul.f32 -1.442695, %v5249_v0  ;;  %v5347_v33 = vrot.slane %v7864_v38, 2 }
0x2760   :  { %6694 = vpow2.f32 %v6129_v46 }
0x2763   :  { %v5125_v26 = vpop.permute.xlu2 %5124 }
0x2764   :  { %v5127_v62 = vadd.f32 %v5125_v26, %v7789_v44 }
0x2766   :  { %v6695_v43 = vpop.eup %6694  ;;  %v6123_v28 = vmul.f32 -1.442695, %v5127_v62 }
0x2767   :  { %v5310_v49 = vadd.f32 1.0, %v6695_v43 }
0x2769   :  { %v5322_v30 = vand.u32 2147483648, %v5310_v49  ;;  %vm5316_vm8 = vweird.f32 %v5310_v49  ;;  %v5320_v39 = vand.u32 2147483647, %v5310_v49 }
0x276b   :  { %v5323_v22 = vor.u32 1.1754944e-38, %v5322_v30  ;;  %vm5321_vm11 = vcmp.eq.f32.partialorder %v5320_v39, 8.507059e+37 }
0x277f   :  { %v5352_v1 = vpop.permute.xlu1 %5351 }
0x2780   :  { %v5354_v63 = vmul.f32 %v5352_v1, %v5305_v32 }
0x2782   :  { %5356 = vrot.lane.b32.xlu1 %v5354_v63, %s6791_s30 }
0x27c8   :  { %v5197_v3 = vpop.permute.xlu0 %5196 }
0x27c9   :  { %v7913_v12 = vadd.f32 %v5197_v3, %v5189_v50 }
0x27cb   :  { %6696 = vtanh.f32 %v7913_v12 }
0x27cc   :  { %6698 = vrcp.f32 %v5310_v49 }
0x27d0   :  { %v5285_v57 = vpop.permute.xlu0 %5284 }
0x27d1   :  { %v6697_v45 = vpop.eup %6696  ;;  %v5287_v1 = vadd.f32 %v5285_v57, %v7537_v42 }
0x27d2   :  { %5202 = vrot.lane.b32.xlu1 %v6697_v45, %s6788_s23  ;;  %v6699_v19 = vpop.eup %6698 }
0x27d3   :  { %v5312_v16 = vmul.f32 %v6699_v19, %v5310_v49  ;;  %vm5317_vm3 = vweird.f32 %v6699_v19  ;;  %v6130_v38 = vmul.f32 -1.442695, %v5287_v1 }
0x27d4   :  { %vm5318_vm10 = vmor %vm5316_vm8, %vm5317_vm3 }
0x27d5   :  { %v5313_v27 = vsub.f32 1.0, %v5312_v16 }
0x27d7   :  { %v5314_v4 = vmul.f32 %v6699_v19, %v5313_v27 }
0x27d9   :  { %v5315_v52 = vadd.f32 %v6699_v19, %v5314_v4 }
0x27db   :  { %v5319_v17 = vsel %vm5318_vm10, %v6699_v19, %v5315_v52 }
0x27dc   :  { %v5324_v25 = vsel %vm5321_vm11, %v5323_v22, %v5319_v17 }
0x27dd   :  { %v5349_v61 = vmul.f32 %v5347_v33, %v5324_v25 }
0x27f4   :  { %v5357_v13 = vpop.permute.xlu1 %5356 }
0x27f5   :  { %v7918_v21 = vadd.f32 %v5357_v13, %v5349_v61 }
0x27f7   :  { %6700 = vtanh.f32 %v7918_v21 }
0x27f8   :  { %6702 = vpow2.f32 %v6123_v28 }
0x27fd   :  { %v6701_v60 = vpop.eup %6700 }
0x27fe   :  { %5362 = vrot.lane.b32.xlu2 %v6701_v60, %s6788_s23  ;;  %v6703_v41 = vpop.eup %6702 }
0x27ff   :  { %v5170_v29 = vadd.f32 1.0, %v6703_v41 }
0x2801   :  { %6704 = vrcp.f32 %v5170_v29  ;;  %v5182_v2 = vand.u32 2147483648, %v5170_v29  ;;  %vm5176_vm13 = vweird.f32 %v5170_v29  ;;  %v5180_v56 = vand.u32 2147483647, %v5170_v29 }
0x2802   :  { %6706 = vpow2.f32 %v6130_v38 }
0x2803   :  { %v5183_v58 = vor.u32 1.1754944e-38, %v5182_v2  ;;  %vm5181_vm15 = vcmp.eq.f32.partialorder %v5180_v56, 8.507059e+37 }
0x2807   :  { %v6705_v32 = vpop.eup %6704 }
0x2808   :  { %v5172_v63 = vmul.f32 %v6705_v32, %v5170_v29  ;;  %v6707_v23 = vpop.eup %6706  ;;  %vm5177_vm12 = vweird.f32 %v6705_v32 }
0x2809   :  { %v5330_v40 = vadd.f32 1.0, %v6707_v23  ;;  %vm5178_vm14 = vmor %vm5176_vm13, %vm5177_vm12 }
0x280a   :  { %v5173_v20 = vsub.f32 1.0, %v5172_v63 }
0x280b   :  { %6708 = vrcp.f32 %v5330_v40  ;;  %v5342_v50 = vand.u32 2147483648, %v5330_v40  ;;  %vm5336_vm1 = vweird.f32 %v5330_v40  ;;  %v5340_v3 = vand.u32 2147483647, %v5330_v40 }
0x280c   :  { %v5174_v5 = vmul.f32 %v6705_v32, %v5173_v20 }
0x280d   :  { %v5343_v49 = vor.u32 1.1754944e-38, %v5342_v50  ;;  %vm5341_vm3 = vcmp.eq.f32.partialorder %v5340_v3, 8.507059e+37 }
0x280e   :  { %v5175_v51 = vadd.f32 %v6705_v32, %v5174_v5 }
0x2810   :  { %v5179_v53 = vsel %vm5178_vm14, %v6705_v32, %v5175_v51 }
0x2811   :  { %v6709_v36 = vpop.eup %6708  ;;  %v5184_v10 = vsel %vm5181_vm15, %v5183_v58, %v5179_v53 }
0x2812   :  { %v5332_v9 = vmul.f32 %v6709_v36, %v5330_v40  ;;  %vm5337_vm0 = vweird.f32 %v6709_v36 }
0x2813   :  { %vm5338_vm2 = vmor %vm5336_vm1, %vm5337_vm0 }
0x2814   :  { %v5333_v46 = vsub.f32 1.0, %v5332_v9 }
0x2816   :  { %v5334_v6 = vmul.f32 %v6709_v36, %v5333_v46 }
0x2818   :  { %v5335_v48 = vadd.f32 %v6709_v36, %v5334_v6 }
0x281a   :  { %v5339_v43 = vsel %vm5338_vm2, %v6709_v36, %v5335_v48 }
0x281b   :  { %v5344_v45 = vsel %vm5341_vm3, %v5343_v49, %v5339_v43 }
0x2844   :  { %v5203_v11 = vpop.permute.xlu1 %5202 }
0x2845   :  { %v7924_v0 = vmul.f32 %v5203_v11, %v5184_v10 }
0x2847   :  { %v5376_v14 = vpack.c.bf16 %v7924_v0, %v7924_v0 }
0x2849   :  { %v5378_v15 = vrot.slane %v5376_v14, 2 }
0x284b   :  { %5379 = vrot.lane.b32.xlu0 %v5378_v15, %s6793_s2 }
0x2858   :  { %v5363_v19 = vpop.permute.xlu2 %5362 }
0x2859   :  { %v7929_v16 = vmul.f32 %v5363_v19, %v5344_v45 }
0x285b   :  { %v5536_v27 = vpack.c.bf16 %v7929_v16, %v7929_v16 }
0x285d   :  { %v5538_v4 = vrot.slane %v5536_v27, 1 }
0x285f   :  { %5539 = vrot.lane.b32.xlu1 %v5538_v4, %s6793_s2 }
0x28bd   :  { %v5380_v52 = vpop.permute.xlu0 %5379 }
0x28be   :  { %6131 = vmatmul.msk.bf16.vlgmr.msra.gmra.mxu2 %vm292_vm9, %v5380_v52  ;;  %6132 = vmatmul.msk.bf16.vlgmr.msra.gmra.mxu3 %vm292_vm9, %v5380_v52 }
0x28bf   :  { %6133 = vmatmul.msk.bf16.vlgmr.msrb.gmra.mxu0 %vm292_vm9, %v5380_v52  ;;  %6134 = vmatmul.msk.bf16.vlgmr.msrb.gmra.mxu1 %vm292_vm9, %v5380_v52 }
0x28d1   :  { %v5540_v30 = vpop.permute.xlu1 %5539 }
0x28d2   :  { %6138 = vmatmul.msk.bf16.vlgmr.msrb.gmra.mxu2 %vm292_vm9, %v5540_v30  ;;  %6139 = vmatmul.msk.bf16.vlgmr.msrb.gmra.mxu3 %vm292_vm9, %v5540_v30 }
0x28d3   :  { %6140 = vmatmul.msk.bf16.vlgmr.msra.gmra.mxu0 %vm292_vm9, %v5540_v30  ;;  %6141 = vmatmul.msk.bf16.vlgmr.msra.gmra.mxu1 %vm292_vm9, %v5540_v30 }
0x293c   :  { %v5429_v39 = vpop.f32.mrf.mxu0  ;;  %v5448_v17 = vpop.f32.mrf.mxu1 }
0x293d   :  { %v5434_v22 = vrot.slane %v5429_v39, 2  ;;  %v5453_v5 = vrot.slane %v5448_v17, 2 }
0x293f   :  { %5435 = vrot.lane.b32.xlu2 %v5434_v22, %s6788_s23 }
0x2941   :  { %v5393_v25 = vpop.f32.mrf.mxu2  ;;  %v5410_v33 = vpop.f32.mrf.mxu3 }
0x2942   :  { %v5415_v57 = vrot.slane %v5410_v33, 2  ;;  %v5398_v53 = vrot.slane %v5393_v25, 2 }
0x2944   :  { %v5431_v61 = vpop.f32.mrf.mxu0  ;;  %v5450_v13 = vpop.f32.mrf.mxu1  ;;  %v5400_v36 = vadd.f32 %v5398_v53, %v7789_v44  ;;  %v5517_v53 = vrot.slane %v7913_v12, 6 }
0x2946   :  { %v6135_v58 = vmul.f32 -1.442695, %v5400_v36 }
0x2949   :  { %v5395_v60 = vpop.f32.mrf.mxu2  ;;  %v5412_v26 = vpop.f32.mrf.mxu3 }
0x2950   :  { %v5585_v62 = vpop.f32.mrf.mxu0  ;;  %v5603_v28 = vpop.f32.mrf.mxu1 }
0x2951   :  { %5590 = vrot.lane.b32.xlu0 %v5585_v62, %s6788_s23 }
0x2955   :  { %v5553_v41 = vpop.f32.mrf.mxu2  ;;  %v5567_v29 = vpop.f32.mrf.mxu3 }
0x2956   :  { %v5557_v9 = vadd.f32 %v5553_v41, %v7537_v42 }
0x2958   :  { %v5587_v1 = vpop.f32.mrf.mxu0  ;;  %v5605_v38 = vpop.f32.mrf.mxu1  ;;  %v6142_v14 = vmul.f32 -1.442695, %v5557_v9 }
0x2959   :  { %5416 = vrot.lane.b32.xlu0 %v5415_v57, %s6791_s30 }
0x295d   :  { %v5555_v32 = vpop.f32.mrf.mxu2  ;;  %v5569_v63 = vpop.f32.mrf.mxu3 }
0x2999   :  { %v5436_v23 = vpop.permute.xlu2 %5435 }
0x299a   :  { %v5438_v20 = vadd.f32 %v5436_v23, %v7789_v44 }
0x299c   :  { %6710 = vtanh.f32 %v5438_v20 }
0x29a2   :  { %v6711_v40 = vpop.eup %6710 }
0x29a3   :  { %5521 = vrot.lane.b32.xlu1 %v6711_v40, %s6790_s29 }
0x29ab   :  { %5572 = vrot.lane.b32.xlu1 %v5567_v29, %s6791_s30 }
0x29b3   :  { %5454 = vrot.lane.b32.xlu1 %v5453_v5, %s6792_s1 }
0x29c3   :  { %v5591_v51 = vpop.permute.xlu0 %5590 }
0x29c4   :  { %v5593_v2 = vadd.f32 %v5591_v51, %v7537_v42 }
0x29c6   :  { %6712 = vtanh.f32 %v5593_v2 }
0x29c7   :  { %6714 = vpow2.f32 %v6135_v58 }
0x29cc   :  { %v6713_v56 = vpop.eup %6712 }
0x29cd   :  { %5675 = vrot.lane.b32.xlu2 %v6713_v56, %s6790_s29  ;;  %v6715_v10 = vpop.eup %6714 }
0x29ce   :  { %v5461_v11 = vadd.f32 1.0, %v6715_v10 }
0x29d0   :  { %6716 = vrcp.f32 %v5461_v11  ;;  %v5473_v49 = vand.u32 2147483648, %v5461_v11  ;;  %vm5467_vm10 = vweird.f32 %v5461_v11  ;;  %v5471_v45 = vand.u32 2147483647, %v5461_v11 }
0x29d1   :  { %6718 = vpow2.f32 %v6142_v14 }
0x29d2   :  { %v5474_v4 = vor.u32 1.1754944e-38, %v5473_v49  ;;  %vm5472_vm12 = vcmp.eq.f32.partialorder %v5471_v45, 8.507059e+37 }
0x29d6   :  { %v6717_v15 = vpop.eup %6716 }
0x29d7   :  { %v5463_v46 = vmul.f32 %v6717_v15, %v5461_v11  ;;  %v6719_v6 = vpop.eup %6718  ;;  %vm5468_vm8 = vweird.f32 %v6717_v15 }
0x29d8   :  { %v5615_v50 = vadd.f32 1.0, %v6719_v6  ;;  %vm5469_vm11 = vmor %vm5467_vm10, %vm5468_vm8 }
0x29d9   :  { %v5464_v48 = vsub.f32 1.0, %v5463_v46 }
0x29da   :  { %6720 = vrcp.f32 %v5615_v50  ;;  %v5627_v61 = vand.u32 2147483648, %v5615_v50  ;;  %vm5621_vm14 = vweird.f32 %v5615_v50  ;;  %v5625_v13 = vand.u32 2147483647, %v5615_v50 }
0x29db   :  { %v5465_v3 = vmul.f32 %v6717_v15, %v5464_v48 }
0x29dc   :  { %v5628_v26 = vor.u32 1.1754944e-38, %v5627_v61  ;;  %vm5626_vm0 = vcmp.eq.f32.partialorder %v5625_v13, 8.507059e+37 }
0x29dd   :  { %v5466_v43 = vadd.f32 %v6717_v15, %v5465_v3 }
0x29df   :  { %v5470_v27 = vsel %vm5469_vm11, %v6717_v15, %v5466_v43 }
0x29e0   :  { %v6721_v19 = vpop.eup %6720  ;;  %v5475_v39 = vsel %vm5472_vm12, %v5474_v4, %v5470_v27 }
0x29e1   :  { %v5617_v52 = vmul.f32 %v6721_v19, %v5615_v50  ;;  %vm5622_vm13 = vweird.f32 %v6721_v19 }
0x29e2   :  { %vm5623_vm15 = vmor %vm5621_vm14, %vm5622_vm13 }
0x29e3   :  { %v5618_v22 = vsub.f32 1.0, %v5617_v52  ;;  %v5671_v52 = vrot.slane %v7918_v21, 2 }
0x29e5   :  { %v5619_v25 = vmul.f32 %v6721_v19, %v5618_v22 }
0x29e7   :  { %v5620_v33 = vadd.f32 %v6721_v19, %v5619_v25 }
0x29e9   :  { %v5624_v60 = vsel %vm5623_vm15, %v6721_v19, %v5620_v33 }
0x29ea   :  { %v5629_v41 = vsel %vm5626_vm0, %v5628_v26, %v5624_v60 }
0x2a15   :  { %v5522_v30 = vpop.permute.xlu1 %5521 }
0x2a16   :  { %v5524_v17 = vmul.f32 %v5522_v30, %v5475_v39 }
0x2a18   :  { %5526 = vrot.lane.b32.xlu2 %v5524_v17, %s6791_s30 }
0x2a1d   :  { %v5573_v20 = vpop.permute.xlu1 %5572 }
0x2a20   :  { %5608 = vrot.lane.b32.xlu2 %v5603_v28, %s6792_s1  ;;  %v5417_v28 = vpop.permute.xlu0 %5416 }
0x2a21   :  { %v5419_v57 = vadd.f32 %v5417_v28, %v7789_v44 }
0x2a23   :  { %v6136_v1 = vmul.f32 -1.442695, %v5419_v57 }
0x2a25   :  { %6722 = vpow2.f32 %v6136_v1  ;;  %v5455_v21 = vpop.permute.xlu1 %5454 }
0x2a27   :  { %v5676_v62 = vpop.permute.xlu2 %5675 }
0x2a28   :  { %v5678_v29 = vmul.f32 %v5676_v62, %v5629_v41  ;;  %3402 = vrot.lane.b32.xlu2 %v7575_v37, %s6793_s2 }
0x2a2a   :  { %5680 = vrot.lane.b32.xlu0 %v5678_v29, %s6791_s30 }
0x2a2b   :  { %v6723_v37 = vpop.eup %6722 }
0x2a2c   :  { %v5480_v38 = vadd.f32 1.0, %v6723_v37 }
0x2a2e   :  { %6724 = vrcp.f32 %v5480_v38  ;;  %v5492_v5 = vand.u32 2147483648, %v5480_v38  ;;  %vm5486_vm2 = vweird.f32 %v5480_v38 }
0x2a30   :  { %3736 = vrot.lane.b32.xlu2 %v7630_v54, %s6793_s2  ;;  %v5493_v56 = vor.u32 1.1754944e-38, %v5492_v5 }
0x2a34   :  { %v6725_v32 = vpop.eup %6724 }
0x2a35   :  { %v5482_v63 = vmul.f32 %v6725_v32, %v5480_v38  ;;  %vm5487_vm1 = vweird.f32 %v6725_v32 }
0x2a36   :  { %vm5488_vm3 = vmor %vm5486_vm2, %vm5487_vm1 }
0x2a37   :  { %v5483_v54 = vsub.f32 1.0, %v5482_v63 }
0x2a38   :  { %4385 = vrot.lane.b32.xlu2 %v7757_v55, %s6793_s2  ;;  %v5575_v55 = vadd.f32 %v5573_v20, %v7537_v42 }
0x2a39   :  { %v5484_v23 = vmul.f32 %v6725_v32, %v5483_v54 }
0x2a3a   :  { %v6143_v51 = vmul.f32 -1.442695, %v5575_v55 }
0x2a3b   :  { %v5485_v40 = vadd.f32 %v6725_v32, %v5484_v23 }
0x2a3c   :  { %6726 = vpow2.f32 %v6143_v51 }
0x2a3d   :  { %v5489_v2 = vsel %vm5488_vm3, %v6725_v32, %v5485_v40 }
0x2a40   :  { %4713 = vrot.lane.b32.xlu2 %v7821_v24, %s6793_s2  ;;  %v5490_v24 = vand.u32 2147483647, %v5480_v38 }
0x2a42   :  { %vm5491_vm8 = vcmp.eq.f32.partialorder %v5490_v24, 8.507059e+37  ;;  %v6727_v11 = vpop.eup %6726 }
0x2a43   :  { %v5634_v9 = vadd.f32 1.0, %v6727_v11 }
0x2a45   :  { %v5646_v45 = vand.u32 2147483648, %v5634_v9  ;;  %vm5640_vm11 = vweird.f32 %v5634_v9  ;;  %v5644_v19 = vand.u32 2147483647, %v5634_v9 }
0x2a47   :  { %v5647_v27 = vor.u32 1.1754944e-38, %v5646_v45  ;;  %vm5645_vm13 = vcmp.eq.f32.partialorder %v5644_v19, 8.507059e+37  ;;  %v6229_v19 = vld [vmem:[%s5797_s12] ss:$0 sm:$0xff] }
0x2a48   :  { %5367 = vrot.lane.b32.xlu2 %v7924_v0, %s6793_s2  ;;  %v5494_v0 = vsel %vm5491_vm8, %v5493_v56, %v5489_v2 }
0x2a49   :  { %v5519_v36 = vmul.f32 %v5517_v53, %v5494_v0 }
0x2a72   :  { %v5527_v58 = vpop.permute.xlu2 %5526 }
0x2a73   :  { %v5529_v10 = vadd.f32 %v5527_v58, %v5519_v36 }
0x2a75   :  { %6728 = vtanh.f32 %v5529_v10 }
0x2a76   :  { %6730 = vrcp.f32 %v5634_v9 }
0x2a7a   :  { %v5609_v14 = vpop.permute.xlu2 %5608 }
0x2a7b   :  { %v6729_v15 = vpop.eup %6728 }
0x2a7c   :  { %5532 = vrot.lane.b32.xlu0 %v6729_v15, %s6788_s23  ;;  %v6731_v46 = vpop.eup %6730 }
0x2a7d   :  { %v5636_v12 = vmul.f32 %v6731_v46, %v5634_v9  ;;  %vm5641_vm10 = vweird.f32 %v6731_v46 }
0x2a7e   :  { %vm5642_vm12 = vmor %vm5640_vm11, %vm5641_vm10 }
0x2a7f   :  { %v5637_v48 = vsub.f32 1.0, %v5636_v12 }
0x2a81   :  { %v5638_v3 = vmul.f32 %v6731_v46, %v5637_v48 }
0x2a82   :  { %v3403_v6 = vpop.permute.xlu2 %3402 }
0x2a83   :  { %3405 = vst.msk [vmem:[#allocation4] sm:$0x3] %vm634_vm5, %v3403_v6  ;;  %v5639_v43 = vadd.f32 %v6731_v46, %v5638_v3 }
0x2a84   :  { %3407 = vrot.lane.b32.xlu0 %v7571_v34, %s6793_s2 }
0x2a85   :  { %v5643_v34 = vsel %vm5642_vm12, %v6731_v46, %v5639_v43 }
0x2a86   :  { %v5648_v4 = vsel %vm5645_vm13, %v5647_v27, %v5643_v34 }
0x2a87   :  { %v5673_v30 = vmul.f32 %v5671_v52, %v5648_v4 }
0x2a8a   :  { %v3737_v50 = vpop.permute.xlu2 %3736 }
0x2a8b   :  { %3739 = vst.msk [vmem:[#allocation5 + $0x8] sm:$0x30] %vm971_vm7, %v3737_v50 }
0x2a8c   :  { %4061 = vrot.lane.b32.xlu0 %v7678_v7, %s6793_s2 }
0x2a92   :  { %v4386_v49 = vpop.permute.xlu2 %4385 }
0x2a93   :  { %4388 = vst.msk [vmem:[#allocation4] sm:$0xc0] %vm640_vm4, %v4386_v49 }
0x2a94   :  { %4390 = vrot.lane.b32.xlu0 %v7762_v47, %s6793_s2 }
0x2a9a   :  { %v4714_v7 = vpop.permute.xlu2 %4713 }
0x2a9b   :  { %4716 = vst.msk [vmem:[#allocation5] sm:$0xc0] %vm640_vm4, %v4714_v7 }
0x2a9c   :  { %5037 = vrot.lane.b32.xlu0 %v7870_v59, %s6793_s2  ;;  %v5681_v39 = vpop.permute.xlu0 %5680  ;;  %v5457_v59 = vadd.f32 %v5455_v21, %v7789_v44 }
0x2a9d   :  { %v5683_v17 = vadd.f32 %v5681_v39, %v5673_v30 }
0x2a9e   :  { %v6137_v25 = vmul.f32 -1.442695, %v5457_v59 }
0x2a9f   :  { %6732 = vtanh.f32 %v5683_v17 }
0x2aa0   :  { %6734 = vpow2.f32 %v6137_v25 }
0x2aa2   :  { %v5368_v22 = vpop.permute.xlu2 %5367 }
0x2aa3   :  { %5370 = vst.msk [vmem:[#allocation4 + $0x8] sm:$0x30] %vm971_vm7, %v5368_v22 }
0x2aa4   :  { %5372 = vrot.lane.b32.xlu0 %v7929_v16, %s6793_s2 }
0x2aa5   :  { %v6733_v47 = vpop.eup %6732 }
0x2aa6   :  { %5686 = vrot.lane.b32.xlu1 %v6733_v47, %s6788_s23  ;;  %v6735_v16 = vpop.eup %6734  ;;  %s6807_s23 = smov 27  }
0x2aa7   :  { %v5500_v33 = vadd.f32 1.0, %v6735_v16  ;;  %s5795_s1 = sld [smem:[%s8024_s0 + %s6807_s23]]  }
0x2aa9   :  { %6736 = vrcp.f32 %v5500_v33  ;;  %v5512_v44 = vand.u32 2147483648, %v5500_v33  ;;  %vm5506_vm15 = vweird.f32 %v5500_v33  ;;  %v5510_v62 = vand.u32 2147483647, %v5500_v33 }
0x2aab   :  { %v5513_v29 = vor.u32 1.1754944e-38, %v5512_v44  ;;  %vm5511_vm1 = vcmp.eq.f32.partialorder %v5510_v62, 8.507059e+37 }
0x2aae   :  { %3731 = vrot.lane.b32.xlu1 %v7624_v8, %s6793_s2 }
0x2aaf   :  { %v6737_v61 = vpop.eup %6736 }
0x2ab0   :  { %v5502_v13 = vmul.f32 %v6737_v61, %v5500_v33  ;;  %vm5507_vm14 = vweird.f32 %v6737_v61 }
0x2ab1   :  { %vm5508_vm0 = vmor %vm5506_vm15, %vm5507_vm14 }
0x2ab2   :  { %v5503_v8 = vsub.f32 1.0, %v5502_v13 }
0x2ab4   :  { %v5504_v60 = vmul.f32 %v6737_v61, %v5503_v8 }
0x2ab6   :  { %4066 = vrot.lane.b32.xlu1 %v7684_v35, %s6793_s2  ;;  %v5611_v35 = vadd.f32 %v5609_v14, %v7537_v42  ;;  %v5505_v26 = vadd.f32 %v6737_v61, %v5504_v60  ;;  %v6188_v14 = vld [vmem:[%s5795_s1] sm:$0xff] }
0x2ab7   :  { %5749 = vmatpush.bf16.msra.mxu3 %v6188_v14 }
0x2ab8   :  { %v5509_v41 = vsel %vm5508_vm0, %v6737_v61, %v5505_v26 }
0x2abe   :  { %4708 = vrot.lane.b32.xlu1 %v7815_v31, %s6793_s2  ;;  %v6144_v31 = vmul.f32 -1.442695, %v5611_v35 }
0x2ac0   :  { %6738 = vpow2.f32 %v6144_v31 }
0x2ac6   :  { %5042 = vrot.lane.b32.xlu1 %v7875_v18, %s6793_s2  ;;  %v5514_v18 = vsel %vm5511_vm1, %v5513_v29, %v5509_v41  ;;  %v6739_v1 = vpop.eup %6738 }
0x2ac7   :  { %v5654_v42 = vadd.f32 1.0, %v6739_v1 }
0x2ac9   :  { %6740 = vrcp.f32 %v5654_v42  ;;  %v5666_v5 = vand.u32 2147483648, %v5654_v42  ;;  %vm5660_vm3 = vweird.f32 %v5654_v42  ;;  %v5664_v24 = vand.u32 2147483647, %v5654_v42 }
0x2acb   :  { %v5667_v56 = vor.u32 1.1754944e-38, %v5666_v5  ;;  %vm5665_vm10 = vcmp.eq.f32.partialorder %v5664_v24, 8.507059e+37 }
0x2acf   :  { %v6741_v32 = vpop.eup %6740 }
0x2ad0   :  { %v5656_v63 = vmul.f32 %v6741_v32, %v5654_v42  ;;  %vm5661_vm2 = vweird.f32 %v6741_v32 }
0x2ad1   :  { %vm5662_vm8 = vmor %vm5660_vm3, %vm5661_vm2 }
0x2ad2   :  { %v5657_v23 = vsub.f32 1.0, %v5656_v63 }
0x2ad4   :  { %v5658_v20 = vmul.f32 %v6741_v32, %v5657_v23 }
0x2ad6   :  { %v5659_v40 = vadd.f32 %v6741_v32, %v5658_v20 }
0x2ad8   :  { %v5663_v51 = vsel %vm5662_vm8, %v6741_v32, %v5659_v40 }
0x2ad9   :  { %v5668_v0 = vsel %vm5665_vm10, %v5667_v56, %v5663_v51 }
0x2aee   :  { %v5533_v28 = vpop.permute.xlu0 %5532 }
0x2aef   :  { %v5535_v57 = vmul.f32 %v5533_v28, %v5514_v18 }
0x2af1   :  { %5691 = vrot.lane.b32.xlu1 %v5535_v57, %s6793_s2 }
0x2af6   :  { %v3408_v37 = vpop.permute.xlu0 %3407 }
0x2af7   :  { %3410 = vst.msk [vmem:[#allocation5 + $0x8] sm:$0xc0] %vm640_vm4, %v3408_v37 }
0x2afe   :  { %v4062_v38 = vpop.permute.xlu0 %4061 }
0x2aff   :  { %4064 = vst.msk [vmem:[#allocation4] sm:$0x30] %vm971_vm7, %v4062_v38 }
0x2b06   :  { %v4391_v54 = vpop.permute.xlu0 %4390 }
0x2b07   :  { %4393 = vst.msk [vmem:[#allocation5 + $0x8] sm:$0x3] %vm634_vm5, %v4391_v54 }
0x2b0e   :  { %v5038_v55 = vpop.permute.xlu0 %5037 }
0x2b0f   :  { %5040 = vst.msk [vmem:[#allocation4 + $0x8] sm:$0xc] %vm965_vm6, %v5038_v55 }
0x2b16   :  { %v5373_v2 = vpop.permute.xlu0 %5372 }
0x2b17   :  { %5375 = vst.msk [vmem:[#allocation5] sm:$0xc] %vm965_vm6, %v5373_v2 }
0x2b18   :  { %v5687_v53 = vpop.permute.xlu1 %5686 }
0x2b19   :  { %v5689_v36 = vmul.f32 %v5687_v53, %v5668_v0 }
0x2b1b   :  { %5696 = vrot.lane.b32.xlu2 %v5689_v36, %s6793_s2  ;;  %s6808_s2 = smov 28  }
0x2b1c   :  { %s5796_s14 = sld [smem:[%s8024_s0 + %s6808_s2]]  }
0x2b20   :  { %v3732_v58 = vpop.permute.xlu1 %3731 }
0x2b21   :  { %3734 = vst.msk [vmem:[#allocation4] sm:$0xc] %vm965_vm6, %v3732_v58 }
0x2b22   :  { %v6189_v15 = vld [vmem:[%s5796_s14] sm:$0xff] }
0x2b23   :  { %5726 = vmatpush.bf16.msra.mxu2 %v6189_v15 }
0x2b28   :  { %v4067_v10 = vpop.permute.xlu1 %4066  ;;  %v5700_v6 = vld [vmem:[#allocation4] sm:$0xff] }
0x2b29   :  { %4069 = vst.msk [vmem:[#allocation5 + $0x8] sm:$0xc] %vm965_vm6, %v4067_v10 }
0x2b30   :  { %v4709_v11 = vpop.permute.xlu1 %4708  ;;  %v5704_v43 = vld [vmem:[#allocation5 + $0x8] sm:$0xff] }
0x2b31   :  { %4711 = vst.msk [vmem:[#allocation4 + $0x8] sm:$0x3] %vm634_vm5, %v4709_v11 }
0x2b38   :  { %v5043_v9 = vpop.permute.xlu1 %5042 }
0x2b39   :  { %5045 = vst.msk [vmem:[#allocation5] sm:$0x30] %vm971_vm7, %v5043_v9 }
0x2b63   :  { %v5692_v46 = vpop.permute.xlu1 %5691 }
0x2b64   :  { %5694 = vst.msk [vmem:[#allocation4 + $0x8] sm:$0xc0] %vm640_vm4, %v5692_v46  ;;  %vm5762_vm4 = vcmask 64512  }
0x2b6b   :  { %v5701_v12 = vld [vmem:[#allocation4 + $0x8] sm:$0xff] }
0x2b6c   :  { %v5702_v48 = vpack.c.bf16 %v5701_v12, %v5700_v6 }
0x2b6e   :  { %6154 = vmatmul.msk.bf16.vlgmr.msra.gmra.mxu3 %vm292_vm9, %v5702_v48 }
0x2b75   :  { %v5697_v50 = vpop.permute.xlu2 %5696 }
0x2b76   :  { %5699 = vst.msk [vmem:[#allocation5] sm:$0x3] %vm634_vm5, %v5697_v50 }
0x2b7d   :  { %v5703_v3 = vld [vmem:[#allocation5] sm:$0xff] }
0x2b7e   :  { %v5705_v49 = vpack.c.bf16 %v5704_v43, %v5703_v3 }
0x2b80   :  { %6149 = vmatmul.msk.bf16.vlgmr.msra.gmra.mxu2 %vm292_vm9, %v5705_v49 }
0x2bf1   :  { %v5751_v45 = vpop.f32.mrf.mxu3 }
0x2bf9   :  { %v5753_v52 = vpop.f32.mrf.mxu3 }
0x2c03   :  { %v5728_v34 = vpop.f32.mrf.mxu2 }
0x2c04   :  { %v5752_v27 = vadd.f32 %v5751_v45, %v5728_v34 }
0x2c06   :  { %v5760_v4 = vadd.f32 %v6229_v19, %v5752_v27 }
0x2c08   :  { %5763 = vst.msk [vmem:[%s5798_s18] sm:$0xff] %vm5762_vm4, %v5760_v4 }
0x2c0b   :  { %v5730_v7 = vpop.f32.mrf.mxu2 }
0x2c0c   :  { %v5754_v30 = vadd.f32 %v5753_v52, %v5730_v7 }
0x2c0e   :  { %v5761_v39 = vadd.f32 %v6229_v19, %v5754_v30 }
0x2c10   :  { %5764 = vst.msk [vmem:[%s5798_s18 + $0x8] sm:$0xff] %vm5762_vm4, %v5761_v39 }

</bundles_post_ra>
